<compile_context>
chip_gen: v5e
topology: v5e:2x2
jax: 0.10.0
libtpu: 0.0.40
codegen_flags: <defaults>
</compile_context>

<pallas_src>
import jax
import jax.numpy as jnp
from jax.experimental import pallas as pl
from jax.experimental.pallas import tpu as pltpu


def _round_up(x, m):
    return (x + m - 1) // m * m


def _vmem_budget_bytes():
    # Physical VMEM differs per generation (v5e/v6e: 128 MiB, v7x: 64 MiB).
    try:
        cap = pltpu.get_tpu_info().vmem_capacity_bytes
    except Exception:
        cap = 64 * 1024 * 1024                      # conservative (v7x) fallback
    # Leave headroom for compiler-internal scratch.
    return min(int(cap * 3 // 4), 100 * 1024 * 1024)


def _pick_d_tile(D, Hp, Wp, Cin, Cout, HW, budget_bytes, max_td=8):
    """Largest divisor of D (capped: the plane loop is statically unrolled) whose
    double-buffered working set fits the VMEM budget."""
    # Padded VMEM footprint of one (Hp, Wp, Cin) bf16 plane ((8,128) tiling on
    # the minor two dims; small Cin pays lane padding — see note in conv3d_block).
    plane = Hp * _round_up(Wp, 8) * _round_up(Cin, 128) * 2
    w_bytes = 2 * _round_up(Cout, 8) * _round_up(27 * Cin, 128) * 2
    best = 1
    for td in range(1, min(D, max_td) + 1):
        if D % td:
            continue
        in_bytes = 2 * (td + 2) * plane                              # cur + 2 halo planes, dbl-buf
        out_bytes = 2 * _round_up(Cout, 8) * _round_up(td * HW, 128) * 4
        if in_bytes + out_bytes + w_bytes <= budget_bytes * 0.8:
            best = td
    return best


def conv3d_block(x, weight, bias, gamma, beta, eps=1e-5, d_tile=None):
    """x: (N, Cin, D, H, W) f32 -> (N, Cout, D, H, W) f32 (NCDHW in/out)."""
    N, Cin, D, H, W = x.shape
    Cout = weight.shape[0]
    HW = H * W
    Hp, Wp = H + 2, W + 2
    K = 27 * Cin

    budget = _vmem_budget_bytes()
    TD = d_tile if d_tile is not None else _pick_d_tile(D, Hp, Wp, Cin, Cout, HW, budget)
    assert D % TD == 0
    Dt = D // TD
    THW = TD * HW

    # Conv bias cancels exactly under training-mode BatchNorm (batch statistics):
    # it shifts the per-channel mean and leaves the variance unchanged.
    # TODO(synk): re-add the bias if this block is ever run with running (eval) stats.
    del bias

    # ---- tiny XLA-side layout prep -------------------------------------------
    # channels-last, H/W zero-padded once here, bf16 (halves input DMA bytes and
    # feeds the MXU at full rate).  Note: with Cin on the lane axis, very small
    # Cin pays lane padding in VMEM; for larger Cin this layout is fully dense.
    x_p = jnp.pad(
        jnp.transpose(x, (0, 2, 3, 4, 1)).astype(jnp.bfloat16),
        ((0, 0), (0, 0), (1, 1), (1, 1), (0, 0)))            # (N, D, Hp, Wp, Cin)
    # weights -> (Cout, (kh, kw, kd, Cin)) to match the patch column order below.
    w27 = (jnp.transpose(weight, (0, 3, 4, 2, 1))            # (O, kh, kw, kd, I)
             .reshape(Cout, K)
             .astype(jnp.bfloat16))

    # ---- kernel 1: conv (one K=27*Cin MXU matmul per output plane) + BN stats --
    def conv_kernel(xprev_ref, xcur_ref, xnext_ref, w_ref,
                    out_ref, psum_ref, psq_ref):
        dt = pl.program_id(1)
        w = w_ref[...]                                       # (Cout, 27*Cin) bf16, loaded once

        # D-halo planes; zeroed by a scalar gate at the volume boundary.
        # (The clamped boundary fetches are dead DMA only at the 2 edge tiles.)
        prev_gate = jnp.where(dt > 0, 1.0, 0.0).astype(jnp.bfloat16)
        next_gate = jnp.where(dt < Dt - 1, 1.0, 0.0).astype(jnp.bfloat16)
        prev_plane = xprev_ref[0, 0] * prev_gate             # (Hp, Wp, Cin)
        next_plane = xnext_ref[0, 0] * next_gate

        s1 = jnp.zeros((Cout, 1), jnp.float32)
        s2 = jnp.zeros((Cout, 1), jnp.float32)

        # Static loop: TD is capped (<= 8) so unrolling stays cheap.
        # TODO(synk): switch to lax.fori_loop + dynamic plane selects if TD grows past ~8.
        for od in range(TD):
            below = xcur_ref[0, od - 1] if od >= 1 else prev_plane
            mid = xcur_ref[0, od]
            above = xcur_ref[0, od + 1] if od <= TD - 2 else next_plane
            # (Hp, Wp, 3*Cin): channel axis ordered (kd, ci)
            plane3 = jnp.concatenate([below, mid, above], axis=-1)

            pieces = []
            for kh in range(3):
                for kw in range(3):
                    pieces.append(
                        plane3[kh:kh + H, kw:kw + W, :].reshape(HW, 3 * Cin))
            patch = jnp.concatenate(pieces, axis=-1)          # (HW, 27*Cin) bf16

            # (Cout, K) x (HW, K)^T -> (Cout, HW): channels-major, HW lane-dense.
            y = jax.lax.dot_general(
                w, patch,
                dimension_numbers=(((1,), (1,)), ((), ())),
                preferred_element_type=jnp.float32)

            out_ref[0, 0, :, od * HW:(od + 1) * HW] = y       # dense lane-aligned store
            s1 = s1 + jnp.sum(y, axis=1, keepdims=True)
            s2 = s2 + jnp.sum(y * y, axis=1, keepdims=True)

        # Fused BatchNorm partial statistics: one tiny output per grid step, so
        # there is no cross-step accumulation (race-free with all-"parallel").
        psum_ref[0, 0] = s1
        psq_ref[0, 0] = s2

    cparams = pltpu.CompilerParams(
        dimension_semantics=("parallel", "parallel"),
        vmem_limit_bytes=budget,
    )

    conv_out, psum, psq = pl.pallas_call(
        conv_kernel,
        out_shape=(
            jax.ShapeDtypeStruct((N, Dt, Cout, THW), jnp.float32),
            jax.ShapeDtypeStruct((N, Dt, Cout, 1), jnp.float32),
            jax.ShapeDtypeStruct((N, Dt, Cout, 1), jnp.float32),
        ),
        grid=(N, Dt),
        in_specs=[
            # prev / cur / next D-planes of the same (H/W pre-padded) array:
            # explicit D halo, index clamped at the volume boundary (the clamped
            # fetch is masked to zero by the scalar gates in the kernel).
            pl.BlockSpec((1, 1, Hp, Wp, Cin),
                         lambda n, t: (n, jnp.maximum(t * TD - 1, 0), 0, 0, 0)),
            pl.BlockSpec((1, TD, Hp, Wp, Cin),
                         lambda n, t: (n, t, 0, 0, 0)),
            pl.BlockSpec((1, 1, Hp, Wp, Cin),
                         lambda n, t: (n, jnp.minimum(t * TD + TD, D - 1), 0, 0, 0)),
            pl.BlockSpec((Cout, K), lambda n, t: (0, 0)),
        ],
        out_specs=(
            pl.BlockSpec((1, 1, Cout, THW), lambda n, t: (n, t, 0, 0)),
            pl.BlockSpec((1, 1, Cout, 1), lambda n, t: (n, t, 0, 0)),
            pl.BlockSpec((1, 1, Cout, 1), lambda n, t: (n, t, 0, 0)),
        ),
        compiler_params=cparams,
    )(x_p, x_p, x_p, w27)

    # ---- finish the (tiny) BatchNorm statistics in XLA -------------------------
    count = jnp.float32(N * D * HW)
    ssum = jnp.sum(psum, axis=(0, 1, 3))
    ssq = jnp.sum(psq, axis=(0, 1, 3))
    mean = ssum / count
    var = jnp.maximum(ssq / count - mean * mean, 0.0)    # biased var, clamped >= 0
    inv = jax.lax.rsqrt(var + eps)
    g = gamma.astype(jnp.float32)
    scale = (g * inv).reshape(Cout, 1)
    shift = (beta.astype(jnp.float32) - mean * g * inv).reshape(Cout, 1)

    # ---- kernel 2: fused normalize + ReLU (dense load, dense channels-major store)
    def bn_relu_kernel(y_ref, scale_ref, shift_ref, o_ref):
        y = y_ref[0, 0]                                     # (Cout, TD*HW) f32
        o_ref[0] = jnp.maximum(y * scale_ref[...] + shift_ref[...], 0.0)

    out3 = pl.pallas_call(
        bn_relu_kernel,
        out_shape=jax.ShapeDtypeStruct((N, Cout, D * HW), jnp.float32),
        grid=(N, Dt),
        in_specs=[
            pl.BlockSpec((1, 1, Cout, THW), lambda n, t: (n, t, 0, 0)),
            pl.BlockSpec((Cout, 1), lambda n, t: (0, 0)),
            pl.BlockSpec((Cout, 1), lambda n, t: (0, 0)),
        ],
        out_specs=pl.BlockSpec((1, Cout, THW), lambda n, t: (n, 0, t)),
        compiler_params=cparams,
    )(conv_out, scale, shift)

    # free reshape: (N, Cout, D*H*W) -> (N, Cout, D, H, W)  (already NCDHW)
    return out3.reshape(N, Cout, D, H, W)


# --------------------------------------------------------------------------------
# Pure-JAX reference mirroring the PyTorch forward (and the kernel's bf16 MXU feed).
# --------------------------------------------------------------------------------
def reference(x, weight, bias, gamma, beta, eps=1e-5):
    f32 = jnp.float32
    xq = x.astype(jnp.bfloat16).astype(f32)       # mirror the kernel's bf16 MXU inputs
    wq = weight.astype(jnp.bfloat16).astype(f32)
    y = jax.lax.conv_general_dilated(
        xq, wq, window_strides=(1, 1, 1), padding=[(1, 1)] * 3,
        dimension_numbers=("NCDHW", "OIDHW", "NCDHW"),
        precision=jax.lax.Precision.HIGHEST)
    y = y + bias.reshape(1, -1, 1, 1, 1)          # bias kept here: cancels under BN
    mean = y.mean(axis=(0, 2, 3, 4), keepdims=True)
    var = y.var(axis=(0, 2, 3, 4), keepdims=True)  # biased, as torch BN (training)
    yhat = (y - mean) * jax.lax.rsqrt(var + eps)
    return jnp.maximum(yhat * gamma.reshape(1, -1, 1, 1, 1)
                       + beta.reshape(1, -1, 1, 1, 1), 0.0)


if __name__ == "__main__":
    # H*W = 128 -> lane-dense stores/loads everywhere; D/TD = 2 tiles so the
    # D-halo path is exercised; N*Dt = 4 parallel steps (even, good for v7x).
    N, Cin, Cout, D, H, W = 2, 4, 8, 16, 8, 16
    key = jax.random.PRNGKey(0)
    k_x, k_w, k_b, k_g, k_bt = jax.random.split(key, 5)

    x = jax.random.normal(k_x, (N, Cin, D, H, W), jnp.float32)
    weight = jax.random.normal(k_w, (Cout, Cin, 3, 3, 3), jnp.float32) * 0.1
    bias = jax.random.normal(k_b, (Cout,), jnp.float32) * 0.1
    gamma = 1.0 + 0.1 * jax.random.normal(k_g, (Cout,), jnp.float32)
    beta = 0.1 * jax.random.normal(k_bt, (Cout,), jnp.float32)

    out = jax.block_until_ready(conv3d_block(x, weight, bias, gamma, beta))
    ref = jax.block_until_ready(reference(x, weight, bias, gamma, beta))

    assert out.shape == (N, Cout, D, H, W), out.shape
    err = float(jnp.max(jnp.abs(out - ref)))
    assert jnp.allclose(out, ref, rtol=1e-3, atol=1e-3), err
    print("KERNEL_OK")
</pallas_src>

<mosaic_0001>
module attributes {stable_mosaic.version = 11 : i64} {
  func.func @conv_kernel(%arg0: i32, %arg1: i32, %arg2: memref<1x1x10x18x4xbf16, #tpu.memory_space<vmem>>, %arg3: memref<1x8x10x18x4xbf16, #tpu.memory_space<vmem>>, %arg4: memref<1x1x10x18x4xbf16, #tpu.memory_space<vmem>>, %arg5: memref<8x108xbf16, #tpu.memory_space<vmem>>, %arg6: memref<1x1x8x1024xf32, #tpu.memory_space<vmem>>, %arg7: memref<1x1x8x1xf32, #tpu.memory_space<vmem>>, %arg8: memref<1x1x8x1xf32, #tpu.memory_space<vmem>>) attributes {dimension_semantics = [#tpu.dimension_semantics<parallel>, #tpu.dimension_semantics<parallel>], iteration_bounds = array<i64: 2, 2>, scalar_prefetch = 0 : i64, scratch_operands = 0 : i64, tpu.core_type = #tpu.core_type<tc>, window_params = [{transform_indices = @transform_0, window_bounds = array<i64: 1, 1, 10, 18, 4>}, {transform_indices = @transform_1, window_bounds = array<i64: 1, 8, 10, 18, 4>}, {transform_indices = @transform_2, window_bounds = array<i64: 1, 1, 10, 18, 4>}, {pipeline_mode = #tpu.pipeline_mode<synchronous>, transform_indices = @transform_3, window_bounds = array<i64: 8, 108>}, {transform_indices = @transform_4, window_bounds = array<i64: 1, 1, 8, 1024>}, {transform_indices = @transform_5, window_bounds = array<i64: 1, 1, 8, 1>}, {transform_indices = @transform_6, window_bounds = array<i64: 1, 1, 8, 1>}]} {
    %c0 = arith.constant 0 : index
    %c0_0 = arith.constant 0 : index
    %0 = vector.load %arg5[%c0, %c0_0] : memref<8x108xbf16, #tpu.memory_space<vmem>>, vector<8x108xbf16>
    %c0_i32 = arith.constant 0 : i32
    %1 = arith.cmpi sgt, %arg1, %c0_i32 : i32
    %cst = arith.constant 1.000000e+00 : f32
    %cst_1 = arith.constant 0.000000e+00 : f32
    %2 = arith.select %1, %cst, %cst_1 : f32
    %3 = arith.truncf %2 : f32 to bf16
    %c1_i32 = arith.constant 1 : i32
    %4 = arith.cmpi slt, %arg1, %c1_i32 : i32
    %cst_2 = arith.constant 1.000000e+00 : f32
    %cst_3 = arith.constant 0.000000e+00 : f32
    %5 = arith.select %4, %cst_2, %cst_3 : f32
    %6 = arith.truncf %5 : f32 to bf16
    %c0_4 = arith.constant 0 : index
    %c0_5 = arith.constant 0 : index
    %c0_6 = arith.constant 0 : index
    %c0_7 = arith.constant 0 : index
    %c0_8 = arith.constant 0 : index
    %7 = vector.load %arg2[%c0_4, %c0_5, %c0_6, %c0_7, %c0_8] : memref<1x1x10x18x4xbf16, #tpu.memory_space<vmem>>, vector<1x1x10x18x4xbf16>
    %8 = vector.shape_cast %7 : vector<1x1x10x18x4xbf16> to vector<10x18x4xbf16>
    %9 = vector.broadcast %3 : bf16 to vector<10x18x4xbf16>
    %10 = arith.mulf %8, %9 : vector<10x18x4xbf16>
    %c0_9 = arith.constant 0 : index
    %c0_10 = arith.constant 0 : index
    %c0_11 = arith.constant 0 : index
    %c0_12 = arith.constant 0 : index
    %c0_13 = arith.constant 0 : index
    %11 = vector.load %arg4[%c0_9, %c0_10, %c0_11, %c0_12, %c0_13] : memref<1x1x10x18x4xbf16, #tpu.memory_space<vmem>>, vector<1x1x10x18x4xbf16>
    %12 = vector.shape_cast %11 : vector<1x1x10x18x4xbf16> to vector<10x18x4xbf16>
    %13 = vector.broadcast %6 : bf16 to vector<10x18x4xbf16>
    %14 = arith.mulf %12, %13 : vector<10x18x4xbf16>
    %cst_14 = arith.constant 0.000000e+00 : f32
    %15 = vector.broadcast %cst_14 : f32 to vector<8x1xf32>
    %cst_15 = arith.constant 0.000000e+00 : f32
    %16 = vector.broadcast %cst_15 : f32 to vector<8x1xf32>
    %c0_16 = arith.constant 0 : index
    %c0_17 = arith.constant 0 : index
    %c0_18 = arith.constant 0 : index
    %c0_19 = arith.constant 0 : index
    %c0_20 = arith.constant 0 : index
    %17 = vector.load %arg3[%c0_16, %c0_17, %c0_18, %c0_19, %c0_20] : memref<1x8x10x18x4xbf16, #tpu.memory_space<vmem>>, vector<1x1x10x18x4xbf16>
    %18 = vector.shape_cast %17 : vector<1x1x10x18x4xbf16> to vector<10x18x4xbf16>
    %c0_21 = arith.constant 0 : index
    %c1 = arith.constant 1 : index
    %c0_22 = arith.constant 0 : index
    %c0_23 = arith.constant 0 : index
    %c0_24 = arith.constant 0 : index
    %19 = vector.load %arg3[%c0_21, %c1, %c0_22, %c0_23, %c0_24] : memref<1x8x10x18x4xbf16, #tpu.memory_space<vmem>>, vector<1x1x10x18x4xbf16>
    %20 = vector.shape_cast %19 : vector<1x1x10x18x4xbf16> to vector<10x18x4xbf16>
    %21 = tpu.concatenate %10, %18, %20 in 2 : vector<10x18x4xbf16>, vector<10x18x4xbf16>, vector<10x18x4xbf16> -> vector<10x18x12xbf16>
    %22 = vector.extract_strided_slice %21 {offsets = [0, 0, 0], sizes = [8, 16, 12], strides = [1, 1, 1]} : vector<10x18x12xbf16> to vector<8x16x12xbf16>
    %23 = vector.shape_cast %22 : vector<8x16x12xbf16> to vector<128x12xbf16>
    %24 = vector.extract_strided_slice %21 {offsets = [0, 1, 0], sizes = [8, 16, 12], strides = [1, 1, 1]} : vector<10x18x12xbf16> to vector<8x16x12xbf16>
    %25 = vector.shape_cast %24 : vector<8x16x12xbf16> to vector<128x12xbf16>
    %26 = vector.extract_strided_slice %21 {offsets = [0, 2, 0], sizes = [8, 16, 12], strides = [1, 1, 1]} : vector<10x18x12xbf16> to vector<8x16x12xbf16>
    %27 = vector.shape_cast %26 : vector<8x16x12xbf16> to vector<128x12xbf16>
    %28 = vector.extract_strided_slice %21 {offsets = [1, 0, 0], sizes = [8, 16, 12], strides = [1, 1, 1]} : vector<10x18x12xbf16> to vector<8x16x12xbf16>
    %29 = vector.shape_cast %28 : vector<8x16x12xbf16> to vector<128x12xbf16>
    %30 = vector.extract_strided_slice %21 {offsets = [1, 1, 0], sizes = [8, 16, 12], strides = [1, 1, 1]} : vector<10x18x12xbf16> to vector<8x16x12xbf16>
    %31 = vector.shape_cast %30 : vector<8x16x12xbf16> to vector<128x12xbf16>
    %32 = vector.extract_strided_slice %21 {offsets = [1, 2, 0], sizes = [8, 16, 12], strides = [1, 1, 1]} : vector<10x18x12xbf16> to vector<8x16x12xbf16>
    %33 = vector.shape_cast %32 : vector<8x16x12xbf16> to vector<128x12xbf16>
    %34 = vector.extract_strided_slice %21 {offsets = [2, 0, 0], sizes = [8, 16, 12], strides = [1, 1, 1]} : vector<10x18x12xbf16> to vector<8x16x12xbf16>
    %35 = vector.shape_cast %34 : vector<8x16x12xbf16> to vector<128x12xbf16>
    %36 = vector.extract_strided_slice %21 {offsets = [2, 1, 0], sizes = [8, 16, 12], strides = [1, 1, 1]} : vector<10x18x12xbf16> to vector<8x16x12xbf16>
    %37 = vector.shape_cast %36 : vector<8x16x12xbf16> to vector<128x12xbf16>
    %38 = vector.extract_strided_slice %21 {offsets = [2, 2, 0], sizes = [8, 16, 12], strides = [1, 1, 1]} : vector<10x18x12xbf16> to vector<8x16x12xbf16>
    %39 = vector.shape_cast %38 : vector<8x16x12xbf16> to vector<128x12xbf16>
    %40 = tpu.concatenate %23, %25, %27, %29, %31, %33, %35, %37, %39 in 1 : vector<128x12xbf16>, vector<128x12xbf16>, vector<128x12xbf16>, vector<128x12xbf16>, vector<128x12xbf16>, vector<128x12xbf16>, vector<128x12xbf16>, vector<128x12xbf16>, vector<128x12xbf16> -> vector<128x108xbf16>
    %cst_25 = arith.constant dense<0.000000e+00> : vector<8x128xf32>
    %41 = tpu.matmul %0, %40, %cst_25 {dimension_numbers = #tpu.dot_dimension_numbers<[1], [1], [0], [0], [0, 0, 1, 0], [], []>} : vector<8x108xbf16>, vector<128x108xbf16>, vector<8x128xf32> -> vector<8x128xf32>
    %c0_26 = arith.constant 0 : index
    %c0_27 = arith.constant 0 : index
    %c0_28 = arith.constant 0 : index
    %c0_29 = arith.constant 0 : index
    %42 = vector.load %arg6[%c0_26, %c0_27, %c0_28, %c0_29] : memref<1x1x8x1024xf32, #tpu.memory_space<vmem>>, vector<1x1x8x128xf32>
    %43 = vector.shape_cast %42 : vector<1x1x8x128xf32> to vector<8x128xf32>
    %44 = vector.shape_cast %41 : vector<8x128xf32> to vector<1x1x8x128xf32>
    tpu.vector_store %arg6[%c0_26, %c0_27, %c0_28, %c0_29], %44 {strides = array<i32>} : memref<1x1x8x1024xf32, #tpu.memory_space<vmem>>, vector<1x1x8x128xf32>,
    %cst_30 = arith.constant dense<0.000000e+00> : vector<8xf32>
    %45 = vector.multi_reduction <add>, %41, %cst_30 [1] : vector<8x128xf32> to vector<8xf32>
    %46 = vector.shape_cast %45 : vector<8xf32> to vector<8x1xf32>
    %47 = arith.addf %15, %46 : vector<8x1xf32>
    %48 = arith.mulf %41, %41 : vector<8x128xf32>
    %cst_31 = arith.constant dense<0.000000e+00> : vector<8xf32>
    %49 = vector.multi_reduction <add>, %48, %cst_31 [1] : vector<8x128xf32> to vector<8xf32>
    %50 = vector.shape_cast %49 : vector<8xf32> to vector<8x1xf32>
    %51 = arith.addf %16, %50 : vector<8x1xf32>
    %c0_32 = arith.constant 0 : index
    %c0_33 = arith.constant 0 : index
    %c0_34 = arith.constant 0 : index
    %c0_35 = arith.constant 0 : index
    %c0_36 = arith.constant 0 : index
    %52 = vector.load %arg3[%c0_32, %c0_33, %c0_34, %c0_35, %c0_36] : memref<1x8x10x18x4xbf16, #tpu.memory_space<vmem>>, vector<1x1x10x18x4xbf16>
    %53 = vector.shape_cast %52 : vector<1x1x10x18x4xbf16> to vector<10x18x4xbf16>
    %c0_37 = arith.constant 0 : index
    %c1_38 = arith.constant 1 : index
    %c0_39 = arith.constant 0 : index
    %c0_40 = arith.constant 0 : index
    %c0_41 = arith.constant 0 : index
    %54 = vector.load %arg3[%c0_37, %c1_38, %c0_39, %c0_40, %c0_41] : memref<1x8x10x18x4xbf16, #tpu.memory_space<vmem>>, vector<1x1x10x18x4xbf16>
    %55 = vector.shape_cast %54 : vector<1x1x10x18x4xbf16> to vector<10x18x4xbf16>
    %c0_42 = arith.constant 0 : index
    %c2 = arith.constant 2 : index
    %c0_43 = arith.constant 0 : index
    %c0_44 = arith.constant 0 : index
    %c0_45 = arith.constant 0 : index
    %56 = vector.load %arg3[%c0_42, %c2, %c0_43, %c0_44, %c0_45] : memref<1x8x10x18x4xbf16, #tpu.memory_space<vmem>>, vector<1x1x10x18x4xbf16>
    %57 = vector.shape_cast %56 : vector<1x1x10x18x4xbf16> to vector<10x18x4xbf16>
    %58 = tpu.concatenate %53, %55, %57 in 2 : vector<10x18x4xbf16>, vector<10x18x4xbf16>, vector<10x18x4xbf16> -> vector<10x18x12xbf16>
    %59 = vector.extract_strided_slice %58 {offsets = [0, 0, 0], sizes = [8, 16, 12], strides = [1, 1, 1]} : vector<10x18x12xbf16> to vector<8x16x12xbf16>
    %60 = vector.shape_cast %59 : vector<8x16x12xbf16> to vector<128x12xbf16>
    %61 = vector.extract_strided_slice %58 {offsets = [0, 1, 0], sizes = [8, 16, 12], strides = [1, 1, 1]} : vector<10x18x12xbf16> to vector<8x16x12xbf16>
    %62 = vector.shape_cast %61 : vector<8x16x12xbf16> to vector<128x12xbf16>
    %63 = vector.extract_strided_slice %58 {offsets = [0, 2, 0], sizes = [8, 16, 12], strides = [1, 1, 1]} : vector<10x18x12xbf16> to vector<8x16x12xbf16>
    %64 = vector.shape_cast %63 : vector<8x16x12xbf16> to vector<128x12xbf16>
    %65 = vector.extract_strided_slice %58 {offsets = [1, 0, 0], sizes = [8, 16, 12], strides = [1, 1, 1]} : vector<10x18x12xbf16> to vector<8x16x12xbf16>
    %66 = vector.shape_cast %65 : vector<8x16x12xbf16> to vector<128x12xbf16>
    %67 = vector.extract_strided_slice %58 {offsets = [1, 1, 0], sizes = [8, 16, 12], strides = [1, 1, 1]} : vector<10x18x12xbf16> to vector<8x16x12xbf16>
    %68 = vector.shape_cast %67 : vector<8x16x12xbf16> to vector<128x12xbf16>
    %69 = vector.extract_strided_slice %58 {offsets = [1, 2, 0], sizes = [8, 16, 12], strides = [1, 1, 1]} : vector<10x18x12xbf16> to vector<8x16x12xbf16>
    %70 = vector.shape_cast %69 : vector<8x16x12xbf16> to vector<128x12xbf16>
    %71 = vector.extract_strided_slice %58 {offsets = [2, 0, 0], sizes = [8, 16, 12], strides = [1, 1, 1]} : vector<10x18x12xbf16> to vector<8x16x12xbf16>
    %72 = vector.shape_cast %71 : vector<8x16x12xbf16> to vector<128x12xbf16>
    %73 = vector.extract_strided_slice %58 {offsets = [2, 1, 0], sizes = [8, 16, 12], strides = [1, 1, 1]} : vector<10x18x12xbf16> to vector<8x16x12xbf16>
    %74 = vector.shape_cast %73 : vector<8x16x12xbf16> to vector<128x12xbf16>
    %75 = vector.extract_strided_slice %58 {offsets = [2, 2, 0], sizes = [8, 16, 12], strides = [1, 1, 1]} : vector<10x18x12xbf16> to vector<8x16x12xbf16>
    %76 = vector.shape_cast %75 : vector<8x16x12xbf16> to vector<128x12xbf16>
    %77 = tpu.concatenate %60, %62, %64, %66, %68, %70, %72, %74, %76 in 1 : vector<128x12xbf16>, vector<128x12xbf16>, vector<128x12xbf16>, vector<128x12xbf16>, vector<128x12xbf16>, vector<128x12xbf16>, vector<128x12xbf16>, vector<128x12xbf16>, vector<128x12xbf16> -> vector<128x108xbf16>
    %cst_46 = arith.constant dense<0.000000e+00> : vector<8x128xf32>
    %78 = tpu.matmul %0, %77, %cst_46 {dimension_numbers = #tpu.dot_dimension_numbers<[1], [1], [0], [0], [0, 0, 1, 0], [], []>} : vector<8x108xbf16>, vector<128x108xbf16>, vector<8x128xf32> -> vector<8x128xf32>
    %c0_47 = arith.constant 0 : index
    %c0_48 = arith.constant 0 : index
    %c0_49 = arith.constant 0 : index
    %c128 = arith.constant 128 : index
    %79 = vector.load %arg6[%c0_47, %c0_48, %c0_49, %c128] : memref<1x1x8x1024xf32, #tpu.memory_space<vmem>>, vector<1x1x8x128xf32>
    %80 = vector.shape_cast %79 : vector<1x1x8x128xf32> to vector<8x128xf32>
    %81 = vector.shape_cast %78 : vector<8x128xf32> to vector<1x1x8x128xf32>
    tpu.vector_store %arg6[%c0_47, %c0_48, %c0_49, %c128], %81 {strides = array<i32>} : memref<1x1x8x1024xf32, #tpu.memory_space<vmem>>, vector<1x1x8x128xf32>,
    %cst_50 = arith.constant dense<0.000000e+00> : vector<8xf32>
    %82 = vector.multi_reduction <add>, %78, %cst_50 [1] : vector<8x128xf32> to vector<8xf32>
    %83 = vector.shape_cast %82 : vector<8xf32> to vector<8x1xf32>
    %84 = arith.addf %47, %83 : vector<8x1xf32>
    %85 = arith.mulf %78, %78 : vector<8x128xf32>
    %cst_51 = arith.constant dense<0.000000e+00> : vector<8xf32>
    %86 = vector.multi_reduction <add>, %85, %cst_51 [1] : vector<8x128xf32> to vector<8xf32>
    %87 = vector.shape_cast %86 : vector<8xf32> to vector<8x1xf32>
    %88 = arith.addf %51, %87 : vector<8x1xf32>
    %c0_52 = arith.constant 0 : index
    %c1_53 = arith.constant 1 : index
    %c0_54 = arith.constant 0 : index
    %c0_55 = arith.constant 0 : index
    %c0_56 = arith.constant 0 : index
    %89 = vector.load %arg3[%c0_52, %c1_53, %c0_54, %c0_55, %c0_56] : memref<1x8x10x18x4xbf16, #tpu.memory_space<vmem>>, vector<1x1x10x18x4xbf16>
    %90 = vector.shape_cast %89 : vector<1x1x10x18x4xbf16> to vector<10x18x4xbf16>
    %c0_57 = arith.constant 0 : index
    %c2_58 = arith.constant 2 : index
    %c0_59 = arith.constant 0 : index
    %c0_60 = arith.constant 0 : index
    %c0_61 = arith.constant 0 : index
    %91 = vector.load %arg3[%c0_57, %c2_58, %c0_59, %c0_60, %c0_61] : memref<1x8x10x18x4xbf16, #tpu.memory_space<vmem>>, vector<1x1x10x18x4xbf16>
    %92 = vector.shape_cast %91 : vector<1x1x10x18x4xbf16> to vector<10x18x4xbf16>
    %c0_62 = arith.constant 0 : index
    %c3 = arith.constant 3 : index
    %c0_63 = arith.constant 0 : index
    %c0_64 = arith.constant 0 : index
    %c0_65 = arith.constant 0 : index
    %93 = vector.load %arg3[%c0_62, %c3, %c0_63, %c0_64, %c0_65] : memref<1x8x10x18x4xbf16, #tpu.memory_space<vmem>>, vector<1x1x10x18x4xbf16>
    %94 = vector.shape_cast %93 : vector<1x1x10x18x4xbf16> to vector<10x18x4xbf16>
    %95 = tpu.concatenate %90, %92, %94 in 2 : vector<10x18x4xbf16>, vector<10x18x4xbf16>, vector<10x18x4xbf16> -> vector<10x18x12xbf16>
    %96 = vector.extract_strided_slice %95 {offsets = [0, 0, 0], sizes = [8, 16, 12], strides = [1, 1, 1]} : vector<10x18x12xbf16> to vector<8x16x12xbf16>
    %97 = vector.shape_cast %96 : vector<8x16x12xbf16> to vector<128x12xbf16>
    %98 = vector.extract_strided_slice %95 {offsets = [0, 1, 0], sizes = [8, 16, 12], strides = [1, 1, 1]} : vector<10x18x12xbf16> to vector<8x16x12xbf16>
    %99 = vector.shape_cast %98 : vector<8x16x12xbf16> to vector<128x12xbf16>
    %100 = vector.extract_strided_slice %95 {offsets = [0, 2, 0], sizes = [8, 16, 12], strides = [1, 1, 1]} : vector<10x18x12xbf16> to vector<8x16x12xbf16>
    %101 = vector.shape_cast %100 : vector<8x16x12xbf16> to vector<128x12xbf16>
    %102 = vector.extract_strided_slice %95 {offsets = [1, 0, 0], sizes = [8, 16, 12], strides = [1, 1, 1]} : vector<10x18x12xbf16> to vector<8x16x12xbf16>
    %103 = vector.shape_cast %102 : vector<8x16x12xbf16> to vector<128x12xbf16>
    %104 = vector.extract_strided_slice %95 {offsets = [1, 1, 0], sizes = [8, 16, 12], strides = [1, 1, 1]} : vector<10x18x12xbf16> to vector<8x16x12xbf16>
    %105 = vector.shape_cast %104 : vector<8x16x12xbf16> to vector<128x12xbf16>
    %106 = vector.extract_strided_slice %95 {offsets = [1, 2, 0], sizes = [8, 16, 12], strides = [1, 1, 1]} : vector<10x18x12xbf16> to vector<8x16x12xbf16>
    %107 = vector.shape_cast %106 : vector<8x16x12xbf16> to vector<128x12xbf16>
    %108 = vector.extract_strided_slice %95 {offsets = [2, 0, 0], sizes = [8, 16, 12], strides = [1, 1, 1]} : vector<10x18x12xbf16> to vector<8x16x12xbf16>
    %109 = vector.shape_cast %108 : vector<8x16x12xbf16> to vector<128x12xbf16>
    %110 = vector.extract_strided_slice %95 {offsets = [2, 1, 0], sizes = [8, 16, 12], strides = [1, 1, 1]} : vector<10x18x12xbf16> to vector<8x16x12xbf16>
    %111 = vector.shape_cast %110 : vector<8x16x12xbf16> to vector<128x12xbf16>
    %112 = vector.extract_strided_slice %95 {offsets = [2, 2, 0], sizes = [8, 16, 12], strides = [1, 1, 1]} : vector<10x18x12xbf16> to vector<8x16x12xbf16>
    %113 = vector.shape_cast %112 : vector<8x16x12xbf16> to vector<128x12xbf16>
    %114 = tpu.concatenate %97, %99, %101, %103, %105, %107, %109, %111, %113 in 1 : vector<128x12xbf16>, vector<128x12xbf16>, vector<128x12xbf16>, vector<128x12xbf16>, vector<128x12xbf16>, vector<128x12xbf16>, vector<128x12xbf16>, vector<128x12xbf16>, vector<128x12xbf16> -> vector<128x108xbf16>
    %cst_66 = arith.constant dense<0.000000e+00> : vector<8x128xf32>
    %115 = tpu.matmul %0, %114, %cst_66 {dimension_numbers = #tpu.dot_dimension_numbers<[1], [1], [0], [0], [0, 0, 1, 0], [], []>} : vector<8x108xbf16>, vector<128x108xbf16>, vector<8x128xf32> -> vector<8x128xf32>
    %c0_67 = arith.constant 0 : index
    %c0_68 = arith.constant 0 : index
    %c0_69 = arith.constant 0 : index
    %c256 = arith.constant 256 : index
    %116 = vector.load %arg6[%c0_67, %c0_68, %c0_69, %c256] : memref<1x1x8x1024xf32, #tpu.memory_space<vmem>>, vector<1x1x8x128xf32>
    %117 = vector.shape_cast %116 : vector<1x1x8x128xf32> to vector<8x128xf32>
    %118 = vector.shape_cast %115 : vector<8x128xf32> to vector<1x1x8x128xf32>
    tpu.vector_store %arg6[%c0_67, %c0_68, %c0_69, %c256], %118 {strides = array<i32>} : memref<1x1x8x1024xf32, #tpu.memory_space<vmem>>, vector<1x1x8x128xf32>,
    %cst_70 = arith.constant dense<0.000000e+00> : vector<8xf32>
    %119 = vector.multi_reduction <add>, %115, %cst_70 [1] : vector<8x128xf32> to vector<8xf32>
    %120 = vector.shape_cast %119 : vector<8xf32> to vector<8x1xf32>
    %121 = arith.addf %84, %120 : vector<8x1xf32>
    %122 = arith.mulf %115, %115 : vector<8x128xf32>
    %cst_71 = arith.constant dense<0.000000e+00> : vector<8xf32>
    %123 = vector.multi_reduction <add>, %122, %cst_71 [1] : vector<8x128xf32> to vector<8xf32>
    %124 = vector.shape_cast %123 : vector<8xf32> to vector<8x1xf32>
    %125 = arith.addf %88, %124 : vector<8x1xf32>
    %c0_72 = arith.constant 0 : index
    %c2_73 = arith.constant 2 : index
    %c0_74 = arith.constant 0 : index
    %c0_75 = arith.constant 0 : index
    %c0_76 = arith.constant 0 : index
    %126 = vector.load %arg3[%c0_72, %c2_73, %c0_74, %c0_75, %c0_76] : memref<1x8x10x18x4xbf16, #tpu.memory_space<vmem>>, vector<1x1x10x18x4xbf16>
    %127 = vector.shape_cast %126 : vector<1x1x10x18x4xbf16> to vector<10x18x4xbf16>
    %c0_77 = arith.constant 0 : index
    %c3_78 = arith.constant 3 : index
    %c0_79 = arith.constant 0 : index
    %c0_80 = arith.constant 0 : index
    %c0_81 = arith.constant 0 : index
    %128 = vector.load %arg3[%c0_77, %c3_78, %c0_79, %c0_80, %c0_81] : memref<1x8x10x18x4xbf16, #tpu.memory_space<vmem>>, vector<1x1x10x18x4xbf16>
    %129 = vector.shape_cast %128 : vector<1x1x10x18x4xbf16> to vector<10x18x4xbf16>
    %c0_82 = arith.constant 0 : index
    %c4 = arith.constant 4 : index
    %c0_83 = arith.constant 0 : index
    %c0_84 = arith.constant 0 : index
    %c0_85 = arith.constant 0 : index
    %130 = vector.load %arg3[%c0_82, %c4, %c0_83, %c0_84, %c0_85] : memref<1x8x10x18x4xbf16, #tpu.memory_space<vmem>>, vector<1x1x10x18x4xbf16>
    %131 = vector.shape_cast %130 : vector<1x1x10x18x4xbf16> to vector<10x18x4xbf16>
    %132 = tpu.concatenate %127, %129, %131 in 2 : vector<10x18x4xbf16>, vector<10x18x4xbf16>, vector<10x18x4xbf16> -> vector<10x18x12xbf16>
    %133 = vector.extract_strided_slice %132 {offsets = [0, 0, 0], sizes = [8, 16, 12], strides = [1, 1, 1]} : vector<10x18x12xbf16> to vector<8x16x12xbf16>
    %134 = vector.shape_cast %133 : vector<8x16x12xbf16> to vector<128x12xbf16>
    %135 = vector.extract_strided_slice %132 {offsets = [0, 1, 0], sizes = [8, 16, 12], strides = [1, 1, 1]} : vector<10x18x12xbf16> to vector<8x16x12xbf16>
    %136 = vector.shape_cast %135 : vector<8x16x12xbf16> to vector<128x12xbf16>
    %137 = vector.extract_strided_slice %132 {offsets = [0, 2, 0], sizes = [8, 16, 12], strides = [1, 1, 1]} : vector<10x18x12xbf16> to vector<8x16x12xbf16>
    %138 = vector.shape_cast %137 : vector<8x16x12xbf16> to vector<128x12xbf16>
    %139 = vector.extract_strided_slice %132 {offsets = [1, 0, 0], sizes = [8, 16, 12], strides = [1, 1, 1]} : vector<10x18x12xbf16> to vector<8x16x12xbf16>
    %140 = vector.shape_cast %139 : vector<8x16x12xbf16> to vector<128x12xbf16>
    %141 = vector.extract_strided_slice %132 {offsets = [1, 1, 0], sizes = [8, 16, 12], strides = [1, 1, 1]} : vector<10x18x12xbf16> to vector<8x16x12xbf16>
    %142 = vector.shape_cast %141 : vector<8x16x12xbf16> to vector<128x12xbf16>
    %143 = vector.extract_strided_slice %132 {offsets = [1, 2, 0], sizes = [8, 16, 12], strides = [1, 1, 1]} : vector<10x18x12xbf16> to vector<8x16x12xbf16>
    %144 = vector.shape_cast %143 : vector<8x16x12xbf16> to vector<128x12xbf16>
    %145 = vector.extract_strided_slice %132 {offsets = [2, 0, 0], sizes = [8, 16, 12], strides = [1, 1, 1]} : vector<10x18x12xbf16> to vector<8x16x12xbf16>
    %146 = vector.shape_cast %145 : vector<8x16x12xbf16> to vector<128x12xbf16>
    %147 = vector.extract_strided_slice %132 {offsets = [2, 1, 0], sizes = [8, 16, 12], strides = [1, 1, 1]} : vector<10x18x12xbf16> to vector<8x16x12xbf16>
    %148 = vector.shape_cast %147 : vector<8x16x12xbf16> to vector<128x12xbf16>
    %149 = vector.extract_strided_slice %132 {offsets = [2, 2, 0], sizes = [8, 16, 12], strides = [1, 1, 1]} : vector<10x18x12xbf16> to vector<8x16x12xbf16>
    %150 = vector.shape_cast %149 : vector<8x16x12xbf16> to vector<128x12xbf16>
    %151 = tpu.concatenate %134, %136, %138, %140, %142, %144, %146, %148, %150 in 1 : vector<128x12xbf16>, vector<128x12xbf16>, vector<128x12xbf16>, vector<128x12xbf16>, vector<128x12xbf16>, vector<128x12xbf16>, vector<128x12xbf16>, vector<128x12xbf16>, vector<128x12xbf16> -> vector<128x108xbf16>
    %cst_86 = arith.constant dense<0.000000e+00> : vector<8x128xf32>
    %152 = tpu.matmul %0, %151, %cst_86 {dimension_numbers = #tpu.dot_dimension_numbers<[1], [1], [0], [0], [0, 0, 1, 0], [], []>} : vector<8x108xbf16>, vector<128x108xbf16>, vector<8x128xf32> -> vector<8x128xf32>
    %c0_87 = arith.constant 0 : index
    %c0_88 = arith.constant 0 : index
    %c0_89 = arith.constant 0 : index
    %c384 = arith.constant 384 : index
    %153 = vector.load %arg6[%c0_87, %c0_88, %c0_89, %c384] : memref<1x1x8x1024xf32, #tpu.memory_space<vmem>>, vector<1x1x8x128xf32>
    %154 = vector.shape_cast %153 : vector<1x1x8x128xf32> to vector<8x128xf32>
    %155 = vector.shape_cast %152 : vector<8x128xf32> to vector<1x1x8x128xf32>
    tpu.vector_store %arg6[%c0_87, %c0_88, %c0_89, %c384], %155 {strides = array<i32>} : memref<1x1x8x1024xf32, #tpu.memory_space<vmem>>, vector<1x1x8x128xf32>,
    %cst_90 = arith.constant dense<0.000000e+00> : vector<8xf32>
    %156 = vector.multi_reduction <add>, %152, %cst_90 [1] : vector<8x128xf32> to vector<8xf32>
    %157 = vector.shape_cast %156 : vector<8xf32> to vector<8x1xf32>
    %158 = arith.addf %121, %157 : vector<8x1xf32>
    %159 = arith.mulf %152, %152 : vector<8x128xf32>
    %cst_91 = arith.constant dense<0.000000e+00> : vector<8xf32>
    %160 = vector.multi_reduction <add>, %159, %cst_91 [1] : vector<8x128xf32> to vector<8xf32>
    %161 = vector.shape_cast %160 : vector<8xf32> to vector<8x1xf32>
    %162 = arith.addf %125, %161 : vector<8x1xf32>
    %c0_92 = arith.constant 0 : index
    %c3_93 = arith.constant 3 : index
    %c0_94 = arith.constant 0 : index
    %c0_95 = arith.constant 0 : index
    %c0_96 = arith.constant 0 : index
    %163 = vector.load %arg3[%c0_92, %c3_93, %c0_94, %c0_95, %c0_96] : memref<1x8x10x18x4xbf16, #tpu.memory_space<vmem>>, vector<1x1x10x18x4xbf16>
    %164 = vector.shape_cast %163 : vector<1x1x10x18x4xbf16> to vector<10x18x4xbf16>
    %c0_97 = arith.constant 0 : index
    %c4_98 = arith.constant 4 : index
    %c0_99 = arith.constant 0 : index
    %c0_100 = arith.constant 0 : index
    %c0_101 = arith.constant 0 : index
    %165 = vector.load %arg3[%c0_97, %c4_98, %c0_99, %c0_100, %c0_101] : memref<1x8x10x18x4xbf16, #tpu.memory_space<vmem>>, vector<1x1x10x18x4xbf16>
    %166 = vector.shape_cast %165 : vector<1x1x10x18x4xbf16> to vector<10x18x4xbf16>
    %c0_102 = arith.constant 0 : index
    %c5 = arith.constant 5 : index
    %c0_103 = arith.constant 0 : index
    %c0_104 = arith.constant 0 : index
    %c0_105 = arith.constant 0 : index
    %167 = vector.load %arg3[%c0_102, %c5, %c0_103, %c0_104, %c0_105] : memref<1x8x10x18x4xbf16, #tpu.memory_space<vmem>>, vector<1x1x10x18x4xbf16>
    %168 = vector.shape_cast %167 : vector<1x1x10x18x4xbf16> to vector<10x18x4xbf16>
    %169 = tpu.concatenate %164, %166, %168 in 2 : vector<10x18x4xbf16>, vector<10x18x4xbf16>, vector<10x18x4xbf16> -> vector<10x18x12xbf16>
    %170 = vector.extract_strided_slice %169 {offsets = [0, 0, 0], sizes = [8, 16, 12], strides = [1, 1, 1]} : vector<10x18x12xbf16> to vector<8x16x12xbf16>
    %171 = vector.shape_cast %170 : vector<8x16x12xbf16> to vector<128x12xbf16>
    %172 = vector.extract_strided_slice %169 {offsets = [0, 1, 0], sizes = [8, 16, 12], strides = [1, 1, 1]} : vector<10x18x12xbf16> to vector<8x16x12xbf16>
    %173 = vector.shape_cast %172 : vector<8x16x12xbf16> to vector<128x12xbf16>
    %174 = vector.extract_strided_slice %169 {offsets = [0, 2, 0], sizes = [8, 16, 12], strides = [1, 1, 1]} : vector<10x18x12xbf16> to vector<8x16x12xbf16>
    %175 = vector.shape_cast %174 : vector<8x16x12xbf16> to vector<128x12xbf16>
    %176 = vector.extract_strided_slice %169 {offsets = [1, 0, 0], sizes = [8, 16, 12], strides = [1, 1, 1]} : vector<10x18x12xbf16> to vector<8x16x12xbf16>
    %177 = vector.shape_cast %176 : vector<8x16x12xbf16> to vector<128x12xbf16>
    %178 = vector.extract_strided_slice %169 {offsets = [1, 1, 0], sizes = [8, 16, 12], strides = [1, 1, 1]} : vector<10x18x12xbf16> to vector<8x16x12xbf16>
    %179 = vector.shape_cast %178 : vector<8x16x12xbf16> to vector<128x12xbf16>
    %180 = vector.extract_strided_slice %169 {offsets = [1, 2, 0], sizes = [8, 16, 12], strides = [1, 1, 1]} : vector<10x18x12xbf16> to vector<8x16x12xbf16>
    %181 = vector.shape_cast %180 : vector<8x16x12xbf16> to vector<128x12xbf16>
    %182 = vector.extract_strided_slice %169 {offsets = [2, 0, 0], sizes = [8, 16, 12], strides = [1, 1, 1]} : vector<10x18x12xbf16> to vector<8x16x12xbf16>
    %183 = vector.shape_cast %182 : vector<8x16x12xbf16> to vector<128x12xbf16>
    %184 = vector.extract_strided_slice %169 {offsets = [2, 1, 0], sizes = [8, 16, 12], strides = [1, 1, 1]} : vector<10x18x12xbf16> to vector<8x16x12xbf16>
    %185 = vector.shape_cast %184 : vector<8x16x12xbf16> to vector<128x12xbf16>
    %186 = vector.extract_strided_slice %169 {offsets = [2, 2, 0], sizes = [8, 16, 12], strides = [1, 1, 1]} : vector<10x18x12xbf16> to vector<8x16x12xbf16>
    %187 = vector.shape_cast %186 : vector<8x16x12xbf16> to vector<128x12xbf16>
    %188 = tpu.concatenate %171, %173, %175, %177, %179, %181, %183, %185, %187 in 1 : vector<128x12xbf16>, vector<128x12xbf16>, vector<128x12xbf16>, vector<128x12xbf16>, vector<128x12xbf16>, vector<128x12xbf16>, vector<128x12xbf16>, vector<128x12xbf16>, vector<128x12xbf16> -> vector<128x108xbf16>
    %cst_106 = arith.constant dense<0.000000e+00> : vector<8x128xf32>
    %189 = tpu.matmul %0, %188, %cst_106 {dimension_numbers = #tpu.dot_dimension_numbers<[1], [1], [0], [0], [0, 0, 1, 0], [], []>} : vector<8x108xbf16>, vector<128x108xbf16>, vector<8x128xf32> -> vector<8x128xf32>
    %c0_107 = arith.constant 0 : index
    %c0_108 = arith.constant 0 : index
    %c0_109 = arith.constant 0 : index
    %c512 = arith.constant 512 : index
    %190 = vector.load %arg6[%c0_107, %c0_108, %c0_109, %c512] : memref<1x1x8x1024xf32, #tpu.memory_space<vmem>>, vector<1x1x8x128xf32>
    %191 = vector.shape_cast %190 : vector<1x1x8x128xf32> to vector<8x128xf32>
    %192 = vector.shape_cast %189 : vector<8x128xf32> to vector<1x1x8x128xf32>
    tpu.vector_store %arg6[%c0_107, %c0_108, %c0_109, %c512], %192 {strides = array<i32>} : memref<1x1x8x1024xf32, #tpu.memory_space<vmem>>, vector<1x1x8x128xf32>,
    %cst_110 = arith.constant dense<0.000000e+00> : vector<8xf32>
    %193 = vector.multi_reduction <add>, %189, %cst_110 [1] : vector<8x128xf32> to vector<8xf32>
    %194 = vector.shape_cast %193 : vector<8xf32> to vector<8x1xf32>
    %195 = arith.addf %158, %194 : vector<8x1xf32>
    %196 = arith.mulf %189, %189 : vector<8x128xf32>
    %cst_111 = arith.constant dense<0.000000e+00> : vector<8xf32>
    %197 = vector.multi_reduction <add>, %196, %cst_111 [1] : vector<8x128xf32> to vector<8xf32>
    %198 = vector.shape_cast %197 : vector<8xf32> to vector<8x1xf32>
    %199 = arith.addf %162, %198 : vector<8x1xf32>
    %c0_112 = arith.constant 0 : index
    %c4_113 = arith.constant 4 : index
    %c0_114 = arith.constant 0 : index
    %c0_115 = arith.constant 0 : index
    %c0_116 = arith.constant 0 : index
    %200 = vector.load %arg3[%c0_112, %c4_113, %c0_114, %c0_115, %c0_116] : memref<1x8x10x18x4xbf16, #tpu.memory_space<vmem>>, vector<1x1x10x18x4xbf16>
    %201 = vector.shape_cast %200 : vector<1x1x10x18x4xbf16> to vector<10x18x4xbf16>
    %c0_117 = arith.constant 0 : index
    %c5_118 = arith.constant 5 : index
    %c0_119 = arith.constant 0 : index
    %c0_120 = arith.constant 0 : index
    %c0_121 = arith.constant 0 : index
    %202 = vector.load %arg3[%c0_117, %c5_118, %c0_119, %c0_120, %c0_121] : memref<1x8x10x18x4xbf16, #tpu.memory_space<vmem>>, vector<1x1x10x18x4xbf16>
    %203 = vector.shape_cast %202 : vector<1x1x10x18x4xbf16> to vector<10x18x4xbf16>
    %c0_122 = arith.constant 0 : index
    %c6 = arith.constant 6 : index
    %c0_123 = arith.constant 0 : index
    %c0_124 = arith.constant 0 : index
    %c0_125 = arith.constant 0 : index
    %204 = vector.load %arg3[%c0_122, %c6, %c0_123, %c0_124, %c0_125] : memref<1x8x10x18x4xbf16, #tpu.memory_space<vmem>>, vector<1x1x10x18x4xbf16>
    %205 = vector.shape_cast %204 : vector<1x1x10x18x4xbf16> to vector<10x18x4xbf16>
    %206 = tpu.concatenate %201, %203, %205 in 2 : vector<10x18x4xbf16>, vector<10x18x4xbf16>, vector<10x18x4xbf16> -> vector<10x18x12xbf16>
    %207 = vector.extract_strided_slice %206 {offsets = [0, 0, 0], sizes = [8, 16, 12], strides = [1, 1, 1]} : vector<10x18x12xbf16> to vector<8x16x12xbf16>
    %208 = vector.shape_cast %207 : vector<8x16x12xbf16> to vector<128x12xbf16>
    %209 = vector.extract_strided_slice %206 {offsets = [0, 1, 0], sizes = [8, 16, 12], strides = [1, 1, 1]} : vector<10x18x12xbf16> to vector<8x16x12xbf16>
    %210 = vector.shape_cast %209 : vector<8x16x12xbf16> to vector<128x12xbf16>
    %211 = vector.extract_strided_slice %206 {offsets = [0, 2, 0], sizes = [8, 16, 12], strides = [1, 1, 1]} : vector<10x18x12xbf16> to vector<8x16x12xbf16>
    %212 = vector.shape_cast %211 : vector<8x16x12xbf16> to vector<128x12xbf16>
    %213 = vector.extract_strided_slice %206 {offsets = [1, 0, 0], sizes = [8, 16, 12], strides = [1, 1, 1]} : vector<10x18x12xbf16> to vector<8x16x12xbf16>
    %214 = vector.shape_cast %213 : vector<8x16x12xbf16> to vector<128x12xbf16>
    %215 = vector.extract_strided_slice %206 {offsets = [1, 1, 0], sizes = [8, 16, 12], strides = [1, 1, 1]} : vector<10x18x12xbf16> to vector<8x16x12xbf16>
    %216 = vector.shape_cast %215 : vector<8x16x12xbf16> to vector<128x12xbf16>
    %217 = vector.extract_strided_slice %206 {offsets = [1, 2, 0], sizes = [8, 16, 12], strides = [1, 1, 1]} : vector<10x18x12xbf16> to vector<8x16x12xbf16>
    %218 = vector.shape_cast %217 : vector<8x16x12xbf16> to vector<128x12xbf16>
    %219 = vector.extract_strided_slice %206 {offsets = [2, 0, 0], sizes = [8, 16, 12], strides = [1, 1, 1]} : vector<10x18x12xbf16> to vector<8x16x12xbf16>
    %220 = vector.shape_cast %219 : vector<8x16x12xbf16> to vector<128x12xbf16>
    %221 = vector.extract_strided_slice %206 {offsets = [2, 1, 0], sizes = [8, 16, 12], strides = [1, 1, 1]} : vector<10x18x12xbf16> to vector<8x16x12xbf16>
    %222 = vector.shape_cast %221 : vector<8x16x12xbf16> to vector<128x12xbf16>
    %223 = vector.extract_strided_slice %206 {offsets = [2, 2, 0], sizes = [8, 16, 12], strides = [1, 1, 1]} : vector<10x18x12xbf16> to vector<8x16x12xbf16>
    %224 = vector.shape_cast %223 : vector<8x16x12xbf16> to vector<128x12xbf16>
    %225 = tpu.concatenate %208, %210, %212, %214, %216, %218, %220, %222, %224 in 1 : vector<128x12xbf16>, vector<128x12xbf16>, vector<128x12xbf16>, vector<128x12xbf16>, vector<128x12xbf16>, vector<128x12xbf16>, vector<128x12xbf16>, vector<128x12xbf16>, vector<128x12xbf16> -> vector<128x108xbf16>
    %cst_126 = arith.constant dense<0.000000e+00> : vector<8x128xf32>
    %226 = tpu.matmul %0, %225, %cst_126 {dimension_numbers = #tpu.dot_dimension_numbers<[1], [1], [0], [0], [0, 0, 1, 0], [], []>} : vector<8x108xbf16>, vector<128x108xbf16>, vector<8x128xf32> -> vector<8x128xf32>
    %c0_127 = arith.constant 0 : index
    %c0_128 = arith.constant 0 : index
    %c0_129 = arith.constant 0 : index
    %c640 = arith.constant 640 : index
    %227 = vector.load %arg6[%c0_127, %c0_128, %c0_129, %c640] : memref<1x1x8x1024xf32, #tpu.memory_space<vmem>>, vector<1x1x8x128xf32>
    %228 = vector.shape_cast %227 : vector<1x1x8x128xf32> to vector<8x128xf32>
    %229 = vector.shape_cast %226 : vector<8x128xf32> to vector<1x1x8x128xf32>
    tpu.vector_store %arg6[%c0_127, %c0_128, %c0_129, %c640], %229 {strides = array<i32>} : memref<1x1x8x1024xf32, #tpu.memory_space<vmem>>, vector<1x1x8x128xf32>,
    %cst_130 = arith.constant dense<0.000000e+00> : vector<8xf32>
    %230 = vector.multi_reduction <add>, %226, %cst_130 [1] : vector<8x128xf32> to vector<8xf32>
    %231 = vector.shape_cast %230 : vector<8xf32> to vector<8x1xf32>
    %232 = arith.addf %195, %231 : vector<8x1xf32>
    %233 = arith.mulf %226, %226 : vector<8x128xf32>
    %cst_131 = arith.constant dense<0.000000e+00> : vector<8xf32>
    %234 = vector.multi_reduction <add>, %233, %cst_131 [1] : vector<8x128xf32> to vector<8xf32>
    %235 = vector.shape_cast %234 : vector<8xf32> to vector<8x1xf32>
    %236 = arith.addf %199, %235 : vector<8x1xf32>
    %c0_132 = arith.constant 0 : index
    %c5_133 = arith.constant 5 : index
    %c0_134 = arith.constant 0 : index
    %c0_135 = arith.constant 0 : index
    %c0_136 = arith.constant 0 : index
    %237 = vector.load %arg3[%c0_132, %c5_133, %c0_134, %c0_135, %c0_136] : memref<1x8x10x18x4xbf16, #tpu.memory_space<vmem>>, vector<1x1x10x18x4xbf16>
    %238 = vector.shape_cast %237 : vector<1x1x10x18x4xbf16> to vector<10x18x4xbf16>
    %c0_137 = arith.constant 0 : index
    %c6_138 = arith.constant 6 : index
    %c0_139 = arith.constant 0 : index
    %c0_140 = arith.constant 0 : index
    %c0_141 = arith.constant 0 : index
    %239 = vector.load %arg3[%c0_137, %c6_138, %c0_139, %c0_140, %c0_141] : memref<1x8x10x18x4xbf16, #tpu.memory_space<vmem>>, vector<1x1x10x18x4xbf16>
    %240 = vector.shape_cast %239 : vector<1x1x10x18x4xbf16> to vector<10x18x4xbf16>
    %c0_142 = arith.constant 0 : index
    %c7 = arith.constant 7 : index
    %c0_143 = arith.constant 0 : index
    %c0_144 = arith.constant 0 : index
    %c0_145 = arith.constant 0 : index
    %241 = vector.load %arg3[%c0_142, %c7, %c0_143, %c0_144, %c0_145] : memref<1x8x10x18x4xbf16, #tpu.memory_space<vmem>>, vector<1x1x10x18x4xbf16>
    %242 = vector.shape_cast %241 : vector<1x1x10x18x4xbf16> to vector<10x18x4xbf16>
    %243 = tpu.concatenate %238, %240, %242 in 2 : vector<10x18x4xbf16>, vector<10x18x4xbf16>, vector<10x18x4xbf16> -> vector<10x18x12xbf16>
    %244 = vector.extract_strided_slice %243 {offsets = [0, 0, 0], sizes = [8, 16, 12], strides = [1, 1, 1]} : vector<10x18x12xbf16> to vector<8x16x12xbf16>
    %245 = vector.shape_cast %244 : vector<8x16x12xbf16> to vector<128x12xbf16>
    %246 = vector.extract_strided_slice %243 {offsets = [0, 1, 0], sizes = [8, 16, 12], strides = [1, 1, 1]} : vector<10x18x12xbf16> to vector<8x16x12xbf16>
    %247 = vector.shape_cast %246 : vector<8x16x12xbf16> to vector<128x12xbf16>
    %248 = vector.extract_strided_slice %243 {offsets = [0, 2, 0], sizes = [8, 16, 12], strides = [1, 1, 1]} : vector<10x18x12xbf16> to vector<8x16x12xbf16>
    %249 = vector.shape_cast %248 : vector<8x16x12xbf16> to vector<128x12xbf16>
    %250 = vector.extract_strided_slice %243 {offsets = [1, 0, 0], sizes = [8, 16, 12], strides = [1, 1, 1]} : vector<10x18x12xbf16> to vector<8x16x12xbf16>
    %251 = vector.shape_cast %250 : vector<8x16x12xbf16> to vector<128x12xbf16>
    %252 = vector.extract_strided_slice %243 {offsets = [1, 1, 0], sizes = [8, 16, 12], strides = [1, 1, 1]} : vector<10x18x12xbf16> to vector<8x16x12xbf16>
    %253 = vector.shape_cast %252 : vector<8x16x12xbf16> to vector<128x12xbf16>
    %254 = vector.extract_strided_slice %243 {offsets = [1, 2, 0], sizes = [8, 16, 12], strides = [1, 1, 1]} : vector<10x18x12xbf16> to vector<8x16x12xbf16>
    %255 = vector.shape_cast %254 : vector<8x16x12xbf16> to vector<128x12xbf16>
    %256 = vector.extract_strided_slice %243 {offsets = [2, 0, 0], sizes = [8, 16, 12], strides = [1, 1, 1]} : vector<10x18x12xbf16> to vector<8x16x12xbf16>
    %257 = vector.shape_cast %256 : vector<8x16x12xbf16> to vector<128x12xbf16>
    %258 = vector.extract_strided_slice %243 {offsets = [2, 1, 0], sizes = [8, 16, 12], strides = [1, 1, 1]} : vector<10x18x12xbf16> to vector<8x16x12xbf16>
    %259 = vector.shape_cast %258 : vector<8x16x12xbf16> to vector<128x12xbf16>
    %260 = vector.extract_strided_slice %243 {offsets = [2, 2, 0], sizes = [8, 16, 12], strides = [1, 1, 1]} : vector<10x18x12xbf16> to vector<8x16x12xbf16>
    %261 = vector.shape_cast %260 : vector<8x16x12xbf16> to vector<128x12xbf16>
    %262 = tpu.concatenate %245, %247, %249, %251, %253, %255, %257, %259, %261 in 1 : vector<128x12xbf16>, vector<128x12xbf16>, vector<128x12xbf16>, vector<128x12xbf16>, vector<128x12xbf16>, vector<128x12xbf16>, vector<128x12xbf16>, vector<128x12xbf16>, vector<128x12xbf16> -> vector<128x108xbf16>
    %cst_146 = arith.constant dense<0.000000e+00> : vector<8x128xf32>
    %263 = tpu.matmul %0, %262, %cst_146 {dimension_numbers = #tpu.dot_dimension_numbers<[1], [1], [0], [0], [0, 0, 1, 0], [], []>} : vector<8x108xbf16>, vector<128x108xbf16>, vector<8x128xf32> -> vector<8x128xf32>
    %c0_147 = arith.constant 0 : index
    %c0_148 = arith.constant 0 : index
    %c0_149 = arith.constant 0 : index
    %c768 = arith.constant 768 : index
    %264 = vector.load %arg6[%c0_147, %c0_148, %c0_149, %c768] : memref<1x1x8x1024xf32, #tpu.memory_space<vmem>>, vector<1x1x8x128xf32>
    %265 = vector.shape_cast %264 : vector<1x1x8x128xf32> to vector<8x128xf32>
    %266 = vector.shape_cast %263 : vector<8x128xf32> to vector<1x1x8x128xf32>
    tpu.vector_store %arg6[%c0_147, %c0_148, %c0_149, %c768], %266 {strides = array<i32>} : memref<1x1x8x1024xf32, #tpu.memory_space<vmem>>, vector<1x1x8x128xf32>,
    %cst_150 = arith.constant dense<0.000000e+00> : vector<8xf32>
    %267 = vector.multi_reduction <add>, %263, %cst_150 [1] : vector<8x128xf32> to vector<8xf32>
    %268 = vector.shape_cast %267 : vector<8xf32> to vector<8x1xf32>
    %269 = arith.addf %232, %268 : vector<8x1xf32>
    %270 = arith.mulf %263, %263 : vector<8x128xf32>
    %cst_151 = arith.constant dense<0.000000e+00> : vector<8xf32>
    %271 = vector.multi_reduction <add>, %270, %cst_151 [1] : vector<8x128xf32> to vector<8xf32>
    %272 = vector.shape_cast %271 : vector<8xf32> to vector<8x1xf32>
    %273 = arith.addf %236, %272 : vector<8x1xf32>
    %c0_152 = arith.constant 0 : index
    %c6_153 = arith.constant 6 : index
    %c0_154 = arith.constant 0 : index
    %c0_155 = arith.constant 0 : index
    %c0_156 = arith.constant 0 : index
    %274 = vector.load %arg3[%c0_152, %c6_153, %c0_154, %c0_155, %c0_156] : memref<1x8x10x18x4xbf16, #tpu.memory_space<vmem>>, vector<1x1x10x18x4xbf16>
    %275 = vector.shape_cast %274 : vector<1x1x10x18x4xbf16> to vector<10x18x4xbf16>
    %c0_157 = arith.constant 0 : index
    %c7_158 = arith.constant 7 : index
    %c0_159 = arith.constant 0 : index
    %c0_160 = arith.constant 0 : index
    %c0_161 = arith.constant 0 : index
    %276 = vector.load %arg3[%c0_157, %c7_158, %c0_159, %c0_160, %c0_161] : memref<1x8x10x18x4xbf16, #tpu.memory_space<vmem>>, vector<1x1x10x18x4xbf16>
    %277 = vector.shape_cast %276 : vector<1x1x10x18x4xbf16> to vector<10x18x4xbf16>
    %278 = tpu.concatenate %275, %277, %14 in 2 : vector<10x18x4xbf16>, vector<10x18x4xbf16>, vector<10x18x4xbf16> -> vector<10x18x12xbf16>
    %279 = vector.extract_strided_slice %278 {offsets = [0, 0, 0], sizes = [8, 16, 12], strides = [1, 1, 1]} : vector<10x18x12xbf16> to vector<8x16x12xbf16>
    %280 = vector.shape_cast %279 : vector<8x16x12xbf16> to vector<128x12xbf16>
    %281 = vector.extract_strided_slice %278 {offsets = [0, 1, 0], sizes = [8, 16, 12], strides = [1, 1, 1]} : vector<10x18x12xbf16> to vector<8x16x12xbf16>
    %282 = vector.shape_cast %281 : vector<8x16x12xbf16> to vector<128x12xbf16>
    %283 = vector.extract_strided_slice %278 {offsets = [0, 2, 0], sizes = [8, 16, 12], strides = [1, 1, 1]} : vector<10x18x12xbf16> to vector<8x16x12xbf16>
    %284 = vector.shape_cast %283 : vector<8x16x12xbf16> to vector<128x12xbf16>
    %285 = vector.extract_strided_slice %278 {offsets = [1, 0, 0], sizes = [8, 16, 12], strides = [1, 1, 1]} : vector<10x18x12xbf16> to vector<8x16x12xbf16>
    %286 = vector.shape_cast %285 : vector<8x16x12xbf16> to vector<128x12xbf16>
    %287 = vector.extract_strided_slice %278 {offsets = [1, 1, 0], sizes = [8, 16, 12], strides = [1, 1, 1]} : vector<10x18x12xbf16> to vector<8x16x12xbf16>
    %288 = vector.shape_cast %287 : vector<8x16x12xbf16> to vector<128x12xbf16>
    %289 = vector.extract_strided_slice %278 {offsets = [1, 2, 0], sizes = [8, 16, 12], strides = [1, 1, 1]} : vector<10x18x12xbf16> to vector<8x16x12xbf16>
    %290 = vector.shape_cast %289 : vector<8x16x12xbf16> to vector<128x12xbf16>
    %291 = vector.extract_strided_slice %278 {offsets = [2, 0, 0], sizes = [8, 16, 12], strides = [1, 1, 1]} : vector<10x18x12xbf16> to vector<8x16x12xbf16>
    %292 = vector.shape_cast %291 : vector<8x16x12xbf16> to vector<128x12xbf16>
    %293 = vector.extract_strided_slice %278 {offsets = [2, 1, 0], sizes = [8, 16, 12], strides = [1, 1, 1]} : vector<10x18x12xbf16> to vector<8x16x12xbf16>
    %294 = vector.shape_cast %293 : vector<8x16x12xbf16> to vector<128x12xbf16>
    %295 = vector.extract_strided_slice %278 {offsets = [2, 2, 0], sizes = [8, 16, 12], strides = [1, 1, 1]} : vector<10x18x12xbf16> to vector<8x16x12xbf16>
    %296 = vector.shape_cast %295 : vector<8x16x12xbf16> to vector<128x12xbf16>
    %297 = tpu.concatenate %280, %282, %284, %286, %288, %290, %292, %294, %296 in 1 : vector<128x12xbf16>, vector<128x12xbf16>, vector<128x12xbf16>, vector<128x12xbf16>, vector<128x12xbf16>, vector<128x12xbf16>, vector<128x12xbf16>, vector<128x12xbf16>, vector<128x12xbf16> -> vector<128x108xbf16>
    %cst_162 = arith.constant dense<0.000000e+00> : vector<8x128xf32>
    %298 = tpu.matmul %0, %297, %cst_162 {dimension_numbers = #tpu.dot_dimension_numbers<[1], [1], [0], [0], [0, 0, 1, 0], [], []>} : vector<8x108xbf16>, vector<128x108xbf16>, vector<8x128xf32> -> vector<8x128xf32>
    %c0_163 = arith.constant 0 : index
    %c0_164 = arith.constant 0 : index
    %c0_165 = arith.constant 0 : index
    %c896 = arith.constant 896 : index
    %299 = vector.load %arg6[%c0_163, %c0_164, %c0_165, %c896] : memref<1x1x8x1024xf32, #tpu.memory_space<vmem>>, vector<1x1x8x128xf32>
    %300 = vector.shape_cast %299 : vector<1x1x8x128xf32> to vector<8x128xf32>
    %301 = vector.shape_cast %298 : vector<8x128xf32> to vector<1x1x8x128xf32>
    tpu.vector_store %arg6[%c0_163, %c0_164, %c0_165, %c896], %301 {strides = array<i32>} : memref<1x1x8x1024xf32, #tpu.memory_space<vmem>>, vector<1x1x8x128xf32>,
    %cst_166 = arith.constant dense<0.000000e+00> : vector<8xf32>
    %302 = vector.multi_reduction <add>, %298, %cst_166 [1] : vector<8x128xf32> to vector<8xf32>
    %303 = vector.shape_cast %302 : vector<8xf32> to vector<8x1xf32>
    %304 = arith.addf %269, %303 : vector<8x1xf32>
    %305 = arith.mulf %298, %298 : vector<8x128xf32>
    %cst_167 = arith.constant dense<0.000000e+00> : vector<8xf32>
    %306 = vector.multi_reduction <add>, %305, %cst_167 [1] : vector<8x128xf32> to vector<8xf32>
    %307 = vector.shape_cast %306 : vector<8xf32> to vector<8x1xf32>
    %308 = arith.addf %273, %307 : vector<8x1xf32>
    %c0_168 = arith.constant 0 : index
    %c0_169 = arith.constant 0 : index
    %c0_170 = arith.constant 0 : index
    %c0_171 = arith.constant 0 : index
    %309 = vector.load %arg7[%c0_168, %c0_169, %c0_170, %c0_171] : memref<1x1x8x1xf32, #tpu.memory_space<vmem>>, vector<1x1x8x1xf32>
    %310 = vector.shape_cast %309 : vector<1x1x8x1xf32> to vector<8x1xf32>
    %311 = vector.shape_cast %304 : vector<8x1xf32> to vector<1x1x8x1xf32>
    tpu.vector_store %arg7[%c0_168, %c0_169, %c0_170, %c0_171], %311 {strides = array<i32>} : memref<1x1x8x1xf32, #tpu.memory_space<vmem>>, vector<1x1x8x1xf32>,
    %c0_172 = arith.constant 0 : index
    %c0_173 = arith.constant 0 : index
    %c0_174 = arith.constant 0 : index
    %c0_175 = arith.constant 0 : index
    %312 = vector.load %arg8[%c0_172, %c0_173, %c0_174, %c0_175] : memref<1x1x8x1xf32, #tpu.memory_space<vmem>>, vector<1x1x8x1xf32>
    %313 = vector.shape_cast %312 : vector<1x1x8x1xf32> to vector<8x1xf32>
    %314 = vector.shape_cast %308 : vector<8x1xf32> to vector<1x1x8x1xf32>
    tpu.vector_store %arg8[%c0_172, %c0_173, %c0_174, %c0_175], %314 {strides = array<i32>} : memref<1x1x8x1xf32, #tpu.memory_space<vmem>>, vector<1x1x8x1xf32>,
    return
  }
  func.func @transform_0(%arg0: i32, %arg1: i32) -> (i32, i32, i32, i32, i32) {
    %c8_i32 = arith.constant 8 : i32
    %0 = arith.muli %arg1, %c8_i32 : i32
    %c1_i32 = arith.constant 1 : i32
    %1 = arith.subi %0, %c1_i32 : i32
    %c0_i32 = arith.constant 0 : i32
    %2 = arith.maxsi %1, %c0_i32 : i32
    %c0_i32_0 = arith.constant 0 : i32
    %c0_i32_1 = arith.constant 0 : i32
    %c0_i32_2 = arith.constant 0 : i32
    %c0_i32_3 = arith.constant 0 : i32
    return %arg0, %2, %c0_i32_0, %c0_i32_1, %c0_i32_2 : i32, i32, i32, i32, i32
  }
  func.func @transform_1(%arg0: i32, %arg1: i32) -> (i32, i32, i32, i32, i32) {
    %c0_i32 = arith.constant 0 : i32
    %c0_i32_0 = arith.constant 0 : i32
    %c0_i32_1 = arith.constant 0 : i32
    %c0_i32_2 = arith.constant 0 : i32
    return %arg0, %arg1, %c0_i32, %c0_i32_0, %c0_i32_1 : i32, i32, i32, i32, i32
  }
  func.func @transform_2(%arg0: i32, %arg1: i32) -> (i32, i32, i32, i32, i32) {
    %c8_i32 = arith.constant 8 : i32
    %0 = arith.muli %arg1, %c8_i32 : i32
    %c8_i32_0 = arith.constant 8 : i32
    %1 = arith.addi %0, %c8_i32_0 : i32
    %c15_i32 = arith.constant 15 : i32
    %2 = arith.minsi %1, %c15_i32 : i32
    %c0_i32 = arith.constant 0 : i32
    %c0_i32_1 = arith.constant 0 : i32
    %c0_i32_2 = arith.constant 0 : i32
    %c0_i32_3 = arith.constant 0 : i32
    return %arg0, %2, %c0_i32, %c0_i32_1, %c0_i32_2 : i32, i32, i32, i32, i32
  }
  func.func @transform_3(%arg0: i32, %arg1: i32) -> (i32, i32) {
    %c0_i32 = arith.constant 0 : i32
    %c0_i32_0 = arith.constant 0 : i32
    %c0_i32_1 = arith.constant 0 : i32
    return %c0_i32, %c0_i32_0 : i32, i32
  }
  func.func @transform_4(%arg0: i32, %arg1: i32) -> (i32, i32, i32, i32) {
    %c0_i32 = arith.constant 0 : i32
    %c0_i32_0 = arith.constant 0 : i32
    %c0_i32_1 = arith.constant 0 : i32
    return %arg0, %arg1, %c0_i32, %c0_i32_0 : i32, i32, i32, i32
  }
  func.func @transform_5(%arg0: i32, %arg1: i32) -> (i32, i32, i32, i32) {
    %c0_i32 = arith.constant 0 : i32
    %c0_i32_0 = arith.constant 0 : i32
    %c0_i32_1 = arith.constant 0 : i32
    return %arg0, %arg1, %c0_i32, %c0_i32_0 : i32, i32, i32, i32
  }
  func.func @transform_6(%arg0: i32, %arg1: i32) -> (i32, i32, i32, i32) {
    %c0_i32 = arith.constant 0 : i32
    %c0_i32_0 = arith.constant 0 : i32
    %c0_i32_1 = arith.constant 0 : i32
    return %arg0, %arg1, %c0_i32, %c0_i32_0 : i32, i32, i32, i32
  }
}

</mosaic_0001>

<bundles_post_ra>
// kernel: tpu_custom_call.1
= control target key start
LH: loop header
LB: loop body
LE: loop exit
PB: predicated region body
PF: predicated region fallthrough
CT: control target
= control target key end

     0   :  { %s15769_s0 = inlined_call_operand.vmem [shape: bf16[2,16,10,18,4], index: 0, kind: input, shape index: {}]   ;;  %s15770_s1 = inlined_call_operand.vmem [shape: bf16[2,16,10,18,4], index: 1, kind: input, shape index: {}]   ;;  %s15771_s2 = inlined_call_operand.vmem [shape: bf16[2,16,10,18,4], index: 2, kind: input, shape index: {}]   ;;  %s15772_s3 = inlined_call_operand.vmem [shape: bf16[8,108], index: 3, kind: input, shape index: {}]   ;;  %s15773_s4 = inlined_call_operand.hbm [shape: f32[2,2,8,1024], index: 4, kind: output, shape index: {0}]   ;;  %s15774_s5 = inlined_call_operand.vmem [shape: f32[2,2,8,1], index: 5, kind: output, shape index: {1}]   ;;  %s15775_s6 = inlined_call_operand.vmem [shape: f32[2,2,8,1], index: 6, kind: output, shape index: {2}]  }
   0x1   :  { %15813 = sst [smem:[#allocation35_spill]] %s15769_s0 }
   0x2   :  { %15814 = sst [smem:[#allocation36_spill]] %s15770_s1 }
   0x3   :  { %15815 = sst [smem:[#allocation37_spill]] %s15774_s5 }
   0x4   :  { %15816 = sst [smem:[#allocation38_spill]] %s15775_s6 }
   0x5   :  { %12 = vsyncpa [#allocation3], 0 }
   0x6   :  { %14 = vsyncpa [#allocation3 + $0x1], 0  ;;  %s10577_s21 = smov 0   ;;  %s10579_s22 = smov 0  }
   0x7   :  { %s10581_s23 = smov 0   ;;  %s10583_s24 = smov 0  }
   0x8   :  { %s10585_s25 = smov 0   ;;  %s10587_s26 = smov 0  }
   0x9   :  { %s10589_s27 = smov 0   ;;  %s10591_s28 = smov 0  }
   0xa LB: > { %15817 = sst [smem:[#allocation5_spill]] %s10502_s21  ;;  %s8550_s29 = sadd.s32 4294967295, %s10530_s28   ;;  %s10530_s28 = sphi %s10591_s28, %s20_s28   ;;  %s10526_s27 = sphi %s10589_s27, %s16018_s27   ;;  %s10522_s26 = sphi %s10587_s26, %s16017_s26   ;;  %s10518_s25 = sphi %s10585_s25, %s16016_s25   ;;  %s10514_s24 = sphi %s10583_s24, %s16015_s24   ;;  %s10510_s23 = sphi %s10581_s23, %s16014_s23   ;;  %s10506_s22 = sphi %s10579_s22, %s16020_s22   ;;  %s10502_s21 = sphi %s10577_s21, %s16019_s21  }
   0xb   : > { %15818 = sst [smem:[#allocation6_spill]] %s10510_s23  ;;  %s8551_s30 = sadd.s32 4294967294, %s10530_s28  }
   0xc   : > { %15819 = sst [smem:[#allocation7_spill]] %s10522_s26  ;;  %s29_s7 = sadd.s32 1, %s10522_s26 }
   0xd   : > { %15820 = sst [smem:[#allocation8_spill]] %s10526_s27  ;;  %p30_p0 = scmp.ge.s32.totalorder %s29_s7, 2 }
   0xe   : > { %15821 = sst [smem:[#allocation9_spill]] %s10530_s28  ;;  %s32_s8 = sadd.s32 1, %s10526_s27 }
   0xf   : > { %p172_p1 = scmp.ne.s32.totalorder %s10510_s23, %s10506_s22  ;;  %p173_p2 = scmp.eq.s32.totalorder %s8550_s29, 3 }
  0x10   : > { %s16022_s7 = smov (%p30_p0, %s29_s7), 0  ;;  %s16024_s8 = smov (!%p30_p0, %s32_s8), %s10526_s27 }
  0x11   : > { %15822 = sst [smem:[#allocation10_spill]] %s16022_s7  ;;  %s158_s9 = ssub.s32 %s10522_s26, %s16022_s7 }
  0x12   : > { %p10628_p3 = por %p173_p2, %p172_p1  ;;  %p34_p4 = scmp.ge.s32.totalorder %s16024_s8, 2 }
  0x13   : > { %p178_p5 = scmp.ne.s32.totalorder %s10506_s22, %s10502_s21  ;;  %p179_p6 = scmp.eq.s32.totalorder %s8551_s30, 3 }
  0x14   : > { %p8560_p7 = scmp.ge.s32.totalorder %s10530_s28, 1  ;;  %s16026_s8 = smov (%p34_p4, %s16024_s8), 0 }
  0x15   : > { %15824 = sst [smem:[#allocation11_spill]] %s16026_s8  ;;  %p10637_p8 = por %p179_p6, %p178_p5 }
  0x16   : > { %p310_p9 = scmp.lt.s32.totalorder %s10530_s28, 5  ;;  %s157_s12 = ssub.s32 %s10526_s27, %s16026_s8 }
  0x17   : > { %s15825_s11 = scalar_select %p10637_p8, 1, 0 }
  0x18   : > { %s162_s13 = sadd.s32 1, %s10510_s23  ;;  %s159_s14 = sor.u32 %s158_s9, %s157_s12 }
  0x19   : > { %15826 = sst [smem:[#allocation12_spill]] %s15825_s11  ;;  %p311_p10 = pnand %p8560_p7, %p310_p9 }
  0x1a   : > { %p160_p11 = scmp.eq.s32.totalorder %s159_s14, 0 }
  0x1b   : > { %314 = sbr.rel (%p311_p10) target bundleno = 5163 (0x142b), region = 36 }
  0x1c   : > { %s10646_s15 = scalar_select %p160_p11, %s10510_s23, %s162_s13  }
  0x1e   : > { %15827 = sst [smem:[#allocation13_spill]] %s10646_s15 }
  0x20   : > { %s10649_s16 = sshll.u32 %s10514_s24, 3  ;;  %p391_p12 = scmp.lt.s32.totalorder %s10518_s25, 1  ;;  %vm1104_vm0 = vcmask 31744   ;;  %vm1165_vm1 = vcmask 64512   ;;  %vm1303_vm2 = vcmask 1046528   ;;  %vm1486_vm4 = vcmask 97280  }
  0x21   : > { %p407_p13 = scmp.lt.s32.totalorder %s10649_s16, 15  ;;  %s15828_s1 = sld [smem:[#allocation36_spill]]  ;;  %vm1206_vm3 = vsmask.f32 7424  ;;  %vm1503_vm5 = vcmask 195584   ;;  %vm1520_vm6 = vcmask 293888  }
  0x22   : > { %s10654_s17 = scalar_select %p391_p12, %s10518_s25, 1  ;;  %vm1537_vm7 = vcmask 392192   ;;  %vm1554_vm8 = vcmask 490496   ;;  %vm1571_vm9 = vcmask 588800   ;;  %vm1588_vm10 = vcmask 687104  }
  0x23   : > { %s408_s18 = scalar_select %p407_p13, %s10649_s16, 15  ;;  %vm1605_vm11 = vcmask 785408   ;;  %vm1622_vm12 = vcmask 883712  }
  0x24   : > { %s10658_s19 = smul.u32 480, %s10654_s17  ;;  %s15778_s14 = smov 4  }
  0x25   : > { %s10347_s20 = smul.u32 30, %s408_s18  ;;  %s15776_s18 = smov 8  }
  0x26   : > { %p449_p0 = scmp.gt.s32.totalorder %s10514_s24, 0  ;;  %s8563_s9 = sadd.s32 4294967295, %s10649_s16 }
  0x27   : > { %s411_s29 = sadd.s32 %s10347_s20, %s10658_s19  ;;  %p389_p1 = scmp.gt.s32.totalorder %s8563_s9, 0 }
  0x28   : > { %s8571_s30 = sshll.u32 %s411_s29, 2  ;;  %p8564_p2 = scmp.lt.s32.totalorder %s8563_s9, 15 }
  0x29   : > { %s10664_s13 = scalar_lea.vmem %s15828_s1, %s8571_s30  ;;  %s16028_s9 = smov (!%p389_p1, %s8563_s9), 0 }
  0x2a   : > { %v10079_v0 = vld [vmem:[%s10664_s13 + $0x18] sm:$0xff]  ;;  %v10078_v1 = vld [vmem:[%s10664_s13 + $0xc] sm:$0xff]  ;;  %v10077_v2 = vld [vmem:[%s10664_s13] sm:$0xff]  ;;  %s450_s20 = scalar_select %p449_p0, 1.0, 0.0 }
  0x2b   : > { %v731_v3 = vld [vmem:[%s10664_s13 + $0x20] sm:$0x1]  ;;  %v728_v4 = vld [vmem:[%s10664_s13 + $0x14] sm:$0x1]  ;;  %v725_v5 = vld [vmem:[%s10664_s13 + $0x8] sm:$0x1]  ;;  %952 = vrot.lane.b32.xlu2 %v10079_v0, %s15778_s14 }
  0x2c   : > { %948 = vrot.lane.b32.xlu1 %v10078_v1, %s15778_s14  ;;  %v902_v6 = vunpack.c.l.b16 %v731_v3  ;;  %v899_v7 = vunpack.c.l.b16 %v728_v4  ;;  %944 = vrot.lane.b32.xlu0 %v10077_v2, %s15778_s14  ;;  %v896_v8 = vunpack.c.l.b16 %v725_v5  ;;  %v734_v12 = vld [vmem:[%s10664_s13 + $0x2c] sm:$0x1]  ;;  %v10081_v14 = vld [vmem:[%s10664_s13 + $0x30] sm:$0xff]  ;;  %s453_s29 = sshrl.u32 %s450_s20, 16  ;;  %p452_p4 = scmp.ne.f32.partialorder %s450_s20, %s450_s20 }
  0x2d   : > { %v905_v13 = vunpack.c.l.b16 %v734_v12  ;;  %v10080_v16 = vld [vmem:[%s10664_s13 + $0x24] sm:$0xff]  ;;  %v737_v18 = vld [vmem:[%s10664_s13 + $0x38] sm:$0x1]  ;;  %v10082_v22 = vld [vmem:[%s10664_s13 + $0x3c] sm:$0xff]  ;;  %s454_s30 = sand.u32 1, %s453_s29  ;;  %s16030_s9 = smov (!%p8564_p2, %s16028_s9), 15 }
  0x2e   : > { %v929_v9 = vpack.c.b16 %v902_v6, %v902_v6  ;;  %v927_v10 = vpack.c.b16 %v899_v7, %v899_v7  ;;  %v925_v11 = vpack.c.b16 %v896_v8, %v896_v8  ;;  %v740_v17 = vld [vmem:[%s10664_s13 + $0x44] sm:$0x1]  ;;  %v908_v20 = vunpack.c.l.b16 %v737_v18  ;;  %v743_v24 = vld [vmem:[%s10664_s13 + $0x50] sm:$0x1]  ;;  %v10084_v26 = vld [vmem:[%s10664_s13 + $0x54] sm:$0xff]  ;;  %s455_s12 = sadd.s32 32767, %s454_s30 }
  0x2f   : > { %v931_v15 = vpack.c.b16 %v905_v13, %v905_v13  ;;  %v911_v19 = vunpack.c.l.b16 %v740_v17  ;;  %v914_v25 = vunpack.c.l.b16 %v743_v24  ;;  %v10083_v28 = vld [vmem:[%s10664_s13 + $0x48] sm:$0xff]  ;;  %v746_v30 = vld [vmem:[%s10664_s13 + $0x5c] sm:$0x1]  ;;  %v10085_v34 = vld [vmem:[%s10664_s13 + $0x60] sm:$0xff]  ;;  %s10345_s29 = smul.u32 30, %s16030_s9  ;;  %s15829_s0 = sld [smem:[#allocation35_spill]] }
  0x30   : > { %v933_v23 = vpack.c.b16 %v908_v20, %v908_v20  ;;  %v749_v29 = vld [vmem:[%s10664_s13 + $0x68] sm:$0x1]  ;;  %v917_v32 = vunpack.c.l.b16 %v746_v30  ;;  %v752_v36 = vld [vmem:[%s10664_s13 + $0x74] sm:$0x1]  ;;  %v10087_v38 = vld [vmem:[%s10664_s13 + $0x78] sm:$0xff]  ;;  %s15786_s7 = smov 12  }
  0x31   : > { %v935_v21 = vpack.c.b16 %v911_v19, %v911_v19  ;;  %v937_v27 = vpack.c.b16 %v914_v25, %v914_v25  ;;  %v920_v31 = vunpack.c.l.b16 %v749_v29  ;;  %v923_v37 = vunpack.c.l.b16 %v752_v36  ;;  %v10086_v40 = vld [vmem:[%s10664_s13 + $0x6c] sm:$0xff]  ;;  %v8583_v42 = vld [vmem:[%s10664_s13 + $0x80] sm:$0x1]  ;;  %v10088_v46 = vld [vmem:[%s10664_s13 + $0x84] sm:$0xff]  ;;  %s397_s1 = sadd.s32 %s10658_s19, %s10345_s29  ;;  %s15797_s9 = smov 60  }
  0x32   : > { %v939_v35 = vpack.c.b16 %v917_v32, %v917_v32  ;;  %v8586_v41 = vld [vmem:[%s10664_s13 + $0x8c] sm:$0x1]  ;;  %v1016_v44 = vunpack.c.l.b16 %v8583_v42  ;;  %v8589_v48 = vld [vmem:[%s10664_s13 + $0x98] sm:$0x1]  ;;  %v10090_v50 = vld [vmem:[%s10664_s13 + $0x9c] sm:$0xff]  ;;  %s8569_s8 = sshll.u32 %s397_s1, 2 }
  0x33   : > { %954 = vrot.lane.b32.xlu2 %v929_v9, %s15778_s14  ;;  %v941_v33 = vpack.c.b16 %v920_v31, %v920_v31  ;;  %v943_v39 = vpack.c.b16 %v923_v37, %v923_v37  ;;  %v1019_v43 = vunpack.c.l.b16 %v8586_v41  ;;  %v1022_v49 = vunpack.c.l.b16 %v8589_v48  ;;  %v10089_v52 = vld [vmem:[%s10664_s13 + $0x90] sm:$0xff]  ;;  %v8592_v54 = vld [vmem:[%s10664_s13 + $0xa4] sm:$0x1]  ;;  %v10091_v58 = vld [vmem:[%s10664_s13 + $0xa8] sm:$0xff]  ;;  %s15804_s1 = smov 24   ;;  %s15794_s29 = smov 72  }
  0x34   : > { %950 = vrot.lane.b32.xlu1 %v927_v10, %s15778_s14  ;;  %946 = vrot.lane.b32.xlu0 %v925_v11, %s15778_s14  ;;  %v1045_v47 = vpack.c.b16 %v1016_v44, %v1016_v44  ;;  %v8595_v53 = vld [vmem:[%s10664_s13 + $0xb0] sm:$0x1]  ;;  %v1025_v56 = vunpack.c.l.b16 %v8592_v54  ;;  %v8598_v60 = vld [vmem:[%s10664_s13 + $0xbc] sm:$0x1]  ;;  %p434_p5 = scmp.lt.s32.totalorder %s10514_s24, 1  ;;  %s416_s26 = sadd.s32 8, %s10649_s16 }
  0x35   : > { %v1047_v45 = vpack.c.b16 %v1019_v43, %v1019_v43  ;;  %v1049_v51 = vpack.c.b16 %v1022_v49, %v1022_v49  ;;  %v1028_v55 = vunpack.c.l.b16 %v8595_v53  ;;  %v1031_v61 = vunpack.c.l.b16 %v8598_v60  ;;  %v10093_v62 = vld [vmem:[%s10664_s13 + $0xc0] sm:$0xff]  ;;  %v10092_v0 = vld [vmem:[%s10664_s13 + $0xb4] sm:$0xff]  ;;  %v8601_v2 = vld [vmem:[%s10664_s13 + $0xc8] sm:$0x1]  ;;  %s10780_s27 = scalar_lea.vmem %s15829_s0, %s8569_s8  ;;  %s15802_s8 = smov 36  }
  0x36   : > { %v1051_v59 = vpack.c.b16 %v1025_v56, %v1025_v56  ;;  %v8604_v1 = vld [vmem:[%s10664_s13 + $0xd4] sm:$0x1]  ;;  %v1034_v4 = vunpack.c.l.b16 %v8601_v2  ;;  %v10094_v6 = vld [vmem:[%s10664_s13 + $0xcc] sm:$0xff]  ;;  %v8607_v8 = vld [vmem:[%s10664_s13 + $0xe0] sm:$0x1]  ;;  %p15152_p6 = scmp.lt.s32.totalorder %s416_s26, 15 }
  0x37   : > { %v1053_v57 = vpack.c.b16 %v1028_v55, %v1028_v55  ;;  %v1055_v63 = vpack.c.b16 %v1031_v61, %v1031_v61  ;;  %v1037_v3 = vunpack.c.l.b16 %v8604_v1  ;;  %v1040_v9 = vunpack.c.l.b16 %v8607_v8  ;;  %v10096_v10 = vld [vmem:[%s10664_s13 + $0xe4] sm:$0xff]  ;;  %v10095_v13 = vld [vmem:[%s10664_s13 + $0xd8] sm:$0xff]  ;;  %v478_v30 = vld [vmem:[%s10780_s27 + $0x14] sm:$0x1]  ;;  %s15140_s0 = scalar_select %p434_p5, 1.0, 0.0 }
  0x38   : > { %v1057_v7 = vpack.c.b16 %v1034_v4, %v1034_v4  ;;  %v10298_v31 = vld [vmem:[%s10780_s27] sm:$0xff]   ;;  %v512_v36 = vunpack.c.l.bf16 %v478_v30  ;;  %v475_v37 = vld [vmem:[%s10780_s27 + $0x8] sm:$0x1]  ;;  %v10337_v43 = vld [vmem:[%s10780_s27 + $0x18] sm:$0xff]   ;;  %s16034_s26 = smov (!%p15152_p6, %s416_s26), 15 }
  0x39   : > { %v1059_v5 = vpack.c.b16 %v1037_v3, %v1037_v3  ;;  %v1061_v11 = vpack.c.b16 %v1040_v9, %v1040_v9  ;;  %v509_v44 = vunpack.c.l.bf16 %v475_v37  ;;  %v10304_v54 = vunpack.c.h.bf16 %v10337_v43  ;;  %v482_v9 = vld [vmem:[%s10780_s27 + $0x24] sm:$0xff]   ;;  %s465_s15 = sshrl.u32 %s15140_s0, 16  ;;  %s16036_s26 = smov (!%p15152_p6, %s16034_s26), 15 }
  0x3a   : > { %s466_s11 = sand.u32 1, %s465_s15  ;;  %p464_p7 = scmp.ne.f32.partialorder %s15140_s0, %s15140_s0 }
  0x3b   : > { %960 = vrot.lane.b32.xlu2 %v10081_v14, %s15778_s14  ;;  %v8610_v14 = vld [vmem:[%s10664_s13 + $0xec] sm:$0x1]  ;;  %s467_s21 = sadd.s32 32767, %s466_s11 }
  0x3c   : > { %958 = vrot.lane.b32.xlu1 %v931_v15, %s15778_s14  ;;  %956 = vrot.lane.b32.xlu0 %v10080_v16, %s15778_s14  ;;  %v1043_v15 = vunpack.c.l.b16 %v8610_v14  ;;  %v487_v14 = vld [vmem:[%s10780_s27 + $0x38] sm:$0x1]  ;;  %s468_s28 = sadd.s32 %s467_s21, %s15140_s0  ;;  %s10348_s21 = smul.u32 30, %s16036_s26 }
  0x3d   : > { %s469_s11 = sand.u32 4294901760, %s468_s28 }
  0x3e   : > { %v1063_v16 = vpack.c.b16 %v1043_v15, %v1043_v15  ;;  %s16038_s11 = smov (%p464_p7, %s469_s11), 2143289344  ;;  %s425_s23 = sadd.s32 %s10348_s21, %s10658_s19 }
  0x3f   : > { %s472_s15 = sshrl.u32 %s16038_s11, 16  ;;  %s8576_s28 = sshll.u32 %s425_s23, 2 }
  0x40   : > { %s628_s0 = sshll.u32 %s472_s15, 16  ;;  %s15192_s5 = scalar_lea.vmem %s15771_s2, %s8576_s28 }
  0x41   : > { %s629_s19 = sor.u32 %s628_s0, %s472_s15  ;;  %s10456_s15 = scalar_lea.hbm %s15773_s4, 256 }
  0x43   : > { %966 = vrot.lane.b32.xlu2 %v935_v21, %s15778_s14 }
  0x44   : > { %964 = vrot.lane.b32.xlu1 %v10082_v22, %s15778_s14  ;;  %962 = vrot.lane.b32.xlu0 %v933_v23, %s15778_s14 }
  0x4b   : > { %972 = vrot.lane.b32.xlu2 %v10084_v26, %s15778_s14 }
  0x4c   : > { %970 = vrot.lane.b32.xlu1 %v937_v27, %s15778_s14  ;;  %968 = vrot.lane.b32.xlu0 %v10083_v28, %s15778_s14 }
  0x53   : > { %978 = vrot.lane.b32.xlu2 %v941_v33, %s15778_s14 }
  0x54   : > { %976 = vrot.lane.b32.xlu1 %v10085_v34, %s15778_s14  ;;  %974 = vrot.lane.b32.xlu0 %v939_v35, %s15778_s14  ;;  %v476_v34 = vld [vmem:[%s10780_s27 + $0xc] sm:$0xff]  }
  0x55   : > { %v510_v41 = vunpack.c.l.bf16 %v476_v34  ;;  %v511_v42 = vunpack.c.h.bf16 %v476_v34  ;;  %v484_v34 = vld [vmem:[%s10780_s27 + $0x2c] sm:$0x1] }
  0x5b   : > { %1064 = vrot.lane.b32.xlu2 %v10087_v38, %s15776_s18  ;;  %v10299_v38 = vunpack.c.l.bf16 %v10298_v31 }
  0x5c   : > { %982 = vrot.lane.b32.xlu1 %v943_v39, %s15778_s14  ;;  %980 = vrot.lane.b32.xlu0 %v10086_v40, %s15778_s14  ;;  %v10300_v39 = vunpack.c.h.bf16 %v10298_v31  ;;  %v490_v31 = vld [vmem:[%s10780_s27 + $0x44] sm:$0x1] }
  0x63   : > { %1070 = vrot.lane.b32.xlu2 %v1047_v45, %s15776_s18  ;;  %v481_v45 = vld [vmem:[%s10780_s27 + $0x20] sm:$0x1] }
  0x64   : > { %1068 = vrot.lane.b32.xlu1 %v10088_v46, %s15776_s18  ;;  %1066 = vrot.lane.b32.xlu0 %v1045_v47, %s15776_s18  ;;  %v515_v55 = vunpack.c.l.bf16 %v481_v45  ;;  %v521_v45 = vunpack.c.l.bf16 %v487_v14 }
  0x6b   : > { %1076 = vrot.lane.b32.xlu2 %v10090_v50, %s15776_s18  ;;  %v10303_v50 = vunpack.c.l.bf16 %v10337_v43 }
  0x6c   : > { %1074 = vrot.lane.b32.xlu1 %v1049_v51, %s15776_s18  ;;  %1072 = vrot.lane.b32.xlu0 %v10089_v52, %s15776_s18 }
  0x73   : > { %1082 = vrot.lane.b32.xlu2 %v1053_v57, %s15776_s18 }
  0x74   : > { %1080 = vrot.lane.b32.xlu1 %v10091_v58, %s15776_s18  ;;  %1078 = vrot.lane.b32.xlu0 %v1051_v59, %s15776_s18  ;;  %v10338_v59 = vld [vmem:[%s10780_s27 + $0x30] sm:$0xff]  }
  0x75   : > { %v10307_v4 = vunpack.c.l.bf16 %v10338_v59 }
  0x7b   : > { %1088 = vrot.lane.b32.xlu2 %v10093_v62, %s15776_s18 }
  0x7c   : > { %1086 = vrot.lane.b32.xlu1 %v1055_v63, %s15776_s18  ;;  %1084 = vrot.lane.b32.xlu0 %v10092_v0, %s15776_s18 }
  0x83   : > { %1094 = vrot.lane.b32.xlu2 %v1059_v5, %s15776_s18  ;;  %v10308_v5 = vunpack.c.h.bf16 %v10338_v59 }
  0x84   : > { %1092 = vrot.lane.b32.xlu1 %v10094_v6, %s15776_s18  ;;  %1090 = vrot.lane.b32.xlu0 %v1057_v7, %s15776_s18 }
  0x85   : > { %v10740_v12 = vpop.permute.xlu2 %952 }
  0x8b   : > { %1100 = vrot.lane.b32.xlu2 %v10096_v10, %s15776_s18 }
  0x8c   : > { %1098 = vrot.lane.b32.xlu1 %v1061_v11, %s15776_s18  ;;  %1096 = vrot.lane.b32.xlu0 %v10095_v13, %s15776_s18 }
  0x8d   : > { %v10747_v17 = vpop.permute.xlu2 %954 }
  0x94   : > { %1102 = vrot.lane.b32.xlu0 %v1063_v16, %s15776_s18  ;;  %s456_s18 = sadd.s32 %s455_s12, %s450_s20 }
  0x95   : > { %v10751_v18 = vpop.permute.xlu2 %960  ;;  %s457_s14 = sand.u32 4294901760, %s456_s18 }
  0x96   : > { %s16032_s14 = smov (%p452_p4, %s457_s14), 2143289344 }
  0x97   : > { %s460_s30 = sshrl.u32 %s16032_s14, 16  ;;  %s15799_s14 = smov 48  }
  0x98   : > { %s503_s12 = sshll.u32 %s460_s30, 16 }
  0x99   : > { %s504_s18 = sor.u32 %s503_s12, %s460_s30  ;;  %s15784_s30 = smov 96  }
  0x9a   : > { %v505_v33 = vstv %s504_s18  ;;  %s15837_s12 = smov 4   ;;  %s15840_s18 = smov 8  }
  0x9b   : > { %v10790_v40 = vunpack.c.l.bf16 %v505_v33 }
  0x9d   : > { %v10760_v22 = vpop.permute.xlu2 %966  ;;  %v543_v46 = vmul.f32 %v10790_v40, %v512_v36  ;;  %v538_v47 = vmul.f32 %v10299_v38, %v10790_v40  ;;  %v539_v48 = vmul.f32 %v10300_v39, %v10790_v40  ;;  %v541_v51 = vmul.f32 %v10790_v40, %v510_v41 }
  0x9e   : > { %v10753_v19 = vpop.permute.xlu1 %948  ;;  %v10755_v20 = vpop.permute.xlu0 %944  ;;  %v542_v52 = vmul.f32 %v10790_v40, %v511_v42  ;;  %v540_v56 = vmul.f32 %v10790_v40, %v509_v44  ;;  %v544_v62 = vmul.f32 %v10303_v50, %v10790_v40  ;;  %v545_v1 = vmul.f32 %v10304_v54, %v10790_v40 }
  0x9f   : > { %v573_v58 = vpack.c.bf16 %v543_v46, %v543_v46  ;;  %v568_v60 = vpack.c.bf16 %v538_v47, %v538_v47  ;;  %v569_v61 = vpack.c.bf16 %v539_v48, %v539_v48  ;;  %v571_v63 = vpack.c.bf16 %v541_v51, %v541_v51 }
  0xa0   : > { %v572_v0 = vpack.c.bf16 %v542_v52, %v542_v52  ;;  %v546_v2 = vmul.f32 %v10790_v40, %v515_v55  ;;  %v570_v3 = vpack.c.bf16 %v540_v56, %v540_v56  ;;  %v574_v10 = vpack.c.bf16 %v544_v62, %v544_v62 }
  0xa1   : > { %v819_v6 = vunpack.c.l.b16 %v573_v58  ;;  %v814_v7 = vunpack.c.l.b16 %v568_v60  ;;  %v815_v8 = vunpack.c.l.b16 %v569_v61  ;;  %v817_v11 = vunpack.c.l.b16 %v571_v63  ;;  %v488_v60 = vld [vmem:[%s10780_s27 + $0x3c] sm:$0xff]  }
  0xa2   : > { %v818_v13 = vunpack.c.l.b16 %v572_v0  ;;  %v575_v16 = vpack.c.bf16 %v545_v1, %v545_v1  ;;  %v576_v30 = vpack.c.bf16 %v546_v2, %v546_v2  ;;  %v816_v33 = vunpack.c.l.b16 %v570_v3 }
  0xa3   : > { %v550_v38 = vmul.f32 %v10307_v4, %v10790_v40  ;;  %v551_v39 = vmul.f32 %v10308_v5, %v10790_v40  ;;  %v847_v41 = vpack.c.b16 %v819_v6, %v819_v6  ;;  %v516_v42 = vunpack.c.l.bf16 %v482_v9 }
  0xa4   : > { %v844_v43 = vpack.c.b16 %v815_v8, %v814_v7  ;;  %v517_v44 = vunpack.c.h.bf16 %v482_v9  ;;  %v10820_v46 = vunpack.c.l.b16 %v574_v10  ;;  %v524_v47 = vunpack.c.l.bf16 %v490_v31 }
  0xa5   : > { %v10768_v26 = vpop.permute.xlu2 %972  ;;  %v846_v48 = vpack.c.b16 %v818_v13, %v817_v11  ;;  %v518_v50 = vunpack.c.l.bf16 %v484_v34  ;;  %v821_v51 = vunpack.c.l.b16 %v575_v16  ;;  %v822_v52 = vunpack.c.l.b16 %v576_v30 }
  0xa6   : > { %v10758_v21 = vpop.permute.xlu1 %950  ;;  %v10762_v23 = vpop.permute.xlu0 %946  ;;  %v845_v54 = vpack.c.b16 %v816_v33, %v816_v33  ;;  %v580_v55 = vpack.c.bf16 %v550_v38, %v550_v38  ;;  %v581_v56 = vpack.c.bf16 %v551_v39, %v551_v39  ;;  %v547_v59 = vmul.f32 %v10790_v40, %v516_v42  ;;  %v494_v42 = vld [vmem:[%s10780_s27 + $0x54] sm:$0xff]  }
  0xa7   : > { %v1116_v58 = vsel %vm1104_vm0, %v847_v41, %v10758_v21  ;;  %v1107_v61 = vsel %vm1104_vm0, %v844_v43, %v10755_v20  ;;  %v548_v62 = vmul.f32 %v10790_v40, %v517_v44  ;;  %v552_v63 = vmul.f32 %v10790_v40, %v521_v45 }
  0xa8   : > { %v555_v1 = vmul.f32 %v10790_v40, %v524_v47  ;;  %v1113_v2 = vsel %vm1104_vm0, %v846_v48, %v10753_v19  ;;  %v549_v21 = vmul.f32 %v10790_v40, %v518_v50  ;;  %v1110_v20 = vsel %vm1104_vm0, %v845_v54, %v10762_v23  ;;  %v493_v48 = vld [vmem:[%s10780_s27 + $0x50] sm:$0x1] }
  0xa9   : > { %v522_v5 = vunpack.c.l.bf16 %v488_v60  ;;  %v577_v8 = vpack.c.bf16 %v547_v59, %v547_v59  ;;  %v582_v13 = vpack.c.bf16 %v552_v63, %v552_v63  ;;  %v849_v16 = vpack.c.b16 %v822_v52, %v822_v52 }
  0xaa   : > { %v826_v30 = vunpack.c.l.b16 %v580_v55  ;;  %v827_v31 = vunpack.c.l.b16 %v581_v56  ;;  %v585_v34 = vpack.c.bf16 %v555_v1, %v555_v1  ;;  %v523_v38 = vunpack.c.h.bf16 %v488_v60 }
  0xab   : > { %v848_v41 = vpack.c.b16 %v821_v51, %v10820_v46  ;;  %v823_v43 = vunpack.c.l.b16 %v577_v8  ;;  %v553_v45 = vmul.f32 %v10790_v40, %v522_v5  ;;  %v828_v47 = vunpack.c.l.b16 %v582_v13  ;;  %v10339_v46 = vld [vmem:[%s10780_s27 + $0x48] sm:$0xff]  }
  0xac   : > { %v1122_v50 = vsel %vm1104_vm0, %v849_v16, %v10747_v17  ;;  %v852_v52 = vpack.c.b16 %v827_v31, %v826_v30  ;;  %v10866_v55 = vunpack.c.l.b16 %v585_v34 }
  0xad   : > { %v10775_v29 = vpop.permute.xlu2 %978  ;;  %v1119_v60 = vsel %vm1104_vm0, %v848_v41, %v10740_v12  ;;  %v583_v1 = vpack.c.bf16 %v553_v45, %v553_v45 }
  0xae   : > { %v10764_v24 = vpop.permute.xlu1 %958  ;;  %v10766_v25 = vpop.permute.xlu0 %956 }
  0xaf   : > { %v829_v30 = vunpack.c.l.b16 %v583_v1 }
  0xb5   : > { %v10797_v49 = vpop.permute.xlu2 %1064 }
  0xb6   : > { %v10771_v27 = vpop.permute.xlu1 %964  ;;  %v10773_v28 = vpop.permute.xlu0 %962  ;;  %v10839_v3 = vsel %vm1165_vm1, %v1107_v61, %v10797_v49  ;;  %v578_v49 = vpack.c.bf16 %v548_v62, %v548_v62  ;;  %v528_v61 = vunpack.c.l.bf16 %v494_v42  ;;  %v527_v62 = vunpack.c.l.bf16 %v493_v48 }
  0xb7   : > { %15830 = vst [vmem:[#allocation14_spill] sm:$0xff] %v10839_v3  ;;  %v1304_v11 = vrot.slane %v10839_v3, 1 }
  0xb8   : > { %v824_v44 = vunpack.c.l.b16 %v578_v49  ;;  %v559_v49 = vmul.f32 %v10790_v40, %v528_v61 }
  0xba   : > { %v850_v17 = vpack.c.b16 %v824_v44, %v823_v43 }
  0xbc   : > { %v1125_v16 = vsel %vm1104_vm0, %v850_v17, %v10766_v25 }
  0xbd   : > { %v1071_v36 = vpop.permute.xlu2 %1070 }
  0xbe   : > { %v10784_v32 = vpop.permute.xlu1 %970  ;;  %v10787_v35 = vpop.permute.xlu0 %968  ;;  %v10831_v0 = vsel %vm1165_vm1, %v1116_v58, %v1071_v36  ;;  %v579_v36 = vpack.c.bf16 %v549_v21, %v549_v21  ;;  %v554_v58 = vmul.f32 %v10790_v40, %v523_v38 }
  0xbf   : > { %v1308_v9 = vrot.slane %v10831_v0, 1 }
  0xc0   : > { %v825_v56 = vunpack.c.l.b16 %v579_v36 }
  0xc2   : > { %v851_v8 = vpack.c.b16 %v825_v56, %v825_v56 }
  0xc4   : > { %v1128_v25 = vsel %vm1104_vm0, %v851_v8, %v10764_v24 }
  0xc5   : > { %v1077_v23 = vpop.permute.xlu2 %1076 }
  0xc6   : > { %v10801_v53 = vpop.permute.xlu1 %976  ;;  %v10804_v57 = vpop.permute.xlu0 %974  ;;  %v10898_v38 = vsel %vm1165_vm1, %v1125_v16, %v1077_v23 }
  0xcd   : > { %v1083_v12 = vpop.permute.xlu2 %1082 }
  0xce   : > { %v10812_v15 = vpop.permute.xlu1 %982  ;;  %v10816_v37 = vpop.permute.xlu0 %980 }
  0xd6   : > { %v1069_v4 = vpop.permute.xlu1 %1068  ;;  %v1067_v7 = vpop.permute.xlu0 %1066 }
  0xd7   : > { %v10844_v6 = vsel %vm1165_vm1, %v1113_v2, %v1069_v4  ;;  %v10848_v19 = vsel %vm1165_vm1, %v1110_v20, %v1067_v7  ;;  %v853_v2 = vpack.c.b16 %v828_v47, %v828_v47  ;;  %v10311_v4 = vunpack.c.l.bf16 %v10339_v46 }
  0xd8   : > { %v1307_v10 = vrot.slane %v10844_v6, 1  ;;  %v1305_v14 = vrot.slane %v10848_v19, 1  ;;  %v10312_v20 = vunpack.c.h.bf16 %v10339_v46  ;;  %v855_v7 = vpack.c.b16 %v10866_v55, %v10866_v55 }
  0xd9   : > { %v1134_v31 = vsel %vm1104_vm0, %v853_v2, %v10773_v28  ;;  %v556_v34 = vmul.f32 %v10311_v4, %v10790_v40  ;;  %v589_v47 = vpack.c.bf16 %v559_v49, %v559_v49  ;;  %v1209_v55 = vshll.u32 %v10839_v3, 16 }
  0xda   : > { %v10854_v33 = vsel %vm1303_vm2, %v1307_v10, %v1308_v9  ;;  %v1306_v39 = vsel %vm1303_vm2, %v1304_v11, %v1305_v14  ;;  %v584_v9 = vpack.c.bf16 %v554_v58, %v554_v58  ;;  %v529_v10 = vunpack.c.h.bf16 %v494_v42  ;;  %v496_v42 = vld [vmem:[%s10780_s27 + $0x5c] sm:$0x1] }
  0xdb   : > { %1376 = vrot.lane.b32.xlu1 %v10854_v33, %s15804_s1  ;;  %1374 = vrot.lane.b32.xlu0 %v1306_v39, %s15804_s1  ;;  %v558_v11 = vmul.f32 %v10790_v40, %v527_v62  ;;  %v1131_v14 = vsel %vm1104_vm0, %v852_v52, %v10751_v18  ;;  %v557_v36 = vmul.f32 %v10312_v20, %v10790_v40  ;;  %v530_v46 = vunpack.c.l.bf16 %v496_v42 }
  0xdc   : > { %v10901_v39 = vsel %vm1165_vm1, %v1134_v31, %v1083_v12  ;;  %v830_v41 = vunpack.c.l.b16 %v584_v9  ;;  %v560_v45 = vmul.f32 %v10790_v40, %v529_v10  ;;  %v586_v56 = vpack.c.bf16 %v556_v34, %v556_v34 }
  0xdd   : > { %v588_v23 = vpack.c.bf16 %v558_v11, %v558_v11  ;;  %v587_v58 = vpack.c.bf16 %v557_v36, %v557_v36  ;;  %v10925_v17 = vunpack.c.l.b16 %v589_v47  ;;  %v1213_v1 = vshll.u32 %v10848_v19, 16 }
  0xde   : > { %v1075_v54 = vpop.permute.xlu1 %1074  ;;  %v1073_v59 = vpop.permute.xlu0 %1072  ;;  %v1140_v2 = vsel %vm1104_vm0, %v855_v7, %v10760_v22  ;;  %v1211_v8 = vrot.slane %v1209_v55, 1  ;;  %v832_v9 = vunpack.c.l.b16 %v586_v56  ;;  %v561_v10 = vmul.f32 %v10790_v40, %v530_v46 }
  0xdf   : > { %v10871_v51 = vsel %vm1165_vm1, %v1122_v50, %v1075_v54  ;;  %v10877_v21 = vsel %vm1165_vm1, %v1119_v60, %v1073_v59  ;;  %v1317_v50 = vrot.slane %v10901_v39, 1  ;;  %v1313_v54 = vrot.slane %v10898_v38, 1 }
  0xe0   : > { %v1311_v63 = vrot.slane %v10871_v51, 1  ;;  %v1310_v5 = vrot.slane %v10877_v21, 1  ;;  %v1229_v44 = vshll.u32 %v10877_v21, 16  ;;  %v854_v59 = vpack.c.b16 %v830_v41, %v829_v30 }
  0xe1   : > { %v834_v4 = vunpack.c.l.b16 %v588_v23  ;;  %v1233_v20 = vshll.u32 %v10871_v51, 16  ;;  %v833_v12 = vunpack.c.l.b16 %v587_v58  ;;  %v1219_v11 = vshll.u32 %v10844_v6, 16 }
  0xe2   : > { %v10885_v13 = vsel %vm1303_vm2, %v1310_v5, %v1311_v63  ;;  %v1231_v62 = vrot.slane %v1229_v44, 1  ;;  %v590_v63 = vpack.c.bf16 %v560_v45, %v560_v45  ;;  %v1227_v5 = vshrl.u32 %v10877_v21, 16 }
  0xe3   : > { %1378 = vrot.lane.b32.xlu2 %v10885_v13, %s15804_s1  ;;  %v1137_v49 = vsel %vm1104_vm0, %v854_v59, %v10771_v27  ;;  %v1207_v7 = vshrl.u32 %v10839_v3, 16  ;;  %v1215_v51 = vrot.slane %v1213_v1, 1  ;;  %v1235_v34 = vrot.slane %v1233_v20, 1  ;;  %v10116_v3 = vld [vmem:[%s10664_s13 + $0xe4] sm:$0xff] }
  0xe4   : > { %v1232_v22 = vor.u32 %v1231_v62, %v1227_v5  ;;  %v836_v27 = vunpack.c.l.b16 %v590_v63  ;;  %v1239_v42 = vshll.u32 %v10898_v38, 16  ;;  %v1221_v45 = vrot.slane %v1219_v11, 1 }
  0xe5   : > { %v1212_v41 = vor.u32 %v1211_v8, %v1207_v7  ;;  %v857_v23 = vpack.c.b16 %v834_v4, %v834_v4  ;;  %v1223_v55 = vshll.u32 %v10831_v0, 16  ;;  %v1217_v56 = vshrl.u32 %v10844_v6, 16 }
  0xe6   : > { %v1081_v18 = vpop.permute.xlu1 %1080  ;;  %v1079_v43 = vpop.permute.xlu0 %1078  ;;  %v10952_v44 = vsel %vm1206_vm3, %v1232_v22, %v1235_v34  ;;  %v1241_v62 = vrot.slane %v1239_v42, 1  ;;  %v1237_v8 = vshrl.u32 %v10898_v38, 16 }
  0xe7   : > { %v10907_v28 = vsel %vm1165_vm1, %v1131_v14, %v1081_v18  ;;  %v10912_v48 = vsel %vm1165_vm1, %v1128_v25, %v1079_v43  ;;  %v856_v25 = vpack.c.b16 %v833_v12, %v832_v9  ;;  %v1146_v20 = vsel %vm1104_vm0, %v857_v23, %v10784_v32 }
  0xe8   : > { %v1314_v52 = vrot.slane %v10912_v48, 1  ;;  %v1316_v24 = vrot.slane %v10907_v28, 1  ;;  %v1249_v0 = vshll.u32 %v10907_v28, 16  ;;  %v1225_v9 = vrot.slane %v1223_v55, 1 }
  0xe9   : > { %v1143_v59 = vsel %vm1104_vm0, %v856_v25, %v10787_v35  ;;  %v1247_v34 = vshrl.u32 %v10907_v28, 16 }
  0xea   : > { %v10920_v60 = vsel %vm1303_vm2, %v1316_v24, %v1317_v50  ;;  %v10923_v61 = vsel %vm1303_vm2, %v1313_v54, %v1314_v52  ;;  %v591_v50 = vpack.c.bf16 %v561_v10, %v561_v10  ;;  %v1089_v52 = vpop.permute.xlu2 %1088  ;;  %v1243_v24 = vshll.u32 %v10912_v48, 16 }
  0xeb   : > { %1382 = vrot.lane.b32.xlu1 %v10920_v60, %s15804_s1  ;;  %1380 = vrot.lane.b32.xlu0 %v10923_v61, %s15804_s1  ;;  %v1216_v54 = vsel %vm1206_vm3, %v1212_v41, %v1215_v51  ;;  %v858_v48 = vpack.c.b16 %v836_v27, %v10925_v17  ;;  %v10968_v63 = vsel %vm1165_vm1, %v1143_v59, %v1089_v52 }
  0xec   : > { %v1245_v5 = vrot.slane %v1243_v24, 1  ;;  %v837_v17 = vunpack.c.l.b16 %v591_v50  ;;  %v10340_v24 = vld [vmem:[%s10780_s27 + $0x60] sm:$0xff]  }
  0xed   : > { %v1149_v11 = vsel %vm1104_vm0, %v858_v48, %v10768_v26  ;;  %v10315_v48 = vunpack.c.l.bf16 %v10340_v24  ;;  %v10316_v59 = vunpack.c.h.bf16 %v10340_v24 }
  0xee   : > { %v1087_v19 = vpop.permute.xlu1 %1086  ;;  %v1085_v16 = vpop.permute.xlu0 %1084  ;;  %v859_v26 = vpack.c.b16 %v837_v17, %v837_v17 }
  0xef   : > { %v1189_v14 = vsel %vm1165_vm1, %v1140_v2, %v1087_v19  ;;  %v10943_v31 = vsel %vm1165_vm1, %v1137_v49, %v1085_v16  ;;  %v1222_v2 = vor.u32 %v1221_v45, %v1217_v56  ;;  %v1242_v19 = vor.u32 %v1241_v62, %v1237_v8 }
  0xf0   : > { %v1320_v30 = vrot.slane %v1189_v14, 1  ;;  %v1319_v36 = vrot.slane %v10943_v31, 1  ;;  %v1259_v18 = vshll.u32 %v10943_v31, 16  ;;  %v1263_v58 = vshll.u32 %v1189_v14, 16 }
  0xf1   : > { %v1257_v46 = vshrl.u32 %v10943_v31, 16  ;;  %v1269_v49 = vshll.u32 %v10968_v63, 16  ;;  %v10979_v14 = vsel %vm1206_vm3, %v1222_v2, %v1225_v9  ;;  %v1251_v16 = vrot.slane %v1249_v0, 1 }
  0xf2   : > { %v10949_v43 = vsel %vm1303_vm2, %v1319_v36, %v1320_v30  ;;  %v1261_v47 = vrot.slane %v1259_v18, 1  ;;  %v1265_v12 = vrot.slane %v1263_v58, 1  ;;  %v10992_v51 = vsel %vm1206_vm3, %v1242_v19, %v1245_v5  ;;  %v1095_v18 = vpop.permute.xlu2 %1094 }
  0xf3   : > { %1384 = vrot.lane.b32.xlu2 %v10949_v43, %s15804_s1  ;;  %1362 = vrot.lane.b32.xlu0 %v10952_v44, %s15786_s7  ;;  %v1253_v30 = vshll.u32 %v10901_v39, 16  ;;  %v1271_v36 = vrot.slane %v1269_v49, 1  ;;  %v1252_v25 = vor.u32 %v1251_v16, %v1247_v34  ;;  %v1267_v45 = vshrl.u32 %v10968_v63, 16  ;;  %v499_v49 = vld [vmem:[%s10780_s27 + $0x68] sm:$0x1] }
  0xf4   : > { %1358 = vrot.lane.b32.xlu1 %v1216_v54, %s15786_s7  ;;  %v1262_v4 = vor.u32 %v1261_v47, %v1257_v46  ;;  %v1152_v47 = vsel %vm1104_vm0, %v859_v26, %v10804_v57  ;;  %v1322_v39 = vrot.slane %v10968_v63, 1  ;;  %v563_v0 = vmul.f32 %v10316_v59, %v10790_v40 }
  0xf5   : > { %v1255_v23 = vrot.slane %v1253_v30, 1  ;;  %v1197_v50 = vsel %vm1165_vm1, %v1152_v47, %v1095_v18  ;;  %v1272_v52 = vor.u32 %v1271_v36, %v1267_v45 }
  0xf6   : > { %v1091_v1 = vpop.permute.xlu0 %1090  ;;  %v1093_v10 = vpop.permute.xlu1 %1092  ;;  %v10982_v32 = vsel %vm1206_vm3, %v1262_v4, %v1265_v12  ;;  %v1283_v58 = vshll.u32 %v1197_v50, 16  ;;  %v562_v4 = vmul.f32 %v10315_v48, %v10790_v40  ;;  %v593_v17 = vpack.c.bf16 %v563_v0, %v563_v0 }
  0xf7   : > { %v1193_v35 = vsel %vm1165_vm1, %v1146_v20, %v1091_v1  ;;  %v10985_v22 = vsel %vm1165_vm1, %v1149_v11, %v1093_v10  ;;  %v11006_v54 = vsel %vm1206_vm3, %v1252_v25, %v1255_v23  ;;  %v1326_v20 = vrot.slane %v1197_v50, 1  ;;  %v500_v23 = vld [vmem:[%s10780_s27 + $0x6c] sm:$0xff]  }
  0xf8   : > { %v1273_v7 = vshll.u32 %v1193_v35, 16  ;;  %v1323_v27 = vrot.slane %v1193_v35, 1  ;;  %v1279_v41 = vshll.u32 %v10985_v22, 16  ;;  %v1277_v46 = vshrl.u32 %v10985_v22, 16 }
  0xf9   : > { %v1325_v1 = vrot.slane %v10985_v22, 1  ;;  %v1285_v2 = vrot.slane %v1283_v58, 1  ;;  %v592_v9 = vpack.c.bf16 %v562_v4, %v562_v4  ;;  %v839_v10 = vunpack.c.l.b16 %v593_v17 }
  0xfa   : > { %v1275_v42 = vrot.slane %v1273_v7, 1  ;;  %v11009_v55 = vsel %vm1303_vm2, %v1322_v39, %v1323_v27  ;;  %v1281_v56 = vrot.slane %v1279_v41, 1  ;;  %v533_v7 = vunpack.c.l.bf16 %v499_v49 }
  0xfb   : > { %1360 = vrot.lane.b32.xlu2 %v10979_v14, %s15786_s7  ;;  %1368 = vrot.lane.b32.xlu0 %v10982_v32, %s15786_s7  ;;  %v11032_v8 = vsel %vm1303_vm2, %v1325_v1, %v1326_v20  ;;  %v838_v12 = vunpack.c.l.b16 %v592_v9  ;;  %v534_v39 = vunpack.c.l.bf16 %v500_v23  ;;  %v535_v50 = vunpack.c.h.bf16 %v500_v23  ;;  %v8703_v23 = vld [vmem:[%s10664_s13 + $0xa4] sm:$0x1] }
  0xfc   : > { %1364 = vrot.lane.b32.xlu1 %v10992_v51, %s15786_s7  ;;  %v11016_v57 = vsel %vm1206_vm3, %v1272_v52, %v1275_v42  ;;  %v1282_v62 = vor.u32 %v1281_v56, %v1277_v46  ;;  %v564_v26 = vmul.f32 %v10790_v40, %v533_v7 }
  0xfd   : > { %v860_v35 = vpack.c.b16 %v839_v10, %v838_v12  ;;  %v565_v58 = vmul.f32 %v10790_v40, %v534_v39  ;;  %v566_v46 = vmul.f32 %v10790_v40, %v535_v50  ;;  %v502_v10 = vld [vmem:[%s10780_s27 + $0x74] sm:$0x1]  ;;  %s15792_s27 = smov 84   ;;  %v1875_v39 = vunpack.c.l.b16 %v8703_v23  ;;  %v10108_v23 = vld [vmem:[%s10664_s13 + $0x84] sm:$0xff] }
  0xfe   : > { %v11025_v5 = vsel %vm1206_vm3, %v1282_v62, %v1285_v2  ;;  %v1097_v19 = vpop.permute.xlu0 %1096  ;;  %v1099_v36 = vpop.permute.xlu1 %1098 }
  0xff   : > { %v1155_v11 = vsel %vm1104_vm0, %v860_v35, %v10801_v53  ;;  %v594_v53 = vpack.c.bf16 %v564_v26, %v564_v26  ;;  %v595_v59 = vpack.c.bf16 %v565_v58, %v565_v58  ;;  %v596_v62 = vpack.c.bf16 %v566_v46, %v566_v46  ;;  %v8709_v58 = vld [vmem:[%s10664_s13 + $0xbc] sm:$0x1]  ;;  %v8700_v46 = vld [vmem:[%s10664_s13 + $0x98] sm:$0x1] }
 0x100   : > { %v11046_v16 = vsel %vm1165_vm1, %v1155_v11, %v1097_v19  ;;  %v536_v19 = vunpack.c.l.bf16 %v502_v10  ;;  %v8694_v10 = vld [vmem:[%s10664_s13 + $0x80] sm:$0x1] }
 0x101   : > { %v840_v30 = vunpack.c.l.b16 %v594_v53  ;;  %v1330_v18 = vshll.u32 %v11046_v16, 16  ;;  %v1328_v42 = vshrl.u32 %v11046_v16, 16  ;;  %v1340_v56 = vrot.slane %v11046_v16, 1 }
 0x102   : > { %v841_v4 = vunpack.c.l.b16 %v595_v59  ;;  %v842_v0 = vunpack.c.l.b16 %v596_v62  ;;  %v567_v26 = vmul.f32 %v10790_v40, %v536_v19  ;;  %v1872_v59 = vunpack.c.l.b16 %v8700_v46 }
 0x103   : > { %1366 = vrot.lane.b32.xlu2 %v11006_v54, %s15786_s7  ;;  %1386 = vrot.lane.b32.xlu0 %v11009_v55, %s15804_s1  ;;  %v861_v34 = vpack.c.b16 %v840_v30, %v840_v30  ;;  %v1332_v25 = vrot.slane %v1330_v18, 1 }
 0x104   : > { %1370 = vrot.lane.b32.xlu1 %v11016_v57, %s15786_s7  ;;  %v862_v20 = vpack.c.b16 %v842_v0, %v841_v4  ;;  %v597_v53 = vpack.c.bf16 %v567_v26, %v567_v26 }
 0x105   : > { %v1158_v27 = vsel %vm1104_vm0, %v861_v34, %v10775_v29  ;;  %v1333_v45 = vor.u32 %v1332_v25, %v1328_v42 }
 0x106   : > { %v1103_v2 = vpop.permute.xlu0 %1102  ;;  %v1161_v35 = vsel %vm1104_vm0, %v862_v20, %v10816_v37  ;;  %v843_v34 = vunpack.c.l.b16 %v597_v53  ;;  %v10107_v20 = vld [vmem:[%s10664_s13 + $0x78] sm:$0xff]  ;;  %v10114_v53 = vld [vmem:[%s10664_s13 + $0xcc] sm:$0xff] }
 0x108   : > { %v863_v40 = vpack.c.b16 %v843_v34, %v843_v34  ;;  %v10112_v34 = vld [vmem:[%s10664_s13 + $0xb4] sm:$0xff] }
 0x10b   : > { %1372 = vrot.lane.b32.xlu2 %v11025_v5, %s15786_s7  ;;  %1392 = vrot.lane.b32.xlu0 %v10877_v21, %s15802_s8 }
 0x10c   : > { %1388 = vrot.lane.b32.xlu1 %v11032_v8, %s15804_s1 }
 0x113   : > { %1390 = vrot.lane.b32.xlu2 %v10844_v6, %s15802_s8  ;;  %1398 = vrot.lane.b32.xlu0 %v10943_v31, %s15802_s8 }
 0x114   : > { %1394 = vrot.lane.b32.xlu1 %v10898_v38, %s15802_s8 }
 0x11b   : > { %1396 = vrot.lane.b32.xlu2 %v10907_v28, %s15802_s8  ;;  %1404 = vrot.lane.b32.xlu0 %v11046_v16, %s15802_s8 }
 0x11c   : > { %1400 = vrot.lane.b32.xlu1 %v10968_v63, %s15802_s8 }
 0x123   : > { %1402 = vrot.lane.b32.xlu2 %v10985_v22, %s15802_s8  ;;  %1410 = vrot.lane.b32.xlu0 %v10992_v51, %s15799_s14 }
 0x124   : > { %1406 = vrot.lane.b32.xlu1 %v10979_v14, %s15799_s14  ;;  %v1201_v14 = vsel %vm1165_vm1, %v1158_v27, %v1099_v36 }
 0x125   : > { %v1334_v41 = vshll.u32 %v1201_v14, 16  ;;  %v1341_v24 = vrot.slane %v1201_v14, 1 }
 0x127   : > { %v1336_v47 = vrot.slane %v1334_v41, 1  ;;  %v11104_v48 = vsel %vm1303_vm2, %v1340_v56, %v1341_v24  ;;  %v1901_v56 = vpack.c.b16 %v1875_v39, %v1875_v39  ;;  %v8697_v39 = vld [vmem:[%s10664_s13 + $0x8c] sm:$0x1] }
 0x129   : > { %v11079_v29 = vsel %vm1206_vm3, %v1333_v45, %v1336_v47 }
 0x12b   : > { %1408 = vrot.lane.b32.xlu2 %v10952_v44, %s15799_s14  ;;  %1416 = vrot.lane.b32.xlu0 %v11016_v57, %s15799_s14 }
 0x12c   : > { %1412 = vrot.lane.b32.xlu1 %v11006_v54, %s15799_s14 }
 0x133   : > { %1414 = vrot.lane.b32.xlu2 %v10982_v32, %s15799_s14  ;;  %1422 = vrot.lane.b32.xlu0 %v10854_v33, %s15797_s9  ;;  %v1101_v33 = vpop.permute.xlu2 %1100 }
 0x134   : > { %1418 = vrot.lane.b32.xlu1 %v11025_v5, %s15799_s14  ;;  %v11126_v49 = vsel %vm1165_vm1, %v1161_v35, %v1101_v33  ;;  %v1866_v35 = vunpack.c.l.b16 %v8694_v10 }
 0x135   : > { %v1345_v25 = vshll.u32 %v11126_v49, 16 }
 0x13b   : > { %1420 = vrot.lane.b32.xlu2 %v11079_v29, %s15799_s14  ;;  %1428 = vrot.lane.b32.xlu0 %v10920_v60, %s15797_s9 }
 0x13c   : > { %1424 = vrot.lane.b32.xlu1 %v10885_v13, %s15797_s9 }
 0x13d   : > { %v11094_v52 = vpop.permute.xlu2 %1378 }
 0x143   : > { %1426 = vrot.lane.b32.xlu2 %v10923_v61, %s15797_s9  ;;  %1434 = vrot.lane.b32.xlu0 %v11032_v8, %s15797_s9 }
 0x144   : > { %1430 = vrot.lane.b32.xlu1 %v10949_v43, %s15797_s9 }
 0x14b   : > { %1432 = vrot.lane.b32.xlu2 %v11009_v55, %s15797_s9  ;;  %1440 = vrot.lane.b32.xlu0 %v10898_v38, %s15794_s29 }
 0x14c   : > { %1436 = vrot.lane.b32.xlu1 %v11104_v48, %s15797_s9 }
 0x14d   : > { %v11108_v1 = vpop.permute.xlu2 %1384  ;;  %v11116_v9 = vpop.permute.xlu1 %1376 }
 0x14e   : > { %15831 = vst [vmem:[#allocation15_spill] sm:$0xff] %v11116_v9  ;;  %v11120_v12 = vpop.permute.xlu0 %1374 }
 0x14f   : > { %15832 = vst [vmem:[#allocation16_spill] sm:$0xff] %v11120_v12  ;;  %v8715_v12 = vld [vmem:[%s10664_s13 + $0xd4] sm:$0x1] }
 0x153   : > { %1438 = vrot.lane.b32.xlu2 %v10877_v21, %s15794_s29  ;;  %1446 = vrot.lane.b32.xlu0 %v10968_v63, %s15794_s29 }
 0x154   : > { %1442 = vrot.lane.b32.xlu1 %v10907_v28, %s15794_s29 }
 0x155   : > { %v11118_v17 = vpop.permute.xlu2 %1360 }
 0x15b   : > { %1444 = vrot.lane.b32.xlu2 %v10943_v31, %s15794_s29  ;;  %1452 = vrot.lane.b32.xlu0 %v11126_v49, %s15794_s29 }
 0x15c   : > { %1448 = vrot.lane.b32.xlu1 %v10985_v22, %s15794_s29 }
 0x15d   : > { %v11134_v11 = vpop.permute.xlu1 %1382  ;;  %v11136_v7 = vpop.permute.xlu2 %1366 }
 0x15e   : > { %v11139_v37 = vpop.permute.xlu0 %1380 }
 0x163   : > { %1450 = vrot.lane.b32.xlu2 %v11046_v16, %s15794_s29  ;;  %1458 = vrot.lane.b32.xlu0 %v11006_v54, %s15792_s27 }
 0x164   : > { %1454 = vrot.lane.b32.xlu1 %v10952_v44, %s15792_s27  ;;  %v1164_v44 = vsel %vm1104_vm0, %v863_v40, %v10812_v15  ;;  %v1895_v40 = vpack.c.b16 %v1866_v35, %v1866_v35 }
 0x165   : > { %v11147_v30 = vpop.permute.xlu2 %1372  ;;  %v1205_v14 = vsel %vm1165_vm1, %v1164_v44, %v1103_v2  ;;  %v8718_v44 = vld [vmem:[%s10664_s13 + $0xe0] sm:$0x1] }
 0x166   : > { %v11149_v36 = vpop.permute.xlu0 %1362  ;;  %v11151_v18 = vpop.permute.xlu1 %1358  ;;  %v1356_v24 = vrot.slane %v1205_v14, 1 }
 0x167   : > { %15833 = vst [vmem:[#allocation17_spill] sm:$0xff] %v11151_v18  ;;  %v8724_v18 = vld [vmem:[%s10664_s13 + $0xf8] sm:$0x1] }
 0x16b   : > { %1456 = vrot.lane.b32.xlu2 %v10992_v51, %s15792_s27  ;;  %1464 = vrot.lane.b32.xlu0 %v11025_v5, %s15792_s27  ;;  %v1349_v51 = vshll.u32 %v1205_v14, 16  ;;  %v1343_v5 = vshrl.u32 %v11126_v49, 16  ;;  %v8712_v14 = vld [vmem:[%s10664_s13 + $0xc8] sm:$0x1] }
 0x16c   : > { %1460 = vrot.lane.b32.xlu1 %v10982_v32, %s15792_s27  ;;  %v1347_v32 = vrot.slane %v1345_v25, 1  ;;  %v1890_v25 = vunpack.c.l.b16 %v8718_v44  ;;  %v10109_v44 = vld [vmem:[%s10664_s13 + $0x90] sm:$0xff] }
 0x16d   : > { %v11159_v54 = vpop.permute.xlu2 %1390  ;;  %v1351_v41 = vrot.slane %v1349_v51, 1  ;;  %v1884_v51 = vunpack.c.l.b16 %v8712_v14 }
 0x16e   : > { %15834 = vst [vmem:[#allocation18_spill] sm:$0xff] %v11159_v54  ;;  %v11163_v16 = vpop.permute.xlu0 %1368  ;;  %v11165_v27 = vpop.permute.xlu1 %1364  ;;  %v1348_v47 = vor.u32 %v1347_v32, %v1343_v5  ;;  %v10113_v54 = vld [vmem:[%s10664_s13 + $0xc0] sm:$0xff] }
 0x173   : > { %1462 = vrot.lane.b32.xlu2 %v11016_v57, %s15792_s27  ;;  %1470 = vrot.lane.b32.xlu0 %v10885_v13, %s15784_s30  ;;  %v1352_v57 = vsel %vm1206_vm3, %v1348_v47, %v1351_v41  ;;  %v1911_v47 = vpack.c.b16 %v1890_v25, %v1890_v25 }
 0x174   : > { %1466 = vrot.lane.b32.xlu1 %v11079_v29, %s15792_s27 }
 0x175   : > { %v11175_v15 = vpop.permute.xlu2 %1396 }
 0x176   : > { %v11178_v42 = vpop.permute.xlu0 %1386  ;;  %v11180_v45 = vpop.permute.xlu1 %1370 }
 0x17b   : > { %1468 = vrot.lane.b32.xlu2 %v1352_v57, %s15792_s27  ;;  %1476 = vrot.lane.b32.xlu0 %v10949_v43, %s15784_s30  ;;  %v1907_v57 = vpack.c.b16 %v1884_v51, %v1884_v51 }
 0x17c   : > { %1472 = vrot.lane.b32.xlu1 %v10923_v61, %s15784_s30 }
 0x17d   : > { %v11188_v13 = vpop.permute.xlu2 %1402 }
 0x17e   : > { %v11190_v29 = vpop.permute.xlu0 %1392  ;;  %v11192_v33 = vpop.permute.xlu1 %1388 }
 0x17f   : > { %15835 = vst [vmem:[#allocation19_spill] sm:$0xff] %v11190_v29  ;;  %v8733_v29 = vld [vmem:[%s10664_s13 + $0x11c] sm:$0x1] }
 0x183   : > { %1474 = vrot.lane.b32.xlu2 %v10920_v60, %s15784_s30  ;;  %1482 = vrot.lane.b32.xlu0 %v11104_v48, %s15784_s30  ;;  %v1355_v60 = vrot.slane %v11126_v49, 1  ;;  %v1881_v48 = vunpack.c.l.b16 %v8709_v58 }
 0x184   : > { %1478 = vrot.lane.b32.xlu1 %v11009_v55, %s15784_s30 }
 0x185   : > { %v11201_v43 = vpop.permute.xlu2 %1408  ;;  %v1357_v55 = vsel %vm1303_vm2, %v1355_v60, %v1356_v24  ;;  %v1905_v0 = vpack.c.b16 %v1881_v48, %v1881_v48  ;;  %v1869_v24 = vunpack.c.l.b16 %v8697_v39  ;;  %v10117_v60 = vld [vmem:[%s10664_s13 + $0xf0] sm:$0xff]  ;;  %v8736_v39 = vld [vmem:[%s10664_s13 + $0x128] sm:$0x1] }
 0x186   : > { %15836 = vst [vmem:[#allocation20_spill] sm:$0xff] %v11201_v43  ;;  %v11203_v61 = vpop.permute.xlu0 %1398  ;;  %v11205_v50 = vpop.permute.xlu1 %1394  ;;  %v10119_v43 = vld [vmem:[%s10664_s13 + $0x108] sm:$0xff] }
 0x187   : > { %v1897_v48 = vpack.c.b16 %v1869_v24, %v1869_v24  ;;  %v8730_v24 = vld [vmem:[%s10664_s13 + $0x110] sm:$0x1] }
 0x18b   : > { %1480 = vrot.lane.b32.xlu2 %v11032_v8, %s15784_s30  ;;  %1928 = vrot.lane.b32.xlu0 %v1901_v56, %s15837_s12  ;;  %v1899_v8 = vpack.c.b16 %v1872_v59, %v1872_v59  ;;  %v8727_v59 = vld [vmem:[%s10664_s13 + $0x104] sm:$0x1] }
 0x18c   : > { %1484 = vrot.lane.b32.xlu1 %v1357_v55, %s15784_s30  ;;  %v10115_v55 = vld [vmem:[%s10664_s13 + $0xd8] sm:$0xff]  ;;  %s15790_s30 = sand.u32 1, %s10506_s22  }
 0x18d   : > { %v11215_v62 = vpop.permute.xlu2 %1414  ;;  %s8561_s20 = sshll.u32 %s15790_s30, 6  ;;  %s15894_s30 = smov 12  }
 0x18e   : > { %v11217_v2 = vpop.permute.xlu0 %1404  ;;  %v11219_v4 = vpop.permute.xlu1 %1400 }
 0x193   : > { %1936 = vrot.lane.b32.xlu0 %v1905_v0, %s15837_s12  ;;  %1924 = vrot.lane.b32.xlu2 %v1899_v8, %s15837_s12  ;;  %v8721_v0 = vld [vmem:[%s10664_s13 + $0xec] sm:$0x1]  ;;  %v1989_v8 = vunpack.c.l.b16 %v8727_v59 }
 0x194   : > { %1914 = vrot.lane.b32.xlu1 %v10107_v20, %s15837_s12  ;;  %v1893_v20 = vunpack.c.l.b16 %v8721_v0 }
 0x195   : > { %v11226_v19 = vpop.permute.xlu2 %1420 }
 0x196   : > { %v11228_v49 = vpop.permute.xlu0 %1410  ;;  %v11230_v26 = vpop.permute.xlu1 %1406 }
 0x197   : > { %15838 = vst [vmem:[#allocation21_spill] sm:$0xff] %v11230_v26 }
 0x19b   : > { %1942 = vrot.lane.b32.xlu0 %v10114_v53, %s15837_s12  ;;  %1934 = vrot.lane.b32.xlu2 %v10112_v34, %s15837_s12  ;;  %v2017_v34 = vpack.c.b16 %v1989_v8, %v1989_v8 }
 0x19c   : > { %1916 = vrot.lane.b32.xlu1 %v1895_v40, %s15837_s12  ;;  %v1913_v40 = vpack.c.b16 %v1893_v20, %v1893_v20 }
 0x19d   : > { %v11239_v32 = vpop.permute.xlu2 %1426 }
 0x19e   : > { %v11241_v5 = vpop.permute.xlu0 %1416  ;;  %v11243_v41 = vpop.permute.xlu1 %1412 }
 0x1a3   : > { %1948 = vrot.lane.b32.xlu0 %v1911_v47, %s15837_s12  ;;  %1940 = vrot.lane.b32.xlu2 %v1907_v57, %s15837_s12  ;;  %v10118_v47 = vld [vmem:[%s10664_s13 + $0xfc] sm:$0xff]  ;;  %v10120_v57 = vld [vmem:[%s10664_s13 + $0x114] sm:$0xff] }
 0x1a4   : > { %1918 = vrot.lane.b32.xlu1 %v10108_v23, %s15837_s12  ;;  %v10110_v23 = vld [vmem:[%s10664_s13 + $0x9c] sm:$0xff] }
 0x1a5   : > { %v11250_v56 = vpop.permute.xlu2 %1432 }
 0x1a6   : > { %v11252_v58 = vpop.permute.xlu0 %1422  ;;  %v11254_v46 = vpop.permute.xlu1 %1418 }
 0x1a7   : > { %15839 = vst [vmem:[#allocation22_spill] sm:$0xff] %v11252_v58 }
 0x1ab   : > { %2034 = vrot.lane.b32.xlu0 %v10117_v60, %s15840_s18  ;;  %1946 = vrot.lane.b32.xlu2 %v10115_v55, %s15837_s12  ;;  %v1998_v60 = vunpack.c.l.b16 %v8736_v39  ;;  %v1992_v55 = vunpack.c.l.b16 %v8730_v24  ;;  %v10123_v39 = vld [vmem:[%s10664_s13 + $0x138] sm:$0xff]  ;;  %v10121_v24 = vld [vmem:[%s10664_s13 + $0x120] sm:$0xff] }
 0x1ac   : > { %1920 = vrot.lane.b32.xlu1 %v1897_v48, %s15837_s12 }
 0x1ad   : > { %v11263_v10 = vpop.permute.xlu2 %1438  ;;  %v2023_v8 = vpack.c.b16 %v1998_v60, %v1998_v60  ;;  %v2019_v20 = vpack.c.b16 %v1992_v55, %v1992_v55  ;;  %v8745_v55 = vld [vmem:[%s10664_s13 + $0x14c] sm:$0x1] }
 0x1ae   : > { %15841 = vst [vmem:[#allocation23_spill] sm:$0xff] %v11263_v10  ;;  %v11265_v35 = vpop.permute.xlu0 %1428  ;;  %v11267_v53 = vpop.permute.xlu1 %1424  ;;  %v8739_v10 = vld [vmem:[%s10664_s13 + $0x134] sm:$0x1] }
 0x1af   : > { %15842 = vst [vmem:[#allocation24_spill] sm:$0xff] %v11267_v53 }
 0x1b3   : > { %2040 = vrot.lane.b32.xlu0 %v2017_v34, %s15840_s18  ;;  %1952 = vrot.lane.b32.xlu2 %v1913_v40, %s15837_s12  ;;  %v10111_v34 = vld [vmem:[%s10664_s13 + $0xa8] sm:$0xff]  ;;  %v8706_v40 = vld [vmem:[%s10664_s13 + $0xb0] sm:$0x1] }
 0x1b4   : > { %1922 = vrot.lane.b32.xlu1 %v10109_v44, %s15837_s12  ;;  %v1878_v44 = vunpack.c.l.b16 %v8706_v40 }
 0x1b5   : > { %v11273_v14 = vpop.permute.xlu2 %1444 }
 0x1b6   : > { %v11275_v25 = vpop.permute.xlu0 %1434  ;;  %v11277_v51 = vpop.permute.xlu1 %1430  ;;  %v1903_v60 = vpack.c.b16 %v1878_v44, %v1878_v44 }
 0x1bb   : > { %2038 = vrot.lane.b32.xlu2 %v10118_v47, %s15840_s18  ;;  %2046 = vrot.lane.b32.xlu0 %v10120_v57, %s15840_s18 }
 0x1bc   : > { %1926 = vrot.lane.b32.xlu1 %v10110_v23, %s15837_s12 }
 0x1bd   : > { %v11287_v48 = vpop.permute.xlu2 %1450 }
 0x1be   : > { %v11289_v59 = vpop.permute.xlu0 %1440  ;;  %v11291_v0 = vpop.permute.xlu1 %1436 }
 0x1bf   : > { %15843 = vst [vmem:[#allocation25_spill] sm:$0xff] %v11289_v59 }
 0x1c3   : > { %2052 = vrot.lane.b32.xlu0 %v2023_v8, %s15840_s18  ;;  %2044 = vrot.lane.b32.xlu2 %v2019_v20, %s15840_s18  ;;  %v2007_v8 = vunpack.c.l.b16 %v8745_v55  ;;  %v2001_v20 = vunpack.c.l.b16 %v8739_v10  ;;  %v1887_v10 = vunpack.c.l.b16 %v8715_v12  ;;  %v10126_v55 = vld [vmem:[%s10664_s13 + $0x15c] sm:$0xff] }
 0x1c4   : > { %1930 = vrot.lane.b32.xlu1 %v10111_v34, %s15837_s12 }
 0x1c5   : > { %v11298_v47 = vpop.permute.xlu2 %1456  ;;  %v2029_v26 = vpack.c.b16 %v2007_v8, %v2007_v8  ;;  %v2025_v44 = vpack.c.b16 %v2001_v20, %v2001_v20  ;;  %v1909_v8 = vpack.c.b16 %v1887_v10, %v1887_v10  ;;  %v8748_v20 = vld [vmem:[%s10664_s13 + $0x158] sm:$0x1]  ;;  %v1986_v10 = vunpack.c.l.b16 %v8724_v18 }
 0x1c6   : > { %15844 = vst [vmem:[#allocation26_spill] sm:$0xff] %v11298_v47  ;;  %v11300_v57 = vpop.permute.xlu0 %1446  ;;  %v11302_v23 = vpop.permute.xlu1 %1442  ;;  %v10124_v47 = vld [vmem:[%s10664_s13 + $0x144] sm:$0xff] }
 0x1cb   : > { %2058 = vrot.lane.b32.xlu0 %v10123_v39, %s15840_s18  ;;  %2050 = vrot.lane.b32.xlu2 %v10121_v24, %s15840_s18 }
 0x1cc   : > { %1932 = vrot.lane.b32.xlu1 %v1903_v60, %s15837_s12 }
 0x1cd   : > { %v11311_v34 = vpop.permute.xlu2 %1462 }
 0x1ce   : > { %v1453_v40 = vpop.permute.xlu0 %1452  ;;  %v11313_v58 = vpop.permute.xlu1 %1448 }
 0x1d3   : > { %2064 = vrot.lane.b32.xlu0 %v2029_v26, %s15840_s18  ;;  %2056 = vrot.lane.b32.xlu2 %v2025_v44, %s15840_s18  ;;  %v2010_v26 = vunpack.c.l.b16 %v8748_v20  ;;  %v2015_v20 = vpack.c.b16 %v1986_v10, %v1986_v10  ;;  %v1502_v10 = vsel %vm1486_vm4, %v10985_v22, %v11147_v30 }
 0x1d4   : > { %1938 = vrot.lane.b32.xlu1 %v10113_v54, %s15837_s12 }
 0x1d5   : > { %v1469_v39 = vpop.permute.xlu2 %1468 }
 0x1d6   : > { %v11320_v24 = vpop.permute.xlu0 %1458  ;;  %v11322_v60 = vpop.permute.xlu1 %1454 }
 0x1d7   : > { %15845 = vst [vmem:[#allocation27_spill] sm:$0xff] %v11322_v60  ;;  %v2031_v60 = vpack.c.b16 %v2010_v26, %v2010_v26 }
 0x1db   : > { %2070 = vrot.lane.b32.xlu0 %v10126_v55, %s15840_s18  ;;  %2062 = vrot.lane.b32.xlu2 %v10124_v47, %s15840_s18 }
 0x1dc   : > { %1944 = vrot.lane.b32.xlu1 %v1909_v8, %s15837_s12 }
 0x1dd   : > { %v11330_v54 = vpop.permute.xlu2 %1474 }
 0x1de   : > { %v11332_v12 = vpop.permute.xlu0 %1464  ;;  %v11334_v44 = vpop.permute.xlu1 %1460 }
 0x1e3   : > { %2068 = vrot.lane.b32.xlu2 %v2031_v60, %s15840_s18 }
 0x1e4   : > { %1950 = vrot.lane.b32.xlu1 %v10116_v3, %s15837_s12  ;;  %v1995_v3 = vunpack.c.l.b16 %v8733_v29 }
 0x1e5   : > { %v11340_v47 = vpop.permute.xlu2 %1480 }
 0x1e6   : > { %v11342_v55 = vpop.permute.xlu0 %1470  ;;  %v1467_v8 = vpop.permute.xlu1 %1466 }
 0x1ec   : > { %2036 = vrot.lane.b32.xlu1 %v2015_v20, %s15840_s18  ;;  %v2021_v20 = vpack.c.b16 %v1995_v3, %v1995_v3 }
 0x1ed   : > { %v11345_v59 = vpop.permute.xlu2 %1924 }
 0x1ee   : > { %15846 = vst [vmem:[#allocation28_spill] sm:$0xff] %v11345_v59  ;;  %v11347_v53 = vpop.permute.xlu0 %1476  ;;  %v11349_v26 = vpop.permute.xlu1 %1472  ;;  %v1519_v59 = vsel %vm1503_vm5, %v1502_v10, %v11192_v33 }
 0x1ef   : > { %v1536_v29 = vsel %vm1520_vm6, %v1519_v59, %v11217_v2 }
 0x1f4   : > { %2042 = vrot.lane.b32.xlu1 %v10119_v43, %s15840_s18  ;;  %v1553_v43 = vsel %vm1537_vm7, %v1536_v29, %v11226_v19 }
 0x1f5   : > { %v11354_v18 = vpop.permute.xlu2 %1934  ;;  %v1570_v22 = vsel %vm1554_vm8, %v1553_v43, %v11291_v0 }
 0x1f6   : > { %15847 = vst [vmem:[#allocation29_spill] sm:$0xff] %v11354_v18  ;;  %v1483_v60 = vpop.permute.xlu0 %1482  ;;  %v11356_v9 = vpop.permute.xlu1 %1478  ;;  %v1500_v18 = vsel %vm1486_vm4, %v10968_v63, %v11180_v45  ;;  %v1587_v30 = vsel %vm1571_vm9, %v1570_v22, %v1453_v40  ;;  %v10122_v40 = vld [vmem:[%s10664_s13 + $0x12c] sm:$0xff] }
 0x1f7   : > { %v1604_v2 = vsel %vm1588_vm10, %v1587_v30, %v1469_v39  ;;  %v1517_v63 = vsel %vm1503_vm5, %v1500_v18, %v11178_v42  ;;  %v8742_v39 = vld [vmem:[%s10664_s13 + $0x140] sm:$0x1]  ;;  %v1498_v18 = vsel %vm1486_vm4, %v10943_v31, %v11163_v16 }
 0x1f8   : > { %v1534_v0 = vsel %vm1520_vm6, %v1517_v63, %v11188_v13  ;;  %v2004_v29 = vunpack.c.l.b16 %v8742_v39 }
 0x1f9   : > { %v1551_v10 = vsel %vm1537_vm7, %v1534_v0, %v11254_v46 }
 0x1fa   : > { %v2027_v16 = vpack.c.b16 %v2004_v29, %v2004_v29 }
 0x1fc   : > { %2048 = vrot.lane.b32.xlu1 %v2021_v20, %s15840_s18  ;;  %v1568_v20 = vsel %vm1554_vm8, %v1551_v10, %v11275_v25  ;;  %v1515_v25 = vsel %vm1503_vm5, %v1498_v18, %v11108_v1  ;;  %v1668_v18 = vld [vmem:[%s10664_s13 + $0x14] sm:$0x1] }
 0x1fd   : > { %v11374_v33 = vpop.permute.xlu2 %1940  ;;  %v1585_v42 = vsel %vm1571_vm9, %v1568_v20, %v11287_v48  ;;  %v1532_v48 = vsel %vm1520_vm6, %v1515_v25, %v11219_v4  ;;  %v1496_v4 = vsel %vm1486_vm4, %v10907_v28, %v11136_v7  ;;  %v10125_v7 = vld [vmem:[%s10664_s13 + $0x150] sm:$0xff] }
 0x1fe   : > { %v11377_v19 = vpop.permute.xlu0 %1928  ;;  %v1485_v59 = vpop.permute.xlu1 %1484  ;;  %v1602_v13 = vsel %vm1588_vm10, %v1585_v42, %v1467_v8  ;;  %v1549_v8 = vsel %vm1537_vm7, %v1532_v48, %v11241_v5 }
 0x1ff   : > { %v1621_v45 = vsel %vm1605_vm11, %v1604_v2, %v1485_v59  ;;  %v1619_v43 = vsel %vm1605_vm11, %v1602_v13, %v1483_v60  ;;  %v1566_v60 = vsel %vm1554_vm8, %v1549_v8, %v11250_v56  ;;  %v1513_v56 = vsel %vm1503_vm5, %v1496_v4, %v11134_v11 }
 0x200   : > { %v1640_v3 = vsel %vm1622_vm12, %v1621_v45, 0  ;;  %v1638_v31 = vsel %vm1622_vm12, %v1619_v43, 0  ;;  %v1583_v1 = vsel %vm1571_vm9, %v1566_v60, %v11313_v58  ;;  %v1530_v58 = vsel %vm1520_vm6, %v1513_v56, %v11203_v61  ;;  %v8751_v45 = vld [vmem:[%s10664_s13 + $0x164] sm:$0x1]  ;;  %v15849_v56 = vld [vmem:[#allocation19_spill] sm:$0xff] }
 0x201   : > { %1642 = vmatpush.bf16.xpose.msra.mxu0 %v1640_v3  ;;  %v1600_v2 = vsel %vm1588_vm10, %v1583_v1, %v11332_v12  ;;  %v1547_v12 = vsel %vm1537_vm7, %v1530_v58, %v11215_v62  ;;  %v1494_v61 = vsel %vm1486_vm4, %v10898_v38, %v11165_v27  ;;  %v2013_v62 = vunpack.c.l.b16 %v8751_v45  ;;  %v10098_v38 = vld [vmem:[%s10664_s13 + $0xc] sm:$0xff] }
 0x202   : > { %v1617_v5 = vsel %vm1605_vm11, %v1600_v2, %v11340_v47  ;;  %v1564_v47 = vsel %vm1554_vm8, %v1547_v12, %v11277_v51  ;;  %v1789_v43 = vunpack.c.l.b16 %v1668_v18  ;;  %v1490_v8 = vsel %vm1486_vm4, %v10844_v6, %v11118_v17  ;;  %v15848_v2 = vld [vmem:[#allocation15_spill] sm:$0xff]  ;;  %v15850_v58 = vld [vmem:[#allocation20_spill] sm:$0xff] }
 0x203   : > { %v1636_v28 = vsel %vm1622_vm12, %v1617_v5, 0  ;;  %v1581_v11 = vsel %vm1571_vm9, %v1564_v47, %v11300_v57  ;;  %v1511_v57 = vsel %vm1503_vm5, %v1494_v61, %v11139_v37  ;;  %v2033_v20 = vpack.c.b16 %v2013_v62, %v2013_v62  ;;  %v15851_v12 = vld [vmem:[#allocation24_spill] sm:$0xff]  ;;  %v15852_v61 = vld [vmem:[#allocation25_spill] sm:$0xff] }
 0x204   : > { %2054 = vrot.lane.b32.xlu1 %v10122_v40, %s15840_s18  ;;  %v1598_v3 = vsel %vm1588_vm10, %v1581_v11, %v11311_v34  ;;  %v1528_v39 = vsel %vm1520_vm6, %v1511_v57, %v11175_v15  ;;  %v1492_v37 = vsel %vm1486_vm4, %v10877_v21, %v11149_v36  ;;  %v1507_v5 = vsel %vm1503_vm5, %v1490_v8, %v15848_v2  ;;  %v15853_v62 = vld [vmem:[#allocation17_spill] sm:$0xff]  ;;  %v15855_v57 = vld [vmem:[#allocation26_spill] sm:$0xff] }
 0x205   : > { %v11407_v30 = vpop.permute.xlu2 %1946  ;;  %v1615_v40 = vsel %vm1605_vm11, %v1598_v3, %v11356_v9  ;;  %v1545_v34 = vsel %vm1537_vm7, %v1528_v39, %v11243_v41  ;;  %v1509_v25 = vsel %vm1503_vm5, %v1492_v37, %v11094_v52  ;;  %v1524_v6 = vsel %vm1520_vm6, %v1507_v5, %v15849_v56 }
 0x206   : > { %v11399_v46 = vpop.permute.xlu0 %1936  ;;  %v11401_v22 = vpop.permute.xlu1 %1914  ;;  %v1634_v27 = vsel %vm1622_vm12, %v1615_v40, 0  ;;  %v1562_v9 = vsel %vm1554_vm8, %v1545_v34, %v11265_v35  ;;  %v1526_v36 = vsel %vm1520_vm6, %v1509_v25, %v11205_v50  ;;  %v15854_v40 = vld [vmem:[#allocation14_spill] sm:$0xff]  ;;  %v15856_v34 = vld [vmem:[#allocation16_spill] sm:$0xff] }
 0x207   : > { %v1579_v42 = vsel %vm1571_vm9, %v1562_v9, %v11273_v14  ;;  %v1543_v48 = vsel %vm1537_vm7, %v1526_v36, %v11228_v49  ;;  %v10101_v25 = vld [vmem:[%s10664_s13 + $0x30] sm:$0xff] }
 0x208   : > { %v1596_v15 = vsel %vm1588_vm10, %v1579_v42, %v11334_v44  ;;  %v15857_v42 = vld [vmem:[#allocation18_spill] sm:$0xff] }
 0x209   : > { %1643 = vmatpush.bf16.xpose.msra.mxu0 %v1638_v31  ;;  %v1613_v41 = vsel %vm1605_vm11, %v1596_v15, %v11347_v53  ;;  %v1560_v53 = vsel %vm1554_vm8, %v1543_v48, %v11239_v32  ;;  %v15858_v15 = vld [vmem:[#allocation21_spill] sm:$0xff] }
 0x20a   : > { %v1632_v44 = vsel %vm1622_vm12, %v1613_v41, 0  ;;  %v1577_v52 = vsel %vm1571_vm9, %v1560_v53, %v11302_v23  ;;  %v15859_v41 = vld [vmem:[#allocation22_spill] sm:$0xff]  ;;  %v1677_v53 = vld [vmem:[%s10664_s13 + $0x38] sm:$0x1] }
 0x20b   : > { %v1594_v50 = vsel %vm1588_vm10, %v1577_v52, %v11320_v24  ;;  %v1798_v8 = vunpack.c.l.b16 %v1677_v53 }
 0x20c   : > { %2060 = vrot.lane.b32.xlu1 %v2027_v16, %s15840_s18  ;;  %v1817_v16 = vpack.c.b16 %v1789_v43, %v1789_v43  ;;  %v1611_v49 = vsel %vm1605_vm11, %v1594_v50, %v11330_v54 }
 0x20d   : > { %v11439_v0 = vpop.permute.xlu2 %1952  ;;  %v1630_v54 = vsel %vm1622_vm12, %v1611_v49, 0 }
 0x20e   : > { %v11424_v59 = vpop.permute.xlu0 %1942  ;;  %v11426_v63 = vpop.permute.xlu1 %1916 }
 0x211   : > { %1644 = vmatpush.bf16.xpose.msra.mxu0 %v1636_v28  ;;  %v1541_v28 = vsel %vm1537_vm7, %v1524_v6, %v15850_v58 }
 0x212   : > { %v1558_v45 = vsel %vm1554_vm8, %v1541_v28, %v15851_v12 }
 0x213   : > { %v1575_v3 = vsel %vm1571_vm9, %v1558_v45, %v15852_v61 }
 0x214   : > { %2066 = vrot.lane.b32.xlu1 %v10125_v7, %s15840_s18  ;;  %v1592_v39 = vsel %vm1588_vm10, %v1575_v3, %v15855_v57 }
 0x215   : > { %v2039_v29 = vpop.permute.xlu2 %2038 }
 0x216   : > { %v11451_v51 = vpop.permute.xlu0 %1948  ;;  %v1919_v10 = vpop.permute.xlu1 %1918 }
 0x217   : > { %v2082_v13 = vsel %vm1104_vm0, %v10098_v38, %v1919_v10  ;;  %v1488_v10 = vsel %vm1486_vm4, %v15854_v40, %v15853_v62 }
 0x218   : > { %v11480_v21 = vsel %vm1165_vm1, %v2082_v13, %v2039_v29  ;;  %v1505_v9 = vsel %vm1503_vm5, %v1488_v10, %v15856_v34 }
 0x219   : > { %1645 = vmatpush.bf16.xpose.msra.mxu0 %v1634_v27  ;;  %v2186_v31 = vshll.u32 %v11480_v21, 16  ;;  %v2184_v17 = vshrl.u32 %v11480_v21, 16  ;;  %v1609_v27 = vsel %vm1605_vm11, %v1592_v39, %v11349_v26  ;;  %v1522_v18 = vsel %vm1520_vm6, %v1505_v9, %v15857_v42  ;;  %v15860_v26 = vld [vmem:[#allocation23_spill] sm:$0xff] }
 0x21a   : > { %v1628_v37 = vsel %vm1622_vm12, %v1609_v27, 0  ;;  %v1539_v13 = vsel %vm1537_vm7, %v1522_v18, %v15858_v15  ;;  %v10097_v15 = vld [vmem:[%s10664_s13] sm:$0xff] }
 0x21b   : > { %v2188_v4 = vrot.slane %v2186_v31, 1  ;;  %v1556_v43 = vsel %vm1554_vm8, %v1539_v13, %v15859_v41  ;;  %v1665_v13 = vld [vmem:[%s10664_s13 + $0x8] sm:$0x1] }
 0x21c   : > { %2072 = vrot.lane.b32.xlu1 %v2033_v20, %s15840_s18 }
 0x21d   : > { %v11514_v7 = vpop.permute.xlu2 %2044  ;;  %v2189_v11 = vor.u32 %v2188_v4, %v2184_v17 }
 0x21e   : > { %v11475_v35 = vpop.permute.xlu0 %2034  ;;  %v1921_v14 = vpop.permute.xlu1 %1920 }
 0x21f   : > { %v2085_v60 = vsel %vm1104_vm0, %v1817_v16, %v1921_v14  ;;  %v1573_v14 = vsel %vm1571_vm9, %v1556_v43, %v15860_v26 }
 0x221   : > { %1646 = vmatpush.bf16.xpose.msra.mxu0 %v1632_v44  ;;  %v15861_v44 = vld [vmem:[#allocation27_spill] sm:$0xff] }
 0x222   : > { %v1590_v48 = vsel %vm1588_vm10, %v1573_v14, %v15861_v44  ;;  %v2076_v14 = vsel %vm1104_vm0, %v10097_v15, %v11401_v22  ;;  %v1671_v44 = vld [vmem:[%s10664_s13 + $0x20] sm:$0x1] }
 0x223   : > { %v1607_v31 = vsel %vm1605_vm11, %v1590_v48, %v11342_v55  ;;  %v11564_v55 = vld [vmem:[%s15772_s3] sm:$0xf]  ;;  %v11611_v48 = vsel %vm1165_vm1, %v2076_v14, %v11475_v35  ;;  %v1792_v53 = vunpack.c.l.b16 %v1671_v44 }
 0x224   : > { %v1626_v49 = vsel %vm1622_vm12, %v1607_v31, 0  ;;  %15862 = vst [vmem:[#allocation15_spill] sm:$0xff] %v11564_v55 }
 0x225   : > { %v2051_v36 = vpop.permute.xlu2 %2050  ;;  %15863 = vst [vmem:[#allocation19_spill] sm:$0xff] %v11611_v48 }
 0x226   : > { %v2041_v1 = vpop.permute.xlu0 %2040  ;;  %v11500_v32 = vpop.permute.xlu1 %1922 }
 0x227   : > { %v11505_v23 = vsel %vm1165_vm1, %v2085_v60, %v2041_v1  ;;  %v1823_v1 = vpack.c.b16 %v1798_v8, %v1798_v8 }
 0x228   : > { %v2190_v24 = vshll.u32 %v11505_v23, 16 }
 0x229   : > { %1647 = vmatpush.bf16.xpose.msra.mxu0 %v1630_v54 }
 0x22a   : > { %v2192_v47 = vrot.slane %v2190_v24, 1  ;;  %v10104_v24 = vld [vmem:[%s10664_s13 + $0x54] sm:$0xff] }
 0x22c   : > { %v11526_v38 = vsel %vm1206_vm3, %v2189_v11, %v2192_v47  ;;  %v1686_v47 = vld [vmem:[%s10664_s13 + $0x5c] sm:$0x1]  ;;  %v2118_v11 = vsel %vm1104_vm0, %v10104_v24, %v11424_v59 }
 0x22d   : > { %2326 = vrot.lane.b32.xlu0 %v11526_v38, %s15786_s7  ;;  %v11558_v4 = vpop.permute.xlu2 %2056  ;;  %v1807_v40 = vunpack.c.l.b16 %v1686_v47  ;;  %v10099_v24 = vld [vmem:[%s10664_s13 + $0x18] sm:$0xff] }
 0x22e   : > { %v11532_v20 = vpop.permute.xlu1 %1926  ;;  %v11541_v29 = vpop.permute.xlu0 %2046 }
 0x22f   : > { %v1829_v57 = vpack.c.b16 %v1807_v40, %v1807_v40 }
 0x231   : > { %1648 = vmatpush.bf16.xpose.msra.mxu0 %v1628_v37 }
 0x235   : > { %v2063_v3 = vpop.permute.xlu2 %2062 }
 0x236   : > { %v1931_v16 = vpop.permute.xlu1 %1930  ;;  %v2053_v60 = vpop.permute.xlu0 %2052  ;;  %v11588_v10 = vsel %vm1165_vm1, %v2118_v11, %v2063_v3  ;;  %v1680_v11 = vld [vmem:[%s10664_s13 + $0x44] sm:$0x1]  ;;  %v2088_v3 = vsel %vm1104_vm0, %v10099_v24, %v11500_v32 }
 0x237   : > { %v2100_v52 = vsel %vm1104_vm0, %v10101_v25, %v1931_v16  ;;  %v2246_v39 = vshll.u32 %v11588_v10, 16  ;;  %v2244_v9 = vshrl.u32 %v11588_v10, 16  ;;  %v1786_v25 = vunpack.c.l.b16 %v1665_v13 }
 0x238   : > { %v11555_v50 = vsel %vm1165_vm1, %v2100_v52, %v2051_v36  ;;  %v2176_v16 = vshll.u32 %v11611_v48, 16  ;;  %v1819_v52 = vpack.c.b16 %v1792_v53, %v1792_v53 }
 0x239   : > { %1649 = vmatpush.bf16.xpose.msra.mxu0 %v1626_v49  ;;  %v2216_v2 = vshll.u32 %v11555_v50, 16  ;;  %v2214_v58 = vshrl.u32 %v11555_v50, 16  ;;  %v2248_v42 = vrot.slane %v2246_v39, 1  ;;  %v1815_v31 = vpack.c.b16 %v1786_v25, %v1786_v25 }
 0x23a   : > { %v2178_v8 = vrot.slane %v2176_v16, 1 }
 0x23b   : > { %v2218_v6 = vrot.slane %v2216_v2, 1  ;;  %v2249_v43 = vor.u32 %v2248_v42, %v2244_v9  ;;  %v2079_v22 = vsel %vm1104_vm0, %v1815_v31, %v11426_v63  ;;  %v10100_v2 = vld [vmem:[%s10664_s13 + $0x24] sm:$0xff]  ;;  %v1801_v9 = vunpack.c.l.b16 %v1680_v11 }
 0x23c   : > { %v2094_v63 = vsel %vm1104_vm0, %v10100_v2, %v11532_v20  ;;  %v10103_v31 = vld [vmem:[%s10664_s13 + $0x48] sm:$0xff] }
 0x23d   : > { %v2219_v12 = vor.u32 %v2218_v6, %v2214_v58  ;;  %v1674_v6 = vld [vmem:[%s10664_s13 + $0x2c] sm:$0x1] }
 0x23e   : > { %v1933_v5 = vpop.permute.xlu1 %1932  ;;  %v11575_v45 = vpop.permute.xlu0 %2058 }
 0x23f   : > { %v2103_v56 = vsel %vm1104_vm0, %v1823_v1, %v1933_v5  ;;  %v2174_v1 = vshrl.u32 %v11611_v48, 16  ;;  %v15864_v5 = vld [vmem:[#allocation28_spill] sm:$0xff] }
 0x240   : > { %v11568_v17 = vsel %vm1165_vm1, %v2103_v56, %v2053_v60  ;;  %8691 = vmatmul.msk.bf16.vlgmr.msra.gmra.mxu0 %vm1622_vm12, %v11564_v55  ;;  %v2091_v56 = vsel %vm1104_vm0, %v1819_v52, %v15864_v5 }
 0x241   : > { %v2220_v54 = vshll.u32 %v11568_v17, 16  ;;  %v2179_v58 = vor.u32 %v2178_v8, %v2174_v1  ;;  %v2145_v47 = vsel %vm1165_vm1, %v2091_v56, %v11514_v7  ;;  %v1683_v1 = vld [vmem:[%s10664_s13 + $0x50] sm:$0x1]  ;;  %v15865_v56 = vld [vmem:[#allocation29_spill] sm:$0xff] }
 0x242   : > { %v2200_v20 = vshll.u32 %v2145_v47, 16 }
 0x243   : > { %v2222_v28 = vrot.slane %v2220_v54, 1 }
 0x244   : > { %v2202_v15 = vrot.slane %v2200_v20, 1 }
 0x245   : > { %v11581_v61 = vsel %vm1206_vm3, %v2219_v12, %v2222_v28  ;;  %v1795_v12 = vunpack.c.l.b16 %v1674_v6 }
 0x246   : > { %2332 = vrot.lane.b32.xlu0 %v11581_v61, %s15786_s7  ;;  %v11585_v62 = vpop.permute.xlu1 %1938  ;;  %v2065_v27 = vpop.permute.xlu0 %2064 }
 0x247   : > { %v2112_v2 = vsel %vm1104_vm0, %v10103_v31, %v11585_v62  ;;  %v2283_v31 = vrot.slane %v11568_v17, 1  ;;  %v10105_v17 = vld [vmem:[%s10664_s13 + $0x60] sm:$0xff] }
 0x24e   : > { %v1945_v59 = vpop.permute.xlu1 %1944 }
 0x24f   : > { %v2121_v34 = vsel %vm1104_vm0, %v1829_v57, %v1945_v59  ;;  %v11637_v57 = vsel %vm1165_vm1, %v2094_v63, %v11541_v29 }
 0x250   : > { %v11594_v18 = vsel %vm1165_vm1, %v2121_v34, %v2065_v27  ;;  %v2277_v27 = vrot.slane %v2145_v47, 1  ;;  %v1821_v34 = vpack.c.b16 %v1795_v12, %v1795_v12  ;;  %v2204_v52 = vshrl.u32 %v11637_v57, 16 }
 0x251   : > { %v2250_v37 = vshll.u32 %v11594_v18, 16 }
 0x253   : > { %v2252_v41 = vrot.slane %v2250_v37, 1  ;;  %v2206_v37 = vshll.u32 %v11637_v57, 16 }
 0x255   : > { %v11600_v26 = vsel %vm1206_vm3, %v2249_v43, %v2252_v41  ;;  %v2097_v41 = vsel %vm1104_vm0, %v1821_v34, %v11377_v19  ;;  %v1825_v43 = vpack.c.b16 %v1801_v9, %v1801_v9  ;;  %v2208_v44 = vrot.slane %v2206_v37, 1 }
 0x256   : > { %2338 = vrot.lane.b32.xlu0 %v11600_v26, %s15786_s7  ;;  %v11606_v36 = vpop.permute.xlu1 %1950  ;;  %v2270_v37 = vrot.slane %v11611_v48, 1 }
 0x257   : > { %v2109_v8 = vsel %vm1104_vm0, %v1825_v43, %v11399_v46  ;;  %v1804_v46 = vunpack.c.l.b16 %v1683_v1  ;;  %v2273_v43 = vrot.slane %v11480_v21, 1 }
 0x258   : > { %v11672_v5 = vsel %vm1165_vm1, %v2109_v8, %v11558_v4 }
 0x259   : > { %v1827_v63 = vpack.c.b16 %v1804_v46, %v1804_v46  ;;  %v2292_v46 = vrot.slane %v11594_v18, 1  ;;  %v10106_v18 = vld [vmem:[%s10664_s13 + $0x6c] sm:$0xff] }
 0x25e   : > { %v2037_v49 = vpop.permute.xlu1 %2036 }
 0x25f   : > { %v11617_v60 = vsel %vm1165_vm1, %v2079_v22, %v2037_v49  ;;  %v10102_v22 = vld [vmem:[%s10664_s13 + $0x3c] sm:$0xff]  ;;  %v2209_v49 = vor.u32 %v2208_v44, %v2204_v52 }
 0x260   : > { %v2180_v35 = vshll.u32 %v11617_v60, 16  ;;  %v2106_v6 = vsel %vm1104_vm0, %v10102_v22, %v15865_v56  ;;  %v2271_v9 = vrot.slane %v11617_v60, 1 }
 0x262   : > { %v2182_v54 = vrot.slane %v2180_v35, 1 }
 0x264   : > { %v2183_v28 = vsel %vm1206_vm3, %v2179_v58, %v2182_v54  ;;  %v11680_v54 = vsel %vm1165_vm1, %v2112_v2, %v11575_v45  ;;  %v2230_v58 = vshll.u32 %v11672_v5, 16 }
 0x265   : > { %2324 = vrot.lane.b32.xlu2 %v2183_v28, %s15786_s7  ;;  %v2236_v47 = vshll.u32 %v11680_v54, 16  ;;  %v2234_v34 = vshrl.u32 %v11680_v54, 16  ;;  %v2288_v52 = vrot.slane %v11680_v54, 1 }
 0x266   : > { %v2043_v40 = vpop.permute.xlu1 %2042  ;;  %v2232_v11 = vrot.slane %v2230_v58, 1  ;;  %v2291_v58 = vrot.slane %v11588_v10, 1 }
 0x267   : > { %v11640_v39 = vsel %vm1165_vm1, %v2088_v3, %v2043_v40  ;;  %v2115_v40 = vsel %vm1104_vm0, %v1827_v63, %v11374_v33  ;;  %v2071_v63 = vpop.permute.xlu0 %2070 }
 0x268   : > { %v2276_v59 = vrot.slane %v11640_v39, 1  ;;  %v2196_v7 = vshll.u32 %v11640_v39, 16  ;;  %v2194_v32 = vshrl.u32 %v11640_v39, 16 }
 0x26a   : > { %v11645_v42 = vsel %vm1303_vm2, %v2276_v59, %v2277_v27  ;;  %v2198_v29 = vrot.slane %v2196_v7, 1  ;;  %v2238_v27 = vrot.slane %v2236_v47, 1 }
 0x26b   : > { %2344 = vrot.lane.b32.xlu0 %v11645_v42, %s15804_s1 }
 0x26c   : > { %v2199_v13 = vor.u32 %v2198_v29, %v2194_v32  ;;  %v2239_v29 = vor.u32 %v2238_v27, %v2234_v34 }
 0x26e   : > { %v2049_v14 = vpop.permute.xlu1 %2048  ;;  %v11654_v25 = vsel %vm1206_vm3, %v2199_v13, %v2202_v15  ;;  %v2272_v15 = vsel %vm1303_vm2, %v2270_v37, %v2271_v9  ;;  %v2274_v13 = vrot.slane %v11505_v23, 1 }
 0x26f   : > { %v2149_v53 = vsel %vm1165_vm1, %v2097_v41, %v2049_v14  ;;  %2328 = vrot.lane.b32.xlu1 %v11654_v25, %s15786_s7  ;;  %v2279_v14 = vrot.slane %v11637_v57, 1 }
 0x270   : > { %v2210_v16 = vshll.u32 %v2149_v53, 16  ;;  %v2280_v41 = vrot.slane %v2149_v53, 1  ;;  %v2275_v60 = vsel %vm1303_vm2, %v2273_v43, %v2274_v13  ;;  %v2282_v53 = vrot.slane %v11555_v50, 1 }
 0x272   : > { %v2212_v19 = vrot.slane %v2210_v16, 1  ;;  %v11713_v44 = vsel %vm1303_vm2, %v2279_v14, %v2280_v41  ;;  %v11720_v16 = vsel %vm1303_vm2, %v2282_v53, %v2283_v31 }
 0x274   : > { %v11668_v35 = vsel %vm1206_vm3, %v2209_v49, %v2212_v19  ;;  %v2124_v19 = vsel %vm1104_vm0, %v10105_v17, %v11407_v30  ;;  %v1692_v17 = vld [vmem:[%s10664_s13 + $0x74] sm:$0x1] }
 0x275   : > { %2330 = vrot.lane.b32.xlu2 %v11668_v35, %s15786_s7 }
 0x276   : > { %v2055_v24 = vpop.permute.xlu1 %2054 }
 0x277   : > { %v11683_v62 = vsel %vm1165_vm1, %v2106_v6, %v2055_v24  ;;  %v2286_v6 = vrot.slane %v11672_v5, 1  ;;  %v2130_v5 = vsel %vm1104_vm0, %v10106_v18, %v11606_v36 }
 0x278   : > { %v2226_v4 = vshll.u32 %v11683_v62, 16  ;;  %v2224_v28 = vshrl.u32 %v11683_v62, 16  ;;  %v2285_v56 = vrot.slane %v11683_v62, 1 }
 0x27a   : > { %v2228_v12 = vrot.slane %v2226_v4, 1  ;;  %v2287_v24 = vsel %vm1303_vm2, %v2285_v56, %v2286_v6  ;;  %v11762_v4 = vsel %vm1303_vm2, %v2291_v58, %v2292_v46 }
 0x27c   : > { %v2229_v3 = vor.u32 %v2228_v12, %v2224_v28  ;;  %v1689_v28 = vld [vmem:[%s10664_s13 + $0x68] sm:$0x1]  ;;  %v11787_v12 = vsel %vm1165_vm1, %v2130_v5, %v2071_v63 }
 0x27d   : > { %v1810_v47 = vunpack.c.l.b16 %v1689_v28 }
 0x27e   : > { %v2061_v45 = vpop.permute.xlu1 %2060  ;;  %v11692_v20 = vsel %vm1206_vm3, %v2229_v3, %v2232_v11 }
 0x27f   : > { %v2161_v59 = vsel %vm1165_vm1, %v2115_v40, %v2061_v45  ;;  %2334 = vrot.lane.b32.xlu1 %v11692_v20, %s15786_s7  ;;  %v1831_v3 = vpack.c.b16 %v1810_v47, %v1810_v47  ;;  %v2069_v40 = vpop.permute.xlu2 %2068 }
 0x280   : > { %v2240_v7 = vshll.u32 %v2161_v59, 16  ;;  %v2289_v23 = vrot.slane %v2161_v59, 1 }
 0x281   : > { %v2127_v36 = vsel %vm1104_vm0, %v1831_v3, %v11451_v51 }
 0x282   : > { %v2242_v32 = vrot.slane %v2240_v7, 1  ;;  %v11726_v22 = vsel %vm1303_vm2, %v2288_v52, %v2289_v23  ;;  %v2169_v27 = vsel %vm1165_vm1, %v2127_v36, %v2069_v40 }
 0x283   : > { %v2300_v7 = vshll.u32 %v2169_v27, 16  ;;  %v2307_v13 = vrot.slane %v2169_v27, 1  ;;  %v2321_v27 = vrot.slane %v11787_v12, 1 }
 0x284   : > { %v11701_v33 = vsel %vm1206_vm3, %v2239_v29, %v2242_v32 }
 0x285   : > { %2336 = vrot.lane.b32.xlu2 %v11701_v33, %s15786_s7  ;;  %s11747_s7 = scalar_lea.vmem [#allocation2], %s8561_s20  ;;  %v2302_v9 = vrot.slane %v2300_v7, 1  ;;  %s15866_s20 = smov 96  }
 0x286   : > { %v2067_v8 = vpop.permute.xlu1 %2066 }
 0x287   : > { %2340 = vrot.lane.b32.xlu1 %v2272_v15, %s15804_s1  ;;  %v11738_v49 = vsel %vm1165_vm1, %v2124_v19, %v2067_v8  ;;  %v1813_v19 = vunpack.c.l.b16 %v1692_v17 }
 0x288   : > { %v2296_v45 = vshll.u32 %v11738_v49, 16  ;;  %v2294_v34 = vshrl.u32 %v11738_v49, 16  ;;  %v2306_v15 = vrot.slane %v11738_v49, 1 }
 0x28a   : > { %v2298_v59 = vrot.slane %v2296_v45, 1  ;;  %v2308_v43 = vsel %vm1303_vm2, %v2306_v15, %v2307_v13 }
 0x28c   : > { %v2299_v51 = vor.u32 %v2298_v59, %v2294_v34 }
 0x28d   : > { %2342 = vrot.lane.b32.xlu2 %v2275_v60, %s15804_s1 }
 0x28e   : > { %v2073_v11 = vpop.permute.xlu1 %2072  ;;  %v2303_v32 = vsel %vm1206_vm3, %v2299_v51, %v2302_v9 }
 0x28f   : > { %2346 = vrot.lane.b32.xlu1 %v11713_v44, %s15804_s1 }
 0x295   : > { %2348 = vrot.lane.b32.xlu2 %v11720_v16, %s15804_s1 }
 0x297   : > { %2352 = vrot.lane.b32.xlu1 %v11726_v22, %s15804_s1 }
 0x29f   : > { %2358 = vrot.lane.b32.xlu1 %v11640_v39, %s15802_s8 }
 0x2a7   : > { %2364 = vrot.lane.b32.xlu1 %v11683_v62, %s15802_s8 }
 0x2af   : > { %2370 = vrot.lane.b32.xlu1 %v11738_v49, %s15802_s8 }
 0x2b7   : > { %2376 = vrot.lane.b32.xlu1 %v11668_v35, %s15799_s14 }
 0x2bd   : > { %v1651_v1 = vpop.f32.mrf.mxu0 }
 0x2be   : > { %1655 = vst [vmem:[%s11747_s7] sm:$0xff] %v1651_v1  ;;  %v1659_v2 = vmul.f32 %v1651_v1, %v1651_v1  ;;  %1656 = vadd.xlane.f32.xlu2 %v1651_v1 }
 0x2bf   : > { %2382 = vrot.lane.b32.xlu1 %v11701_v33, %s15799_s14  ;;  %v11816_v29 = vpop.permute.xlu2 %2324 }
 0x2c0   : > { %1660 = vadd.xlane.f32.xlu0 %v1659_v2  ;;  %v1833_v2 = vpack.c.b16 %v1813_v19, %v1813_v19 }
 0x2c5   : > { %v1653_v30 = vpop.f32.mrf.mxu0 }
 0x2c7   : > { %2388 = vrot.lane.b32.xlu1 %v2275_v60, %s15797_s9  ;;  %v11842_v60 = vpop.permute.xlu0 %2326 }
 0x2cf   : > { %2394 = vrot.lane.b32.xlu1 %v11720_v16, %s15797_s9  ;;  %v11852_v23 = vpop.permute.xlu0 %2332 }
 0x2d4   : > { %2350 = vrot.lane.b32.xlu0 %v2287_v24, %s15804_s1 }
 0x2d6   : > { %2354 = vrot.lane.b32.xlu2 %v11762_v4, %s15804_s1 }
 0x2d7   : > { %2400 = vrot.lane.b32.xlu1 %v11762_v4, %s15797_s9  ;;  %v11863_v8 = vpop.permute.xlu0 %2338 }
 0x2dc   : > { %2356 = vrot.lane.b32.xlu0 %v11480_v21, %s15802_s8 }
 0x2de   : > { %2360 = vrot.lane.b32.xlu2 %v11637_v57, %s15802_s8 }
 0x2df   : > { %2406 = vrot.lane.b32.xlu1 %v11637_v57, %s15794_s29  ;;  %v11873_v56 = vpop.permute.xlu0 %2344 }
 0x2e4   : > { %2362 = vrot.lane.b32.xlu0 %v11555_v50, %s15802_s8 }
 0x2e6   : > { %2366 = vrot.lane.b32.xlu2 %v11680_v54, %s15802_s8 }
 0x2e7   : > { %2412 = vrot.lane.b32.xlu1 %v11680_v54, %s15794_s29 }
 0x2ec   : > { %2368 = vrot.lane.b32.xlu0 %v11588_v10, %s15802_s8 }
 0x2ee   : > { %2372 = vrot.lane.b32.xlu2 %v11526_v38, %s15799_s14  ;;  %v11802_v38 = vpop.permute.xlu1 %2328 }
 0x2ef   : > { %2418 = vrot.lane.b32.xlu1 %v11787_v12, %s15794_s29 }
 0x2f4   : > { %2374 = vrot.lane.b32.xlu0 %v11654_v25, %s15799_s14 }
 0x2f6   : > { %2378 = vrot.lane.b32.xlu2 %v11581_v61, %s15799_s14 }
 0x2f7   : > { %2424 = vrot.lane.b32.xlu1 %v11581_v61, %s15792_s27  ;;  %v11812_v61 = vpop.permute.xlu1 %2334 }
 0x2fc   : > { %2380 = vrot.lane.b32.xlu0 %v11692_v20, %s15799_s14 }
 0x2fe   : > { %2384 = vrot.lane.b32.xlu2 %v11600_v26, %s15799_s14 }
 0x2ff   : > { %2430 = vrot.lane.b32.xlu1 %v11600_v26, %s15792_s27  ;;  %v11822_v37 = vpop.permute.xlu1 %2340  ;;  %v11826_v26 = vpop.permute.xlu2 %2330 }
 0x300   : > { %15867 = vst [vmem:[#allocation20_spill] sm:$0xff] %v11822_v37 }
 0x304   : > { %2386 = vrot.lane.b32.xlu0 %v2303_v32, %s15799_s14 }
 0x306   : > { %2390 = vrot.lane.b32.xlu2 %v11645_v42, %s15797_s9 }
 0x307   : > { %2436 = vrot.lane.b32.xlu1 %v11645_v42, %s15866_s20  ;;  %v11833_v41 = vpop.permute.xlu2 %2336  ;;  %v11835_v42 = vpop.permute.xlu1 %2346 }
 0x30c   : > { %2392 = vrot.lane.b32.xlu0 %v11713_v44, %s15797_s9 }
 0x30e   : > { %2396 = vrot.lane.b32.xlu2 %v2287_v24, %s15797_s9 }
 0x30f   : > { %2442 = vrot.lane.b32.xlu1 %v2287_v24, %s15866_s20  ;;  %v11846_v14 = vpop.permute.xlu2 %2342  ;;  %v11848_v31 = vpop.permute.xlu1 %2352 }
 0x314   : > { %2398 = vrot.lane.b32.xlu0 %v11726_v22, %s15797_s9 }
 0x316   : > { %2402 = vrot.lane.b32.xlu2 %v2308_v43, %s15797_s9 }
 0x317   : > { %2448 = vrot.lane.b32.xlu1 %v2308_v43, %s15866_s20  ;;  %v11856_v53 = vpop.permute.xlu2 %2348  ;;  %v11858_v52 = vpop.permute.xlu1 %2358 }
 0x31c   : > { %2404 = vrot.lane.b32.xlu0 %v11640_v39, %s15794_s29 }
 0x31e   : > { %2408 = vrot.lane.b32.xlu2 %v11555_v50, %s15794_s29 }
 0x31f   : > { %v11869_v30 = vpop.permute.xlu1 %2364 }
 0x324   : > { %2410 = vrot.lane.b32.xlu0 %v11683_v62, %s15794_s29 }
 0x326   : > { %2414 = vrot.lane.b32.xlu2 %v11588_v10, %s15794_s29 }
 0x327   : > { %v2371_v18 = vpop.permute.xlu1 %2370 }
 0x32c   : > { %2416 = vrot.lane.b32.xlu0 %v11738_v49, %s15794_s29  ;;  %v2133_v49 = vsel %vm1104_vm0, %v1833_v2, %v11439_v0 }
 0x32d   : > { %v2173_v6 = vsel %vm1165_vm1, %v2133_v49, %v2073_v11 }
 0x32e   : > { %2420 = vrot.lane.b32.xlu2 %v11654_v25, %s15792_s27  ;;  %v2311_v25 = vshll.u32 %v11787_v12, 16  ;;  %v2315_v24 = vshll.u32 %v2173_v6, 16  ;;  %v2322_v36 = vrot.slane %v2173_v6, 1 }
 0x330   : > { %v2313_v58 = vrot.slane %v2311_v25, 1  ;;  %v2317_v5 = vrot.slane %v2315_v24, 1 }
 0x331   : > { %v11867_v1 = vpop.xlane.xlu2 %1656 }
 0x332   : > { %15868 = vst [vmem:[#allocation24_spill] sm:$0xff] %v11867_v1 }
 0x334   : > { %2422 = vrot.lane.b32.xlu0 %v11668_v35, %s15792_s27  ;;  %v11883_v35 = vpop.xlane.xlu0 %1660 }
 0x335   : > { %15869 = vst [vmem:[#allocation25_spill] sm:$0xff] %v11883_v35 }
 0x336   : > { %2426 = vrot.lane.b32.xlu2 %v11692_v20, %s15792_s27  ;;  %v2309_v20 = vshrl.u32 %v11787_v12, 16 }
 0x338   : > { %v2314_v63 = vor.u32 %v2313_v58, %v2309_v20 }
 0x339   : > { %v2355_v46 = vpop.permute.xlu2 %2354 }
 0x33a   : > { %v2318_v28 = vsel %vm1206_vm3, %v2314_v63, %v2317_v5 }
 0x33c   : > { %2428 = vrot.lane.b32.xlu0 %v11701_v33, %s15792_s27  ;;  %v11895_v33 = vpop.permute.xlu1 %2376 }
 0x33e   : > { %2432 = vrot.lane.b32.xlu2 %v2303_v32, %s15792_s27 }
 0x341   : > { %v11887_v0 = vpop.permute.xlu2 %2360 }
 0x344   : > { %2434 = vrot.lane.b32.xlu0 %v2318_v28, %s15792_s27  ;;  %v11905_v40 = vpop.permute.xlu1 %2382 }
 0x346   : > { %v11891_v47 = vpop.permute.xlu0 %2350  ;;  %2438 = vrot.lane.b32.xlu2 %v11713_v44, %s15866_s20  ;;  %v2323_v44 = vsel %vm1303_vm2, %v2321_v27, %v2322_v36 }
 0x349   : > { %v11897_v11 = vpop.permute.xlu2 %2366 }
 0x34c   : > { %2440 = vrot.lane.b32.xlu0 %v11720_v16, %s15866_s20  ;;  %v11918_v7 = vpop.permute.xlu1 %2388 }
 0x34d   : > { %15872 = vst [vmem:[#allocation26_spill] sm:$0xff] %v11918_v7 }
 0x34e   : > { %v11901_v3 = vpop.permute.xlu0 %2356  ;;  %2444 = vrot.lane.b32.xlu2 %v11726_v22, %s15866_s20 }
 0x34f   : > { %15870 = vst [vmem:[#allocation17_spill] sm:$0xff] %v11901_v3 }
 0x351   : > { %v11907_v45 = vpop.permute.xlu2 %2372 }
 0x352   : > { %15871 = vst [vmem:[#allocation14_spill] sm:$0xff] %v11907_v45 }
 0x354   : > { %2446 = vrot.lane.b32.xlu0 %v11762_v4, %s15866_s20  ;;  %v11920_v51 = vpop.permute.xlu1 %2394 }
 0x356   : > { %v11913_v59 = vpop.permute.xlu0 %2362  ;;  %2450 = vrot.lane.b32.xlu2 %v2323_v44, %s15866_s20 }
 0x359   : > { %v11916_v16 = vpop.permute.xlu2 %2378 }
 0x35c   : > { %v2401_v4 = vpop.permute.xlu1 %2400 }
 0x35e   : > { %v2369_v22 = vpop.permute.xlu0 %2368 }
 0x361   : > { %v2385_v34 = vpop.permute.xlu2 %2384 }
 0x364   : > { %v11928_v43 = vpop.permute.xlu1 %2406 }
 0x365   : > { %15873 = vst [vmem:[#allocation16_spill] sm:$0xff] %v11928_v43 }
 0x366   : > { %v11922_v9 = vpop.permute.xlu0 %2374 }
 0x369   : > { %v11924_v12 = vpop.permute.xlu2 %2390 }
 0x36c   : > { %v2413_v49 = vpop.permute.xlu1 %2412 }
 0x36e   : > { %v11926_v32 = vpop.permute.xlu0 %2380 }
 0x371   : > { %v2397_v15 = vpop.permute.xlu2 %2396 }
 0x374   : > { %v2419_v24 = vpop.permute.xlu1 %2418 }
 0x376   : > { %v2387_v13 = vpop.permute.xlu0 %2386 }
 0x379   : > { %v2403_v17 = vpop.permute.xlu2 %2402 }
 0x37c   : > { %v11940_v63 = vpop.permute.xlu1 %2424 }
 0x37e   : > { %v11930_v19 = vpop.permute.xlu0 %2392 }
 0x381   : > { %v11932_v2 = vpop.permute.xlu2 %2408 }
 0x384   : > { %v2431_v27 = vpop.permute.xlu1 %2430 }
 0x386   : > { %v2399_v6 = vpop.permute.xlu0 %2398 }
 0x389   : > { %v2415_v25 = vpop.permute.xlu2 %2414 }
 0x38c   : > { %v11948_v55 = vpop.permute.xlu1 %2436 }
 0x38d   : > { %15878 = vst [vmem:[#allocation27_spill] sm:$0xff] %v11948_v55 }
 0x38e   : > { %v11934_v58 = vpop.permute.xlu0 %2404 }
 0x38f   : > { %15874 = vst [vmem:[#allocation18_spill] sm:$0xff] %v11934_v58 }
 0x391   : > { %v11936_v20 = vpop.permute.xlu2 %2420 }
 0x392   : > { %15875 = vst [vmem:[#allocation21_spill] sm:$0xff] %v11936_v20  ;;  %v2467_v20 = vsel %vm1486_vm4, %v11588_v10, %v11863_v8 }
 0x393   : > { %v2483_v58 = vsel %vm1503_vm5, %v2467_v20, %v2355_v46 }
 0x394   : > { %v2499_v3 = vsel %vm1520_vm6, %v2483_v58, %v2371_v18  ;;  %v2443_v37 = vpop.permute.xlu1 %2442 }
 0x395   : > { %v2515_v43 = vsel %vm1537_vm7, %v2499_v3, %v2387_v13 }
 0x396   : > { %v11938_v5 = vpop.permute.xlu0 %2410 }
 0x399   : > { %v11942_v28 = vpop.permute.xlu2 %2426 }
 0x39e   : > { %v2417_v36 = vpop.permute.xlu0 %2416 }
 0x3a1   : > { %v2433_v44 = vpop.permute.xlu2 %2432 }
 0x3a6   : > { %v11944_v35 = vpop.permute.xlu0 %2422 }
 0x3a7   : > { %15876 = vst [vmem:[#allocation22_spill] sm:$0xff] %v11944_v35  ;;  %v2465_v35 = vsel %vm1486_vm4, %v11680_v54, %v11833_v41 }
 0x3a8   : > { %v2481_v55 = vsel %vm1503_vm5, %v2465_v35, %v11848_v31 }
 0x3a9   : > { %v11946_v1 = vpop.permute.xlu2 %2438  ;;  %v2497_v10 = vsel %vm1520_vm6, %v2481_v55, %v2369_v22  ;;  %v2463_v55 = vsel %vm1486_vm4, %v11683_v62, %v11812_v61  ;;  %v2449_v22 = vpop.permute.xlu1 %2448 }
 0x3aa   : > { %15877 = vst [vmem:[#allocation23_spill] sm:$0xff] %v11946_v1  ;;  %v2531_v1 = vsel %vm1554_vm8, %v2515_v43, %v2403_v17  ;;  %v2513_v8 = vsel %vm1537_vm7, %v2497_v10, %v2385_v34 }
 0x3ab   : > { %v2547_v46 = vsel %vm1571_vm9, %v2531_v1, %v2419_v24  ;;  %v2529_v54 = vsel %vm1554_vm8, %v2513_v8, %v2401_v4  ;;  %v2479_v1 = vsel %vm1503_vm5, %v2463_v55, %v11891_v47  ;;  %v2461_v47 = vsel %vm1486_vm4, %v11555_v50, %v11852_v23 }
 0x3ac   : > { %v2545_v43 = vsel %vm1571_vm9, %v2529_v54, %v2417_v36  ;;  %v2495_v35 = vsel %vm1520_vm6, %v2479_v1, %v11897_v11  ;;  %v2477_v58 = vsel %vm1503_vm5, %v2461_v47, %v11856_v53  ;;  %v2459_v50 = vsel %vm1486_vm4, %v11637_v57, %v11826_v26  ;;  %v8908_v1 = vld [vmem:[%s10664_s13 + $0x104] sm:$0x1] }
 0x3ad   : > { %v2561_v31 = vsel %vm1588_vm10, %v2545_v43, %v2433_v44  ;;  %v2511_v4 = vsel %vm1537_vm7, %v2495_v35, %v11905_v40  ;;  %v2493_v40 = vsel %vm1520_vm6, %v2477_v58, %v11869_v30  ;;  %v2475_v23 = vsel %vm1503_vm5, %v2459_v50, %v11835_v42  ;;  %v8905_v44 = vld [vmem:[%s10664_s13 + $0xf8] sm:$0x1] }
 0x3ae   : > { %v2429_v7 = vpop.permute.xlu0 %2428  ;;  %v2577_v34 = vsel %vm1605_vm11, %v2561_v31, %v2449_v22  ;;  %v2527_v17 = vsel %vm1554_vm8, %v2511_v4, %v2399_v6  ;;  %v2509_v6 = vsel %vm1537_vm7, %v2493_v40, %v11926_v32  ;;  %v2491_v30 = vsel %vm1520_vm6, %v2475_v23, %v11913_v59  ;;  %v15883_v54 = vld [vmem:[#allocation22_spill] sm:$0xff]  ;;  %v15890_v40 = vld [vmem:[#allocation15_spill] sm:$0xff] }
 0x3af   : > { %v2592_v24 = vsel %vm1622_vm12, %v2577_v34, 0  ;;  %v2543_v62 = vsel %vm1571_vm9, %v2527_v17, %v2415_v25  ;;  %v2525_v25 = vsel %vm1554_vm8, %v2509_v6, %v2397_v15  ;;  %v2507_v15 = vsel %vm1537_vm7, %v2491_v30, %v11916_v16  ;;  %v10138_v31 = vld [vmem:[%s10664_s13 + $0xfc] sm:$0xff]  ;;  %v10140_v6 = vld [vmem:[%s10664_s13 + $0x114] sm:$0xff] }
 0x3b0   : > { %v2559_v11 = vsel %vm1588_vm10, %v2543_v62, %v2431_v27  ;;  %v2541_v53 = vsel %vm1571_vm9, %v2525_v25, %v2413_v49  ;;  %v2457_v57 = vsel %vm1486_vm4, %v11640_v39, %v11802_v38  ;;  %v2523_v26 = vsel %vm1554_vm8, %v2507_v15, %v11920_v51  ;;  %v15887_v34 = vld [vmem:[#allocation18_spill] sm:$0xff]  ;;  %v15888_v17 = vld [vmem:[#allocation21_spill] sm:$0xff] }
 0x3b1   : > { %v2445_v45 = vpop.permute.xlu2 %2444  ;;  %v2557_v32 = vsel %vm1588_vm10, %v2541_v53, %v2429_v7  ;;  %v2539_v59 = vsel %vm1571_vm9, %v2523_v26, %v11938_v5  ;;  %v2473_v16 = vsel %vm1503_vm5, %v2457_v57, %v11873_v56  ;;  %v10137_v5 = vld [vmem:[%s10664_s13 + $0xf0] sm:$0xff]  ;;  %v2820_v56 = vunpack.c.l.b16 %v8905_v44  ;;  %v15885_v55 = vld [vmem:[#allocation23_spill] sm:$0xff]  ;;  %v10141_v25 = vld [vmem:[%s10664_s13 + $0x120] sm:$0xff] }
 0x3b2   : > { %v2573_v27 = vsel %vm1605_vm11, %v2557_v32, %v2445_v45  ;;  %v2555_v7 = vsel %vm1588_vm10, %v2539_v59, %v11942_v28  ;;  %v2489_v45 = vsel %vm1520_vm6, %v2473_v16, %v11887_v0  ;;  %2868 = vrot.lane.b32.xlu2 %v10137_v5, %s15837_s12  ;;  %v2823_v62 = vunpack.c.l.b16 %v8908_v1  ;;  %v8920_v53 = vld [vmem:[%s10664_s13 + $0x134] sm:$0x1]  ;;  %v10144_v15 = vld [vmem:[%s10664_s13 + $0x144] sm:$0xff]  ;;  %v8938_v59 = vld [vmem:[%s10664_s13 + $0x17c] sm:$0x1] }
 0x3b3   : > { %v2588_v42 = vsel %vm1622_vm12, %v2573_v27, 0  ;;  %v2571_v39 = vsel %vm1605_vm11, %v2555_v7, %v2443_v37  ;;  %v2505_v38 = vsel %vm1537_vm7, %v2489_v45, %v11895_v33  ;;  %v2455_v37 = vsel %vm1486_vm4, %v11480_v21, %v11842_v60  ;;  %v8929_v27 = vld [vmem:[%s10664_s13 + $0x158] sm:$0x1]  ;;  %v10150_v45 = vld [vmem:[%s10664_s13 + $0x18c] sm:$0xff]  ;;  %v8947_v44 = vld [vmem:[%s10664_s13 + $0x1a0] sm:$0x1] }
 0x3b4   : > { %v2521_v51 = vsel %vm1554_vm8, %v2505_v38, %v11930_v19  ;;  %v2586_v49 = vsel %vm1622_vm12, %v2571_v39, 0  ;;  %v2471_v33 = vsel %vm1503_vm5, %v2455_v37, %v11846_v14  ;;  %v2849_v10 = vpack.c.b16 %v2820_v56, %v2820_v56 }
 0x3b5   : > { %v2537_v28 = vsel %vm1571_vm9, %v2521_v51, %v11932_v2  ;;  %v2487_v2 = vsel %vm1520_vm6, %v2471_v33, %v11858_v52  ;;  %v15881_v52 = vld [vmem:[#allocation16_spill] sm:$0xff]  ;;  %v2835_v30 = vunpack.c.l.b16 %v8920_v53  ;;  %v2844_v57 = vunpack.c.l.b16 %v8929_v27 }
 0x3b6   : > { %v2435_v48 = vpop.permute.xlu0 %2434  ;;  %v2553_v0 = vsel %vm1588_vm10, %v2537_v28, %v11940_v63  ;;  %v2503_v8 = vsel %vm1537_vm7, %v2487_v2, %v11922_v9  ;;  %v15879_v63 = vld [vmem:[#allocation19_spill] sm:$0xff]  ;;  %v2943_v7 = vunpack.c.l.b16 %v8938_v59  ;;  %v2952_v28 = vunpack.c.l.b16 %v8947_v44 }
 0x3b7   : > { %v2563_v18 = vsel %vm1588_vm10, %v2547_v46, %v2435_v48  ;;  %v2519_v21 = vsel %vm1554_vm8, %v2503_v8, %v11924_v12  ;;  %v2453_v14 = vsel %vm1486_vm4, %v15879_v63, %v11816_v29  ;;  %v15880_v46 = vld [vmem:[#allocation20_spill] sm:$0xff]  ;;  %v2859_v32 = vpack.c.b16 %v2835_v30, %v2835_v30  ;;  %v10154_v30 = vld [vmem:[%s10664_s13 + $0x1bc] sm:$0xff] }
 0x3b8   : > { %v2865_v26 = vpack.c.b16 %v2844_v57, %v2844_v57  ;;  %v2971_v16 = vpack.c.b16 %v2943_v7, %v2943_v7  ;;  %v2977_v56 = vpack.c.b16 %v2952_v28, %v2952_v28  ;;  %v10142_v2 = vld [vmem:[%s10664_s13 + $0x12c] sm:$0xff] }
 0x3b9   : > { %v2451_v3 = vpop.permute.xlu2 %2450  ;;  %v10153_v8 = vld [vmem:[%s10664_s13 + $0x1b0] sm:$0xff]  ;;  %v10155_v57 = vld [vmem:[%s10664_s13 + $0x1c8] sm:$0xff] }
 0x3ba   : > { %v2579_v13 = vsel %vm1605_vm11, %v2563_v18, %v2451_v3  ;;  %2870 = vrot.lane.b32.xlu2 %v2849_v10, %s15837_s12  ;;  %v2469_v18 = vsel %vm1503_vm5, %v2453_v14, %v15880_v46  ;;  %v2535_v3 = vsel %vm1571_vm9, %v2519_v21, %v15881_v52  ;;  %v8923_v10 = vld [vmem:[%s10664_s13 + $0x140] sm:$0x1]  ;;  %v8926_v14 = vld [vmem:[%s10664_s13 + $0x14c] sm:$0x1]  ;;  %v8956_v46 = vld [vmem:[%s10664_s13 + $0x1c4] sm:$0x1] }
 0x3bb   : > { %v2594_v41 = vsel %vm1622_vm12, %v2579_v13, 0  ;;  %v15882_v13 = vld [vmem:[#allocation17_spill] sm:$0xff]  ;;  %v2551_v12 = vsel %vm1588_vm10, %v2535_v3, %v15883_v54  ;;  %v2838_v21 = vunpack.c.l.b16 %v8923_v10  ;;  %v2841_v52 = vunpack.c.l.b16 %v8926_v14  ;;  %v8932_v54 = vld [vmem:[%s10664_s13 + $0x164] sm:$0x1] }
 0x3bc   : > { %2596 = vmatpush.bf16.xpose.msra.mxu1 %v2594_v41  ;;  %v2485_v9 = vsel %vm1520_vm6, %v2469_v18, %v15882_v13  ;;  %v15884_v41 = vld [vmem:[#allocation14_spill] sm:$0xff]  ;;  %v2567_v29 = vsel %vm1605_vm11, %v2551_v12, %v15885_v55  ;;  %v2961_v18 = vunpack.c.l.b16 %v8956_v46  ;;  %v10156_v12 = vld [vmem:[%s10664_s13 + $0x1d4] sm:$0xff] }
 0x3bd   : > { %v2501_v43 = vsel %vm1537_vm7, %v2485_v9, %v15884_v41  ;;  %v2582_v22 = vsel %vm1622_vm12, %v2567_v29, 0  ;;  %v2861_v63 = vpack.c.b16 %v2838_v21, %v2838_v21  ;;  %v2863_v13 = vpack.c.b16 %v2841_v52, %v2841_v52  ;;  %v10145_v9 = vld [vmem:[%s10664_s13 + $0x150] sm:$0xff]  ;;  %v10127_v10 = vld [vmem:[%s10664_s13 + $0x78] sm:$0xff] }
 0x3be   : > { %v2441_v48 = vpop.permute.xlu0 %2440  ;;  %v2983_v3 = vpack.c.b16 %v2961_v18, %v2961_v18  ;;  %v2847_v41 = vunpack.c.l.b16 %v8932_v54  ;;  %v8935_v29 = vld [vmem:[%s10664_s13 + $0x170] sm:$0x1] }
 0x3bf   : > { %v2569_v19 = vsel %vm1605_vm11, %v2553_v0, %v2441_v48  ;;  %v15886_v48 = vld [vmem:[#allocation26_spill] sm:$0xff]  ;;  %v8914_v0 = vld [vmem:[%s10664_s13 + $0x11c] sm:$0x1]  ;;  %v2940_v1 = vunpack.c.l.b16 %v8935_v29 }
 0x3c0   : > { %v2584_v60 = vsel %vm1622_vm12, %v2569_v19, 0  ;;  %v2517_v35 = vsel %vm1554_vm8, %v2501_v43, %v15886_v48  ;;  %v2829_v33 = vunpack.c.l.b16 %v8914_v0  ;;  %v10146_v43 = vld [vmem:[%s10664_s13 + $0x15c] sm:$0xff]  ;;  %v2867_v55 = vpack.c.b16 %v2847_v41, %v2847_v41  ;;  %v10128_v41 = vld [vmem:[%s10664_s13 + $0x84] sm:$0xff] }
 0x3c1   : > { %v2533_v4 = vsel %vm1571_vm9, %v2517_v35, %v15887_v34  ;;  %v2969_v48 = vpack.c.b16 %v2940_v1, %v2940_v1  ;;  %v10148_v35 = vld [vmem:[%s10664_s13 + $0x174] sm:$0xff] }
 0x3c2   : > { %2872 = vrot.lane.b32.xlu2 %v10138_v31, %s15837_s12  ;;  %v2855_v19 = vpack.c.b16 %v2829_v33, %v2829_v33 }
 0x3c4   : > { %2597 = vmatpush.bf16.xpose.msra.mxu1 %v2592_v24  ;;  %v2549_v24 = vsel %vm1588_vm10, %v2533_v4, %v15888_v17  ;;  %v10149_v17 = vld [vmem:[%s10664_s13 + $0x180] sm:$0xff] }
 0x3c6   : > { %v2447_v61 = vpop.permute.xlu0 %2446 }
 0x3c7   : > { %v2575_v20 = vsel %vm1605_vm11, %v2559_v11, %v2447_v61  ;;  %v15889_v61 = vld [vmem:[#allocation27_spill] sm:$0xff]  ;;  %v2851_v11 = vpack.c.b16 %v2823_v62, %v2823_v62  ;;  %v8944_v62 = vld [vmem:[%s10664_s13 + $0x194] sm:$0x1] }
 0x3c8   : > { %v2590_v36 = vsel %vm1622_vm12, %v2575_v20, 0  ;;  %v2565_v47 = vsel %vm1605_vm11, %v2549_v24, %v15889_v61  ;;  %v10139_v20 = vld [vmem:[%s10664_s13 + $0x108] sm:$0xff]  ;;  %v2949_v61 = vunpack.c.l.b16 %v8944_v62 }
 0x3c9   : > { %v2580_v58 = vsel %vm1622_vm12, %v2565_v47, 0 }
 0x3ca   : > { %2874 = vrot.lane.b32.xlu2 %v2851_v11, %s15837_s12  ;;  %v2975_v11 = vpack.c.b16 %v2949_v61, %v2949_v61  ;;  %v10130_v61 = vld [vmem:[%s10664_s13 + $0x9c] sm:$0xff] }
 0x3cc   : > { %2598 = vmatpush.bf16.xpose.msra.mxu1 %v2590_v36  ;;  %v8917_v36 = vld [vmem:[%s10664_s13 + $0x128] sm:$0x1] }
 0x3cd   : > { %v2832_v50 = vunpack.c.l.b16 %v8917_v36 }
 0x3cf   : > { %v2857_v23 = vpack.c.b16 %v2832_v50, %v2832_v50  ;;  %v8953_v50 = vld [vmem:[%s10664_s13 + $0x1b8] sm:$0x1] }
 0x3d2   : > { %2876 = vrot.lane.b32.xlu2 %v10139_v20, %s15837_s12  ;;  %v8950_v20 = vld [vmem:[%s10664_s13 + $0x1ac] sm:$0x1] }
 0x3d4   : > { %2599 = vmatpush.bf16.xpose.msra.mxu1 %v2588_v42  ;;  %v10147_v42 = vld [vmem:[%s10664_s13 + $0x168] sm:$0xff] }
 0x3da   : > { %2880 = vrot.lane.b32.xlu2 %v10140_v6, %s15837_s12  ;;  %v10152_v6 = vld [vmem:[%s10664_s13 + $0x1a4] sm:$0xff] }
 0x3dc   : > { %2600 = vmatpush.bf16.xpose.msra.mxu1 %v2586_v49  ;;  %v8911_v49 = vld [vmem:[%s10664_s13 + $0x110] sm:$0x1] }
 0x3dd   : > { %v2826_v5 = vunpack.c.l.b16 %v8911_v49 }
 0x3df   : > { %v2853_v37 = vpack.c.b16 %v2826_v5, %v2826_v5 }
 0x3e2   : > { %2884 = vrot.lane.b32.xlu2 %v10141_v25, %s15837_s12 }
 0x3e4   : > { %2601 = vmatpush.bf16.xpose.msra.mxu1 %v2584_v60  ;;  %v10143_v60 = vld [vmem:[%s10664_s13 + $0x138] sm:$0xff] }
 0x3ea   : > { %2886 = vrot.lane.b32.xlu2 %v2857_v23, %s15837_s12  ;;  %v2958_v23 = vunpack.c.l.b16 %v8953_v50 }
 0x3ec   : > { %2602 = vmatpush.bf16.xpose.msra.mxu1 %v2582_v22  ;;  %v8941_v22 = vld [vmem:[%s10664_s13 + $0x188] sm:$0x1]  ;;  %v2981_v53 = vpack.c.b16 %v2958_v23, %v2958_v23  ;;  %v8884_v23 = vld [vmem:[%s10664_s13 + $0xa4] sm:$0x1] }
 0x3ed   : > { %v2946_v4 = vunpack.c.l.b16 %v8941_v22 }
 0x3ef   : > { %v2973_v24 = vpack.c.b16 %v2946_v4, %v2946_v4  ;;  %v8887_v4 = vld [vmem:[%s10664_s13 + $0xb0] sm:$0x1] }
 0x3f2   : > { %2890 = vrot.lane.b32.xlu2 %v2859_v32, %s15837_s12  ;;  %v8959_v32 = vld [vmem:[%s10664_s13 + $0x1d0] sm:$0x1] }
 0x3f3   : > { %v2964_v27 = vunpack.c.l.b16 %v8959_v32 }
 0x3f4   : > { %2603 = vmatpush.bf16.xpose.msra.mxu1 %v2580_v58  ;;  %v10151_v58 = vld [vmem:[%s10664_s13 + $0x198] sm:$0xff] }
 0x3fa   : > { %2896 = vrot.lane.b32.xlu2 %v10144_v15, %s15837_s12 }
 0x3fb   : > { %8872 = vmatmul.msk.bf16.vlgmr.msra.gmra.mxu1 %vm1622_vm12, %v15890_v40  ;;  %v2955_v40 = vunpack.c.l.b16 %v8950_v20 }
 0x3fd   : > { %v2979_v36 = vpack.c.b16 %v2955_v40, %v2955_v40 }
 0x402   : > { %2902 = vrot.lane.b32.xlu2 %v2865_v26, %s15837_s12  ;;  %v2985_v26 = vpack.c.b16 %v2964_v27, %v2964_v27 }
 0x40a   : > { %2988 = vrot.lane.b32.xlu2 %v10147_v42, %s15840_s18  ;;  %v8962_v42 = vld [vmem:[%s10664_s13 + $0x1dc] sm:$0x1] }
 0x40b   : > { %v2967_v59 = vunpack.c.l.b16 %v8962_v42 }
 0x40c   : > { %v12127_v31 = vpop.permute.xlu2 %2868 }
 0x40d   : > { %v3030_v14 = vsel %vm1104_vm0, %v10127_v10, %v12127_v31 }
 0x412   : > { %2994 = vrot.lane.b32.xlu2 %v2971_v16, %s15840_s18  ;;  %v2987_v16 = vpack.c.b16 %v2967_v59, %v2967_v59 }
 0x414   : > { %v12134_v34 = vpop.permute.xlu2 %2870 }
 0x41a   : > { %3000 = vrot.lane.b32.xlu2 %v10150_v45, %s15840_s18 }
 0x41c   : > { %v12141_v47 = vpop.permute.xlu2 %2872 }
 0x41d   : > { %v3036_v22 = vsel %vm1104_vm0, %v10128_v41, %v12141_v47  ;;  %v2752_v47 = vunpack.c.l.b16 %v8887_v4 }
 0x41f   : > { %v2777_v59 = vpack.c.b16 %v2752_v47, %v2752_v47 }
 0x422   : > { %3006 = vrot.lane.b32.xlu2 %v2977_v56, %s15840_s18 }
 0x424   : > { %v2875_v25 = vpop.permute.xlu2 %2874 }
 0x42a   : > { %3012 = vrot.lane.b32.xlu2 %v10153_v8, %s15840_s18  ;;  %v8878_v8 = vld [vmem:[%s10664_s13 + $0x8c] sm:$0x1] }
 0x42c   : > { %v12153_v15 = vpop.permute.xlu2 %2876 }
 0x432   : > { %3018 = vrot.lane.b32.xlu2 %v2983_v3, %s15840_s18 }
 0x434   : > { %v2881_v7 = vpop.permute.xlu2 %2880 }
 0x435   : > { %v3048_v32 = vsel %vm1104_vm0, %v10130_v61, %v2881_v7 }
 0x43a   : > { %3024 = vrot.lane.b32.xlu2 %v10156_v12, %s15840_s18 }
 0x43c   : > { %v12162_v45 = vpop.permute.xlu2 %2884 }
 0x478   : > { %v2605_v39 = vpop.f32.mrf.mxu1 }
 0x479   : > { %2609 = vst [vmem:[%s11747_s7 + $0x8] sm:$0xff] %v2605_v39  ;;  %v2613_v38 = vmul.f32 %v2605_v39, %v2605_v39  ;;  %2610 = vadd.xlane.f32.xlu0 %v2605_v39  ;;  %v12164_v39 = vpop.permute.xlu2 %2886 }
 0x47b   : > { %2614 = vadd.xlane.f32.xlu1 %v2613_v38 }
 0x480   : > { %v2607_v51 = vpop.f32.mrf.mxu1 }
 0x481   : > { %v12168_v51 = vpop.permute.xlu2 %2890 }
 0x489   : > { %v12172_v44 = vpop.permute.xlu2 %2896 }
 0x48d   : > { %2878 = vrot.lane.b32.xlu0 %v2853_v37, %s15837_s12 }
 0x491   : > { %v12180_v0 = vpop.permute.xlu2 %2902 }
 0x494   : > { %2882 = vrot.lane.b32.xlu1 %v2855_v19, %s15837_s12 }
 0x495   : > { %2888 = vrot.lane.b32.xlu0 %v10142_v2, %s15837_s12 }
 0x499   : > { %v2989_v21 = vpop.permute.xlu2 %2988 }
 0x49a   : > { %v12196_v3 = vsel %vm1165_vm1, %v3030_v14, %v2989_v21 }
 0x49b   : > { %15893 = vst [vmem:[#allocation19_spill] sm:$0xff] %v12196_v3  ;;  %v3130_v12 = vshll.u32 %v12196_v3, 16  ;;  %v3128_v31 = vshrl.u32 %v12196_v3, 16 }
 0x49c   : > { %2892 = vrot.lane.b32.xlu1 %v10143_v60, %s15837_s12  ;;  %v8875_v60 = vld [vmem:[%s10664_s13 + $0x80] sm:$0x1] }
 0x49d   : > { %2894 = vrot.lane.b32.xlu0 %v2861_v63, %s15837_s12  ;;  %v2743_v63 = vunpack.c.l.b16 %v8878_v8  ;;  %v2740_v46 = vunpack.c.l.b16 %v8875_v60  ;;  %v3132_v1 = vrot.slane %v3130_v12, 1 }
 0x49f   : > { %v2771_v52 = vpack.c.b16 %v2743_v63, %v2743_v63  ;;  %v2769_v54 = vpack.c.b16 %v2740_v46, %v2740_v46 }
 0x4a1   : > { %v3033_v29 = vsel %vm1104_vm0, %v2769_v54, %v12134_v34 }
 0x4a4   : > { %2898 = vrot.lane.b32.xlu1 %v2863_v13, %s15837_s12 }
 0x4a5   : > { %2900 = vrot.lane.b32.xlu0 %v10145_v9, %s15837_s12  ;;  %v2995_v9 = vpop.permute.xlu2 %2994 }
 0x4ac   : > { %2904 = vrot.lane.b32.xlu1 %v10146_v43, %s15837_s12  ;;  %v3039_v43 = vsel %vm1104_vm0, %v2771_v52, %v2875_v25  ;;  %v3133_v25 = vor.u32 %v3132_v1, %v3128_v31 }
 0x4ad   : > { %2906 = vrot.lane.b32.xlu0 %v2867_v55, %s15837_s12  ;;  %v8881_v55 = vld [vmem:[%s10664_s13 + $0x98] sm:$0x1]  ;;  %v3001_v20 = vpop.permute.xlu2 %3000 }
 0x4ae   : > { %v12232_v8 = vsel %vm1165_vm1, %v3048_v32, %v3001_v20  ;;  %v10133_v20 = vld [vmem:[%s10664_s13 + $0xc0] sm:$0xff] }
 0x4af   : > { %v3160_v41 = vshll.u32 %v12232_v8, 16 }
 0x4b1   : > { %v3162_v61 = vrot.slane %v3160_v41, 1 }
 0x4b4   : > { %2990 = vrot.lane.b32.xlu1 %v2969_v48, %s15840_s18  ;;  %v12208_v48 = vsel %vm1165_vm1, %v3039_v43, %v2995_v9  ;;  %v8890_v9 = vld [vmem:[%s10664_s13 + $0xbc] sm:$0x1]  ;;  %v10131_v43 = vld [vmem:[%s10664_s13 + $0xa8] sm:$0xff] }
 0x4b5   : > { %2992 = vrot.lane.b32.xlu0 %v10148_v35, %s15840_s18  ;;  %v3007_v46 = vpop.permute.xlu2 %3006  ;;  %v2755_v1 = vunpack.c.l.b16 %v8890_v9 }
 0x4bc   : > { %2996 = vrot.lane.b32.xlu1 %v10149_v17, %s15840_s18  ;;  %v2746_v17 = vunpack.c.l.b16 %v8881_v55  ;;  %v3057_v55 = vsel %vm1104_vm0, %v2777_v59, %v12164_v39  ;;  %v3054_v39 = vsel %vm1104_vm0, %v10131_v43, %v12162_v45  ;;  %v2779_v45 = vpack.c.b16 %v2755_v1, %v2755_v1 }
 0x4bd   : > { %2998 = vrot.lane.b32.xlu0 %v2973_v24, %s15840_s18 }
 0x4be   : > { %v2773_v50 = vpack.c.b16 %v2746_v17, %v2746_v17 }
 0x4c4   : > { %3002 = vrot.lane.b32.xlu1 %v2975_v11, %s15840_s18 }
 0x4c5   : > { %3004 = vrot.lane.b32.xlu0 %v10151_v58, %s15840_s18  ;;  %v3144_v58 = vshll.u32 %v12208_v48, 16 }
 0x4cc   : > { %3008 = vrot.lane.b32.xlu1 %v10152_v6, %s15840_s18  ;;  %v10129_v6 = vld [vmem:[%s10664_s13 + $0x90] sm:$0xff] }
 0x4cd   : > { %3010 = vrot.lane.b32.xlu0 %v2979_v36, %s15840_s18  ;;  %v3042_v42 = vsel %vm1104_vm0, %v10129_v6, %v12153_v15 }
 0x4d4   : > { %3014 = vrot.lane.b32.xlu1 %v2981_v53, %s15840_s18 }
 0x4d5   : > { %3016 = vrot.lane.b32.xlu0 %v10154_v30, %s15840_s18 }
 0x4dc   : > { %3020 = vrot.lane.b32.xlu1 %v10155_v57, %s15840_s18  ;;  %v3146_v57 = vrot.slane %v3144_v58, 1 }
 0x4dd   : > { %3022 = vrot.lane.b32.xlu0 %v2985_v26, %s15840_s18 }
 0x4e4   : > { %3026 = vrot.lane.b32.xlu1 %v2987_v16, %s15840_s18  ;;  %v2749_v16 = vunpack.c.l.b16 %v8884_v23 }
 0x4ec   : > { %v12166_v38 = vpop.xlane.xlu0 %2610 }
 0x4ed   : > { %15891 = vst [vmem:[#allocation28_spill] sm:$0xff] %v12166_v38 }
 0x4ee   : > { %v12170_v49 = vpop.xlane.xlu1 %2614 }
 0x4ef   : > { %15892 = vst [vmem:[#allocation29_spill] sm:$0xff] %v12170_v49 }
 0x4ff   : > { %v2879_v5 = vpop.permute.xlu0 %2878 }
 0x500   : > { %v3045_v21 = vsel %vm1104_vm0, %v2773_v50, %v2879_v5  ;;  %v2775_v5 = vpack.c.b16 %v2749_v16, %v2749_v16  ;;  %v10132_v50 = vld [vmem:[%s10664_s13 + $0xb4] sm:$0xff] }
 0x506   : > { %v12174_v28 = vpop.permute.xlu1 %2882 }
 0x507   : > { %v12176_v56 = vpop.permute.xlu0 %2888  ;;  %v3051_v4 = vsel %vm1104_vm0, %v2775_v5, %v12174_v28 }
 0x50e   : > { %v12178_v37 = vpop.permute.xlu1 %2892 }
 0x50f   : > { %v12182_v33 = vpop.permute.xlu0 %2894 }
 0x516   : > { %v12184_v19 = vpop.permute.xlu1 %2898 }
 0x517   : > { %v12186_v2 = vpop.permute.xlu0 %2900 }
 0x51e   : > { %v12193_v18 = vpop.permute.xlu1 %2904 }
 0x51f   : > { %v12198_v13 = vpop.permute.xlu0 %2906 }
 0x526   : > { %v2991_v35 = vpop.permute.xlu1 %2990 }
 0x527   : > { %v12214_v24 = vsel %vm1165_vm1, %v3033_v29, %v2991_v35  ;;  %v2993_v62 = vpop.permute.xlu0 %2992  ;;  %v3158_v35 = vshrl.u32 %v12232_v8, 16 }
 0x528   : > { %v3134_v34 = vshll.u32 %v12214_v24, 16  ;;  %v12219_v11 = vsel %vm1165_vm1, %v3036_v22, %v2993_v62  ;;  %v12256_v22 = vsel %vm1165_vm1, %v3057_v55, %v3007_v46 }
 0x529   : > { %v3140_v40 = vshll.u32 %v12219_v11, 16  ;;  %v3138_v53 = vshrl.u32 %v12219_v11, 16  ;;  %v3174_v47 = vshll.u32 %v12256_v22, 16 }
 0x52a   : > { %v3136_v36 = vrot.slane %v3134_v34, 1 }
 0x52b   : > { %v3142_v30 = vrot.slane %v3140_v40, 1  ;;  %v8896_v40 = vld [vmem:[%s10664_s13 + $0xd4] sm:$0x1]  ;;  %v3176_v59 = vrot.slane %v3174_v47, 1 }
 0x52c   : > { %v3137_v27 = vsel %vm1206_vm3, %v3133_v25, %v3136_v36  ;;  %v3013_v25 = vpop.permute.xlu2 %3012  ;;  %v2761_v32 = vunpack.c.l.b16 %v8896_v40 }
 0x52d   : > { %3278 = vrot.lane.b32.xlu0 %v3137_v27, %s15894_s30  ;;  %v3143_v26 = vor.u32 %v3142_v30, %v3138_v53  ;;  %v3163_v53 = vor.u32 %v3162_v61, %v3158_v35  ;;  %v8893_v30 = vld [vmem:[%s10664_s13 + $0xc8] sm:$0x1] }
 0x52e   : > { %v2997_v10 = vpop.permute.xlu1 %2996 }
 0x52f   : > { %v12236_v7 = vsel %vm1165_vm1, %v3042_v42, %v2997_v10  ;;  %v2999_v60 = vpop.permute.xlu0 %2998  ;;  %v12239_v63 = vsel %vm1206_vm3, %v3143_v26, %v3146_v57  ;;  %v3066_v26 = vsel %vm1104_vm0, %v10133_v20, %v12178_v37  ;;  %v3063_v10 = vsel %vm1104_vm0, %v2779_v45, %v12168_v51 }
 0x530   : > { %v12242_v14 = vsel %vm1165_vm1, %v3045_v21, %v2999_v60  ;;  %3280 = vrot.lane.b32.xlu2 %v12239_v63, %s15894_s30  ;;  %v3150_v15 = vshll.u32 %v12236_v7, 16  ;;  %v3148_v54 = vshrl.u32 %v12236_v7, 16  ;;  %v3060_v21 = vsel %vm1104_vm0, %v10132_v50, %v12176_v56 }
 0x531   : > { %v3154_v52 = vshll.u32 %v12242_v14, 16  ;;  %v2758_v60 = vunpack.c.l.b16 %v8893_v30  ;;  %v12293_v46 = vsel %vm1165_vm1, %v3066_v26, %v3013_v25  ;;  %v2783_v37 = vpack.c.b16 %v2761_v32, %v2761_v32 }
 0x532   : > { %v3152_v12 = vrot.slane %v3150_v15, 1  ;;  %v3190_v55 = vshll.u32 %v12293_v46, 16  ;;  %v3225_v50 = vrot.slane %v12214_v24, 1  ;;  %v3224_v32 = vrot.slane %v12196_v3, 1 }
 0x533   : > { %v3156_v29 = vrot.slane %v3154_v52, 1 }
 0x534   : > { %v3153_v31 = vor.u32 %v3152_v12, %v3148_v54  ;;  %v2781_v12 = vpack.c.b16 %v2758_v60, %v2758_v60  ;;  %v3019_v1 = vpop.permute.xlu2 %3018  ;;  %v3192_v20 = vrot.slane %v3190_v55, 1  ;;  %v3231_v60 = vrot.slane %v12242_v14, 1 }
 0x535   : > { %v3242_v55 = vrot.slane %v12293_v46, 1 }
 0x536   : > { %v3003_v17 = vpop.permute.xlu1 %3002  ;;  %v12261_v62 = vsel %vm1206_vm3, %v3153_v31, %v3156_v29  ;;  %v10134_v29 = vld [vmem:[%s10664_s13 + $0xcc] sm:$0xff]  ;;  %v3075_v31 = vsel %vm1104_vm0, %v2783_v37, %v12184_v19 }
 0x537   : > { %v12266_v34 = vsel %vm1165_vm1, %v3051_v4, %v3003_v17  ;;  %v3005_v58 = vpop.permute.xlu0 %3004  ;;  %3282 = vrot.lane.b32.xlu1 %v12261_v62, %s15894_s30  ;;  %v3069_v17 = vsel %vm1104_vm0, %v2781_v12, %v12182_v33  ;;  %v3119_v61 = vsel %vm1165_vm1, %v3075_v31, %v3019_v1  ;;  %v3072_v40 = vsel %vm1104_vm0, %v10134_v29, %v12172_v44 }
 0x538   : > { %v3164_v28 = vshll.u32 %v12266_v34, 16  ;;  %v12274_v6 = vsel %vm1165_vm1, %v3054_v39, %v3005_v58  ;;  %v3188_v33 = vshrl.u32 %v12293_v46, 16  ;;  %v3246_v31 = vrot.slane %v3119_v61, 1 }
 0x539   : > { %v3170_v36 = vshll.u32 %v12274_v6, 16  ;;  %v3168_v27 = vshrl.u32 %v12274_v6, 16  ;;  %v3236_v14 = vrot.slane %v12274_v6, 1 }
 0x53a   : > { %v3166_v23 = vrot.slane %v3164_v28, 1 }
 0x53b   : > { %v3172_v57 = vrot.slane %v3170_v36, 1  ;;  %v3204_v36 = vshll.u32 %v3119_v61, 16 }
 0x53c   : > { %v12284_v42 = vsel %vm1206_vm3, %v3163_v53, %v3166_v23  ;;  %v3193_v53 = vor.u32 %v3192_v20, %v3188_v33 }
 0x53d   : > { %3284 = vrot.lane.b32.xlu0 %v12284_v42, %s15894_s30  ;;  %v3173_v16 = vor.u32 %v3172_v57, %v3168_v27  ;;  %v3206_v57 = vrot.slane %v3204_v36, 1 }
 0x53e   : > { %v3009_v15 = vpop.permute.xlu1 %3008 }
 0x53f   : > { %v12296_v52 = vsel %vm1165_vm1, %v3060_v21, %v3009_v15  ;;  %v3011_v9 = vpop.permute.xlu0 %3010  ;;  %v12299_v5 = vsel %vm1206_vm3, %v3173_v16, %v3176_v59  ;;  %v3226_v59 = vsel %vm1303_vm2, %v3224_v32, %v3225_v50  ;;  %v3227_v16 = vrot.slane %v12219_v11, 1 }
 0x540   : > { %v12302_v54 = vsel %vm1165_vm1, %v3063_v10, %v3011_v9  ;;  %3286 = vrot.lane.b32.xlu2 %v12299_v5, %s15894_s30  ;;  %v3180_v51 = vshll.u32 %v12296_v52, 16  ;;  %v3178_v41 = vshrl.u32 %v12296_v52, 16  ;;  %v3228_v10 = vrot.slane %v12208_v48, 1 }
 0x541   : > { %v3184_v56 = vshll.u32 %v12302_v54, 16  ;;  %v3234_v21 = vrot.slane %v12266_v34, 1  ;;  %v3230_v15 = vrot.slane %v12236_v7, 1  ;;  %v3233_v9 = vrot.slane %v12232_v8, 1 }
 0x542   : > { %v3182_v43 = vrot.slane %v3180_v51, 1  ;;  %v3229_v37 = vsel %vm1303_vm2, %v3227_v16, %v3228_v10  ;;  %v3237_v34 = vrot.slane %v12256_v22, 1  ;;  %v3240_v12 = vrot.slane %v12302_v54, 1 }
 0x543   : > { %v3186_v35 = vrot.slane %v3184_v56, 1  ;;  %v12353_v51 = vsel %vm1303_vm2, %v3233_v9, %v3234_v21  ;;  %v12358_v48 = vsel %vm1303_vm2, %v3230_v15, %v3231_v60  ;;  %v8902_v9 = vld [vmem:[%s10664_s13 + $0xec] sm:$0x1] }
 0x544   : > { %v3183_v4 = vor.u32 %v3182_v43, %v3178_v41  ;;  %v3239_v41 = vrot.slane %v12296_v52, 1  ;;  %v12367_v43 = vsel %vm1303_vm2, %v3236_v14, %v3237_v34 }
 0x546   : > { %v3015_v39 = vpop.permute.xlu1 %3014  ;;  %v12317_v58 = vsel %vm1206_vm3, %v3183_v4, %v3186_v35  ;;  %v12378_v22 = vsel %vm1303_vm2, %v3239_v41, %v3240_v12  ;;  %v10135_v35 = vld [vmem:[%s10664_s13 + $0xd8] sm:$0xff] }
 0x547   : > { %v3115_v28 = vsel %vm1165_vm1, %v3069_v17, %v3015_v39  ;;  %v3017_v47 = vpop.permute.xlu0 %3016  ;;  %3288 = vrot.lane.b32.xlu1 %v12317_v58, %s15894_s30  ;;  %v3078_v17 = vsel %vm1104_vm0, %v10135_v35, %v12186_v2  ;;  %v8899_v39 = vld [vmem:[%s10664_s13 + $0xe0] sm:$0x1] }
 0x548   : > { %v3194_v19 = vshll.u32 %v3115_v28, 16  ;;  %v12325_v25 = vsel %vm1165_vm1, %v3072_v40, %v3017_v47  ;;  %v3243_v56 = vrot.slane %v3115_v28, 1  ;;  %v2764_v20 = vunpack.c.l.b16 %v8899_v39 }
 0x549   : > { %v3200_v45 = vshll.u32 %v12325_v25, 16  ;;  %v3198_v44 = vshrl.u32 %v12325_v25, 16  ;;  %v3245_v54 = vrot.slane %v12325_v25, 1 }
 0x54a   : > { %v3196_v23 = vrot.slane %v3194_v19, 1  ;;  %v12373_v29 = vsel %vm1303_vm2, %v3242_v55, %v3243_v56  ;;  %v2785_v40 = vpack.c.b16 %v2764_v20, %v2764_v20  ;;  %v2767_v56 = vunpack.c.l.b16 %v8902_v9 }
 0x54b   : > { %v3202_v30 = vrot.slane %v3200_v45, 1  ;;  %v12384_v1 = vsel %vm1303_vm2, %v3245_v54, %v3246_v31 }
 0x54c   : > { %v12333_v27 = vsel %vm1206_vm3, %v3193_v53, %v3196_v23  ;;  %v3081_v28 = vsel %vm1104_vm0, %v2785_v40, %v12180_v0  ;;  %v3025_v23 = vpop.permute.xlu2 %3024 }
 0x54d   : > { %3290 = vrot.lane.b32.xlu0 %v12333_v27, %s15894_s30  ;;  %v3203_v26 = vor.u32 %v3202_v30, %v3198_v44 }
 0x54e   : > { %v3021_v4 = vpop.permute.xlu1 %3020 }
 0x54f   : > { %3294 = vrot.lane.b32.xlu1 %v3226_v59, %s15804_s1  ;;  %v12340_v24 = vsel %vm1206_vm3, %v3203_v26, %v3206_v57  ;;  %v3121_v61 = vsel %vm1165_vm1, %v3078_v17, %v3021_v4  ;;  %v3023_v2 = vpop.permute.xlu0 %3022  ;;  %v10136_v59 = vld [vmem:[%s10664_s13 + $0xe4] sm:$0xff] }
 0x550   : > { %3292 = vrot.lane.b32.xlu2 %v12340_v24, %s15894_s30  ;;  %v3250_v47 = vshll.u32 %v3121_v61, 16  ;;  %v3123_v19 = vsel %vm1165_vm1, %v3081_v28, %v3023_v2  ;;  %v3260_v30 = vrot.slane %v3121_v61, 1  ;;  %v3084_v60 = vsel %vm1104_vm0, %v10136_v59, %v12193_v18 }
 0x551   : > { %v3254_v36 = vshll.u32 %v3123_v19, 16  ;;  %v3261_v44 = vrot.slane %v3123_v19, 1  ;;  %v3125_v15 = vsel %vm1165_vm1, %v3084_v60, %v3025_v23  ;;  %v2787_v18 = vpack.c.b16 %v2767_v56, %v2767_v56 }
 0x552   : > { %v3252_v33 = vrot.slane %v3250_v47, 1  ;;  %v3265_v35 = vshll.u32 %v3125_v15, 16 }
 0x553   : > { %v3256_v45 = vrot.slane %v3254_v36, 1  ;;  %v3262_v32 = vsel %vm1303_vm2, %v3260_v30, %v3261_v44  ;;  %v3087_v55 = vsel %vm1104_vm0, %v2787_v18, %v12198_v13  ;;  %v3263_v13 = vshrl.u32 %v3125_v15, 16 }
 0x555   : > { %3296 = vrot.lane.b32.xlu0 %v3229_v37, %s15804_s1 }
 0x556   : > { %v3027_v26 = vpop.permute.xlu1 %3026 }
 0x557   : > { %3300 = vrot.lane.b32.xlu1 %v12353_v51, %s15804_s1  ;;  %v3127_v31 = vsel %vm1165_vm1, %v3087_v55, %v3027_v26 }
 0x558   : > { %3298 = vrot.lane.b32.xlu2 %v12358_v48, %s15804_s1  ;;  %v3276_v28 = vrot.slane %v3127_v31, 1 }
 0x55d   : > { %3302 = vrot.lane.b32.xlu0 %v12367_v43, %s15804_s1 }
 0x55f   : > { %3306 = vrot.lane.b32.xlu1 %v12373_v29, %s15804_s1 }
 0x560   : > { %3304 = vrot.lane.b32.xlu2 %v12378_v22, %s15804_s1 }
 0x565   : > { %3308 = vrot.lane.b32.xlu0 %v12384_v1, %s15804_s1 }
 0x567   : > { %3312 = vrot.lane.b32.xlu1 %v12236_v7, %s15802_s8 }
 0x568   : > { %3310 = vrot.lane.b32.xlu2 %v12219_v11, %s15802_s8 }
 0x56d   : > { %3314 = vrot.lane.b32.xlu0 %v12232_v8, %s15802_s8 }
 0x56f   : > { %3318 = vrot.lane.b32.xlu1 %v12296_v52, %s15802_s8 }
 0x570   : > { %3316 = vrot.lane.b32.xlu2 %v12274_v6, %s15802_s8 }
 0x575   : > { %3320 = vrot.lane.b32.xlu0 %v12293_v46, %s15802_s8 }
 0x577   : > { %3324 = vrot.lane.b32.xlu1 %v3121_v61, %s15802_s8 }
 0x578   : > { %3322 = vrot.lane.b32.xlu2 %v12325_v25, %s15802_s8 }
 0x57d   : > { %3326 = vrot.lane.b32.xlu0 %v12239_v63, %s15799_s14  ;;  %v3248_v63 = vshrl.u32 %v3121_v61, 16 }
 0x57f   : > { %3330 = vrot.lane.b32.xlu1 %v12284_v42, %s15799_s14  ;;  %v3253_v50 = vor.u32 %v3252_v33, %v3248_v63 }
 0x580   : > { %3328 = vrot.lane.b32.xlu2 %v12261_v62, %s15799_s14 }
 0x581   : > { %v3257_v0 = vsel %vm1206_vm3, %v3253_v50, %v3256_v45 }
 0x585   : > { %3332 = vrot.lane.b32.xlu0 %v12299_v5, %s15799_s14 }
 0x587   : > { %3336 = vrot.lane.b32.xlu1 %v12333_v27, %s15799_s14 }
 0x588   : > { %3334 = vrot.lane.b32.xlu2 %v12317_v58, %s15799_s14 }
 0x58a   : > { %v12436_v53 = vpop.permute.xlu2 %3280 }
 0x58d   : > { %3338 = vrot.lane.b32.xlu0 %v12340_v24, %s15799_s14 }
 0x58f   : > { %3342 = vrot.lane.b32.xlu1 %v3229_v37, %s15797_s9 }
 0x590   : > { %3340 = vrot.lane.b32.xlu2 %v3257_v0, %s15799_s14 }
 0x595   : > { %3344 = vrot.lane.b32.xlu0 %v12358_v48, %s15797_s9 }
 0x597   : > { %3348 = vrot.lane.b32.xlu1 %v12367_v43, %s15797_s9 }
 0x598   : > { %3346 = vrot.lane.b32.xlu2 %v12353_v51, %s15797_s9 }
 0x59a   : > { %v12444_v57 = vpop.permute.xlu2 %3286 }
 0x59d   : > { %3350 = vrot.lane.b32.xlu0 %v12378_v22, %s15797_s9 }
 0x59f   : > { %3354 = vrot.lane.b32.xlu1 %v12384_v1, %s15797_s9  ;;  %v12453_v16 = vpop.permute.xlu0 %3278 }
 0x5a0   : > { %3352 = vrot.lane.b32.xlu2 %v12373_v29, %s15797_s9  ;;  %15895 = vst [vmem:[#allocation20_spill] sm:$0xff] %v12453_v16 }
 0x5a5   : > { %3356 = vrot.lane.b32.xlu0 %v3262_v32, %s15797_s9 }
 0x5a7   : > { %3360 = vrot.lane.b32.xlu1 %v12232_v8, %s15794_s29 }
 0x5a8   : > { %3358 = vrot.lane.b32.xlu2 %v12236_v7, %s15794_s29 }
 0x5a9   : > { %v12461_v21 = vpop.permute.xlu1 %3282 }
 0x5aa   : > { %v12455_v10 = vpop.permute.xlu2 %3292 }
 0x5ad   : > { %3362 = vrot.lane.b32.xlu0 %v12274_v6, %s15794_s29 }
 0x5af   : > { %3366 = vrot.lane.b32.xlu1 %v12293_v46, %s15794_s29  ;;  %v12468_v37 = vpop.permute.xlu0 %3284 }
 0x5b0   : > { %3364 = vrot.lane.b32.xlu2 %v12296_v52, %s15794_s29 }
 0x5b2   : > { %v12473_v14 = vpop.permute.xlu2 %3298 }
 0x5b5   : > { %3368 = vrot.lane.b32.xlu0 %v12325_v25, %s15794_s29 }
 0x5b7   : > { %3372 = vrot.lane.b32.xlu1 %v3125_v15, %s15794_s29 }
 0x5b8   : > { %3370 = vrot.lane.b32.xlu2 %v3121_v61, %s15794_s29  ;;  %s15922_s29 = smov 72  }
 0x5b9   : > { %v12475_v34 = vpop.permute.xlu1 %3288 }
 0x5ba   : > { %v12489_v54 = vpop.permute.xlu2 %3304 }
 0x5bd   : > { %3374 = vrot.lane.b32.xlu0 %v12261_v62, %s15792_s27  ;;  %v3269_v62 = vshll.u32 %v3127_v31, 16 }
 0x5bf   : > { %v12479_v12 = vpop.permute.xlu0 %3290  ;;  %3378 = vrot.lane.b32.xlu1 %v12299_v5, %s15792_s27  ;;  %v3271_v17 = vrot.slane %v3269_v62, 1 }
 0x5c0   : > { %3376 = vrot.lane.b32.xlu2 %v12284_v42, %s15792_s27  ;;  %v3267_v42 = vrot.slane %v3265_v35, 1  ;;  %v3419_v16 = vsel %vm1486_vm4, %v12293_v46, %v12479_v12 }
 0x5c1   : > { %v12485_v41 = vpop.permute.xlu1 %3294 }
 0x5c2   : > { %15896 = vst [vmem:[#allocation16_spill] sm:$0xff] %v12485_v41  ;;  %v3268_v61 = vor.u32 %v3267_v42, %v3263_v13  ;;  %v12502_v39 = vpop.permute.xlu2 %3310 }
 0x5c3   : > { %15897 = vst [vmem:[#allocation17_spill] sm:$0xff] %v12502_v39 }
 0x5c5   : > { %3380 = vrot.lane.b32.xlu0 %v12317_v58, %s15792_s27 }
 0x5c7   : > { %v12494_v4 = vpop.permute.xlu0 %3296  ;;  %3384 = vrot.lane.b32.xlu1 %v12340_v24, %s15792_s27  ;;  %v3272_v24 = vsel %vm1206_vm3, %v3268_v61, %v3271_v17 }
 0x5c8   : > { %3382 = vrot.lane.b32.xlu2 %v12333_v27, %s15792_s27 }
 0x5c9   : > { %v12500_v5 = vpop.permute.xlu1 %3300 }
 0x5ca   : > { %v12513_v20 = vpop.permute.xlu2 %3316 }
 0x5cd   : > { %3386 = vrot.lane.b32.xlu0 %v3257_v0, %s15792_s27 }
 0x5cf   : > { %v12505_v58 = vpop.permute.xlu0 %3302  ;;  %3390 = vrot.lane.b32.xlu1 %v12358_v48, %s15866_s20 }
 0x5d0   : > { %3388 = vrot.lane.b32.xlu2 %v3272_v24, %s15792_s27  ;;  %s15923_s27 = smov 84  }
 0x5d1   : > { %v3307_v27 = vpop.permute.xlu1 %3306 }
 0x5d5   : > { %3392 = vrot.lane.b32.xlu0 %v12353_v51, %s15866_s20  ;;  %v3323_v51 = vpop.permute.xlu2 %3322 }
 0x5d7   : > { %v3309_v40 = vpop.permute.xlu0 %3308  ;;  %3396 = vrot.lane.b32.xlu1 %v12378_v22, %s15866_s20  ;;  %v3275_v22 = vrot.slane %v3125_v15, 1 }
 0x5d8   : > { %3394 = vrot.lane.b32.xlu2 %v12367_v43, %s15866_s20 }
 0x5d9   : > { %v12519_v2 = vpop.permute.xlu1 %3312  ;;  %v3277_v19 = vsel %vm1303_vm2, %v3275_v22, %v3276_v28 }
 0x5dd   : > { %3398 = vrot.lane.b32.xlu0 %v12373_v29, %s15866_s20  ;;  %v12532_v36 = vpop.permute.xlu2 %3328 }
 0x5df   : > { %v12523_v48 = vpop.permute.xlu0 %3314  ;;  %3402 = vrot.lane.b32.xlu1 %v3262_v32, %s15866_s20 }
 0x5e0   : > { %3400 = vrot.lane.b32.xlu2 %v12384_v1, %s15866_s20 }
 0x5e1   : > { %v12528_v47 = vpop.permute.xlu1 %3318 }
 0x5e5   : > { %3404 = vrot.lane.b32.xlu0 %v3277_v19, %s15866_s20  ;;  %v12538_v45 = vpop.permute.xlu2 %3334 }
 0x5e7   : > { %v3321_v43 = vpop.permute.xlu0 %3320 }
 0x5e9   : > { %v3325_v33 = vpop.permute.xlu1 %3324 }
 0x5ed   : > { %v3341_v0 = vpop.permute.xlu2 %3340 }
 0x5ef   : > { %v12534_v29 = vpop.permute.xlu0 %3326 }
 0x5f0   : > { %15898 = vst [vmem:[#allocation22_spill] sm:$0xff] %v12534_v29 }
 0x5f1   : > { %v12536_v63 = vpop.permute.xlu1 %3330 }
 0x5f5   : > { %v12546_v32 = vpop.permute.xlu2 %3346 }
 0x5f7   : > { %v12540_v50 = vpop.permute.xlu0 %3332 }
 0x5f9   : > { %v3337_v1 = vpop.permute.xlu1 %3336 }
 0x5fd   : > { %v3353_v15 = vpop.permute.xlu2 %3352 }
 0x5ff   : > { %v3339_v23 = vpop.permute.xlu0 %3338 }
 0x601   : > { %v12542_v44 = vpop.permute.xlu1 %3342 }
 0x602   : > { %15899 = vst [vmem:[#allocation14_spill] sm:$0xff] %v12542_v44  ;;  %v3421_v44 = vsel %vm1486_vm4, %v12325_v25, %v12455_v10 }
 0x605   : > { %v12552_v18 = vpop.permute.xlu2 %3358 }
 0x606   : > { %15901 = vst [vmem:[#allocation26_spill] sm:$0xff] %v12552_v18 }
 0x607   : > { %v12544_v30 = vpop.permute.xlu0 %3344 }
 0x609   : > { %v12548_v26 = vpop.permute.xlu1 %3348 }
 0x60d   : > { %v12556_v35 = vpop.permute.xlu2 %3364 }
 0x60f   : > { %v3351_v59 = vpop.permute.xlu0 %3350 }
 0x611   : > { %v3355_v60 = vpop.permute.xlu1 %3354 }
 0x615   : > { %v3371_v17 = vpop.permute.xlu2 %3370 }
 0x617   : > { %v3357_v9 = vpop.permute.xlu0 %3356 }
 0x619   : > { %v12550_v56 = vpop.permute.xlu1 %3360 }
 0x61a   : > { %15900 = vst [vmem:[#allocation23_spill] sm:$0xff] %v12550_v56 }
 0x61d   : > { %v12564_v28 = vpop.permute.xlu2 %3376 }
 0x61e   : > { %15903 = vst [vmem:[#allocation21_spill] sm:$0xff] %v12564_v28 }
 0x61f   : > { %v12554_v55 = vpop.permute.xlu0 %3362 }
 0x621   : > { %v3367_v31 = vpop.permute.xlu1 %3366 }
 0x625   : > { %v3383_v49 = vpop.permute.xlu2 %3382 }
 0x627   : > { %v3369_v62 = vpop.permute.xlu0 %3368 }
 0x629   : > { %v3373_v42 = vpop.permute.xlu1 %3372 }
 0x62d   : > { %v3389_v39 = vpop.permute.xlu2 %3388 }
 0x62f   : > { %v12558_v13 = vpop.permute.xlu0 %3374 }
 0x630   : > { %15902 = vst [vmem:[#allocation18_spill] sm:$0xff] %v12558_v13  ;;  %v3437_v13 = vsel %vm1503_vm5, %v3421_v44, %v3309_v40 }
 0x631   : > { %v12560_v61 = vpop.permute.xlu1 %3378  ;;  %v3453_v29 = vsel %vm1520_vm6, %v3437_v13, %v3325_v33 }
 0x632   : > { %v3469_v28 = vsel %vm1537_vm7, %v3453_v29, %v3341_v0  ;;  %v3417_v29 = vsel %vm1486_vm4, %v12296_v52, %v12475_v34 }
 0x635   : > { %v3395_v12 = vpop.permute.xlu2 %3394 }
 0x637   : > { %v12562_v24 = vpop.permute.xlu0 %3380 }
 0x639   : > { %v3385_v22 = vpop.permute.xlu1 %3384 }
 0x63f   : > { %v3387_v19 = vpop.permute.xlu0 %3386 }
 0x641   : > { %v12566_v38 = vpop.permute.xlu1 %3390 }
 0x642   : > { %15904 = vst [vmem:[#allocation27_spill] sm:$0xff] %v12566_v38  ;;  %v3485_v38 = vsel %vm1554_vm8, %v3469_v28, %v3357_v9  ;;  %v9116_v28 = vld [vmem:[%s10664_s13 + $0x170] sm:$0x1] }
 0x643   : > { %v3501_v56 = vsel %vm1571_vm9, %v3485_v38, %v3373_v42 }
 0x644   : > { %v3517_v10 = vsel %vm1588_vm10, %v3501_v56, %v3389_v39 }
 0x647   : > { %v12568_v18 = vpop.permute.xlu0 %3392 }
 0x648   : > { %15905 = vst [vmem:[#allocation15_spill] sm:$0xff] %v12568_v18  ;;  %v3435_v18 = vsel %vm1503_vm5, %v3419_v16, %v3307_v27  ;;  %v3433_v27 = vsel %vm1503_vm5, %v3417_v29, %v12489_v54  ;;  %v3415_v54 = vsel %vm1486_vm4, %v12274_v6, %v12444_v57  ;;  %v3413_v57 = vsel %vm1486_vm4, %v12232_v8, %v12468_v37 }
 0x649   : > { %v3397_v3 = vpop.permute.xlu1 %3396  ;;  %v3451_v25 = vsel %vm1520_vm6, %v3435_v18, %v3323_v51  ;;  %v3449_v51 = vsel %vm1520_vm6, %v3433_v27, %v3321_v43  ;;  %v3401_v43 = vpop.permute.xlu2 %3400  ;;  %v3431_v18 = vsel %vm1503_vm5, %v3415_v54, %v12505_v58  ;;  %v3429_v58 = vsel %vm1503_vm5, %v3413_v57, %v12500_v5 }
 0x64a   : > { %v3467_v33 = vsel %vm1537_vm7, %v3451_v25, %v3339_v23  ;;  %v3465_v23 = vsel %vm1537_vm7, %v3449_v51, %v3337_v1  ;;  %v3447_v1 = vsel %vm1520_vm6, %v3431_v18, %v12528_v47  ;;  %v15914_v51 = vld [vmem:[#allocation14_spill] sm:$0xff] }
 0x64b   : > { %v3483_v46 = vsel %vm1554_vm8, %v3467_v33, %v3355_v60  ;;  %v3481_v34 = vsel %vm1554_vm8, %v3465_v23, %v3353_v15  ;;  %v3463_v42 = vsel %vm1537_vm7, %v3447_v1, %v12538_v45  ;;  %v3445_v45 = vsel %vm1520_vm6, %v3429_v58, %v12513_v20 }
 0x64c   : > { %v3499_v39 = vsel %vm1571_vm9, %v3483_v46, %v3371_v17  ;;  %v3497_v9 = vsel %vm1571_vm9, %v3481_v34, %v3369_v62  ;;  %v3479_v62 = vsel %vm1554_vm8, %v3463_v42, %v3351_v59  ;;  %v3461_v59 = vsel %vm1537_vm7, %v3445_v45, %v12540_v50  ;;  %v15912_v46 = vld [vmem:[#allocation17_spill] sm:$0xff]  ;;  %v15915_v34 = vld [vmem:[#allocation26_spill] sm:$0xff] }
 0x64d   : > { %v3515_v0 = vsel %vm1588_vm10, %v3499_v39, %v3387_v19  ;;  %v3513_v56 = vsel %vm1588_vm10, %v3497_v9, %v3385_v22  ;;  %v3495_v6 = vsel %vm1571_vm9, %v3479_v62, %v3367_v31  ;;  %v3477_v31 = vsel %vm1554_vm8, %v3461_v59, %v12548_v26  ;;  %v15906_v19 = vld [vmem:[#allocation23_spill] sm:$0xff]  ;;  %v9119_v39 = vld [vmem:[%s10664_s13 + $0x17c] sm:$0x1]  ;;  %v15916_v9 = vld [vmem:[#allocation18_spill] sm:$0xff] }
 0x64e   : > { %v3529_v15 = vsel %vm1605_vm11, %v3513_v56, %v3401_v43  ;;  %v3511_v47 = vsel %vm1588_vm10, %v3495_v6, %v3383_v49  ;;  %v3411_v49 = vsel %vm1486_vm4, %v12236_v7, %v12461_v21  ;;  %v15917_v56 = vld [vmem:[#allocation27_spill] sm:$0xff]  ;;  %v10430_v42 = vld [vmem:[%s15772_s3] sm:$0xf] }
 0x64f   : > { %v3399_v41 = vpop.permute.xlu0 %3398  ;;  %v3544_v13 = vsel %vm1622_vm12, %v3529_v15, 0  ;;  %v3427_v37 = vsel %vm1503_vm5, %v3411_v49, %v12473_v14  ;;  %v10167_v14 = vld [vmem:[%s10664_s13 + $0x168] sm:$0xff]  ;;  %v10169_v15 = vld [vmem:[%s10664_s13 + $0x180] sm:$0xff] }
 0x650   : > { %v3527_v17 = vsel %vm1605_vm11, %v3511_v47, %v3399_v41  ;;  %v3493_v41 = vsel %vm1571_vm9, %v3477_v31, %v12556_v35  ;;  %v3443_v5 = vsel %vm1520_vm6, %v3427_v37, %v12523_v48  ;;  %v3409_v48 = vsel %vm1486_vm4, %v12219_v11, %v12436_v53  ;;  %3822 = vrot.lane.b32.xlu0 %v10167_v14, %s15837_s12  ;;  %v15911_v29 = vld [vmem:[#allocation15_spill] sm:$0xff]  ;;  %v9128_v6 = vld [vmem:[%s10664_s13 + $0x1a0] sm:$0x1]  ;;  %v9140_v31 = vld [vmem:[%s10664_s13 + $0x1d0] sm:$0x1] }
 0x651   : > { %v3403_v38 = vpop.permute.xlu1 %3402  ;;  %v3542_v8 = vsel %vm1622_vm12, %v3527_v17, 0  ;;  %v3509_v20 = vsel %vm1588_vm10, %v3493_v41, %v12562_v24  ;;  %v3459_v50 = vsel %vm1537_vm7, %v3443_v5, %v12536_v63  ;;  %v10170_v62 = vld [vmem:[%s10664_s13 + $0x18c] sm:$0xff]  ;;  %v3786_v57 = vunpack.c.l.b16 %v9128_v6  ;;  %v10174_v59 = vld [vmem:[%s10664_s13 + $0x1bc] sm:$0xff]  ;;  %v9149_v41 = vld [vmem:[%s10664_s13 + $0x1f4] sm:$0x1] }
 0x652   : > { %v3531_v52 = vsel %vm1605_vm11, %v3515_v0, %v3403_v38  ;;  %v3525_v26 = vsel %vm1605_vm11, %v3509_v20, %v3397_v3  ;;  %v3475_v7 = vsel %vm1554_vm8, %v3459_v50, %v12546_v32  ;;  %v3774_v3 = vunpack.c.l.b16 %v9116_v28  ;;  %v15913_v38 = vld [vmem:[#allocation22_spill] sm:$0xff]  ;;  %v9131_v47 = vld [vmem:[%s10664_s13 + $0x1ac] sm:$0x1]  ;;  %v9164_v6 = vld [vmem:[%s10664_s13 + $0x230] sm:$0x1] }
 0x653   : > { %v3546_v60 = vsel %vm1622_vm12, %v3531_v52, 0  ;;  %v3540_v21 = vsel %vm1622_vm12, %v3525_v26, 0  ;;  %v3491_v35 = vsel %vm1571_vm9, %v3475_v7, %v12554_v55  ;;  %v3425_v32 = vsel %vm1503_vm5, %v3409_v48, %v12494_v4  ;;  %v15907_v4 = vld [vmem:[#allocation20_spill] sm:$0xff]  ;;  %v10177_v37 = vld [vmem:[%s10664_s13 + $0x1e0] sm:$0xff]  ;;  %v9158_v26 = vld [vmem:[%s10664_s13 + $0x218] sm:$0x1] }
 0x654   : > { %v3507_v63 = vsel %vm1588_vm10, %v3491_v35, %v12560_v61  ;;  %v3441_v24 = vsel %vm1520_vm6, %v3425_v32, %v12519_v2  ;;  %v3803_v22 = vpack.c.b16 %v3774_v3, %v3774_v3  ;;  %v3777_v52 = vunpack.c.l.b16 %v9119_v39  ;;  %v10180_v50 = vld [vmem:[%s10664_s13 + $0x204] sm:$0xff] }
 0x655   : > { %v3523_v55 = vsel %vm1605_vm11, %v3507_v63, %v3395_v12  ;;  %v3457_v11 = vsel %vm1537_vm7, %v3441_v24, %v12532_v36  ;;  %v3811_v58 = vpack.c.b16 %v3786_v57, %v3786_v57  ;;  %v3789_v17 = vunpack.c.l.b16 %v9131_v47  ;;  %v10183_v35 = vld [vmem:[%s10664_s13 + $0x228] sm:$0xff]  ;;  %v9167_v63 = vld [vmem:[%s10664_s13 + $0x23c] sm:$0x1] }
 0x656   : > { %v3473_v53 = vsel %vm1554_vm8, %v3457_v11, %v12544_v30  ;;  %v3538_v61 = vsel %vm1622_vm12, %v3523_v55, 0  ;;  %v3805_v18 = vpack.c.b16 %v3777_v52, %v3777_v52  ;;  %v3897_v5 = vunpack.c.l.b16 %v9149_v41  ;;  %v9122_v24 = vld [vmem:[%s10664_s13 + $0x188] sm:$0x1]  ;;  %v9125_v55 = vld [vmem:[%s10664_s13 + $0x194] sm:$0x1]  ;;  %v10178_v52 = vld [vmem:[%s10664_s13 + $0x1ec] sm:$0xff] }
 0x657   : > { %v3405_v40 = vpop.permute.xlu0 %3404  ;;  %v3489_v25 = vsel %vm1571_vm9, %v3473_v53, %v15906_v19  ;;  %v3813_v45 = vpack.c.b16 %v3789_v17, %v3789_v17  ;;  %v3906_v7 = vunpack.c.l.b16 %v9158_v26  ;;  %v3915_v3 = vunpack.c.l.b16 %v9167_v63  ;;  %v10186_v53 = vld [vmem:[%s10664_s13 + $0x24c] sm:$0xff] }
 0x658   : > { %v3533_v44 = vsel %vm1605_vm11, %v3517_v10, %v3405_v40  ;;  %v15908_v10 = vld [vmem:[#allocation19_spill] sm:$0xff]  ;;  %3824 = vrot.lane.b32.xlu0 %v3803_v22, %s15837_s12  ;;  %v15909_v40 = vld [vmem:[#allocation16_spill] sm:$0xff]  ;;  %v3925_v20 = vpack.c.b16 %v3897_v5, %v3897_v5  ;;  %v3780_v22 = vunpack.c.l.b16 %v9122_v24  ;;  %v3783_v11 = vunpack.c.l.b16 %v9125_v55 }
 0x659   : > { %v3548_v16 = vsel %vm1622_vm12, %v3533_v44, 0  ;;  %v3407_v2 = vsel %vm1486_vm4, %v15908_v10, %v15907_v4  ;;  %v15910_v44 = vld [vmem:[#allocation21_spill] sm:$0xff]  ;;  %v3937_v32 = vpack.c.b16 %v3915_v3, %v3915_v3  ;;  %v10173_v10 = vld [vmem:[%s10664_s13 + $0x1b0] sm:$0xff] }
 0x65a   : > { %3550 = vmatpush.bf16.xpose.msra.mxu2 %v3548_v16  ;;  %v3423_v33 = vsel %vm1503_vm5, %v3407_v2, %v15909_v40  ;;  %v3505_v36 = vsel %vm1588_vm10, %v3489_v25, %v15910_v44  ;;  %v10168_v16 = vld [vmem:[%s10664_s13 + $0x174] sm:$0xff]  ;;  %v3809_v19 = vpack.c.b16 %v3783_v11, %v3783_v11  ;;  %v10172_v25 = vld [vmem:[%s10664_s13 + $0x1a4] sm:$0xff] }
 0x65b   : > { %v3521_v30 = vsel %vm1605_vm11, %v3505_v36, %v15911_v29  ;;  %v3439_v12 = vsel %vm1520_vm6, %v3423_v33, %v15912_v46  ;;  %v9134_v4 = vld [vmem:[%s10664_s13 + $0x1b8] sm:$0x1]  ;;  %v9137_v2 = vld [vmem:[%s10664_s13 + $0x1c4] sm:$0x1]  ;;  %v9143_v46 = vld [vmem:[%s10664_s13 + $0x1dc] sm:$0x1] }
 0x65c   : > { %v3455_v27 = vsel %vm1537_vm7, %v3439_v12, %v15913_v38  ;;  %v3536_v23 = vsel %vm1622_vm12, %v3521_v30, 0  ;;  %v3792_v40 = vunpack.c.l.b16 %v9134_v4  ;;  %v3795_v33 = vunpack.c.l.b16 %v9137_v2  ;;  %v10175_v30 = vld [vmem:[%s10664_s13 + $0x1c8] sm:$0xff]  ;;  %v10158_v2 = vld [vmem:[%s10664_s13 + $0xfc] sm:$0xff] }
 0x65d   : > { %v3471_v0 = vsel %vm1554_vm8, %v3455_v27, %v15914_v51  ;;  %v9146_v38 = vld [vmem:[%s10664_s13 + $0x1e8] sm:$0x1]  ;;  %v3801_v27 = vunpack.c.l.b16 %v9143_v46 }
 0x65e   : > { %v3815_v44 = vpack.c.b16 %v3792_v40, %v3792_v40  ;;  %v3817_v29 = vpack.c.b16 %v3795_v33, %v3795_v33  ;;  %v3894_v39 = vunpack.c.l.b16 %v9146_v38  ;;  %v9086_v33 = vld [vmem:[%s10664_s13 + $0xf8] sm:$0x1]  ;;  %v9098_v38 = vld [vmem:[%s10664_s13 + $0x128] sm:$0x1] }
 0x65f   : > { %v3821_v51 = vpack.c.b16 %v3801_v27, %v3801_v27 }
 0x660   : > { %3826 = vrot.lane.b32.xlu0 %v10168_v16, %s15837_s12  ;;  %v10176_v16 = vld [vmem:[%s10664_s13 + $0x1d4] sm:$0xff] }
 0x662   : > { %3551 = vmatpush.bf16.xpose.msra.mxu2 %v3546_v60  ;;  %v3487_v60 = vsel %vm1571_vm9, %v3471_v0, %v15915_v34  ;;  %v3923_v0 = vpack.c.b16 %v3894_v39, %v3894_v39  ;;  %v9152_v34 = vld [vmem:[%s10664_s13 + $0x200] sm:$0x1]  ;;  %v3694_v39 = vunpack.c.l.b16 %v9086_v33 }
 0x663   : > { %v3503_v54 = vsel %vm1588_vm10, %v3487_v60, %v15916_v9  ;;  %v10179_v60 = vld [vmem:[%s10664_s13 + $0x1f8] sm:$0xff]  ;;  %v9155_v9 = vld [vmem:[%s10664_s13 + $0x20c] sm:$0x1] }
 0x664   : > { %v3519_v43 = vsel %vm1605_vm11, %v3503_v54, %v15917_v56  ;;  %v3900_v54 = vunpack.c.l.b16 %v9152_v34 }
 0x665   : > { %v3534_v1 = vsel %vm1622_vm12, %v3519_v43, 0  ;;  %v3903_v43 = vunpack.c.l.b16 %v9155_v9  ;;  %v9092_v9 = vld [vmem:[%s10664_s13 + $0x110] sm:$0x1] }
 0x668   : > { %3828 = vrot.lane.b32.xlu0 %v3805_v18, %s15837_s12  ;;  %v3927_v18 = vpack.c.b16 %v3900_v54, %v3900_v54  ;;  %v3723_v54 = vpack.c.b16 %v3694_v39, %v3694_v39 }
 0x66a   : > { %3552 = vmatpush.bf16.xpose.msra.mxu2 %v3544_v13  ;;  %v10171_v13 = vld [vmem:[%s10664_s13 + $0x198] sm:$0xff] }
 0x670   : > { %3830 = vrot.lane.b32.xlu0 %v10169_v15, %s15837_s12  ;;  %v10181_v15 = vld [vmem:[%s10664_s13 + $0x210] sm:$0xff] }
 0x672   : > { %3553 = vmatpush.bf16.xpose.msra.mxu2 %v3542_v8  ;;  %v3798_v8 = vunpack.c.l.b16 %v9140_v31  ;;  %v9170_v31 = vld [vmem:[%s10664_s13 + $0x248] sm:$0x1] }
 0x674   : > { %v3819_v49 = vpack.c.b16 %v3798_v8, %v3798_v8  ;;  %v10185_v8 = vld [vmem:[%s10664_s13 + $0x240] sm:$0xff] }
 0x678   : > { %3834 = vrot.lane.b32.xlu0 %v10170_v62, %s15837_s12  ;;  %v9161_v62 = vld [vmem:[%s10664_s13 + $0x224] sm:$0x1] }
 0x679   : > { %v3909_v57 = vunpack.c.l.b16 %v9161_v62 }
 0x67a   : > { %3554 = vmatpush.bf16.xpose.msra.mxu2 %v3540_v21  ;;  %v3931_v21 = vpack.c.b16 %v3906_v7, %v3906_v7 }
 0x67b   : > { %v3933_v47 = vpack.c.b16 %v3909_v57, %v3909_v57 }
 0x680   : > { %3838 = vrot.lane.b32.xlu0 %v10171_v13, %s15837_s12  ;;  %v10182_v13 = vld [vmem:[%s10664_s13 + $0x21c] sm:$0xff] }
 0x682   : > { %3555 = vmatpush.bf16.xpose.msra.mxu2 %v3538_v61  ;;  %v3807_v61 = vpack.c.b16 %v3780_v22, %v3780_v22  ;;  %v9089_v22 = vld [vmem:[%s10664_s13 + $0x104] sm:$0x1] }
 0x688   : > { %3840 = vrot.lane.b32.xlu0 %v3811_v58, %s15837_s12  ;;  %v3912_v58 = vunpack.c.l.b16 %v9164_v6 }
 0x68a   : > { %3556 = vmatpush.bf16.xpose.msra.mxu2 %v3536_v23 }
 0x690   : > { %3844 = vrot.lane.b32.xlu0 %v3813_v45, %s15837_s12  ;;  %v3935_v45 = vpack.c.b16 %v3912_v58, %v3912_v58 }
 0x692   : > { %3557 = vmatpush.bf16.xpose.msra.mxu2 %v3534_v1  ;;  %v3929_v1 = vpack.c.b16 %v3903_v43, %v3903_v43 }
 0x698   : > { %3850 = vrot.lane.b32.xlu0 %v10174_v59, %s15837_s12  ;;  %v10184_v59 = vld [vmem:[%s10664_s13 + $0x234] sm:$0xff] }
 0x699   : > { %9083 = vmatmul.msk.bf16.vlgmr.msra.gmra.mxu2 %vm1622_vm12, %v10430_v42 }
 0x6a0   : > { %3856 = vrot.lane.b32.xlu0 %v3819_v49, %s15837_s12  ;;  %v9173_v49 = vld [vmem:[%s10664_s13 + $0x254] sm:$0x1] }
 0x6a1   : > { %v3921_v5 = vunpack.c.l.b16 %v9173_v49 }
 0x6a8   : > { %3942 = vrot.lane.b32.xlu0 %v10177_v37, %s15840_s18  ;;  %v3918_v37 = vunpack.c.l.b16 %v9170_v31 }
 0x6b0   : > { %3948 = vrot.lane.b32.xlu0 %v3925_v20, %s15840_s18  ;;  %v3939_v20 = vpack.c.b16 %v3918_v37, %v3918_v37 }
 0x6b8   : > { %3954 = vrot.lane.b32.xlu0 %v10180_v50, %s15840_s18  ;;  %v3941_v50 = vpack.c.b16 %v3921_v5, %v3921_v5 }
 0x6c0   : > { %3960 = vrot.lane.b32.xlu0 %v3931_v21, %s15840_s18 }
 0x6c2   : > { %v12739_v36 = vpop.permute.xlu0 %3822 }
 0x6c8   : > { %3966 = vrot.lane.b32.xlu0 %v10183_v35, %s15840_s18 }
 0x6ca   : > { %v12745_v12 = vpop.permute.xlu0 %3824 }
 0x6cb   : > { %v3987_v57 = vsel %vm1104_vm0, %v3723_v54, %v12745_v12 }
 0x6d0   : > { %3972 = vrot.lane.b32.xlu0 %v3937_v32, %s15840_s18 }
 0x6d2   : > { %v12752_v23 = vpop.permute.xlu0 %3826 }
 0x6d8   : > { %3978 = vrot.lane.b32.xlu0 %v10186_v53, %s15840_s18  ;;  %v3697_v53 = vunpack.c.l.b16 %v9089_v22 }
 0x6da   : > { %v3829_v56 = vpop.permute.xlu0 %3828 }
 0x6e2   : > { %v12764_v42 = vpop.permute.xlu0 %3830 }
 0x6ea   : > { %v12771_v17 = vpop.permute.xlu0 %3834 }
 0x6f2   : > { %v12780_v41 = vpop.permute.xlu0 %3838 }
 0x6fa   : > { %v3841_v26 = vpop.permute.xlu0 %3840 }
 0x702   : > { %v12787_v21 = vpop.permute.xlu0 %3844 }
 0x71c   : > { %v3559_v14 = vpop.f32.mrf.mxu2 }
 0x71d   : > { %3563 = vst [vmem:[%s11747_s7 + $0x10] sm:$0xff] %v3559_v14  ;;  %v3567_v28 = vmul.f32 %v3559_v14, %v3559_v14  ;;  %3564 = vadd.xlane.f32.xlu2 %v3559_v14 }
 0x71f   : > { %3568 = vadd.xlane.f32.xlu1 %v3567_v28  ;;  %v12791_v28 = vpop.permute.xlu0 %3850 }
 0x724   : > { %v3561_v48 = vpop.f32.mrf.mxu2 }
 0x727   : > { %v12797_v63 = vpop.permute.xlu0 %3856 }
 0x72f   : > { %v3943_v24 = vpop.permute.xlu0 %3942 }
 0x735   : > { %3832 = vrot.lane.b32.xlu2 %v3807_v61, %s15837_s12  ;;  %v3725_v61 = vpack.c.b16 %v3697_v53, %v3697_v53 }
 0x737   : > { %v3993_v40 = vsel %vm1104_vm0, %v3725_v61, %v3829_v56 }
 0x738   : > { %3836 = vrot.lane.b32.xlu1 %v3809_v19, %s15837_s12  ;;  %v3949_v19 = vpop.permute.xlu0 %3948 }
 0x73d   : > { %3842 = vrot.lane.b32.xlu2 %v10172_v25, %s15837_s12 }
 0x740   : > { %3846 = vrot.lane.b32.xlu1 %v10173_v10, %s15837_s12  ;;  %v10157_v10 = vld [vmem:[%s10664_s13 + $0xf0] sm:$0xff]  ;;  %v3955_v46 = vpop.permute.xlu0 %3954 }
 0x745   : > { %3848 = vrot.lane.b32.xlu2 %v3815_v44, %s15837_s12  ;;  %v12817_v44 = vsel %vm1165_vm1, %v3993_v40, %v3949_v19 }
 0x748   : > { %3852 = vrot.lane.b32.xlu1 %v3817_v29, %s15837_s12  ;;  %v3984_v29 = vsel %vm1104_vm0, %v10157_v10, %v12739_v36  ;;  %v3706_v36 = vunpack.c.l.b16 %v9098_v38  ;;  %v3961_v62 = vpop.permute.xlu0 %3960 }
 0x749   : > { %v12832_v34 = vsel %vm1165_vm1, %v3984_v29, %v3943_v24  ;;  %v9095_v24 = vld [vmem:[%s10664_s13 + $0x11c] sm:$0x1] }
 0x74a   : > { %15920 = vst [vmem:[#allocation19_spill] sm:$0xff] %v12832_v34  ;;  %v4084_v56 = vshll.u32 %v12832_v34, 16  ;;  %v4082_v58 = vshrl.u32 %v12832_v34, 16  ;;  %v3703_v40 = vunpack.c.l.b16 %v9095_v24 }
 0x74d   : > { %3854 = vrot.lane.b32.xlu2 %v10175_v30, %s15837_s12  ;;  %v3990_v30 = vsel %vm1104_vm0, %v10158_v2, %v12752_v23 }
 0x750   : > { %3858 = vrot.lane.b32.xlu1 %v10176_v16, %s15837_s12 }
 0x755   : > { %3860 = vrot.lane.b32.xlu2 %v3821_v51, %s15837_s12  ;;  %v4098_v51 = vshll.u32 %v12817_v44, 16 }
 0x757   : > { %v4100_v43 = vrot.slane %v4098_v51, 1 }
 0x758   : > { %3944 = vrot.lane.b32.xlu1 %v3923_v0, %s15840_s18 }
 0x75d   : > { %3946 = vrot.lane.b32.xlu2 %v10178_v52, %s15840_s18 }
 0x760   : > { %3950 = vrot.lane.b32.xlu1 %v10179_v60, %s15840_s18 }
 0x765   : > { %3952 = vrot.lane.b32.xlu2 %v3927_v18, %s15840_s18 }
 0x768   : > { %3956 = vrot.lane.b32.xlu1 %v3929_v1, %s15840_s18  ;;  %v3731_v1 = vpack.c.b16 %v3706_v36, %v3706_v36 }
 0x76a   : > { %v4011_v49 = vsel %vm1104_vm0, %v3731_v1, %v3841_v26  ;;  %v9107_v26 = vld [vmem:[%s10664_s13 + $0x14c] sm:$0x1] }
 0x76b   : > { %v12857_v53 = vsel %vm1165_vm1, %v4011_v49, %v3961_v62  ;;  %v3715_v39 = vunpack.c.l.b16 %v9107_v26 }
 0x76d   : > { %3958 = vrot.lane.b32.xlu2 %v10181_v15, %s15840_s18  ;;  %v3700_v15 = vunpack.c.l.b16 %v9092_v9 }
 0x76f   : > { %v3727_v37 = vpack.c.b16 %v3700_v15, %v3700_v15  ;;  %v3737_v15 = vpack.c.b16 %v3715_v39, %v3715_v39 }
 0x770   : > { %3962 = vrot.lane.b32.xlu1 %v10182_v13, %s15840_s18 }
 0x775   : > { %3964 = vrot.lane.b32.xlu2 %v3933_v47, %s15840_s18  ;;  %v4086_v47 = vrot.slane %v4084_v56, 1 }
 0x778   : > { %3968 = vrot.lane.b32.xlu1 %v3935_v45, %s15840_s18 }
 0x77d   : > { %3970 = vrot.lane.b32.xlu2 %v10184_v59, %s15840_s18  ;;  %v10160_v59 = vld [vmem:[%s10664_s13 + $0x114] sm:$0xff] }
 0x77e   : > { %v4002_v12 = vsel %vm1104_vm0, %v10160_v59, %v12771_v17 }
 0x77f   : > { %v12875_v29 = vsel %vm1165_vm1, %v4002_v12, %v3955_v46  ;;  %v3729_v46 = vpack.c.b16 %v3703_v40, %v3703_v40  ;;  %v10162_v12 = vld [vmem:[%s10664_s13 + $0x12c] sm:$0xff] }
 0x780   : > { %3974 = vrot.lane.b32.xlu1 %v10185_v8, %s15840_s18  ;;  %v10161_v8 = vld [vmem:[%s10664_s13 + $0x120] sm:$0xff]  ;;  %v4114_v9 = vshll.u32 %v12875_v29, 16 }
 0x781   : > { %v4008_v61 = vsel %vm1104_vm0, %v10161_v8, %v12780_v41  ;;  %v4112_v8 = vshrl.u32 %v12875_v29, 16 }
 0x782   : > { %v4116_v49 = vrot.slane %v4114_v9, 1 }
 0x784   : > { %v4117_v26 = vor.u32 %v4116_v49, %v4112_v8 }
 0x785   : > { %3976 = vrot.lane.b32.xlu2 %v3939_v20, %s15840_s18  ;;  %v10159_v20 = vld [vmem:[%s10664_s13 + $0x108] sm:$0xff] }
 0x786   : > { %v3996_v41 = vsel %vm1104_vm0, %v10159_v20, %v12764_v42 }
 0x788   : > { %3980 = vrot.lane.b32.xlu1 %v3941_v50, %s15840_s18  ;;  %v4087_v50 = vor.u32 %v4086_v47, %v4082_v58 }
 0x790   : > { %v12785_v7 = vpop.xlane.xlu2 %3564 }
 0x791   : > { %15918 = vst [vmem:[#allocation23_spill] sm:$0xff] %v12785_v7 }
 0x792   : > { %v12795_v48 = vpop.xlane.xlu1 %3568 }
 0x793   : > { %15919 = vst [vmem:[#allocation20_spill] sm:$0xff] %v12795_v48 }
 0x798   : > { %v12789_v14 = vpop.permute.xlu2 %3832 }
 0x799   : > { %v3999_v19 = vsel %vm1104_vm0, %v3727_v37, %v12789_v14  ;;  %v4128_v14 = vshll.u32 %v12857_v53, 16  ;;  %v10163_v37 = vld [vmem:[%s10664_s13 + $0x138] sm:$0xff] }
 0x79b   : > { %v4130_v54 = vrot.slane %v4128_v14, 1 }
 0x7a0   : > { %v12793_v35 = vpop.permute.xlu2 %3842 }
 0x7a8   : > { %v12799_v3 = vpop.permute.xlu2 %3848 }
 0x7aa   : > { %v12801_v32 = vpop.permute.xlu1 %3836 }
 0x7ab   : > { %v4005_v47 = vsel %vm1104_vm0, %v3729_v46, %v12801_v32 }
 0x7b0   : > { %v12803_v55 = vpop.permute.xlu2 %3854 }
 0x7b2   : > { %v12806_v11 = vpop.permute.xlu1 %3846 }
 0x7b8   : > { %v12808_v25 = vpop.permute.xlu2 %3860 }
 0x7ba   : > { %v12810_v4 = vpop.permute.xlu1 %3852 }
 0x7bb   : > { %v4029_v24 = vsel %vm1104_vm0, %v3737_v15, %v12810_v4 }
 0x7c0   : > { %v3947_v16 = vpop.permute.xlu2 %3946 }
 0x7c1   : > { %v12825_v27 = vsel %vm1165_vm1, %v3990_v30, %v3947_v16  ;;  %v3967_v30 = vpop.permute.xlu0 %3966 }
 0x7c2   : > { %v4094_v0 = vshll.u32 %v12825_v27, 16  ;;  %v12829_v52 = vpop.permute.xlu1 %3858  ;;  %v4092_v60 = vshrl.u32 %v12825_v27, 16 }
 0x7c4   : > { %v4096_v23 = vrot.slane %v4094_v0, 1  ;;  %v9101_v0 = vld [vmem:[%s10664_s13 + $0x134] sm:$0x1] }
 0x7c5   : > { %v3709_v1 = vunpack.c.l.b16 %v9101_v0 }
 0x7c6   : > { %v4097_v18 = vor.u32 %v4096_v23, %v4092_v60 }
 0x7c7   : > { %v3733_v20 = vpack.c.b16 %v3709_v1, %v3709_v1 }
 0x7c8   : > { %v3953_v13 = vpop.permute.xlu2 %3952  ;;  %v12838_v6 = vsel %vm1206_vm3, %v4097_v18, %v4100_v43 }
 0x7c9   : > { %4234 = vrot.lane.b32.xlu0 %v12838_v6, %s15894_s30  ;;  %v12866_v33 = vsel %vm1165_vm1, %v3999_v19, %v3953_v13  ;;  %v3973_v32 = vpop.permute.xlu0 %3972  ;;  %v4017_v40 = vsel %vm1104_vm0, %v3733_v20, %v12787_v21 }
 0x7ca   : > { %v3945_v45 = vpop.permute.xlu1 %3944  ;;  %v4108_v36 = vshll.u32 %v12866_v33, 16 }
 0x7cb   : > { %v12847_v31 = vsel %vm1165_vm1, %v3987_v57, %v3945_v45 }
 0x7cc   : > { %v4088_v5 = vshll.u32 %v12847_v31, 16  ;;  %v4110_v62 = vrot.slane %v4108_v36, 1 }
 0x7ce   : > { %v4090_v22 = vrot.slane %v4088_v5, 1 }
 0x7d0   : > { %v3959_v10 = vpop.permute.xlu2 %3958  ;;  %v4091_v2 = vsel %vm1206_vm3, %v4087_v50, %v4090_v22  ;;  %v10164_v50 = vld [vmem:[%s10664_s13 + $0x144] sm:$0xff] }
 0x7d1   : > { %v12869_v17 = vsel %vm1165_vm1, %v4008_v61, %v3959_v10  ;;  %4232 = vrot.lane.b32.xlu2 %v4091_v2, %s15894_s30  ;;  %v9104_v61 = vld [vmem:[%s10664_s13 + $0x140] sm:$0x1]  ;;  %v4020_v10 = vsel %vm1104_vm0, %v10163_v37, %v12806_v11  ;;  %v12914_v2 = vsel %vm1165_vm1, %v4029_v24, %v3973_v32  ;;  %v4014_v11 = vsel %vm1104_vm0, %v10162_v12, %v12793_v35 }
 0x7d2   : > { %v3951_v16 = vpop.permute.xlu1 %3950  ;;  %v4124_v38 = vshll.u32 %v12869_v17, 16  ;;  %v4122_v60 = vshrl.u32 %v12869_v17, 16  ;;  %v12932_v21 = vsel %vm1165_vm1, %v4020_v10, %v3967_v30  ;;  %v4179_v24 = vrot.slane %v12847_v31, 1 }
 0x7d3   : > { %v12880_v51 = vsel %vm1165_vm1, %v3996_v41, %v3951_v16  ;;  %v4026_v41 = vsel %vm1104_vm0, %v10164_v50, %v12791_v28  ;;  %v3712_v16 = vunpack.c.l.b16 %v9104_v61  ;;  %v4158_v28 = vshll.u32 %v12914_v2, 16 }
 0x7d4   : > { %v4126_v23 = vrot.slane %v4124_v38, 1  ;;  %v4104_v42 = vshll.u32 %v12880_v51, 16  ;;  %v4102_v43 = vshrl.u32 %v12880_v51, 16  ;;  %v4144_v35 = vshll.u32 %v12932_v21, 16 }
 0x7d5   : > { %v4184_v37 = vrot.slane %v12880_v51, 1  ;;  %v4142_v20 = vshrl.u32 %v12932_v21, 16  ;;  %v4185_v50 = vrot.slane %v12866_v33, 1 }
 0x7d6   : > { %v4127_v56 = vor.u32 %v4126_v23, %v4122_v60  ;;  %v4106_v18 = vrot.slane %v4104_v42, 1 }
 0x7d7   : > { %v12962_v12 = vsel %vm1303_vm2, %v4184_v37, %v4185_v50 }
 0x7d8   : > { %v3965_v13 = vpop.permute.xlu2 %3964  ;;  %v12889_v57 = vsel %vm1206_vm3, %v4127_v56, %v4130_v54  ;;  %v4107_v58 = vor.u32 %v4106_v18, %v4102_v43  ;;  %v3735_v54 = vpack.c.b16 %v3712_v16, %v3712_v16  ;;  %v4160_v56 = vrot.slane %v4158_v28, 1 }
 0x7d9   : > { %4240 = vrot.lane.b32.xlu0 %v12889_v57, %s15894_s30  ;;  %v4065_v38 = vsel %vm1165_vm1, %v4017_v40, %v3965_v13  ;;  %v4187_v16 = vrot.slane %v12875_v29, 1 }
 0x7da   : > { %v3957_v45 = vpop.permute.xlu1 %3956  ;;  %v12896_v59 = vsel %vm1206_vm3, %v4107_v58, %v4110_v62  ;;  %v4138_v23 = vshll.u32 %v4065_v38, 16  ;;  %v4023_v13 = vsel %vm1104_vm0, %v3735_v54, %v12799_v3  ;;  %v4194_v10 = vrot.slane %v4065_v38, 1 }
 0x7db   : > { %v12901_v5 = vsel %vm1165_vm1, %v4005_v47, %v3957_v45  ;;  %4236 = vrot.lane.b32.xlu1 %v12896_v59, %s15894_s30  ;;  %v4146_v45 = vrot.slane %v4144_v35, 1 }
 0x7dc   : > { %v4118_v22 = vshll.u32 %v12901_v5, 16  ;;  %v4140_v1 = vrot.slane %v4138_v23, 1  ;;  %v4188_v40 = vrot.slane %v12901_v5, 1  ;;  %v4191_v5 = vrot.slane %v12857_v53, 1 }
 0x7dd   : > { %v4147_v32 = vor.u32 %v4146_v45, %v4142_v20  ;;  %v4200_v23 = vrot.slane %v12914_v2, 1  ;;  %v10165_v2 = vld [vmem:[%s10664_s13 + $0x150] sm:$0xff] }
 0x7de   : > { %v4120_v19 = vrot.slane %v4118_v22, 1  ;;  %v4178_v22 = vrot.slane %v12832_v34, 1  ;;  %v4032_v35 = vsel %vm1104_vm0, %v10165_v2, %v12803_v55 }
 0x7e0   : > { %v3971_v4 = vpop.permute.xlu2 %3970  ;;  %v12921_v14 = vsel %vm1206_vm3, %v4117_v26, %v4120_v19  ;;  %v4180_v33 = vsel %vm1303_vm2, %v4178_v22, %v4179_v24  ;;  %v4181_v19 = vrot.slane %v12825_v27, 1  ;;  %v4182_v26 = vrot.slane %v12817_v44, 1 }
 0x7e1   : > { %v12925_v39 = vsel %vm1165_vm1, %v4026_v41, %v3971_v4  ;;  %4238 = vrot.lane.b32.xlu2 %v12921_v14, %s15894_s30  ;;  %v4190_v44 = vrot.slane %v12869_v17, 1 }
 0x7e2   : > { %v3963_v0 = vpop.permute.xlu1 %3962  ;;  %v4154_v36 = vshll.u32 %v12925_v39, 16  ;;  %v4152_v42 = vshrl.u32 %v12925_v39, 16  ;;  %v4183_v4 = vsel %vm1303_vm2, %v4181_v19, %v4182_v26  ;;  %v4199_v53 = vrot.slane %v12925_v39, 1 }
 0x7e3   : > { %v12937_v60 = vsel %vm1165_vm1, %v4014_v11, %v3963_v0  ;;  %v12986_v11 = vsel %vm1303_vm2, %v4187_v16, %v4188_v40  ;;  %v12993_v28 = vsel %vm1303_vm2, %v4190_v44, %v4191_v5  ;;  %v4196_v0 = vrot.slane %v12932_v21, 1 }
 0x7e4   : > { %v4156_v46 = vrot.slane %v4154_v36, 1  ;;  %v4134_v9 = vshll.u32 %v12937_v60, 16  ;;  %v4132_v43 = vshrl.u32 %v12937_v60, 16  ;;  %v4193_v31 = vrot.slane %v12937_v60, 1 }
 0x7e6   : > { %v4157_v30 = vor.u32 %v4156_v46, %v4152_v42  ;;  %v4136_v18 = vrot.slane %v4134_v9, 1  ;;  %v12978_v41 = vsel %vm1303_vm2, %v4193_v31, %v4194_v10  ;;  %v13008_v42 = vsel %vm1303_vm2, %v4199_v53, %v4200_v23  ;;  %v9110_v46 = vld [vmem:[%s10664_s13 + $0x158] sm:$0x1]  ;;  %v10166_v31 = vld [vmem:[%s10664_s13 + $0x15c] sm:$0xff] }
 0x7e7   : > { %v3718_v9 = vunpack.c.l.b16 %v9110_v46 }
 0x7e8   : > { %v12944_v15 = vsel %vm1206_vm3, %v4157_v30, %v4160_v56  ;;  %v4137_v62 = vor.u32 %v4136_v18, %v4132_v43  ;;  %v3977_v43 = vpop.permute.xlu2 %3976 }
 0x7e9   : > { %4246 = vrot.lane.b32.xlu0 %v12944_v15, %s15894_s30  ;;  %v3739_v30 = vpack.c.b16 %v3718_v9, %v3718_v9 }
 0x7ea   : > { %v3969_v58 = vpop.permute.xlu1 %3968  ;;  %v12951_v47 = vsel %vm1206_vm3, %v4137_v62, %v4140_v1 }
 0x7eb   : > { %v4069_v8 = vsel %vm1165_vm1, %v4023_v13, %v3969_v58  ;;  %4242 = vrot.lane.b32.xlu1 %v12951_v47, %s15894_s30  ;;  %v4035_v1 = vsel %vm1104_vm0, %v3739_v30, %v12797_v63 }
 0x7ec   : > { %v4148_v49 = vshll.u32 %v4069_v8, 16  ;;  %v4197_v38 = vrot.slane %v4069_v8, 1  ;;  %v4077_v62 = vsel %vm1165_vm1, %v4035_v1, %v3977_v43 }
 0x7ed   : > { %v4208_v55 = vshll.u32 %v4077_v62, 16  ;;  %v4215_v50 = vrot.slane %v4077_v62, 1 }
 0x7ee   : > { %v4150_v3 = vrot.slane %v4148_v49, 1  ;;  %v13001_v36 = vsel %vm1303_vm2, %v4196_v0, %v4197_v38 }
 0x7ef   : > { %v4210_v8 = vrot.slane %v4208_v55, 1 }
 0x7f0   : > { %v12965_v61 = vsel %vm1206_vm3, %v4147_v32, %v4150_v3 }
 0x7f1   : > { %4252 = vrot.lane.b32.xlu0 %v12962_v12, %s15804_s1  ;;  %4244 = vrot.lane.b32.xlu2 %v12965_v61, %s15894_s30 }
 0x7f2   : > { %v3975_v54 = vpop.permute.xlu1 %3974 }
 0x7f3   : > { %4248 = vrot.lane.b32.xlu1 %v4180_v33, %s15804_s1  ;;  %v4075_v56 = vsel %vm1165_vm1, %v4032_v35, %v3975_v54  ;;  %v9113_v33 = vld [vmem:[%s10664_s13 + $0x164] sm:$0x1] }
 0x7f4   : > { %v4204_v18 = vshll.u32 %v4075_v56, 16  ;;  %v4202_v58 = vshrl.u32 %v4075_v56, 16  ;;  %v4214_v20 = vrot.slane %v4075_v56, 1  ;;  %v3721_v10 = vunpack.c.l.b16 %v9113_v33 }
 0x7f6   : > { %v4206_v13 = vrot.slane %v4204_v18, 1  ;;  %v4216_v24 = vsel %vm1303_vm2, %v4214_v20, %v4215_v50  ;;  %v3741_v16 = vpack.c.b16 %v3721_v10, %v3721_v10 }
 0x7f8   : > { %v4207_v45 = vor.u32 %v4206_v13, %v4202_v58  ;;  %v4041_v0 = vsel %vm1104_vm0, %v3741_v16, %v12808_v25 }
 0x7f9   : > { %4258 = vrot.lane.b32.xlu0 %v12978_v41, %s15804_s1  ;;  %4250 = vrot.lane.b32.xlu2 %v4183_v4, %s15804_s1 }
 0x7fa   : > { %v13042_v49 = vsel %vm1206_vm3, %v4207_v45, %v4210_v8  ;;  %v3981_v22 = vpop.permute.xlu1 %3980 }
 0x7fb   : > { %4254 = vrot.lane.b32.xlu1 %v12986_v11, %s15804_s1 }
 0x801   : > { %4264 = vrot.lane.b32.xlu0 %v12825_v27, %s15802_s8  ;;  %4256 = vrot.lane.b32.xlu2 %v12993_v28, %s15804_s1 }
 0x803   : > { %4260 = vrot.lane.b32.xlu1 %v13001_v36, %s15804_s1 }
 0x809   : > { %4270 = vrot.lane.b32.xlu0 %v12869_v17, %s15802_s8  ;;  %4262 = vrot.lane.b32.xlu2 %v13008_v42, %s15804_s1 }
 0x80b   : > { %4266 = vrot.lane.b32.xlu1 %v12880_v51, %s15802_s8 }
 0x811   : > { %4276 = vrot.lane.b32.xlu0 %v12925_v39, %s15802_s8  ;;  %4268 = vrot.lane.b32.xlu2 %v12875_v29, %s15802_s8 }
 0x813   : > { %4272 = vrot.lane.b32.xlu1 %v12937_v60, %s15802_s8 }
 0x819   : > { %4282 = vrot.lane.b32.xlu0 %v12896_v59, %s15799_s14  ;;  %4274 = vrot.lane.b32.xlu2 %v12932_v21, %s15802_s8 }
 0x81b   : > { %4278 = vrot.lane.b32.xlu1 %v4075_v56, %s15802_s8 }
 0x821   : > { %4288 = vrot.lane.b32.xlu0 %v12951_v47, %s15799_s14  ;;  %4280 = vrot.lane.b32.xlu2 %v12838_v6, %s15799_s14  ;;  %v3979_v6 = vpop.permute.xlu0 %3978 }
 0x823   : > { %4284 = vrot.lane.b32.xlu1 %v12921_v14, %s15799_s14 }
 0x829   : > { %4286 = vrot.lane.b32.xlu2 %v12889_v57, %s15799_s14  ;;  %4294 = vrot.lane.b32.xlu0 %v13042_v49, %s15799_s14 }
 0x82b   : > { %4290 = vrot.lane.b32.xlu1 %v12965_v61, %s15799_s14  ;;  %v13059_v63 = vpop.permute.xlu2 %4232 }
 0x82c   : > { %15921 = vst [vmem:[#allocation16_spill] sm:$0xff] %v13059_v63 }
 0x831   : > { %4292 = vrot.lane.b32.xlu2 %v12944_v15, %s15799_s14  ;;  %4300 = vrot.lane.b32.xlu0 %v12986_v11, %s15797_s9  ;;  %s15949_s14 = smov 48  }
 0x833   : > { %4296 = vrot.lane.b32.xlu1 %v4183_v4, %s15797_s9  ;;  %v4038_v4 = vsel %vm1104_vm0, %v10166_v31, %v12829_v52  ;;  %v4081_v52 = vsel %vm1165_vm1, %v4041_v0, %v3981_v22 }
 0x834   : > { %v4079_v44 = vsel %vm1165_vm1, %v4038_v4, %v3979_v6  ;;  %v4223_v46 = vshll.u32 %v4081_v52, 16 }
 0x835   : > { %v4219_v23 = vshll.u32 %v4079_v44, 16  ;;  %v4217_v25 = vshrl.u32 %v4079_v44, 16 }
 0x836   : > { %v4225_v54 = vrot.slane %v4223_v46, 1 }
 0x839   : > { %4298 = vrot.lane.b32.xlu2 %v12962_v12, %s15797_s9  ;;  %4306 = vrot.lane.b32.xlu0 %v13001_v36, %s15797_s9 }
 0x83b   : > { %4302 = vrot.lane.b32.xlu1 %v12993_v28, %s15797_s9  ;;  %v13067_v37 = vpop.permute.xlu2 %4238  ;;  %v13075_v3 = vpop.permute.xlu0 %4234 }
 0x841   : > { %4304 = vrot.lane.b32.xlu2 %v12978_v41, %s15797_s9  ;;  %4312 = vrot.lane.b32.xlu0 %v12880_v51, %s15922_s29 }
 0x843   : > { %4308 = vrot.lane.b32.xlu1 %v13008_v42, %s15797_s9 }
 0x849   : > { %4310 = vrot.lane.b32.xlu2 %v4216_v24, %s15797_s9  ;;  %4318 = vrot.lane.b32.xlu0 %v12937_v60, %s15922_s29  ;;  %s15950_s9 = smov 60  }
 0x84b   : > { %v13077_v32 = vpop.permute.xlu2 %4244  ;;  %4314 = vrot.lane.b32.xlu1 %v12875_v29, %s15922_s29  ;;  %v13086_v19 = vpop.permute.xlu0 %4240 }
 0x84d   : > { %v13092_v40 = vpop.permute.xlu1 %4236 }
 0x851   : > { %4316 = vrot.lane.b32.xlu2 %v12869_v17, %s15922_s29  ;;  %4324 = vrot.lane.b32.xlu0 %v4075_v56, %s15922_s29 }
 0x853   : > { %v13088_v26 = vpop.permute.xlu2 %4250  ;;  %4320 = vrot.lane.b32.xlu1 %v12932_v21, %s15922_s29 }
 0x859   : > { %4322 = vrot.lane.b32.xlu2 %v12925_v39, %s15922_s29  ;;  %4330 = vrot.lane.b32.xlu0 %v12921_v14, %s15923_s27  ;;  %v4221_v14 = vrot.slane %v4219_v23, 1 }
 0x85b   : > { %v13101_v5 = vpop.permute.xlu0 %4246  ;;  %v13103_v38 = vpop.permute.xlu2 %4256  ;;  %4326 = vrot.lane.b32.xlu1 %v4079_v44, %s15922_s29  ;;  %v4222_v56 = vor.u32 %v4221_v14, %v4217_v25 }
 0x85d   : > { %v13109_v53 = vpop.permute.xlu1 %4242  ;;  %v4226_v30 = vsel %vm1206_vm3, %v4222_v56, %v4225_v54 }
 0x861   : > { %4328 = vrot.lane.b32.xlu2 %v12896_v59, %s15923_s27  ;;  %4336 = vrot.lane.b32.xlu0 %v12965_v61, %s15923_s27 }
 0x863   : > { %v13115_v2 = vpop.permute.xlu0 %4252  ;;  %v13117_v9 = vpop.permute.xlu2 %4262  ;;  %4332 = vrot.lane.b32.xlu1 %v12889_v57, %s15923_s27 }
 0x865   : > { %v13121_v35 = vpop.permute.xlu1 %4248 }
 0x866   : > { %15924 = vst [vmem:[#allocation21_spill] sm:$0xff] %v13121_v35 }
 0x869   : > { %4334 = vrot.lane.b32.xlu2 %v12951_v47, %s15923_s27  ;;  %4342 = vrot.lane.b32.xlu0 %v4226_v30, %s15923_s27 }
 0x86b   : > { %v13127_v59 = vpop.permute.xlu0 %4258  ;;  %v13129_v61 = vpop.permute.xlu2 %4268  ;;  %4338 = vrot.lane.b32.xlu1 %v12944_v15, %s15923_s27 }
 0x86d   : > { %v13133_v57 = vpop.permute.xlu1 %4254 }
 0x871   : > { %4340 = vrot.lane.b32.xlu2 %v13042_v49, %s15923_s27  ;;  %4348 = vrot.lane.b32.xlu0 %v12993_v28, %s15866_s20 }
 0x873   : > { %v13139_v43 = vpop.permute.xlu0 %4264  ;;  %v13141_v47 = vpop.permute.xlu2 %4274  ;;  %4344 = vrot.lane.b32.xlu1 %v12962_v12, %s15866_s20 }
 0x874   : > { %15925 = vst [vmem:[#allocation15_spill] sm:$0xff] %v13139_v43 }
 0x875   : > { %v13145_v18 = vpop.permute.xlu1 %4260 }
 0x879   : > { %4346 = vrot.lane.b32.xlu2 %v12986_v11, %s15866_s20  ;;  %4354 = vrot.lane.b32.xlu0 %v13008_v42, %s15866_s20  ;;  %v4230_v11 = vrot.slane %v4081_v52, 1  ;;  %v4229_v42 = vrot.slane %v4079_v44, 1 }
 0x87b   : > { %v13151_v15 = vpop.permute.xlu0 %4270  ;;  %v13153_v1 = vpop.permute.xlu2 %4280  ;;  %4350 = vrot.lane.b32.xlu1 %v12978_v41, %s15866_s20  ;;  %v4231_v55 = vsel %vm1303_vm2, %v4229_v42, %v4230_v11 }
 0x87c   : > { %15926 = vst [vmem:[#allocation17_spill] sm:$0xff] %v13153_v1 }
 0x87d   : > { %v13157_v28 = vpop.permute.xlu1 %4266 }
 0x881   : > { %4352 = vrot.lane.b32.xlu2 %v13001_v36, %s15866_s20 }
 0x883   : > { %v4277_v12 = vpop.permute.xlu0 %4276  ;;  %v13161_v62 = vpop.permute.xlu2 %4286  ;;  %4356 = vrot.lane.b32.xlu1 %v4216_v24, %s15866_s20 }
 0x885   : > { %v13164_v13 = vpop.permute.xlu1 %4272 }
 0x889   : > { %4358 = vrot.lane.b32.xlu2 %v4231_v55, %s15866_s20 }
 0x88b   : > { %v13168_v58 = vpop.permute.xlu0 %4282  ;;  %v4293_v41 = vpop.permute.xlu2 %4292 }
 0x88d   : > { %v4279_v45 = vpop.permute.xlu1 %4278 }
 0x893   : > { %v13170_v8 = vpop.permute.xlu0 %4288  ;;  %v13172_v36 = vpop.permute.xlu2 %4298 }
 0x894   : > { %15927 = vst [vmem:[#allocation22_spill] sm:$0xff] %v13172_v36 }
 0x895   : > { %v13174_v49 = vpop.permute.xlu1 %4284 }
 0x89b   : > { %v13176_v6 = vpop.permute.xlu2 %4304  ;;  %v4295_v20 = vpop.permute.xlu0 %4294 }
 0x89d   : > { %v4291_v50 = vpop.permute.xlu1 %4290 }
 0x8a3   : > { %v4311_v24 = vpop.permute.xlu2 %4310  ;;  %v13178_v22 = vpop.permute.xlu0 %4300 }
 0x8a5   : > { %v13180_v33 = vpop.permute.xlu1 %4296 }
 0x8a6   : > { %15928 = vst [vmem:[#allocation14_spill] sm:$0xff] %v13180_v33 }
 0x8ab   : > { %v13182_v31 = vpop.permute.xlu2 %4316  ;;  %v4307_v10 = vpop.permute.xlu0 %4306 }
 0x8ad   : > { %v13184_v4 = vpop.permute.xlu1 %4302 }
 0x8b3   : > { %v4323_v16 = vpop.permute.xlu2 %4322  ;;  %v13186_v44 = vpop.permute.xlu0 %4312 }
 0x8b4   : > { %15929 = vst [vmem:[#allocation26_spill] sm:$0xff] %v13186_v44 }
 0x8b5   : > { %v4309_v0 = vpop.permute.xlu1 %4308 }
 0x8bb   : > { %v13188_v52 = vpop.permute.xlu2 %4328  ;;  %v13190_v23 = vpop.permute.xlu0 %4318 }
 0x8bc   : > { %15930 = vst [vmem:[#allocation18_spill] sm:$0xff] %v13188_v52  ;;  %v4375_v52 = vsel %vm1486_vm4, %v12925_v39, %v13101_v5 }
 0x8bd   : > { %v13192_v46 = vpop.permute.xlu1 %4314  ;;  %v4391_v33 = vsel %vm1503_vm5, %v4375_v52, %v13117_v9  ;;  %v4373_v9 = vsel %vm1486_vm4, %v12932_v21, %v13077_v32 }
 0x8be   : > { %15931 = vst [vmem:[#allocation27_spill] sm:$0xff] %v13192_v46  ;;  %v4407_v1 = vsel %vm1520_vm6, %v4391_v33, %v4279_v45 }
 0x8bf   : > { %v4423_v43 = vsel %vm1537_vm7, %v4407_v1, %v4295_v20  ;;  %v4371_v20 = vsel %vm1486_vm4, %v12937_v60, %v13109_v53 }
 0x8c0   : > { %v4439_v34 = vsel %vm1554_vm8, %v4423_v43, %v4311_v24  ;;  %v4389_v43 = vsel %vm1503_vm5, %v4373_v9, %v13145_v18  ;;  %v4387_v21 = vsel %vm1503_vm5, %v4371_v20, %v13127_v59  ;;  %v4369_v59 = vsel %vm1486_vm4, %v12869_v17, %v13086_v19  ;;  %v9330_v20 = vld [vmem:[%s10664_s13 + $0x1f4] sm:$0x1] }
 0x8c1   : > { %v4403_v18 = vsel %vm1520_vm6, %v4387_v21, %v13141_v47  ;;  %v4385_v47 = vsel %vm1503_vm5, %v4369_v59, %v13103_v38  ;;  %v4367_v19 = vsel %vm1486_vm4, %v12875_v29, %v13067_v37 }
 0x8c2   : > { %v4383_v38 = vsel %vm1503_vm5, %v4367_v19, %v13133_v57  ;;  %v4365_v57 = vsel %vm1486_vm4, %v12880_v51, %v13092_v40  ;;  %v9345_v19 = vld [vmem:[%s10664_s13 + $0x230] sm:$0x1] }
 0x8c3   : > { %v13194_v14 = vpop.permute.xlu2 %4334  ;;  %v4325_v25 = vpop.permute.xlu0 %4324 }
 0x8c5   : > { %v4321_v54 = vpop.permute.xlu1 %4320  ;;  %v15935_v9 = vld [vmem:[#allocation27_spill] sm:$0xff] }
 0x8cb   : > { %v4341_v56 = vpop.permute.xlu2 %4340  ;;  %v13196_v30 = vpop.permute.xlu0 %4330 }
 0x8cc   : > { %15932 = vst [vmem:[#allocation30_spill] sm:$0xff] %v13196_v30 }
 0x8cd   : > { %v4327_v11 = vpop.permute.xlu1 %4326 }
 0x8ce   : > { %v4455_v63 = vsel %vm1571_vm9, %v4439_v34, %v4327_v11  ;;  %v4405_v34 = vsel %vm1520_vm6, %v4389_v43, %v4277_v12  ;;  %v15938_v43 = vld [vmem:[#allocation16_spill] sm:$0xff] }
 0x8d3   : > { %v13198_v42 = vpop.permute.xlu2 %4346  ;;  %v4337_v48 = vpop.permute.xlu0 %4336 }
 0x8d4   : > { %15933 = vst [vmem:[#allocation31_spill] sm:$0xff] %v13198_v42 }
 0x8d5   : > { %v13200_v55 = vpop.permute.xlu1 %4332 }
 0x8db   : > { %v4353_v7 = vpop.permute.xlu2 %4352  ;;  %v4343_v35 = vpop.permute.xlu0 %4342 }
 0x8dc   : > { %v4471_v42 = vsel %vm1588_vm10, %v4455_v63, %v4343_v35  ;;  %v4421_v63 = vsel %vm1537_vm7, %v4405_v34, %v4293_v41  ;;  %v4419_v41 = vsel %vm1537_vm7, %v4403_v18, %v4291_v50  ;;  %v4401_v50 = vsel %vm1520_vm6, %v4385_v47, %v13164_v13  ;;  %v15939_v34 = vld [vmem:[#allocation19_spill] sm:$0xff] }
 0x8dd   : > { %v4339_v44 = vpop.permute.xlu1 %4338  ;;  %v4437_v35 = vsel %vm1554_vm8, %v4421_v63, %v4309_v0  ;;  %v4435_v0 = vsel %vm1554_vm8, %v4419_v41, %v4307_v10  ;;  %v4417_v10 = vsel %vm1537_vm7, %v4401_v50, %v13170_v8  ;;  %v4399_v13 = vsel %vm1520_vm6, %v4383_v38, %v13151_v15 }
 0x8de   : > { %v4453_v45 = vsel %vm1571_vm9, %v4437_v35, %v4325_v25  ;;  %v4451_v60 = vsel %vm1571_vm9, %v4435_v0, %v4323_v16  ;;  %v4433_v16 = vsel %vm1554_vm8, %v4417_v10, %v13176_v6  ;;  %v4415_v6 = vsel %vm1537_vm7, %v4399_v13, %v13161_v62  ;;  %v15940_v35 = vld [vmem:[#allocation21_spill] sm:$0xff]  ;;  %v9336_v10 = vld [vmem:[%s10664_s13 + $0x20c] sm:$0x1] }
 0x8df   : > { %v4469_v24 = vsel %vm1588_vm10, %v4453_v45, %v4341_v56  ;;  %v4467_v53 = vsel %vm1588_vm10, %v4451_v60, %v4339_v44  ;;  %v4449_v44 = vsel %vm1571_vm9, %v4433_v16, %v4321_v54  ;;  %v4381_v15 = vsel %vm1503_vm5, %v4365_v57, %v13115_v2  ;;  %v10197_v54 = vld [vmem:[%s10664_s13 + $0x1e0] sm:$0xff] }
 0x8e0   : > { %v4465_v56 = vsel %vm1588_vm10, %v4449_v44, %v4337_v48  ;;  %v4397_v62 = vsel %vm1520_vm6, %v4381_v15, %v13129_v61  ;;  %4776 = vrot.lane.b32.xlu2 %v10197_v54, %s15837_s12  ;;  %v4361_v63 = vsel %vm1486_vm4, %v15939_v34, %v15938_v43  ;;  %v4731_v0 = vunpack.c.l.b16 %v9330_v20  ;;  %v10431_v16 = vld [vmem:[%s15772_s3] sm:$0xf]  ;;  %v9363_v15 = vld [vmem:[%s10664_s13 + $0x278] sm:$0x1] }
 0x8e1   : > { %v4481_v17 = vsel %vm1605_vm11, %v4465_v56, %v4353_v7  ;;  %v4431_v7 = vsel %vm1554_vm8, %v4415_v6, %v13184_v4  ;;  %v4377_v45 = vsel %vm1503_vm5, %v4361_v63, %v15940_v35  ;;  %v10201_v56 = vld [vmem:[%s10664_s13 + $0x210] sm:$0xff]  ;;  %v4746_v38 = vunpack.c.l.b16 %v9345_v19  ;;  %v9381_v43 = vld [vmem:[%s10664_s13 + $0x2c0] sm:$0x1] }
 0x8e2   : > { %v4496_v8 = vsel %vm1622_vm12, %v4481_v17, 0  ;;  %v4447_v48 = vsel %vm1571_vm9, %v4431_v7, %v13190_v23  ;;  %v4413_v23 = vsel %vm1537_vm7, %v4397_v62, %v13174_v49  ;;  %v4363_v49 = vsel %vm1486_vm4, %v12825_v27, %v13075_v3  ;;  %v15936_v3 = vld [vmem:[#allocation30_spill] sm:$0xff]  ;;  %v9354_v6 = vld [vmem:[%s10664_s13 + $0x254] sm:$0x1] }
 0x8e3   : > { %v4359_v30 = vpop.permute.xlu2 %4358  ;;  %v4349_v1 = vpop.permute.xlu0 %4348  ;;  %v4463_v29 = vsel %vm1588_vm10, %v4447_v48, %v13194_v14  ;;  %v4429_v14 = vsel %vm1554_vm8, %v4413_v23, %v13178_v22  ;;  %v4379_v22 = vsel %vm1503_vm5, %v4363_v49, %v13088_v26  ;;  %v4759_v47 = vpack.c.b16 %v4731_v0, %v4731_v0  ;;  %v10202_v17 = vld [vmem:[%s10664_s13 + $0x21c] sm:$0xff]  ;;  %v10209_v0 = vld [vmem:[%s10664_s13 + $0x270] sm:$0xff] }
 0x8e4   : > { %v4487_v46 = vsel %vm1605_vm11, %v4471_v42, %v4359_v30  ;;  %v9327_v30 = vld [vmem:[%s10664_s13 + $0x1e8] sm:$0x1]  ;;  %v4445_v40 = vsel %vm1571_vm9, %v4429_v14, %v13182_v31  ;;  %v4395_v42 = vsel %vm1520_vm6, %v4379_v22, %v13157_v28  ;;  %v4769_v13 = vpack.c.b16 %v4746_v38, %v4746_v38  ;;  %v9372_v22 = vld [vmem:[%s10664_s13 + $0x29c] sm:$0x1]  ;;  %v9357_v20 = vld [vmem:[%s10664_s13 + $0x260] sm:$0x1] }
 0x8e5   : > { %v13213_v36 = vpop.permute.xlu1 %4344  ;;  %v4502_v39 = vsel %vm1622_vm12, %v4487_v46, 0  ;;  %v4728_v51 = vunpack.c.l.b16 %v9327_v30  ;;  %v4461_v2 = vsel %vm1588_vm10, %v4445_v40, %v13200_v55  ;;  %v15934_v55 = vld [vmem:[#allocation22_spill] sm:$0xff]  ;;  %v4755_v7 = vunpack.c.l.b16 %v9354_v6  ;;  %v10211_v14 = vld [vmem:[%s10664_s13 + $0x288] sm:$0xff]  ;;  %v9339_v40 = vld [vmem:[%s10664_s13 + $0x218] sm:$0x1] }
 0x8e6   : > { %4504 = vmatpush.bf16.xpose.msra.mxu3 %v4502_v39  ;;  %v4477_v61 = vsel %vm1605_vm11, %v4461_v2, %v4349_v1  ;;  %v4411_v39 = vsel %vm1537_vm7, %v4395_v42, %v13168_v58  ;;  %v15937_v1 = vld [vmem:[#allocation31_spill] sm:$0xff]  ;;  %v4854_v62 = vunpack.c.l.b16 %v9363_v15  ;;  %v9333_v30 = vld [vmem:[%s10664_s13 + $0x200] sm:$0x1]  ;;  %v4740_v2 = vunpack.c.l.b16 %v9339_v40  ;;  %v9378_v38 = vld [vmem:[%s10664_s13 + $0x2b4] sm:$0x1] }
 0x8e7   : > { %v4757_v11 = vpack.c.b16 %v4728_v51, %v4728_v51  ;;  %v4492_v31 = vsel %vm1622_vm12, %v4477_v61, 0  ;;  %v10198_v58 = vld [vmem:[%s10664_s13 + $0x1ec] sm:$0xff]  ;;  %v4775_v48 = vpack.c.b16 %v4755_v7, %v4755_v7  ;;  %v4734_v23 = vunpack.c.l.b16 %v9333_v30  ;;  %v10200_v61 = vld [vmem:[%s10664_s13 + $0x204] sm:$0xff]  ;;  %v10215_v6 = vld [vmem:[%s10664_s13 + $0x2b8] sm:$0xff] }
 0x8e8   : > { %v4765_v49 = vpack.c.b16 %v4740_v2, %v4740_v2  ;;  %v4863_v42 = vunpack.c.l.b16 %v9372_v22  ;;  %v4872_v63 = vunpack.c.l.b16 %v9381_v43 }
 0x8e9   : > { %4778 = vrot.lane.b32.xlu2 %v4757_v11, %s15837_s12  ;;  %v4761_v51 = vpack.c.b16 %v4734_v23, %v4734_v23  ;;  %v9342_v11 = vld [vmem:[%s10664_s13 + $0x224] sm:$0x1] }
 0x8eb   : > { %v4355_v52 = vpop.permute.xlu0 %4354 }
 0x8ec   : > { %v4483_v46 = vsel %vm1605_vm11, %v4467_v53, %v4355_v52  ;;  %v15944_v52 = vld [vmem:[#allocation26_spill] sm:$0xff] }
 0x8ed   : > { %v4351_v5 = vpop.permute.xlu1 %4350  ;;  %v4498_v25 = vsel %vm1622_vm12, %v4483_v46, 0  ;;  %v15945_v53 = vld [vmem:[#allocation18_spill] sm:$0xff] }
 0x8ee   : > { %v4479_v37 = vsel %vm1605_vm11, %v4463_v29, %v4351_v5  ;;  %v4427_v5 = vsel %vm1554_vm8, %v4411_v39, %v15934_v55  ;;  %v10208_v29 = vld [vmem:[%s10664_s13 + $0x264] sm:$0xff]  ;;  %v4887_v39 = vpack.c.b16 %v4863_v42, %v4863_v42 }
 0x8ef   : > { %v4494_v4 = vsel %vm1622_vm12, %v4479_v37, 0  ;;  %v4443_v27 = vsel %vm1571_vm9, %v4427_v5, %v15935_v9  ;;  %v10203_v5 = vld [vmem:[%s10664_s13 + $0x228] sm:$0xff]  ;;  %v9348_v9 = vld [vmem:[%s10664_s13 + $0x23c] sm:$0x1] }
 0x8f0   : > { %v4459_v26 = vsel %vm1588_vm10, %v4443_v27, %v15936_v3  ;;  %v10214_v27 = vld [vmem:[%s10664_s13 + $0x2ac] sm:$0xff]  ;;  %v4749_v3 = vunpack.c.l.b16 %v9348_v9  ;;  %v10188_v9 = vld [vmem:[%s10664_s13 + $0x174] sm:$0xff] }
 0x8f1   : > { %v4475_v28 = vsel %vm1605_vm11, %v4459_v26, %v15937_v1  ;;  %4780 = vrot.lane.b32.xlu2 %v10198_v58, %s15837_s12  ;;  %v10204_v26 = vld [vmem:[%s10664_s13 + $0x234] sm:$0xff]  ;;  %v4893_v58 = vpack.c.b16 %v4872_v63, %v4872_v63 }
 0x8f2   : > { %v4490_v21 = vsel %vm1622_vm12, %v4475_v28, 0  ;;  %v4771_v1 = vpack.c.b16 %v4749_v3, %v4749_v3  ;;  %v9351_v28 = vld [vmem:[%s10664_s13 + $0x248] sm:$0x1] }
 0x8f3   : > { %v4752_v34 = vunpack.c.l.b16 %v9351_v28  ;;  %v9303_v3 = vld [vmem:[%s10664_s13 + $0x188] sm:$0x1] }
 0x8f4   : > { %v4654_v43 = vunpack.c.l.b16 %v9303_v3  ;;  %v9309_v3 = vld [vmem:[%s10664_s13 + $0x1a0] sm:$0x1] }
 0x8f5   : > { %v4357_v33 = vpop.permute.xlu1 %4356  ;;  %v4773_v35 = vpack.c.b16 %v4752_v34, %v4752_v34 }
 0x8f6   : > { %v4485_v32 = vsel %vm1605_vm11, %v4469_v24, %v4357_v33  ;;  %v15941_v24 = vld [vmem:[#allocation15_spill] sm:$0xff] }
 0x8f7   : > { %v4500_v12 = vsel %vm1622_vm12, %v4485_v32, 0  ;;  %v4393_v33 = vsel %vm1520_vm6, %v4377_v45, %v15941_v24  ;;  %v15942_v32 = vld [vmem:[#allocation17_spill] sm:$0xff]  ;;  %v10206_v45 = vld [vmem:[%s10664_s13 + $0x24c] sm:$0xff]  ;;  %v4848_v24 = vunpack.c.l.b16 %v9357_v20 }
 0x8f8   : > { %4505 = vmatpush.bf16.xpose.msra.mxu3 %v4500_v12  ;;  %v4409_v18 = vsel %vm1537_vm7, %v4393_v33, %v15942_v32  ;;  %v15943_v12 = vld [vmem:[#allocation14_spill] sm:$0xff]  ;;  %v10207_v33 = vld [vmem:[%s10664_s13 + $0x258] sm:$0xff]  ;;  %v9360_v32 = vld [vmem:[%s10664_s13 + $0x26c] sm:$0x1] }
 0x8f9   : > { %v4425_v41 = vsel %vm1554_vm8, %v4409_v18, %v15943_v12  ;;  %4782 = vrot.lane.b32.xlu2 %v4759_v47, %s15837_s12  ;;  %v4851_v12 = vunpack.c.l.b16 %v9360_v32  ;;  %v9369_v47 = vld [vmem:[%s10664_s13 + $0x290] sm:$0x1] }
 0x8fa   : > { %v4441_v60 = vsel %vm1571_vm9, %v4425_v41, %v15944_v52  ;;  %v9366_v52 = vld [vmem:[%s10664_s13 + $0x284] sm:$0x1] }
 0x8fb   : > { %v4457_v46 = vsel %vm1588_vm10, %v4441_v60, %v15945_v53  ;;  %v4879_v41 = vpack.c.b16 %v4851_v12, %v4851_v12  ;;  %v4857_v53 = vunpack.c.l.b16 %v9366_v52  ;;  %v9306_v52 = vld [vmem:[%s10664_s13 + $0x194] sm:$0x1] }
 0x8fc   : > { %v4473_v59 = vsel %vm1605_vm11, %v4457_v46, %v13213_v36  ;;  %v4737_v36 = vunpack.c.l.b16 %v9336_v10  ;;  %v10210_v46 = vld [vmem:[%s10664_s13 + $0x27c] sm:$0xff] }
 0x8fd   : > { %v4488_v50 = vsel %vm1622_vm12, %v4473_v59, 0  ;;  %v4883_v59 = vpack.c.b16 %v4857_v53, %v4857_v53 }
 0x8fe   : > { %v4763_v44 = vpack.c.b16 %v4737_v36, %v4737_v36  ;;  %v9375_v36 = vld [vmem:[%s10664_s13 + $0x2a8] sm:$0x1] }
 0x900   : > { %4506 = vmatpush.bf16.xpose.msra.mxu3 %v4498_v25  ;;  %v10199_v25 = vld [vmem:[%s10664_s13 + $0x1f8] sm:$0xff] }
 0x901   : > { %4784 = vrot.lane.b32.xlu2 %v10199_v25, %s15837_s12 }
 0x908   : > { %4507 = vmatpush.bf16.xpose.msra.mxu3 %v4496_v8  ;;  %v10205_v8 = vld [vmem:[%s10664_s13 + $0x240] sm:$0xff] }
 0x909   : > { %4790 = vrot.lane.b32.xlu2 %v4763_v44, %s15837_s12  ;;  %v4866_v44 = vunpack.c.l.b16 %v9375_v36 }
 0x90b   : > { %v4889_v19 = vpack.c.b16 %v4866_v44, %v4866_v44 }
 0x910   : > { %4508 = vmatpush.bf16.xpose.msra.mxu3 %v4494_v4  ;;  %v4881_v4 = vpack.c.b16 %v4854_v62, %v4854_v62 }
 0x911   : > { %4792 = vrot.lane.b32.xlu2 %v10201_v56, %s15837_s12 }
 0x918   : > { %4509 = vmatpush.bf16.xpose.msra.mxu3 %v4492_v31  ;;  %v4743_v31 = vunpack.c.l.b16 %v9342_v11 }
 0x919   : > { %4796 = vrot.lane.b32.xlu2 %v10202_v17, %s15837_s12  ;;  %v10213_v17 = vld [vmem:[%s10664_s13 + $0x2a0] sm:$0xff] }
 0x91a   : > { %v4767_v55 = vpack.c.b16 %v4743_v31, %v4743_v31  ;;  %v9297_v31 = vld [vmem:[%s10664_s13 + $0x170] sm:$0x1] }
 0x920   : > { %4510 = vmatpush.bf16.xpose.msra.mxu3 %v4490_v21  ;;  %v4877_v21 = vpack.c.b16 %v4848_v24, %v4848_v24  ;;  %v4681_v24 = vpack.c.b16 %v4654_v43, %v4654_v43 }
 0x921   : > { %4802 = vrot.lane.b32.xlu2 %v4769_v13, %s15837_s12  ;;  %v4869_v13 = vunpack.c.l.b16 %v9378_v38 }
 0x928   : > { %4511 = vmatpush.bf16.xpose.msra.mxu3 %v4488_v50  ;;  %v4860_v50 = vunpack.c.l.b16 %v9369_v47 }
 0x929   : > { %4808 = vrot.lane.b32.xlu2 %v10205_v8, %s15837_s12  ;;  %v4891_v8 = vpack.c.b16 %v4869_v13, %v4869_v13 }
 0x92a   : > { %v4885_v10 = vpack.c.b16 %v4860_v50, %v4860_v50 }
 0x92f   : > { %9294 = vmatmul.msk.bf16.vlgmr.msra.gmra.mxu3 %vm1622_vm12, %v10431_v16  ;;  %v10212_v16 = vld [vmem:[%s10664_s13 + $0x294] sm:$0xff] }
 0x931   : > { %4814 = vrot.lane.b32.xlu2 %v4775_v48, %s15837_s12  ;;  %v9384_v48 = vld [vmem:[%s10664_s13 + $0x2cc] sm:$0x1] }
 0x939   : > { %4900 = vrot.lane.b32.xlu2 %v10208_v29, %s15840_s18  ;;  %v4875_v29 = vunpack.c.l.b16 %v9384_v48  ;;  %v9312_v48 = vld [vmem:[%s10664_s13 + $0x1ac] sm:$0x1] }
 0x93a   : > { %v13386_v18 = vpop.permute.xlu2 %4776 }
 0x941   : > { %4906 = vrot.lane.b32.xlu2 %v4881_v4, %s15840_s18 }
 0x943   : > { %v13392_v60 = vpop.permute.xlu2 %4778 }
 0x949   : > { %4912 = vrot.lane.b32.xlu2 %v10211_v14, %s15840_s18 }
 0x94b   : > { %v4781_v25 = vpop.permute.xlu2 %4780 }
 0x94c   : > { %v4944_v34 = vsel %vm1104_vm0, %v10188_v9, %v4781_v25 }
 0x951   : > { %4918 = vrot.lane.b32.xlu2 %v4887_v39, %s15840_s18 }
 0x953   : > { %v13404_v56 = vpop.permute.xlu2 %4782 }
 0x959   : > { %4924 = vrot.lane.b32.xlu2 %v10214_v27, %s15840_s18 }
 0x95b   : > { %v13411_v7 = vpop.permute.xlu2 %4784 }
 0x961   : > { %4930 = vrot.lane.b32.xlu2 %v4893_v58, %s15840_s18 }
 0x963   : > { %v13417_v15 = vpop.permute.xlu2 %4790 }
 0x96b   : > { %v13421_v62 = vpop.permute.xlu2 %4792 }
 0x9b2   : > { %v4513_v37 = vpop.f32.mrf.mxu3 }
 0x9b3   : > { %4517 = vst [vmem:[%s11747_s7 + $0x18] sm:$0xff] %v4513_v37  ;;  %v4521_v57 = vmul.f32 %v4513_v37, %v4513_v37  ;;  %4518 = vadd.xlane.f32.xlu0 %v4513_v37  ;;  %v10216_v37 = vld [vmem:[%s10664_s13 + $0x2c4] sm:$0xff] }
 0x9b5   : > { %4522 = vadd.xlane.f32.xlu1 %v4521_v57  ;;  %v4895_v57 = vpack.c.b16 %v4875_v29, %v4875_v29 }
 0x9ba   : > { %v4515_v54 = vpop.f32.mrf.mxu3 }
 0x9bb   : > { %v13425_v54 = vpop.permute.xlu2 %4796 }
 0x9c3   : > { %v13429_v14 = vpop.permute.xlu2 %4802 }
 0x9c7   : > { %4786 = vrot.lane.b32.xlu0 %v4761_v51, %s15837_s12 }
 0x9cb   : > { %v13435_v2 = vpop.permute.xlu2 %4808 }
 0x9ce   : > { %4788 = vrot.lane.b32.xlu1 %v10200_v61, %s15837_s12 }
 0x9cf   : > { %4794 = vrot.lane.b32.xlu0 %v4765_v49, %s15837_s12 }
 0x9d3   : > { %v13441_v11 = vpop.permute.xlu2 %4814 }
 0x9d6   : > { %4798 = vrot.lane.b32.xlu1 %v4767_v55, %s15837_s12  ;;  %v4648_v55 = vunpack.c.l.b16 %v9297_v31 }
 0x9d7   : > { %4800 = vrot.lane.b32.xlu0 %v10203_v5, %s15837_s12 }
 0x9d8   : > { %v4677_v28 = vpack.c.b16 %v4648_v55, %v4648_v55 }
 0x9db   : > { %v4901_v27 = vpop.permute.xlu2 %4900 }
 0x9dc   : > { %v13462_v20 = vsel %vm1165_vm1, %v4944_v34, %v4901_v27 }
 0x9dd   : > { %v5046_v36 = vshrl.u32 %v13462_v20, 16 }
 0x9de   : > { %4804 = vrot.lane.b32.xlu1 %v10204_v26, %s15837_s12  ;;  %v10187_v26 = vld [vmem:[%s10664_s13 + $0x168] sm:$0xff] }
 0x9df   : > { %4806 = vrot.lane.b32.xlu0 %v4771_v1, %s15837_s12  ;;  %v9300_v1 = vld [vmem:[%s10664_s13 + $0x17c] sm:$0x1]  ;;  %v4938_v58 = vsel %vm1104_vm0, %v10187_v26, %v13386_v18  ;;  %v4663_v26 = vunpack.c.l.b16 %v9312_v48 }
 0x9e0   : > { %v4651_v63 = vunpack.c.l.b16 %v9300_v1 }
 0x9e2   : > { %v4679_v18 = vpack.c.b16 %v4651_v63, %v4651_v63 }
 0x9e3   : > { %v4907_v32 = vpop.permute.xlu2 %4906 }
 0x9e6   : > { %4810 = vrot.lane.b32.xlu1 %v4773_v35, %s15837_s12 }
 0x9e7   : > { %4812 = vrot.lane.b32.xlu0 %v10206_v45, %s15837_s12  ;;  %v4941_v45 = vsel %vm1104_vm0, %v4677_v28, %v13392_v60  ;;  %v5048_v60 = vshll.u32 %v13462_v20, 16 }
 0x9e9   : > { %v5050_v44 = vrot.slane %v5048_v60, 1 }
 0x9eb   : > { %v4913_v55 = vpop.permute.xlu2 %4912  ;;  %v5051_v27 = vor.u32 %v5050_v44, %v5046_v36 }
 0x9ee   : > { %4896 = vrot.lane.b32.xlu1 %v10207_v33, %s15840_s18 }
 0x9ef   : > { %4898 = vrot.lane.b32.xlu0 %v4877_v21, %s15840_s18 }
 0x9f6   : > { %4902 = vrot.lane.b32.xlu1 %v4879_v41, %s15840_s18 }
 0x9f7   : > { %4904 = vrot.lane.b32.xlu0 %v10209_v0, %s15840_s18 }
 0x9fe   : > { %4908 = vrot.lane.b32.xlu1 %v10210_v46, %s15840_s18 }
 0x9ff   : > { %4910 = vrot.lane.b32.xlu0 %v4883_v59, %s15840_s18  ;;  %v10189_v59 = vld [vmem:[%s10664_s13 + $0x180] sm:$0xff] }
 0xa00   : > { %v4950_v13 = vsel %vm1104_vm0, %v10189_v59, %v13411_v7  ;;  %v10190_v7 = vld [vmem:[%s10664_s13 + $0x18c] sm:$0xff] }
 0xa06   : > { %4914 = vrot.lane.b32.xlu1 %v4885_v10, %s15840_s18  ;;  %v4947_v10 = vsel %vm1104_vm0, %v4679_v18, %v13404_v56  ;;  %v10191_v56 = vld [vmem:[%s10664_s13 + $0x198] sm:$0xff] }
 0xa07   : > { %4916 = vrot.lane.b32.xlu0 %v10212_v16, %s15840_s18  ;;  %v4657_v16 = vunpack.c.l.b16 %v9306_v52  ;;  %v4962_v43 = vsel %vm1104_vm0, %v10191_v56, %v13421_v62  ;;  %v4687_v62 = vpack.c.b16 %v4663_v26, %v4663_v26  ;;  %v9318_v26 = vld [vmem:[%s10664_s13 + $0x1c4] sm:$0x1] }
 0xa09   : > { %v4683_v31 = vpack.c.b16 %v4657_v16, %v4657_v16  ;;  %v9315_v16 = vld [vmem:[%s10664_s13 + $0x1b8] sm:$0x1] }
 0xa0a   : > { %v4666_v48 = vunpack.c.l.b16 %v9315_v16 }
 0xa0e   : > { %4920 = vrot.lane.b32.xlu1 %v10213_v17, %s15840_s18 }
 0xa0f   : > { %4922 = vrot.lane.b32.xlu0 %v4889_v19, %s15840_s18 }
 0xa16   : > { %4926 = vrot.lane.b32.xlu1 %v4891_v8, %s15840_s18 }
 0xa17   : > { %4928 = vrot.lane.b32.xlu0 %v10215_v6, %s15840_s18 }
 0xa1e   : > { %4932 = vrot.lane.b32.xlu1 %v10216_v37, %s15840_s18 }
 0xa1f   : > { %4934 = vrot.lane.b32.xlu0 %v4895_v57, %s15840_s18 }
 0xa26   : > { %v13423_v4 = vpop.xlane.xlu0 %4518 }
 0xa27   : > { %15946 = vst [vmem:[#allocation22_spill] sm:$0xff] %v13423_v4 }
 0xa28   : > { %v13427_v30 = vpop.xlane.xlu1 %4522 }
 0xa29   : > { %15947 = vst [vmem:[#allocation27_spill] sm:$0xff] %v13427_v30 }
 0xa39   : > { %v4787_v23 = vpop.permute.xlu0 %4786 }
 0xa3a   : > { %v4953_v47 = vsel %vm1104_vm0, %v4681_v24, %v4787_v23  ;;  %v4660_v24 = vunpack.c.l.b16 %v9309_v3  ;;  %v4689_v3 = vpack.c.b16 %v4666_v48, %v4666_v48 }
 0xa3b   : > { %v13481_v17 = vsel %vm1165_vm1, %v4953_v47, %v4907_v32  ;;  %v13513_v32 = vsel %vm1165_vm1, %v4962_v43, %v4913_v55 }
 0xa3c   : > { %v5062_v57 = vshll.u32 %v13481_v17, 16  ;;  %v4685_v60 = vpack.c.b16 %v4660_v24, %v4660_v24  ;;  %v5078_v47 = vshll.u32 %v13513_v32, 16  ;;  %v5076_v44 = vshrl.u32 %v13513_v32, 16 }
 0xa3e   : > { %v5064_v63 = vrot.slane %v5062_v57, 1  ;;  %v5080_v56 = vrot.slane %v5078_v47, 1 }
 0xa40   : > { %v13431_v51 = vpop.permute.xlu1 %4788 }
 0xa41   : > { %v13433_v40 = vpop.permute.xlu0 %4794 }
 0xa48   : > { %v13437_v61 = vpop.permute.xlu1 %4798 }
 0xa49   : > { %v13439_v49 = vpop.permute.xlu0 %4800 }
 0xa50   : > { %v13443_v22 = vpop.permute.xlu1 %4804 }
 0xa51   : > { %v13445_v42 = vpop.permute.xlu0 %4806 }
 0xa58   : > { %v13448_v39 = vpop.permute.xlu1 %4810 }
 0xa59   : > { %v13450_v5 = vpop.permute.xlu0 %4812 }
 0xa60   : > { %v4897_v35 = vpop.permute.xlu1 %4896 }
 0xa61   : > { %v13465_v33 = vsel %vm1165_vm1, %v4938_v58, %v4897_v35  ;;  %v4899_v21 = vpop.permute.xlu0 %4898  ;;  %v4959_v35 = vsel %vm1104_vm0, %v4683_v31, %v13417_v15 }
 0xa62   : > { %15948 = vst [vmem:[#allocation30_spill] sm:$0xff] %v13465_v33  ;;  %v5038_v12 = vshll.u32 %v13465_v33, 16  ;;  %v13469_v41 = vsel %vm1165_vm1, %v4941_v45, %v4899_v21  ;;  %v5036_v53 = vshrl.u32 %v13465_v33, 16  ;;  %v4956_v45 = vsel %vm1104_vm0, %v10190_v7, %v13431_v51 }
 0xa63   : > { %v5042_v0 = vshll.u32 %v13469_v41, 16 }
 0xa64   : > { %v5040_v46 = vrot.slane %v5038_v12, 1 }
 0xa65   : > { %v5044_v50 = vrot.slane %v5042_v0, 1 }
 0xa66   : > { %v5041_v25 = vor.u32 %v5040_v46, %v5036_v53  ;;  %v4919_v53 = vpop.permute.xlu2 %4918 }
 0xa68   : > { %v4903_v19 = vpop.permute.xlu1 %4902  ;;  %v5045_v38 = vsel %vm1206_vm3, %v5041_v25, %v5044_v50  ;;  %v10192_v50 = vld [vmem:[%s10664_s13 + $0x1a4] sm:$0xff]  ;;  %v4971_v25 = vsel %vm1104_vm0, %v4687_v62, %v13437_v61 }
 0xa69   : > { %v13487_v8 = vsel %vm1165_vm1, %v4947_v10, %v4903_v19  ;;  %v4905_v6 = vpop.permute.xlu0 %4904  ;;  %5186 = vrot.lane.b32.xlu2 %v5045_v38, %s15894_s30  ;;  %v4965_v19 = vsel %vm1104_vm0, %v4685_v60, %v13433_v40  ;;  %v13538_v38 = vsel %vm1165_vm1, %v4971_v25, %v4919_v53  ;;  %v4968_v61 = vsel %vm1104_vm0, %v10192_v50, %v13425_v54  ;;  %v10194_v40 = vld [vmem:[%s10664_s13 + $0x1bc] sm:$0xff] }
 0xa6a   : > { %v5052_v29 = vshll.u32 %v13487_v8, 16  ;;  %v13494_v37 = vsel %vm1165_vm1, %v4950_v13, %v4905_v6  ;;  %v5092_v55 = vshll.u32 %v13538_v38, 16  ;;  %v4980_v43 = vsel %vm1104_vm0, %v10194_v40, %v13443_v22 }
 0xa6b   : > { %v5058_v23 = vshll.u32 %v13494_v37, 16  ;;  %v5056_v1 = vshrl.u32 %v13494_v37, 16  ;;  %v5132_v25 = vrot.slane %v13465_v33, 1  ;;  %v5136_v40 = vrot.slane %v13487_v8, 1 }
 0xa6c   : > { %v5054_v9 = vrot.slane %v5052_v29, 1 }
 0xa6d   : > { %v5060_v28 = vrot.slane %v5058_v23, 1 }
 0xa6e   : > { %v13504_v34 = vsel %vm1206_vm3, %v5051_v27, %v5054_v9  ;;  %v10193_v9 = vld [vmem:[%s10664_s13 + $0x1b0] sm:$0xff]  ;;  %v5081_v27 = vor.u32 %v5080_v56, %v5076_v44 }
 0xa6f   : > { %5188 = vrot.lane.b32.xlu1 %v13504_v34, %s15894_s30  ;;  %v5061_v58 = vor.u32 %v5060_v28, %v5056_v1  ;;  %v4974_v24 = vsel %vm1104_vm0, %v10193_v9, %v13439_v49 }
 0xa70   : > { %v4909_v21 = vpop.permute.xlu1 %4908 }
 0xa71   : > { %v13516_v12 = vsel %vm1165_vm1, %v4956_v45, %v4909_v21  ;;  %v4911_v18 = vpop.permute.xlu0 %4910  ;;  %v13519_v0 = vsel %vm1206_vm3, %v5061_v58, %v5064_v63  ;;  %v4925_v63 = vpop.permute.xlu2 %4924  ;;  %v4669_v21 = vunpack.c.l.b16 %v9318_v26 }
 0xa72   : > { %v13522_v15 = vsel %vm1165_vm1, %v4959_v35, %v4911_v18  ;;  %5190 = vrot.lane.b32.xlu0 %v13519_v0, %s15894_s30  ;;  %v5068_v51 = vshll.u32 %v13516_v12, 16  ;;  %v5066_v46 = vshrl.u32 %v13516_v12, 16  ;;  %v5094_v35 = vrot.slane %v5092_v55, 1 }
 0xa73   : > { %v5072_v52 = vshll.u32 %v13522_v15, 16  ;;  %v4977_v18 = vsel %vm1104_vm0, %v4689_v3, %v13429_v14  ;;  %v5142_v55 = vrot.slane %v13522_v15, 1  ;;  %v5138_v15 = vrot.slane %v13494_v37, 1 }
 0xa74   : > { %v5070_v59 = vrot.slane %v5068_v51, 1  ;;  %v13572_v51 = vsel %vm1165_vm1, %v4980_v43, %v4925_v63  ;;  %v5139_v3 = vrot.slane %v13481_v17, 1  ;;  %v5144_v63 = vrot.slane %v13513_v32, 1 }
 0xa75   : > { %v5074_v10 = vrot.slane %v5072_v52, 1  ;;  %v5108_v50 = vshll.u32 %v13572_v51, 16  ;;  %v5106_v56 = vshrl.u32 %v13572_v51, 16 }
 0xa76   : > { %v5071_v36 = vor.u32 %v5070_v59, %v5066_v46  ;;  %v4691_v59 = vpack.c.b16 %v4669_v21, %v4669_v21  ;;  %v13620_v43 = vsel %vm1303_vm2, %v5138_v15, %v5139_v3 }
 0xa78   : > { %v4915_v13 = vpop.permute.xlu1 %4914  ;;  %v13541_v6 = vsel %vm1206_vm3, %v5071_v36, %v5074_v10  ;;  %v5133_v10 = vrot.slane %v13469_v41, 1  ;;  %v4983_v44 = vsel %vm1104_vm0, %v4691_v59, %v13445_v42 }
 0xa79   : > { %v13546_v29 = vsel %vm1165_vm1, %v4965_v19, %v4915_v13  ;;  %v4917_v57 = vpop.permute.xlu0 %4916  ;;  %5192 = vrot.lane.b32.xlu2 %v13541_v6, %s15894_s30 }
 0xa7a   : > { %v5082_v23 = vshll.u32 %v13546_v29, 16  ;;  %v13553_v31 = vsel %vm1165_vm1, %v4968_v61, %v4917_v57  ;;  %v5110_v61 = vrot.slane %v5108_v50, 1  ;;  %v5134_v57 = vsel %vm1303_vm2, %v5132_v25, %v5133_v10 }
 0xa7b   : > { %v5088_v7 = vshll.u32 %v13553_v31, 16  ;;  %v5086_v1 = vshrl.u32 %v13553_v31, 16  ;;  %v5145_v26 = vrot.slane %v13546_v29, 1  ;;  %v5147_v29 = vrot.slane %v13553_v31, 1 }
 0xa7c   : > { %v5084_v54 = vrot.slane %v5082_v23, 1  ;;  %v5111_v23 = vor.u32 %v5110_v61, %v5106_v56 }
 0xa7d   : > { %v5090_v28 = vrot.slane %v5088_v7, 1  ;;  %v5141_v7 = vrot.slane %v13516_v12, 1 }
 0xa7e   : > { %v13563_v58 = vsel %vm1206_vm3, %v5081_v27, %v5084_v54  ;;  %v5135_v54 = vrot.slane %v13462_v20, 1 }
 0xa7f   : > { %5194 = vrot.lane.b32.xlu1 %v13563_v58, %s15894_s30  ;;  %v5091_v45 = vor.u32 %v5090_v28, %v5086_v1  ;;  %v13611_v8 = vsel %vm1303_vm2, %v5141_v7, %v5142_v55  ;;  %v10196_v55 = vld [vmem:[%s10664_s13 + $0x1d4] sm:$0xff] }
 0xa80   : > { %v4921_v62 = vpop.permute.xlu1 %4920  ;;  %v5137_v27 = vsel %vm1303_vm2, %v5135_v54, %v5136_v40  ;;  %v4992_v54 = vsel %vm1104_vm0, %v10196_v55, %v13450_v5 }
 0xa81   : > { %v13575_v22 = vsel %vm1165_vm1, %v4974_v24, %v4921_v62  ;;  %v4923_v52 = vpop.permute.xlu0 %4922  ;;  %v13578_v60 = vsel %vm1206_vm3, %v5091_v45, %v5094_v35  ;;  %v13626_v35 = vsel %vm1303_vm2, %v5144_v63, %v5145_v26  ;;  %v5148_v45 = vrot.slane %v13538_v38, 1  ;;  %v10195_v38 = vld [vmem:[%s10664_s13 + $0x1c8] sm:$0xff] }
 0xa82   : > { %v5023_v53 = vsel %vm1165_vm1, %v4977_v18, %v4923_v52  ;;  %5196 = vrot.lane.b32.xlu0 %v13578_v60, %s15894_s30  ;;  %v5098_v49 = vshll.u32 %v13575_v22, 16  ;;  %v5096_v14 = vshrl.u32 %v13575_v22, 16  ;;  %v5150_v28 = vrot.slane %v13575_v22, 1 }
 0xa83   : > { %v5102_v46 = vshll.u32 %v5023_v53, 16  ;;  %v5151_v1 = vrot.slane %v5023_v53, 1  ;;  %v13638_v21 = vsel %vm1303_vm2, %v5147_v29, %v5148_v45  ;;  %v5153_v62 = vrot.slane %v13572_v51, 1 }
 0xa84   : > { %v5100_v47 = vrot.slane %v5098_v49, 1  ;;  %v4986_v53 = vsel %vm1104_vm0, %v10195_v38, %v13435_v2 }
 0xa85   : > { %v5104_v16 = vrot.slane %v5102_v46, 1  ;;  %v13631_v17 = vsel %vm1303_vm2, %v5150_v28, %v5151_v1  ;;  %v9321_v46 = vld [vmem:[%s10664_s13 + $0x1d0] sm:$0x1]  ;;  %v9324_v1 = vld [vmem:[%s10664_s13 + $0x1dc] sm:$0x1] }
 0xa86   : > { %v5101_v36 = vor.u32 %v5100_v47, %v5096_v14  ;;  %v4672_v59 = vunpack.c.l.b16 %v9321_v46  ;;  %v4931_v47 = vpop.permute.xlu2 %4930  ;;  %v4675_v5 = vunpack.c.l.b16 %v9324_v1 }
 0xa88   : > { %v4927_v19 = vpop.permute.xlu1 %4926  ;;  %v13591_v13 = vsel %vm1206_vm3, %v5101_v36, %v5104_v16  ;;  %v4693_v14 = vpack.c.b16 %v4672_v59, %v4672_v59  ;;  %v4695_v45 = vpack.c.b16 %v4675_v5, %v4675_v5 }
 0xa89   : > { %v5027_v48 = vsel %vm1165_vm1, %v4983_v44, %v4927_v19  ;;  %5198 = vrot.lane.b32.xlu2 %v13591_v13, %s15894_s30  ;;  %v4929_v52 = vpop.permute.xlu0 %4928 }
 0xa8a   : > { %v5112_v41 = vshll.u32 %v5027_v48, 16  ;;  %5202 = vrot.lane.b32.xlu0 %v5134_v57, %s15804_s1  ;;  %v5154_v24 = vrot.slane %v5027_v48, 1  ;;  %v5029_v49 = vsel %vm1165_vm1, %v4986_v53, %v4929_v52  ;;  %v4989_v2 = vsel %vm1104_vm0, %v4693_v14, %v13448_v39 }
 0xa8b   : > { %v5158_v50 = vshll.u32 %v5029_v49, 16  ;;  %v5156_v16 = vshrl.u32 %v5029_v49, 16  ;;  %v5168_v61 = vrot.slane %v5029_v49, 1 }
 0xa8c   : > { %v5114_v42 = vrot.slane %v5112_v41, 1  ;;  %v13644_v18 = vsel %vm1303_vm2, %v5153_v62, %v5154_v24 }
 0xa8d   : > { %v5160_v25 = vrot.slane %v5158_v50, 1 }
 0xa8e   : > { %v13603_v9 = vsel %vm1206_vm3, %v5111_v23, %v5114_v42 }
 0xa8f   : > { %5200 = vrot.lane.b32.xlu1 %v13603_v9, %s15894_s30  ;;  %v5161_v36 = vor.u32 %v5160_v25, %v5156_v16 }
 0xa90   : > { %v4933_v42 = vpop.permute.xlu1 %4932 }
 0xa91   : > { %5204 = vrot.lane.b32.xlu2 %v5137_v27, %s15804_s1  ;;  %v4935_v40 = vpop.permute.xlu0 %4934 }
 0xa92   : > { %5208 = vrot.lane.b32.xlu0 %v13611_v8, %s15804_s1 }
 0xa97   : > { %5206 = vrot.lane.b32.xlu1 %v13620_v43, %s15804_s1 }
 0xa99   : > { %5210 = vrot.lane.b32.xlu2 %v13626_v35, %s15804_s1 }
 0xa9a   : > { %5214 = vrot.lane.b32.xlu0 %v13631_v17, %s15804_s1 }
 0xa9f   : > { %5212 = vrot.lane.b32.xlu1 %v13638_v21, %s15804_s1 }
 0xaa1   : > { %5216 = vrot.lane.b32.xlu2 %v13644_v18, %s15804_s1  ;;  %s15973_s1 = smov 24  }
 0xaa2   : > { %5220 = vrot.lane.b32.xlu0 %v13494_v37, %s15802_s8 }
 0xaa7   : > { %5218 = vrot.lane.b32.xlu1 %v13462_v20, %s15802_s8 }
 0xaa9   : > { %5222 = vrot.lane.b32.xlu2 %v13516_v12, %s15802_s8 }
 0xaaa   : > { %5226 = vrot.lane.b32.xlu0 %v13553_v31, %s15802_s8 }
 0xaaf   : > { %5224 = vrot.lane.b32.xlu1 %v13513_v32, %s15802_s8 }
 0xab1   : > { %5228 = vrot.lane.b32.xlu2 %v13575_v22, %s15802_s8 }
 0xab2   : > { %5232 = vrot.lane.b32.xlu0 %v5029_v49, %s15802_s8 }
 0xab7   : > { %5230 = vrot.lane.b32.xlu1 %v13572_v51, %s15802_s8  ;;  %s15974_s8 = smov 36  }
 0xab9   : > { %5234 = vrot.lane.b32.xlu2 %v13504_v34, %s15949_s14  ;;  %v5031_v34 = vsel %vm1165_vm1, %v4989_v2, %v4931_v47 }
 0xaba   : > { %5238 = vrot.lane.b32.xlu0 %v13541_v6, %s15949_s14  ;;  %v5162_v10 = vshll.u32 %v5031_v34, 16  ;;  %v5169_v48 = vrot.slane %v5031_v34, 1 }
 0xabc   : > { %v5164_v39 = vrot.slane %v5162_v10, 1  ;;  %v5170_v57 = vsel %vm1303_vm2, %v5168_v61, %v5169_v48 }
 0xabe   : > { %v5165_v44 = vsel %vm1206_vm3, %v5161_v36, %v5164_v39 }
 0xabf   : > { %5236 = vrot.lane.b32.xlu1 %v13519_v0, %s15949_s14 }
 0xac1   : > { %5240 = vrot.lane.b32.xlu2 %v13563_v58, %s15949_s14 }
 0xac2   : > { %5244 = vrot.lane.b32.xlu0 %v13591_v13, %s15949_s14 }
 0xac3   : > { %v13692_v19 = vpop.permute.xlu2 %5186 }
 0xac4   : > { %15951 = vst [vmem:[#allocation31_spill] sm:$0xff] %v13692_v19 }
 0xac7   : > { %5242 = vrot.lane.b32.xlu1 %v13578_v60, %s15949_s14 }
 0xac9   : > { %5246 = vrot.lane.b32.xlu2 %v13603_v9, %s15949_s14 }
 0xaca   : > { %5250 = vrot.lane.b32.xlu0 %v5137_v27, %s15950_s9  ;;  %v5033_v27 = vsel %vm1165_vm1, %v4992_v54, %v4933_v42 }
 0xacb   : > { %v5173_v62 = vshll.u32 %v5033_v27, 16  ;;  %v5183_v50 = vrot.slane %v5033_v27, 1 }
 0xacd   : > { %v5175_v53 = vrot.slane %v5173_v62, 1 }
 0xacf   : > { %5248 = vrot.lane.b32.xlu1 %v5165_v44, %s15949_s14 }
 0xad1   : > { %5252 = vrot.lane.b32.xlu2 %v13620_v43, %s15950_s9 }
 0xad2   : > { %5256 = vrot.lane.b32.xlu0 %v13626_v35, %s15950_s9 }
 0xad3   : > { %v13700_v56 = vpop.permute.xlu2 %5192 }
 0xad7   : > { %5254 = vrot.lane.b32.xlu1 %v13611_v8, %s15950_s9 }
 0xad9   : > { %5258 = vrot.lane.b32.xlu2 %v13638_v21, %s15950_s9 }
 0xada   : > { %5262 = vrot.lane.b32.xlu0 %v13644_v18, %s15950_s9 }
 0xadf   : > { %5260 = vrot.lane.b32.xlu1 %v13631_v17, %s15950_s9 }
 0xae1   : > { %5264 = vrot.lane.b32.xlu2 %v5170_v57, %s15950_s9  ;;  %v13726_v15 = vpop.permute.xlu1 %5188 }
 0xae2   : > { %5268 = vrot.lane.b32.xlu0 %v13516_v12, %s15922_s29 }
 0xae3   : > { %v13708_v41 = vpop.permute.xlu2 %5198 }
 0xae4   : > { %v13719_v7 = vpop.permute.xlu0 %5190 }
 0xae7   : > { %5266 = vrot.lane.b32.xlu1 %v13494_v37, %s15922_s29 }
 0xae9   : > { %5270 = vrot.lane.b32.xlu2 %v13513_v32, %s15922_s29 }
 0xaea   : > { %5274 = vrot.lane.b32.xlu0 %v13575_v22, %s15922_s29 }
 0xaeb   : > { %v13716_v23 = vpop.permute.xlu2 %5204 }
 0xaef   : > { %5272 = vrot.lane.b32.xlu1 %v13553_v31, %s15922_s29 }
 0xaf1   : > { %5276 = vrot.lane.b32.xlu2 %v13572_v51, %s15922_s29  ;;  %v13737_v28 = vpop.permute.xlu1 %5194 }
 0xaf2   : > { %5280 = vrot.lane.b32.xlu0 %v5033_v27, %s15922_s29 }
 0xaf3   : > { %v13731_v3 = vpop.permute.xlu2 %5210 }
 0xaf4   : > { %v13733_v26 = vpop.permute.xlu0 %5196 }
 0xaf7   : > { %5278 = vrot.lane.b32.xlu1 %v5029_v49, %s15922_s29 }
 0xaf9   : > { %5282 = vrot.lane.b32.xlu2 %v13519_v0, %s15923_s27  ;;  %v4995_v0 = vsel %vm1104_vm0, %v4695_v45, %v13441_v11 }
 0xafa   : > { %5286 = vrot.lane.b32.xlu0 %v13563_v58, %s15923_s27  ;;  %v5035_v58 = vsel %vm1165_vm1, %v4995_v0, %v4935_v40 }
 0xafb   : > { %v13743_v63 = vpop.permute.xlu2 %5216  ;;  %v5184_v34 = vrot.slane %v5035_v58, 1 }
 0xafc   : > { %v13745_v29 = vpop.permute.xlu0 %5202 }
 0xafd   : > { %15952 = vst [vmem:[#allocation16_spill] sm:$0xff] %v13745_v29 }
 0xaff   : > { %5284 = vrot.lane.b32.xlu1 %v13541_v6, %s15923_s27  ;;  %v5177_v6 = vshll.u32 %v5035_v58, 16 }
 0xb01   : > { %5288 = vrot.lane.b32.xlu2 %v13578_v60, %s15923_s27  ;;  %v13751_v24 = vpop.permute.xlu1 %5200  ;;  %v5171_v60 = vshrl.u32 %v5033_v27, 16  ;;  %v5179_v46 = vrot.slane %v5177_v6, 1 }
 0xb02   : > { %5292 = vrot.lane.b32.xlu0 %v13603_v9, %s15923_s27  ;;  %v5329_v4 = vsel %vm1486_vm4, %v13572_v51, %v13751_v24  ;;  %v5327_v51 = vsel %vm1486_vm4, %v13575_v22, %v13708_v41  ;;  %v5325_v22 = vsel %vm1486_vm4, %v13553_v31, %v13733_v26  ;;  %v5323_v31 = vsel %vm1486_vm4, %v13513_v32, %v13737_v28 }
 0xb03   : > { %v13758_v38 = vpop.permute.xlu2 %5222  ;;  %v5176_v11 = vor.u32 %v5175_v53, %v5171_v60 }
 0xb04   : > { %v13760_v52 = vpop.permute.xlu0 %5208 }
 0xb05   : > { %v5180_v14 = vsel %vm1206_vm3, %v5176_v11, %v5179_v46 }
 0xb07   : > { %5290 = vrot.lane.b32.xlu1 %v13591_v13, %s15923_s27 }
 0xb09   : > { %5294 = vrot.lane.b32.xlu2 %v5165_v44, %s15923_s27  ;;  %v13765_v49 = vpop.permute.xlu1 %5206 }
 0xb0a   : > { %5298 = vrot.lane.b32.xlu0 %v13620_v43, %s15866_s20 }
 0xb0b   : > { %v13769_v9 = vpop.permute.xlu2 %5228 }
 0xb0c   : > { %v13771_v59 = vpop.permute.xlu0 %5214 }
 0xb0f   : > { %5296 = vrot.lane.b32.xlu1 %v5180_v14, %s15923_s27 }
 0xb11   : > { %5300 = vrot.lane.b32.xlu2 %v13611_v8, %s15866_s20  ;;  %v13777_v13 = vpop.permute.xlu1 %5212 }
 0xb12   : > { %5304 = vrot.lane.b32.xlu0 %v13638_v21, %s15866_s20  ;;  %v5185_v21 = vsel %vm1303_vm2, %v5183_v50, %v5184_v34 }
 0xb13   : > { %v13781_v2 = vpop.permute.xlu2 %5234 }
 0xb14   : > { %15953 = vst [vmem:[#allocation19_spill] sm:$0xff] %v13781_v2  ;;  %v13783_v47 = vpop.permute.xlu0 %5220 }
 0xb17   : > { %5302 = vrot.lane.b32.xlu1 %v13626_v35, %s15866_s20 }
 0xb19   : > { %5306 = vrot.lane.b32.xlu2 %v13631_v17, %s15866_s20  ;;  %v13789_v43 = vpop.permute.xlu1 %5218 }
 0xb1a   : > { %15954 = vst [vmem:[#allocation21_spill] sm:$0xff] %v13789_v43  ;;  %5310 = vrot.lane.b32.xlu0 %v5170_v57, %s15866_s20 }
 0xb1b   : > { %v13792_v8 = vpop.permute.xlu2 %5240 }
 0xb1c   : > { %v13794_v25 = vpop.permute.xlu0 %5226 }
 0xb1f   : > { %5308 = vrot.lane.b32.xlu1 %v13644_v18, %s15866_s20 }
 0xb21   : > { %5312 = vrot.lane.b32.xlu2 %v5185_v21, %s15866_s20  ;;  %v13800_v35 = vpop.permute.xlu1 %5224 }
 0xb23   : > { %v5247_v17 = vpop.permute.xlu2 %5246 }
 0xb24   : > { %v5233_v10 = vpop.permute.xlu0 %5232 }
 0xb29   : > { %v5231_v16 = vpop.permute.xlu1 %5230 }
 0xb2b   : > { %v13802_v36 = vpop.permute.xlu2 %5252 }
 0xb2c   : > { %v13804_v39 = vpop.permute.xlu0 %5238 }
 0xb31   : > { %v13806_v44 = vpop.permute.xlu1 %5236 }
 0xb33   : > { %v13808_v61 = vpop.permute.xlu2 %5258 }
 0xb34   : > { %v5245_v48 = vpop.permute.xlu0 %5244 }
 0xb39   : > { %v13810_v57 = vpop.permute.xlu1 %5242 }
 0xb3b   : > { %v5265_v18 = vpop.permute.xlu2 %5264 }
 0xb3c   : > { %v13812_v40 = vpop.permute.xlu0 %5250 }
 0xb3d   : > { %15955 = vst [vmem:[#allocation15_spill] sm:$0xff] %v13812_v40  ;;  %v5345_v40 = vsel %vm1503_vm5, %v5329_v4, %v13743_v63  ;;  %v5343_v4 = vsel %vm1503_vm5, %v5327_v51, %v13771_v59 }
 0xb3e   : > { %v5361_v2 = vsel %vm1520_vm6, %v5345_v40, %v5233_v10  ;;  %v5359_v10 = vsel %vm1520_vm6, %v5343_v4, %v5231_v16 }
 0xb41   : > { %v5249_v42 = vpop.permute.xlu1 %5248 }
 0xb42   : > { %v5377_v29 = vsel %vm1537_vm7, %v5361_v2, %v5249_v42 }
 0xb43   : > { %v13814_v55 = vpop.permute.xlu2 %5270 }
 0xb44   : > { %v13816_v54 = vpop.permute.xlu0 %5256 }
 0xb49   : > { %v13818_v27 = vpop.permute.xlu1 %5254 }
 0xb4b   : > { %v5277_v1 = vpop.permute.xlu2 %5276 }
 0xb4c   : > { %v5263_v5 = vpop.permute.xlu0 %5262 }
 0xb51   : > { %v5261_v45 = vpop.permute.xlu1 %5260 }
 0xb53   : > { %v13820_v0 = vpop.permute.xlu2 %5282 }
 0xb54   : > { %15956 = vst [vmem:[#allocation17_spill] sm:$0xff] %v13820_v0  ;;  %v13822_v62 = vpop.permute.xlu0 %5268 }
 0xb59   : > { %v13824_v58 = vpop.permute.xlu1 %5266 }
 0xb5a   : > { %15957 = vst [vmem:[#allocation14_spill] sm:$0xff] %v13824_v58 }
 0xb5b   : > { %v13826_v53 = vpop.permute.xlu2 %5288 }
 0xb5c   : > { %v5275_v6 = vpop.permute.xlu0 %5274 }
 0xb61   : > { %v5273_v60 = vpop.permute.xlu1 %5272 }
 0xb63   : > { %v5295_v11 = vpop.permute.xlu2 %5294 }
 0xb64   : > { %v5281_v46 = vpop.permute.xlu0 %5280 }
 0xb69   : > { %v5279_v14 = vpop.permute.xlu1 %5278 }
 0xb6b   : > { %v13830_v34 = vpop.permute.xlu2 %5300 }
 0xb6c   : > { %v13828_v50 = vpop.permute.xlu0 %5286  ;;  %15958 = vst [vmem:[#allocation26_spill] sm:$0xff] %v13830_v34  ;;  %v5393_v34 = vsel %vm1554_vm8, %v5377_v29, %v5265_v18  ;;  %v5375_v18 = vsel %vm1537_vm7, %v5359_v10, %v5247_v17  ;;  %v15961_v10 = vld [vmem:[#allocation30_spill] sm:$0xff] }
 0xb6d   : > { %v5391_v41 = vsel %vm1554_vm8, %v5375_v18, %v5263_v5  ;;  %v5339_v5 = vsel %vm1503_vm5, %v5323_v31, %v13731_v3 }
 0xb6e   : > { %v5407_v59 = vsel %vm1571_vm9, %v5391_v41, %v5279_v14 }
 0xb6f   : > { %v5423_v42 = vsel %vm1588_vm10, %v5407_v59, %v5295_v11  ;;  %v15966_v59 = vld [vmem:[#allocation19_spill] sm:$0xff] }
 0xb71   : > { %v13832_v21 = vpop.permute.xlu1 %5284 }
 0xb72   : > { %15959 = vst [vmem:[#allocation18_spill] sm:$0xff] %v13832_v21  ;;  %v5409_v21 = vsel %vm1571_vm9, %v5393_v34, %v5281_v46 }
 0xb73   : > { %v5307_v0 = vpop.permute.xlu2 %5306  ;;  %v15965_v41 = vld [vmem:[#allocation26_spill] sm:$0xff] }
 0xb74   : > { %v5293_v30 = vpop.permute.xlu0 %5292 }
 0xb79   : > { %v5291_v58 = vpop.permute.xlu1 %5290 }
 0xb7b   : > { %v5313_v24 = vpop.permute.xlu2 %5312 }
 0xb7c   : > { %v13840_v43 = vpop.permute.xlu0 %5298 }
 0xb81   : > { %v5297_v33 = vpop.permute.xlu1 %5296 }
 0xb82   : > { %v5425_v19 = vsel %vm1588_vm10, %v5409_v21, %v5297_v33  ;;  %v5341_v33 = vsel %vm1503_vm5, %v5325_v22, %v13777_v13  ;;  %v15964_v22 = vld [vmem:[#allocation21_spill] sm:$0xff] }
 0xb83   : > { %v5441_v63 = vsel %vm1605_vm11, %v5425_v19, %v5313_v24  ;;  %v5357_v16 = vsel %vm1520_vm6, %v5341_v33, %v13769_v9 }
 0xb84   : > { %v5305_v2 = vpop.permute.xlu0 %5304  ;;  %v5456_v29 = vsel %vm1622_vm12, %v5441_v63, 0  ;;  %v5373_v17 = vsel %vm1537_vm7, %v5357_v16, %v5245_v48  ;;  %v5355_v48 = vsel %vm1520_vm6, %v5339_v5, %v13794_v25  ;;  %v9541_v16 = vld [vmem:[%s10664_s13 + $0x26c] sm:$0x1] }
 0xb85   : > { %5458 = vmatpush.bf16.xpose.msrb.mxu0 %v5456_v29  ;;  %v5389_v26 = vsel %vm1554_vm8, %v5373_v17, %v5261_v45  ;;  %v5371_v34 = vsel %vm1537_vm7, %v5355_v48, %v13810_v57 }
 0xb86   : > { %v5405_v9 = vsel %vm1571_vm9, %v5389_v26, %v5277_v1  ;;  %v5387_v28 = vsel %vm1554_vm8, %v5371_v34, %v13808_v61  ;;  %v5321_v1 = vsel %vm1486_vm4, %v13516_v12, %v13700_v56  ;;  %v5685_v26 = vunpack.c.l.b16 %v9541_v16  ;;  %v9544_v34 = vld [vmem:[%s10664_s13 + $0x278] sm:$0x1] }
 0xb87   : > { %v5421_v11 = vsel %vm1588_vm10, %v5405_v9, %v5293_v30  ;;  %v5403_v3 = vsel %vm1571_vm9, %v5387_v28, %v5275_v6  ;;  %v5337_v30 = vsel %vm1503_vm5, %v5321_v1, %v13760_v52  ;;  %v5319_v52 = vsel %vm1486_vm4, %v13494_v37, %v13719_v7  ;;  %v10227_v37 = vld [vmem:[%s10664_s13 + $0x258] sm:$0xff]  ;;  %v9538_v7 = vld [vmem:[%s10664_s13 + $0x260] sm:$0x1] }
 0xb88   : > { %v5419_v25 = vsel %vm1588_vm10, %v5403_v3, %v5291_v58  ;;  %v5353_v57 = vsel %vm1520_vm6, %v5337_v30, %v13800_v35  ;;  %v5335_v35 = vsel %vm1503_vm5, %v5319_v52, %v13765_v49  ;;  %v5317_v49 = vsel %vm1486_vm4, %v13462_v20, %v13726_v15  ;;  %5730 = vrot.lane.b32.xlu2 %v10227_v37, %s15837_s12  ;;  %v9550_v3 = vld [vmem:[%s10664_s13 + $0x290] sm:$0x1]  ;;  %v9553_v30 = vld [vmem:[%s10664_s13 + $0x29c] sm:$0x1]  ;;  %v9547_v37 = vld [vmem:[%s10664_s13 + $0x284] sm:$0x1] }
 0xb89   : > { %v5303_v19 = vpop.permute.xlu1 %5302  ;;  %v5435_v61 = vsel %vm1605_vm11, %v5419_v25, %v5307_v0  ;;  %v5369_v6 = vsel %vm1537_vm7, %v5353_v57, %v13792_v8  ;;  %v5694_v1 = vunpack.c.l.b16 %v9550_v3  ;;  %v5697_v57 = vunpack.c.l.b16 %v9553_v30  ;;  %v10237_v52 = vld [vmem:[%s10664_s13 + $0x2d0] sm:$0xff]  ;;  %v10244_v30 = vld [vmem:[%s10664_s13 + $0x324] sm:$0xff] }
 0xb8a   : > { %v5385_v21 = vsel %vm1554_vm8, %v5369_v6, %v13816_v54  ;;  %v5450_v12 = vsel %vm1622_vm12, %v5435_v61, 0  ;;  %v5351_v54 = vsel %vm1520_vm6, %v5335_v35, %v13758_v38  ;;  %v5333_v38 = vsel %vm1503_vm5, %v5317_v49, %v13716_v23  ;;  %v10234_v6 = vld [vmem:[%s10664_s13 + $0x2ac] sm:$0xff]  ;;  %v9571_v35 = vld [vmem:[%s10664_s13 + $0x2e4] sm:$0x1] }
 0xb8b   : > { %v5401_v56 = vsel %vm1571_vm9, %v5385_v21, %v5273_v60  ;;  %v5367_v58 = vsel %vm1537_vm7, %v5351_v54, %v13804_v39  ;;  %v5719_v25 = vpack.c.b16 %v5694_v1, %v5694_v1  ;;  %v5721_v61 = vpack.c.b16 %v5697_v57, %v5697_v57  ;;  %v9562_v21 = vld [vmem:[%s10664_s13 + $0x2c0] sm:$0x1]  ;;  %v9592_v57 = vld [vmem:[%s10664_s13 + $0x338] sm:$0x1] }
 0xb8c   : > { %v5311_v40 = vpop.permute.xlu0 %5310  ;;  %v5417_v0 = vsel %vm1588_vm10, %v5401_v56, %v13826_v53  ;;  %v5383_v60 = vsel %vm1554_vm8, %v5367_v58, %v13818_v27  ;;  %v5682_v53 = vunpack.c.l.b16 %v9538_v7  ;;  %v5349_v27 = vsel %vm1520_vm6, %v5333_v38, %v13783_v47  ;;  %v15960_v47 = vld [vmem:[#allocation31_spill] sm:$0xff] }
 0xb8d   : > { %v5439_v46 = vsel %vm1605_vm11, %v5423_v42, %v5311_v40  ;;  %v5433_v8 = vsel %vm1605_vm11, %v5417_v0, %v5305_v2  ;;  %v5399_v39 = vsel %vm1571_vm9, %v5383_v60, %v13814_v55  ;;  %v5365_v20 = vsel %vm1537_vm7, %v5349_v27, %v13806_v44  ;;  %v15962_v2 = vld [vmem:[#allocation18_spill] sm:$0xff]  ;;  %v15963_v44 = vld [vmem:[#allocation16_spill] sm:$0xff]  ;;  %v15967_v40 = vld [vmem:[#allocation15_spill] sm:$0xff] }
 0xb8e   : > { %v5454_v13 = vsel %vm1622_vm12, %v5439_v46, 0  ;;  %v5448_v51 = vsel %vm1622_vm12, %v5433_v8, 0  ;;  %v5415_v24 = vsel %vm1588_vm10, %v5399_v39, %v13828_v50  ;;  %v5711_v4 = vpack.c.b16 %v5682_v53, %v5682_v53  ;;  %v15968_v46 = vld [vmem:[#allocation14_spill] sm:$0xff]  ;;  %v10240_v60 = vld [vmem:[%s10664_s13 + $0x2f4] sm:$0xff]  ;;  %v9580_v7 = vld [vmem:[%s10664_s13 + $0x308] sm:$0x1] }
 0xb8f   : > { %5459 = vmatpush.bf16.xpose.msrb.mxu0 %v5454_v13  ;;  %v5431_v15 = vsel %vm1605_vm11, %v5415_v24, %v5303_v19  ;;  %v5381_v23 = vsel %vm1554_vm8, %v5365_v20, %v13802_v36  ;;  %v5315_v50 = vsel %vm1486_vm4, %v15961_v10, %v15960_v47  ;;  %v15969_v13 = vld [vmem:[#allocation17_spill] sm:$0xff]  ;;  %v5805_v0 = vunpack.c.l.b16 %v9571_v35 }
 0xb90   : > { %v5446_v63 = vsel %vm1622_vm12, %v5431_v15, 0  ;;  %v5397_v55 = vsel %vm1571_vm9, %v5381_v23, %v13822_v62  ;;  %5732 = vrot.lane.b32.xlu2 %v5711_v4, %s15837_s12  ;;  %v5331_v18 = vsel %vm1503_vm5, %v5315_v50, %v15963_v44  ;;  %v10228_v62 = vld [vmem:[%s10664_s13 + $0x264] sm:$0xff]  ;;  %v5814_v49 = vunpack.c.l.b16 %v9580_v7  ;;  %v10230_v27 = vld [vmem:[%s10664_s13 + $0x27c] sm:$0xff]  ;;  %v10232_v20 = vld [vmem:[%s10664_s13 + $0x294] sm:$0xff] }
 0xb91   : > { %v5309_v14 = vpop.permute.xlu1 %5308  ;;  %v5413_v29 = vsel %vm1588_vm10, %v5397_v55, %v15962_v2  ;;  %v5347_v36 = vsel %vm1520_vm6, %v5331_v18, %v15964_v22  ;;  %v5833_v8 = vpack.c.b16 %v5805_v0, %v5805_v0  ;;  %v5691_v53 = vunpack.c.l.b16 %v9547_v37  ;;  %v10243_v24 = vld [vmem:[%s10664_s13 + $0x318] sm:$0xff]  ;;  %v9556_v15 = vld [vmem:[%s10664_s13 + $0x2a8] sm:$0x1]  ;;  %v10233_v4 = vld [vmem:[%s10664_s13 + $0x2a0] sm:$0xff] }
 0xb92   : > { %v5437_v32 = vsel %vm1605_vm11, %v5421_v11, %v5309_v14  ;;  %v5429_v33 = vsel %vm1605_vm11, %v5413_v29, %v15965_v41  ;;  %v5363_v19 = vsel %vm1537_vm7, %v5347_v36, %v15966_v59  ;;  %v5713_v14 = vpack.c.b16 %v5685_v26, %v5685_v26  ;;  %v10229_v11 = vld [vmem:[%s10664_s13 + $0x270] sm:$0xff]  ;;  %v9589_v55 = vld [vmem:[%s10664_s13 + $0x32c] sm:$0x1]  ;;  %v10246_v44 = vld [vmem:[%s10664_s13 + $0x33c] sm:$0xff] }
 0xb93   : > { %v5452_v45 = vsel %vm1622_vm12, %v5437_v32, 0  ;;  %v5379_v42 = vsel %vm1554_vm8, %v5363_v19, %v15967_v40  ;;  %v5444_v17 = vsel %vm1622_vm12, %v5429_v33, 0  ;;  %v10432_v32 = vld [vmem:[%s15772_s3] sm:$0xf]  ;;  %v5839_v38 = vpack.c.b16 %v5814_v49, %v5814_v49  ;;  %v10235_v18 = vld [vmem:[%s10664_s13 + $0x2b8] sm:$0xff]  ;;  %v10236_v36 = vld [vmem:[%s10664_s13 + $0x2c4] sm:$0xff] }
 0xb94   : > { %v5395_v31 = vsel %vm1571_vm9, %v5379_v42, %v15968_v46  ;;  %v5717_v39 = vpack.c.b16 %v5691_v53, %v5691_v53  ;;  %v5700_v23 = vunpack.c.l.b16 %v9556_v15  ;;  %v5823_v47 = vunpack.c.l.b16 %v9589_v55  ;;  %v9565_v22 = vld [vmem:[%s10664_s13 + $0x2cc] sm:$0x1]  ;;  %v9568_v33 = vld [vmem:[%s10664_s13 + $0x2d8] sm:$0x1]  ;;  %v10238_v40 = vld [vmem:[%s10664_s13 + $0x2dc] sm:$0xff] }
 0xb95   : > { %v5411_v5 = vsel %vm1588_vm10, %v5395_v31, %v15969_v13  ;;  %v5709_v41 = vunpack.c.l.b16 %v9565_v22  ;;  %v5802_v59 = vunpack.c.l.b16 %v9568_v33  ;;  %v10239_v46 = vld [vmem:[%s10664_s13 + $0x2e8] sm:$0xff]  ;;  %v9577_v26 = vld [vmem:[%s10664_s13 + $0x2fc] sm:$0x1] }
 0xb96   : > { %v5427_v9 = vsel %vm1605_vm11, %v5411_v5, %v13840_v43  ;;  %v5688_v43 = vunpack.c.l.b16 %v9544_v34  ;;  %v5845_v50 = vpack.c.b16 %v5823_v47, %v5823_v47  ;;  %v5723_v2 = vpack.c.b16 %v5700_v23, %v5700_v23  ;;  %v10242_v34 = vld [vmem:[%s10664_s13 + $0x30c] sm:$0xff]  ;;  %v9508_v15 = vld [vmem:[%s10664_s13 + $0x1e8] sm:$0x1] }
 0xb97   : > { %5460 = vmatpush.bf16.xpose.msrb.mxu0 %v5452_v45  ;;  %v5442_v48 = vsel %vm1622_vm12, %v5427_v9, 0  ;;  %v10231_v45 = vld [vmem:[%s10664_s13 + $0x288] sm:$0xff]  ;;  %v5729_v19 = vpack.c.b16 %v5709_v41, %v5709_v41  ;;  %v5831_v16 = vpack.c.b16 %v5802_v59, %v5802_v59  ;;  %v5811_v13 = vunpack.c.l.b16 %v9577_v26 }
 0xb98   : > { %5734 = vrot.lane.b32.xlu2 %v10228_v62, %s15837_s12  ;;  %v5715_v28 = vpack.c.b16 %v5688_v43, %v5688_v43  ;;  %v9586_v43 = vld [vmem:[%s10664_s13 + $0x320] sm:$0x1]  ;;  %v5602_v55 = vunpack.c.l.b16 %v9508_v15  ;;  %v10218_v59 = vld [vmem:[%s10664_s13 + $0x1ec] sm:$0xff] }
 0xb9f   : > { %5461 = vmatpush.bf16.xpose.msrb.mxu0 %v5450_v12  ;;  %v5706_v12 = vunpack.c.l.b16 %v9562_v21  ;;  %v9595_v21 = vld [vmem:[%s10664_s13 + $0x344] sm:$0x1] }
 0xba0   : > { %5736 = vrot.lane.b32.xlu2 %v5713_v14, %s15837_s12  ;;  %v5837_v14 = vpack.c.b16 %v5811_v13, %v5811_v13 }
 0xba1   : > { %v5727_v56 = vpack.c.b16 %v5706_v12, %v5706_v12  ;;  %v5829_v12 = vunpack.c.l.b16 %v9595_v21 }
 0xba3   : > { %v5849_v35 = vpack.c.b16 %v5829_v12, %v5829_v12 }
 0xba7   : > { %5462 = vmatpush.bf16.xpose.msrb.mxu0 %v5448_v51 }
 0xba8   : > { %5738 = vrot.lane.b32.xlu2 %v10229_v11, %s15837_s12  ;;  %v9583_v11 = vld [vmem:[%s10664_s13 + $0x314] sm:$0x1] }
 0xbaf   : > { %5463 = vmatpush.bf16.xpose.msrb.mxu0 %v5446_v63  ;;  %v9559_v63 = vld [vmem:[%s10664_s13 + $0x2b4] sm:$0x1] }
 0xbb0   : > { %5740 = vrot.lane.b32.xlu2 %v5715_v28, %s15837_s12  ;;  %v5703_v10 = vunpack.c.l.b16 %v9559_v63  ;;  %v9511_v63 = vld [vmem:[%s10664_s13 + $0x1f4] sm:$0x1] }
 0xbb2   : > { %v5725_v29 = vpack.c.b16 %v5703_v10, %v5703_v10  ;;  %v5605_v10 = vunpack.c.l.b16 %v9511_v63 }
 0xbb7   : > { %5464 = vmatpush.bf16.xpose.msrb.mxu0 %v5444_v17  ;;  %v9574_v17 = vld [vmem:[%s10664_s13 + $0x2f0] sm:$0x1] }
 0xbb8   : > { %5746 = vrot.lane.b32.xlu2 %v10231_v45, %s15837_s12  ;;  %v5808_v31 = vunpack.c.l.b16 %v9574_v17  ;;  %v5820_v45 = vunpack.c.l.b16 %v9586_v43  ;;  %v10220_v17 = vld [vmem:[%s10664_s13 + $0x204] sm:$0xff] }
 0xbba   : > { %v5835_v5 = vpack.c.b16 %v5808_v31, %v5808_v31  ;;  %v5843_v1 = vpack.c.b16 %v5820_v45, %v5820_v45  ;;  %v10219_v31 = vld [vmem:[%s10664_s13 + $0x1f8] sm:$0xff] }
 0xbbf   : > { %5465 = vmatpush.bf16.xpose.msrb.mxu0 %v5442_v48  ;;  %v10241_v48 = vld [vmem:[%s10664_s13 + $0x300] sm:$0xff] }
 0xbc0   : > { %5748 = vrot.lane.b32.xlu2 %v5719_v25, %s15837_s12 }
 0xbc6   : > { %9505 = vmatmul.msk.bf16.vlgmr.msrb.gmra.mxu0 %vm1622_vm12, %v10432_v32  ;;  %v5817_v32 = vunpack.c.l.b16 %v9583_v11  ;;  %v9520_v11 = vld [vmem:[%s10664_s13 + $0x218] sm:$0x1] }
 0xbc8   : > { %5752 = vrot.lane.b32.xlu2 %v5721_v61, %s15837_s12  ;;  %v5841_v3 = vpack.c.b16 %v5817_v32, %v5817_v32  ;;  %v10245_v61 = vld [vmem:[%s10664_s13 + $0x330] sm:$0xff] }
 0xbd0   : > { %5758 = vrot.lane.b32.xlu2 %v10234_v6, %s15837_s12  ;;  %v5826_v6 = vunpack.c.l.b16 %v9592_v57  ;;  %v5614_v57 = vunpack.c.l.b16 %v9520_v11 }
 0xbd2   : > { %v5639_v63 = vpack.c.b16 %v5614_v57, %v5614_v57 }
 0xbd8   : > { %5764 = vrot.lane.b32.xlu2 %v5727_v56, %s15837_s12  ;;  %v5847_v56 = vpack.c.b16 %v5826_v6, %v5826_v6 }
 0xbe0   : > { %5850 = vrot.lane.b32.xlu2 %v10237_v52, %s15840_s18 }
 0xbe2   : > { %v14015_v62 = vpop.permute.xlu2 %5730 }
 0xbe8   : > { %5856 = vrot.lane.b32.xlu2 %v5833_v8, %s15840_s18 }
 0xbea   : > { %v14021_v42 = vpop.permute.xlu2 %5732 }
 0xbf0   : > { %5862 = vrot.lane.b32.xlu2 %v10240_v60, %s15840_s18 }
 0xbf2   : > { %v14028_v9 = vpop.permute.xlu2 %5734 }
 0xbf8   : > { %5868 = vrot.lane.b32.xlu2 %v5839_v38, %s15840_s18 }
 0xbfa   : > { %v5737_v28 = vpop.permute.xlu2 %5736 }
 0xc00   : > { %5874 = vrot.lane.b32.xlu2 %v10243_v24, %s15840_s18  ;;  %v10217_v24 = vld [vmem:[%s10664_s13 + $0x1e0] sm:$0xff] }
 0xc01   : > { %v5892_v23 = vsel %vm1104_vm0, %v10217_v24, %v14015_v62 }
 0xc02   : > { %v14039_v25 = vpop.permute.xlu2 %5738 }
 0xc08   : > { %5880 = vrot.lane.b32.xlu2 %v5845_v50, %s15840_s18 }
 0xc0a   : > { %v14048_v52 = vpop.permute.xlu2 %5740 }
 0xc10   : > { %5886 = vrot.lane.b32.xlu2 %v10246_v44, %s15840_s18 }
 0xc12   : > { %v14052_v0 = vpop.permute.xlu2 %5746 }
 0xc1a   : > { %v14054_v8 = vpop.permute.xlu2 %5748 }
 0xc43   : > { %v5467_v54 = vpop.f32.mrf.mxu0 }
 0xc44   : > { %5471 = vst [vmem:[%s11747_s7 + $0x20] sm:$0xff] %v5467_v54  ;;  %v5475_v58 = vmul.f32 %v5467_v54, %v5467_v54  ;;  %5472 = vadd.xlane.f32.xlu1 %v5467_v54 }
 0xc46   : > { %5476 = vadd.xlane.f32.xlu0 %v5475_v58  ;;  %v14058_v58 = vpop.permute.xlu2 %5752 }
 0xc4b   : > { %v5469_v51 = vpop.f32.mrf.mxu0 }
 0xc4e   : > { %v14064_v37 = vpop.permute.xlu2 %5758 }
 0xc56   : > { %v14070_v38 = vpop.permute.xlu2 %5764 }
 0xc5a   : > { %5744 = vrot.lane.b32.xlu0 %v5717_v39, %s15837_s12 }
 0xc5d   : > { %5742 = vrot.lane.b32.xlu1 %v10230_v27, %s15837_s12 }
 0xc62   : > { %5750 = vrot.lane.b32.xlu0 %v10232_v20, %s15837_s12  ;;  %v5851_v20 = vpop.permute.xlu2 %5850 }
 0xc63   : > { %v14086_v50 = vsel %vm1165_vm1, %v5892_v23, %v5851_v20 }
 0xc64   : > { %15972 = vst [vmem:[#allocation18_spill] sm:$0xff] %v14086_v50  ;;  %v5990_v41 = vshrl.u32 %v14086_v50, 16 }
 0xc65   : > { %5754 = vrot.lane.b32.xlu1 %v10233_v4, %s15837_s12 }
 0xc6a   : > { %5756 = vrot.lane.b32.xlu0 %v5723_v2, %s15837_s12  ;;  %v5631_v2 = vpack.c.b16 %v5602_v55, %v5602_v55  ;;  %v5857_v44 = vpop.permute.xlu2 %5856 }
 0xc6d   : > { %5760 = vrot.lane.b32.xlu1 %v5725_v29, %s15837_s12  ;;  %v5992_v29 = vshll.u32 %v14086_v50, 16 }
 0xc6f   : > { %v5994_v33 = vrot.slane %v5992_v29, 1 }
 0xc71   : > { %v5995_v13 = vor.u32 %v5994_v33, %v5990_v41 }
 0xc72   : > { %5762 = vrot.lane.b32.xlu0 %v10235_v18, %s15837_s12  ;;  %v5633_v18 = vpack.c.b16 %v5605_v10, %v5605_v10 }
 0xc75   : > { %5766 = vrot.lane.b32.xlu1 %v10236_v36, %s15837_s12  ;;  %v5895_v36 = vsel %vm1104_vm0, %v5631_v2, %v14021_v42 }
 0xc7a   : > { %5768 = vrot.lane.b32.xlu0 %v5729_v19, %s15837_s12  ;;  %v5901_v19 = vsel %vm1104_vm0, %v5633_v18, %v5737_v28 }
 0xc7b   : > { %v14104_v42 = vsel %vm1165_vm1, %v5901_v19, %v5857_v44  ;;  %v9523_v19 = vld [vmem:[%s10664_s13 + $0x224] sm:$0x1] }
 0xc7d   : > { %5852 = vrot.lane.b32.xlu1 %v5831_v16, %s15840_s18  ;;  %v9514_v16 = vld [vmem:[%s10664_s13 + $0x200] sm:$0x1] }
 0xc7e   : > { %v5608_v26 = vunpack.c.l.b16 %v9514_v16 }
 0xc82   : > { %5854 = vrot.lane.b32.xlu0 %v10238_v40, %s15840_s18 }
 0xc85   : > { %5858 = vrot.lane.b32.xlu1 %v10239_v46, %s15840_s18 }
 0xc8a   : > { %5860 = vrot.lane.b32.xlu0 %v5835_v5, %s15840_s18  ;;  %v5863_v5 = vpop.permute.xlu2 %5862 }
 0xc8d   : > { %5864 = vrot.lane.b32.xlu1 %v5837_v14, %s15840_s18 }
 0xc92   : > { %5866 = vrot.lane.b32.xlu0 %v10241_v48, %s15840_s18  ;;  %v5898_v48 = vsel %vm1104_vm0, %v10218_v59, %v14028_v9  ;;  %v5635_v9 = vpack.c.b16 %v5608_v26, %v5608_v26  ;;  %v5869_v29 = vpop.permute.xlu2 %5868  ;;  %v5919_v59 = vsel %vm1104_vm0, %v5639_v63, %v14054_v8  ;;  %v10222_v8 = vld [vmem:[%s10664_s13 + $0x21c] sm:$0xff] }
 0xc94   : > { %v5907_v23 = vsel %vm1104_vm0, %v5635_v9, %v14048_v52 }
 0xc95   : > { %5870 = vrot.lane.b32.xlu1 %v10242_v34, %s15840_s18  ;;  %v9517_v34 = vld [vmem:[%s10664_s13 + $0x20c] sm:$0x1] }
 0xc9a   : > { %5872 = vrot.lane.b32.xlu0 %v5841_v3, %s15840_s18  ;;  %v6006_v3 = vshll.u32 %v14104_v42, 16 }
 0xc9c   : > { %v6008_v24 = vrot.slane %v6006_v3, 1 }
 0xc9d   : > { %5876 = vrot.lane.b32.xlu1 %v5843_v1, %s15840_s18 }
 0xca2   : > { %5878 = vrot.lane.b32.xlu0 %v10244_v30, %s15840_s18  ;;  %v5904_v30 = vsel %vm1104_vm0, %v10219_v31, %v14039_v25  ;;  %v10223_v31 = vld [vmem:[%s10664_s13 + $0x228] sm:$0xff] }
 0xca5   : > { %5882 = vrot.lane.b32.xlu1 %v10245_v61, %s15840_s18  ;;  %v5611_v61 = vunpack.c.l.b16 %v9517_v34 }
 0xca7   : > { %v5637_v15 = vpack.c.b16 %v5611_v61, %v5611_v61 }
 0xcaa   : > { %5884 = vrot.lane.b32.xlu0 %v5847_v56, %s15840_s18 }
 0xcad   : > { %5888 = vrot.lane.b32.xlu1 %v5849_v35, %s15840_s18 }
 0xcb7   : > { %v14060_v60 = vpop.xlane.xlu1 %5472 }
 0xcb8   : > { %15971 = vst [vmem:[#allocation30_spill] sm:$0xff] %v14060_v60 }
 0xcb9   : > { %v14056_v54 = vpop.xlane.xlu0 %5476 }
 0xcba   : > { %15970 = vst [vmem:[#allocation31_spill] sm:$0xff] %v14056_v54 }
 0xccc   : > { %v14062_v51 = vpop.permute.xlu0 %5744 }
 0xccd   : > { %v5913_v52 = vsel %vm1104_vm0, %v5637_v15, %v14062_v51 }
 0xccf   : > { %v5743_v7 = vpop.permute.xlu1 %5742 }
 0xcd0   : > { %v5910_v43 = vsel %vm1104_vm0, %v10220_v17, %v5743_v7 }
 0xcd1   : > { %v14121_v21 = vsel %vm1165_vm1, %v5910_v43, %v5863_v5  ;;  %v5617_v5 = vunpack.c.l.b16 %v9523_v19  ;;  %v9529_v43 = vld [vmem:[%s10664_s13 + $0x23c] sm:$0x1] }
 0xcd2   : > { %v6022_v25 = vshll.u32 %v14121_v21, 16 }
 0xcd3   : > { %v5641_v61 = vpack.c.b16 %v5617_v5, %v5617_v5 }
 0xcd4   : > { %v14066_v49 = vpop.permute.xlu0 %5750  ;;  %v6024_v33 = vrot.slane %v6022_v25, 1 }
 0xcd7   : > { %v14068_v53 = vpop.permute.xlu1 %5754 }
 0xcd8   : > { %v5928_v3 = vsel %vm1104_vm0, %v10223_v31, %v14068_v53  ;;  %v5623_v53 = vunpack.c.l.b16 %v9529_v43 }
 0xcdc   : > { %v14072_v39 = vpop.permute.xlu0 %5756 }
 0xcdf   : > { %v14074_v27 = vpop.permute.xlu1 %5760 }
 0xce4   : > { %v14078_v4 = vpop.permute.xlu0 %5762 }
 0xce7   : > { %v14083_v47 = vpop.permute.xlu1 %5766 }
 0xcec   : > { %v14089_v22 = vpop.permute.xlu0 %5768 }
 0xcef   : > { %v5853_v62 = vpop.permute.xlu1 %5852 }
 0xcf0   : > { %v14098_v40 = vsel %vm1165_vm1, %v5895_v36, %v5853_v62  ;;  %v10221_v62 = vld [vmem:[%s10664_s13 + $0x210] sm:$0xff] }
 0xcf1   : > { %v5996_v46 = vshll.u32 %v14098_v40, 16  ;;  %v5916_v34 = vsel %vm1104_vm0, %v10221_v62, %v14052_v0 }
 0xcf3   : > { %v5998_v14 = vrot.slane %v5996_v46, 1 }
 0xcf4   : > { %v5855_v32 = vpop.permute.xlu0 %5854 }
 0xcf5   : > { %v14112_v28 = vsel %vm1165_vm1, %v5898_v48, %v5855_v32  ;;  %v5999_v45 = vsel %vm1206_vm3, %v5995_v13, %v5998_v14  ;;  %v6020_v13 = vshrl.u32 %v14121_v21, 16  ;;  %v14157_v14 = vsel %vm1165_vm1, %v5919_v59, %v5869_v29  ;;  %v9526_v32 = vld [vmem:[%s10664_s13 + $0x230] sm:$0x1] }
 0xcf6   : > { %v6002_v1 = vshll.u32 %v14112_v28, 16  ;;  %6140 = vrot.lane.b32.xlu0 %v5999_v45, %s15894_s30  ;;  %v6000_v12 = vshrl.u32 %v14112_v28, 16  ;;  %v6036_v57 = vshll.u32 %v14157_v14, 16  ;;  %v5645_v29 = vpack.c.b16 %v5623_v53, %v5623_v53 }
 0xcf7   : > { %v5859_v6 = vpop.permute.xlu1 %5858  ;;  %v6025_v11 = vor.u32 %v6024_v33, %v6020_v13 }
 0xcf8   : > { %v6004_v56 = vrot.slane %v6002_v1, 1  ;;  %v14125_v35 = vsel %vm1165_vm1, %v5904_v30, %v5859_v6  ;;  %v5875_v1 = vpop.permute.xlu2 %5874  ;;  %v5922_v6 = vsel %vm1104_vm0, %v10222_v8, %v14066_v49 }
 0xcf9   : > { %v6012_v7 = vshll.u32 %v14125_v35, 16  ;;  %v6010_v36 = vshrl.u32 %v14125_v35, 16 }
 0xcfa   : > { %v6005_v20 = vor.u32 %v6004_v56, %v6000_v12  ;;  %v5620_v12 = vunpack.c.l.b16 %v9526_v32 }
 0xcfb   : > { %v6014_v2 = vrot.slane %v6012_v7, 1  ;;  %v14181_v7 = vsel %vm1165_vm1, %v5928_v3, %v5875_v1 }
 0xcfc   : > { %v5861_v55 = vpop.permute.xlu0 %5860  ;;  %v14132_v10 = vsel %vm1206_vm3, %v6005_v20, %v6008_v24  ;;  %v6052_v49 = vshll.u32 %v14181_v7, 16 }
 0xcfd   : > { %v14135_v44 = vsel %vm1165_vm1, %v5907_v23, %v5861_v55  ;;  %6142 = vrot.lane.b32.xlu2 %v14132_v10, %s15894_s30  ;;  %v6015_v46 = vor.u32 %v6014_v2, %v6010_v36  ;;  %v6038_v23 = vrot.slane %v6036_v57, 1  ;;  %v5643_v55 = vpack.c.b16 %v5620_v12, %v5620_v12 }
 0xcfe   : > { %v6016_v18 = vshll.u32 %v14135_v44, 16  ;;  %v5925_v2 = vsel %vm1104_vm0, %v5641_v61, %v14058_v58  ;;  %v6054_v19 = vrot.slane %v6052_v49, 1  ;;  %v6087_v57 = vrot.slane %v14098_v40, 1 }
 0xcff   : > { %v5865_v41 = vpop.permute.xlu1 %5864  ;;  %v5931_v59 = vsel %vm1104_vm0, %v5643_v55, %v14072_v39  ;;  %v6086_v61 = vrot.slane %v14086_v50, 1  ;;  %v6089_v12 = vrot.slane %v14112_v28, 1  ;;  %v6095_v55 = vrot.slane %v14121_v21, 1 }
 0xd00   : > { %v6018_v16 = vrot.slane %v6016_v18, 1  ;;  %v14148_v17 = vsel %vm1165_vm1, %v5913_v52, %v5865_v41  ;;  %v5881_v31 = vpop.permute.xlu2 %5880 }
 0xd01   : > { %v6026_v26 = vshll.u32 %v14148_v17, 16 }
 0xd02   : > { %v14154_v51 = vsel %vm1206_vm3, %v6015_v46, %v6018_v16  ;;  %v10224_v16 = vld [vmem:[%s10664_s13 + $0x234] sm:$0xff]  ;;  %v5937_v46 = vsel %vm1104_vm0, %v5645_v29, %v14074_v27  ;;  %v6099_v29 = vrot.slane %v14157_v14, 1  ;;  %v6104_v14 = vrot.slane %v14181_v7, 1 }
 0xd03   : > { %v6028_v48 = vrot.slane %v6026_v26, 1  ;;  %6144 = vrot.lane.b32.xlu1 %v14154_v51, %s15894_s30  ;;  %v5934_v27 = vsel %vm1104_vm0, %v10224_v16, %v14064_v37  ;;  %v10225_v16 = vld [vmem:[%s10664_s13 + $0x240] sm:$0xff] }
 0xd04   : > { %v5867_v45 = vpop.permute.xlu0 %5866 }
 0xd05   : > { %v14169_v30 = vsel %vm1165_vm1, %v5916_v34, %v5867_v45  ;;  %v14172_v9 = vsel %vm1206_vm3, %v6025_v11, %v6028_v48  ;;  %v6050_v48 = vshrl.u32 %v14181_v7, 16  ;;  %v5981_v34 = vsel %vm1165_vm1, %v5937_v46, %v5881_v31 }
 0xd06   : > { %6146 = vrot.lane.b32.xlu0 %v14172_v9, %s15894_s30  ;;  %v6032_v0 = vshll.u32 %v14169_v30, 16  ;;  %v6030_v20 = vshrl.u32 %v14169_v30, 16  ;;  %v6066_v1 = vshll.u32 %v5981_v34, 16  ;;  %v5940_v31 = vsel %vm1104_vm0, %v10225_v16, %v14078_v4 }
 0xd07   : > { %v5871_v56 = vpop.permute.xlu1 %5870  ;;  %v6055_v32 = vor.u32 %v6054_v19, %v6050_v48 }
 0xd08   : > { %v14184_v24 = vsel %vm1165_vm1, %v5922_v6, %v5871_v56  ;;  %v6034_v15 = vrot.slane %v6032_v0, 1  ;;  %v6068_v53 = vrot.slane %v6066_v1, 1  ;;  %v6088_v56 = vsel %vm1303_vm2, %v6086_v61, %v6087_v57  ;;  %v5887_v57 = vpop.permute.xlu2 %5886 }
 0xd09   : > { %v6042_v25 = vshll.u32 %v14184_v24, 16  ;;  %v6040_v62 = vshrl.u32 %v14184_v24, 16 }
 0xd0a   : > { %v6035_v63 = vor.u32 %v6034_v15, %v6030_v20  ;;  %v6090_v15 = vrot.slane %v14104_v42, 1  ;;  %v6098_v42 = vrot.slane %v14169_v30, 1 }
 0xd0b   : > { %v6044_v52 = vrot.slane %v6042_v25, 1 }
 0xd0c   : > { %v5873_v18 = vpop.permute.xlu0 %5872  ;;  %v14192_v36 = vsel %vm1206_vm3, %v6035_v63, %v6038_v23  ;;  %v6091_v25 = vsel %vm1303_vm2, %v6089_v12, %v6090_v15  ;;  %v6096_v23 = vrot.slane %v14148_v17, 1  ;;  %v6093_v63 = vrot.slane %v14135_v44, 1  ;;  %v10226_v15 = vld [vmem:[%s10664_s13 + $0x24c] sm:$0xff] }
 0xd0d   : > { %v14195_v41 = vsel %vm1165_vm1, %v5925_v2, %v5873_v18  ;;  %6148 = vrot.lane.b32.xlu2 %v14192_v36, %s15894_s30  ;;  %v6045_v5 = vor.u32 %v6044_v52, %v6040_v62  ;;  %v6092_v2 = vrot.slane %v14125_v35, 1  ;;  %v14256_v44 = vsel %vm1303_vm2, %v6098_v42, %v6099_v29 }
 0xd0e   : > { %v6046_v33 = vshll.u32 %v14195_v41, 16  ;;  %v14244_v49 = vsel %vm1303_vm2, %v6095_v55, %v6096_v23  ;;  %v6102_v52 = vrot.slane %v14195_v41, 1  ;;  %v5946_v23 = vsel %vm1104_vm0, %v10226_v15, %v14083_v47 }
 0xd0f   : > { %v5877_v58 = vpop.permute.xlu1 %5876  ;;  %v14251_v17 = vsel %vm1303_vm2, %v6092_v2, %v6093_v63  ;;  %v5987_v55 = vsel %vm1165_vm1, %v5946_v23, %v5887_v57  ;;  %v9535_v2 = vld [vmem:[%s10664_s13 + $0x254] sm:$0x1] }
 0xd10   : > { %v6048_v26 = vrot.slane %v6046_v33, 1  ;;  %v5977_v13 = vsel %vm1165_vm1, %v5931_v59, %v5877_v58  ;;  %v6101_v59 = vrot.slane %v14184_v24, 1  ;;  %v6108_v58 = vrot.slane %v5981_v34, 1 }
 0xd11   : > { %v6056_v8 = vshll.u32 %v5977_v13, 16  ;;  %v6105_v18 = vrot.slane %v5977_v13, 1  ;;  %v9532_v13 = vld [vmem:[%s10664_s13 + $0x248] sm:$0x1]  ;;  %v6127_v16 = vshll.u32 %v5987_v55, 16 }
 0xd12   : > { %v14209_v11 = vsel %vm1206_vm3, %v6045_v5, %v6048_v26  ;;  %v14270_v19 = vsel %vm1303_vm2, %v6101_v59, %v6102_v52  ;;  %v5626_v5 = vunpack.c.l.b16 %v9532_v13 }
 0xd13   : > { %v6058_v39 = vrot.slane %v6056_v8, 1  ;;  %6150 = vrot.lane.b32.xlu1 %v14209_v11, %s15894_s30  ;;  %v14264_v62 = vsel %vm1303_vm2, %v6104_v14, %v6105_v18  ;;  %v5629_v18 = vunpack.c.l.b16 %v9535_v2 }
 0xd14   : > { %v5879_v43 = vpop.permute.xlu0 %5878  ;;  %v5647_v8 = vpack.c.b16 %v5626_v5, %v5626_v5 }
 0xd15   : > { %v14217_v45 = vsel %vm1165_vm1, %v5934_v27, %v5879_v43  ;;  %v14220_v3 = vsel %vm1206_vm3, %v6055_v32, %v6058_v39  ;;  %v5649_v47 = vpack.c.b16 %v5629_v18, %v5629_v18 }
 0xd16   : > { %6152 = vrot.lane.b32.xlu0 %v14220_v3, %s15894_s30  ;;  %v6062_v0 = vshll.u32 %v14217_v45, 16  ;;  %v6060_v6 = vshrl.u32 %v14217_v45, 16  ;;  %v6107_v33 = vrot.slane %v14217_v45, 1  ;;  %v5943_v48 = vsel %vm1104_vm0, %v5647_v8, %v14070_v38 }
 0xd17   : > { %v5883_v46 = vpop.permute.xlu1 %5882 }
 0xd18   : > { %v6064_v37 = vrot.slane %v6062_v0, 1  ;;  %v14275_v41 = vsel %vm1303_vm2, %v6107_v33, %v6108_v58  ;;  %v5983_v26 = vsel %vm1165_vm1, %v5940_v31, %v5883_v46 }
 0xd19   : > { %v6112_v39 = vshll.u32 %v5983_v26, 16  ;;  %v6110_v27 = vshrl.u32 %v5983_v26, 16 }
 0xd1a   : > { %v6065_v20 = vor.u32 %v6064_v37, %v6060_v6  ;;  %v6122_v6 = vrot.slane %v5983_v26, 1 }
 0xd1b   : > { %6156 = vrot.lane.b32.xlu1 %v6088_v56, %s15973_s1  ;;  %v6114_v32 = vrot.slane %v6112_v39, 1  ;;  %v6137_v39 = vrot.slane %v5987_v55, 1 }
 0xd1c   : > { %v14233_v40 = vsel %vm1206_vm3, %v6065_v20, %v6068_v53  ;;  %v5885_v4 = vpop.permute.xlu0 %5884 }
 0xd1d   : > { %6154 = vrot.lane.b32.xlu2 %v14233_v40, %s15894_s30  ;;  %v5985_v34 = vsel %vm1165_vm1, %v5943_v48, %v5885_v4  ;;  %v6115_v1 = vor.u32 %v6114_v32, %v6110_v27 }
 0xd1e   : > { %6158 = vrot.lane.b32.xlu0 %v6091_v25, %s15973_s1  ;;  %v6123_v61 = vrot.slane %v5985_v34, 1 }
 0xd1f   : > { %v5889_v53 = vpop.permute.xlu1 %5888 }
 0xd20   : > { %v6124_v37 = vsel %vm1303_vm2, %v6122_v6, %v6123_v61 }
 0xd23   : > { %6162 = vrot.lane.b32.xlu1 %v14244_v49, %s15973_s1 }
 0xd25   : > { %6160 = vrot.lane.b32.xlu2 %v14251_v17, %s15973_s1 }
 0xd26   : > { %6164 = vrot.lane.b32.xlu0 %v14256_v44, %s15973_s1 }
 0xd2b   : > { %6168 = vrot.lane.b32.xlu1 %v14264_v62, %s15973_s1 }
 0xd2d   : > { %6166 = vrot.lane.b32.xlu2 %v14270_v19, %s15973_s1 }
 0xd2e   : > { %6170 = vrot.lane.b32.xlu0 %v14275_v41, %s15973_s1 }
 0xd33   : > { %6174 = vrot.lane.b32.xlu1 %v14125_v35, %s15974_s8 }
 0xd35   : > { %6172 = vrot.lane.b32.xlu2 %v14112_v28, %s15974_s8 }
 0xd36   : > { %6176 = vrot.lane.b32.xlu0 %v14121_v21, %s15974_s8 }
 0xd3b   : > { %6180 = vrot.lane.b32.xlu1 %v14184_v24, %s15974_s8 }
 0xd3d   : > { %6178 = vrot.lane.b32.xlu2 %v14169_v30, %s15974_s8 }
 0xd3e   : > { %6182 = vrot.lane.b32.xlu0 %v14181_v7, %s15974_s8 }
 0xd43   : > { %6186 = vrot.lane.b32.xlu1 %v5983_v26, %s15974_s8 }
 0xd45   : > { %6184 = vrot.lane.b32.xlu2 %v14217_v45, %s15974_s8 }
 0xd46   : > { %6188 = vrot.lane.b32.xlu0 %v14132_v10, %s15949_s14  ;;  %v6116_v10 = vshll.u32 %v5985_v34, 16 }
 0xd48   : > { %v6118_v43 = vrot.slane %v6116_v10, 1 }
 0xd4a   : > { %v6119_v38 = vsel %vm1206_vm3, %v6115_v1, %v6118_v43 }
 0xd4b   : > { %6192 = vrot.lane.b32.xlu1 %v14172_v9, %s15949_s14 }
 0xd4d   : > { %6190 = vrot.lane.b32.xlu2 %v14154_v51, %s15949_s14 }
 0xd4e   : > { %6194 = vrot.lane.b32.xlu0 %v14192_v36, %s15949_s14 }
 0xd53   : > { %6198 = vrot.lane.b32.xlu1 %v14220_v3, %s15949_s14 }
 0xd55   : > { %6196 = vrot.lane.b32.xlu2 %v14209_v11, %s15949_s14 }
 0xd56   : > { %6200 = vrot.lane.b32.xlu0 %v14233_v40, %s15949_s14 }
 0xd57   : > { %v14327_v0 = vpop.permute.xlu2 %6142 }
 0xd5b   : > { %6204 = vrot.lane.b32.xlu1 %v6091_v25, %s15950_s9 }
 0xd5d   : > { %6202 = vrot.lane.b32.xlu2 %v6119_v38, %s15949_s14 }
 0xd5e   : > { %6206 = vrot.lane.b32.xlu0 %v14251_v17, %s15950_s9 }
 0xd63   : > { %6210 = vrot.lane.b32.xlu1 %v14256_v44, %s15950_s9 }
 0xd65   : > { %6208 = vrot.lane.b32.xlu2 %v14244_v49, %s15950_s9 }
 0xd66   : > { %6212 = vrot.lane.b32.xlu0 %v14270_v19, %s15950_s9 }
 0xd67   : > { %v14335_v12 = vpop.permute.xlu2 %6148 }
 0xd68   : > { %v14343_v56 = vpop.permute.xlu0 %6140 }
 0xd69   : > { %15975 = vst [vmem:[#allocation16_spill] sm:$0xff] %v14343_v56 }
 0xd6b   : > { %6216 = vrot.lane.b32.xlu1 %v14275_v41, %s15950_s9 }
 0xd6d   : > { %6214 = vrot.lane.b32.xlu2 %v14264_v62, %s15950_s9 }
 0xd6e   : > { %6218 = vrot.lane.b32.xlu0 %v6124_v37, %s15950_s9 }
 0xd73   : > { %6222 = vrot.lane.b32.xlu1 %v14121_v21, %s15922_s29 }
 0xd75   : > { %6220 = vrot.lane.b32.xlu2 %v14125_v35, %s15922_s29  ;;  %v14350_v25 = vpop.permute.xlu1 %6144 }
 0xd76   : > { %6224 = vrot.lane.b32.xlu0 %v14169_v30, %s15922_s29 }
 0xd77   : > { %v14345_v20 = vpop.permute.xlu2 %6154 }
 0xd78   : > { %v14358_v63 = vpop.permute.xlu0 %6146 }
 0xd7b   : > { %6228 = vrot.lane.b32.xlu1 %v14181_v7, %s15922_s29 }
 0xd7d   : > { %6226 = vrot.lane.b32.xlu2 %v14184_v24, %s15922_s29 }
 0xd7e   : > { %6230 = vrot.lane.b32.xlu0 %v14217_v45, %s15922_s29 }
 0xd7f   : > { %v14361_v42 = vpop.permute.xlu2 %6160 }
 0xd83   : > { %6234 = vrot.lane.b32.xlu1 %v5987_v55, %s15922_s29 }
 0xd85   : > { %v14365_v29 = vpop.permute.xlu1 %6150  ;;  %6232 = vrot.lane.b32.xlu2 %v5983_v26, %s15922_s29 }
 0xd86   : > { %6236 = vrot.lane.b32.xlu0 %v14154_v51, %s15923_s27  ;;  %v5949_v51 = vsel %vm1104_vm0, %v5649_v47, %v14089_v22  ;;  %v6125_v22 = vshrl.u32 %v5987_v55, 16 }
 0xd87   : > { %v14374_v14 = vpop.permute.xlu2 %6166  ;;  %v5989_v58 = vsel %vm1165_vm1, %v5949_v51, %v5889_v53 }
 0xd88   : > { %v14370_v52 = vpop.permute.xlu0 %6152  ;;  %v6138_v48 = vrot.slane %v5989_v58, 1 }
 0xd89   : > { %v6281_v56 = vsel %vm1486_vm4, %v14181_v7, %v14370_v52  ;;  %v6279_v7 = vsel %vm1486_vm4, %v14184_v24, %v14365_v29 }
 0xd8b   : > { %6240 = vrot.lane.b32.xlu1 %v14192_v36, %s15923_s27  ;;  %v6131_v36 = vshll.u32 %v5989_v58, 16 }
 0xd8d   : > { %v14376_v33 = vpop.permute.xlu1 %6156  ;;  %6238 = vrot.lane.b32.xlu2 %v14172_v9, %s15923_s27  ;;  %v6129_v9 = vrot.slane %v6127_v16, 1 }
 0xd8e   : > { %15976 = vst [vmem:[#allocation21_spill] sm:$0xff] %v14376_v33  ;;  %6242 = vrot.lane.b32.xlu0 %v14209_v11, %s15923_s27  ;;  %v6133_v11 = vrot.slane %v6131_v36, 1 }
 0xd8f   : > { %v14393_v31 = vpop.permute.xlu2 %6172  ;;  %v6130_v13 = vor.u32 %v6129_v9, %v6125_v22 }
 0xd90   : > { %v14384_v59 = vpop.permute.xlu0 %6158  ;;  %15977 = vst [vmem:[#allocation26_spill] sm:$0xff] %v14393_v31 }
 0xd93   : > { %6246 = vrot.lane.b32.xlu1 %v14233_v40, %s15923_s27  ;;  %v6134_v40 = vsel %vm1206_vm3, %v6130_v13, %v6133_v11 }
 0xd95   : > { %v14389_v46 = vpop.permute.xlu1 %6162  ;;  %6244 = vrot.lane.b32.xlu2 %v14220_v3, %s15923_s27 }
 0xd96   : > { %6248 = vrot.lane.b32.xlu0 %v6119_v38, %s15923_s27 }
 0xd97   : > { %v14406_v3 = vpop.permute.xlu2 %6178 }
 0xd98   : > { %v14396_v26 = vpop.permute.xlu0 %6164 }
 0xd9b   : > { %6252 = vrot.lane.b32.xlu1 %v14251_v17, %s15866_s20 }
 0xd9d   : > { %v14401_v5 = vpop.permute.xlu1 %6168  ;;  %6250 = vrot.lane.b32.xlu2 %v6134_v40, %s15923_s27 }
 0xd9e   : > { %6254 = vrot.lane.b32.xlu0 %v14244_v49, %s15866_s20 }
 0xd9f   : > { %v6185_v34 = vpop.permute.xlu2 %6184 }
 0xda0   : > { %v6171_v8 = vpop.permute.xlu0 %6170 }
 0xda3   : > { %6258 = vrot.lane.b32.xlu1 %v14270_v19, %s15866_s20  ;;  %v6139_v19 = vsel %vm1303_vm2, %v6137_v39, %v6138_v48 }
 0xda5   : > { %v14410_v4 = vpop.permute.xlu1 %6174  ;;  %6256 = vrot.lane.b32.xlu2 %v14256_v44, %s15866_s20 }
 0xda6   : > { %6260 = vrot.lane.b32.xlu0 %v14264_v62, %s15866_s20 }
 0xda7   : > { %v14425_v10 = vpop.permute.xlu2 %6190 }
 0xda8   : > { %v14416_v17 = vpop.permute.xlu0 %6176 }
 0xdab   : > { %6264 = vrot.lane.b32.xlu1 %v6124_v37, %s15866_s20 }
 0xdad   : > { %v14419_v49 = vpop.permute.xlu1 %6180  ;;  %6262 = vrot.lane.b32.xlu2 %v14275_v41, %s15866_s20 }
 0xdae   : > { %6266 = vrot.lane.b32.xlu0 %v6139_v19, %s15866_s20 }
 0xdaf   : > { %v14431_v43 = vpop.permute.xlu2 %6196 }
 0xdb0   : > { %v6183_v44 = vpop.permute.xlu0 %6182 }
 0xdb5   : > { %v6187_v62 = vpop.permute.xlu1 %6186 }
 0xdb7   : > { %v6203_v57 = vpop.permute.xlu2 %6202 }
 0xdb8   : > { %v14427_v32 = vpop.permute.xlu0 %6188 }
 0xdb9   : > { %15978 = vst [vmem:[#allocation19_spill] sm:$0xff] %v14427_v32 }
 0xdbd   : > { %v14429_v27 = vpop.permute.xlu1 %6192 }
 0xdbf   : > { %v14439_v37 = vpop.permute.xlu2 %6208 }
 0xdc0   : > { %v14433_v1 = vpop.permute.xlu0 %6194 }
 0xdc5   : > { %v6199_v38 = vpop.permute.xlu1 %6198 }
 0xdc7   : > { %v6215_v23 = vpop.permute.xlu2 %6214 }
 0xdc8   : > { %v6201_v61 = vpop.permute.xlu0 %6200 }
 0xdcd   : > { %v14435_v41 = vpop.permute.xlu1 %6204 }
 0xdce   : > { %15979 = vst [vmem:[#allocation15_spill] sm:$0xff] %v14435_v41  ;;  %v6283_v41 = vsel %vm1486_vm4, %v14217_v45, %v14345_v20 }
 0xdcf   : > { %v14445_v47 = vpop.permute.xlu2 %6220 }
 0xdd0   : > { %v14437_v6 = vpop.permute.xlu0 %6206  ;;  %15980 = vst [vmem:[#allocation14_spill] sm:$0xff] %v14445_v47 }
 0xdd5   : > { %v14441_v53 = vpop.permute.xlu1 %6210 }
 0xdd7   : > { %v14449_v16 = vpop.permute.xlu2 %6226 }
 0xdd8   : > { %v6213_v15 = vpop.permute.xlu0 %6212 }
 0xddd   : > { %v6217_v55 = vpop.permute.xlu1 %6216 }
 0xddf   : > { %v6233_v11 = vpop.permute.xlu2 %6232 }
 0xde0   : > { %v6219_v2 = vpop.permute.xlu0 %6218 }
 0xde5   : > { %v14443_v18 = vpop.permute.xlu1 %6222 }
 0xde7   : > { %v14457_v48 = vpop.permute.xlu2 %6238 }
 0xde8   : > { %v14447_v51 = vpop.permute.xlu0 %6224  ;;  %15982 = vst [vmem:[#allocation32_spill] sm:$0xff] %v14457_v48 }
 0xded   : > { %v6229_v58 = vpop.permute.xlu1 %6228 }
 0xdef   : > { %v6245_v54 = vpop.permute.xlu2 %6244 }
 0xdf0   : > { %v6231_v36 = vpop.permute.xlu0 %6230 }
 0xdf5   : > { %v6235_v9 = vpop.permute.xlu1 %6234 }
 0xdf7   : > { %v6251_v31 = vpop.permute.xlu2 %6250 }
 0xdf8   : > { %v14451_v22 = vpop.permute.xlu0 %6236 }
 0xdf9   : > { %15981 = vst [vmem:[#allocation17_spill] sm:$0xff] %v14451_v22  ;;  %v6299_v22 = vsel %vm1503_vm5, %v6283_v41, %v6171_v8 }
 0xdfa   : > { %v6315_v32 = vsel %vm1520_vm6, %v6299_v22, %v6187_v62 }
 0xdfb   : > { %v6331_v48 = vsel %vm1537_vm7, %v6315_v32, %v6203_v57 }
 0xdfd   : > { %v14453_v13 = vpop.permute.xlu1 %6240 }
 0xdff   : > { %v6257_v57 = vpop.permute.xlu2 %6256 }
 0xe00   : > { %v14455_v40 = vpop.permute.xlu0 %6242 }
 0xe05   : > { %v6247_v39 = vpop.permute.xlu1 %6246 }
 0xe08   : > { %v6249_v19 = vpop.permute.xlu0 %6248 }
 0xe0d   : > { %v14459_v60 = vpop.permute.xlu1 %6252 }
 0xe0e   : > { %15983 = vst [vmem:[#allocation33_spill] sm:$0xff] %v14459_v60  ;;  %v6347_v60 = vsel %vm1554_vm8, %v6331_v48, %v6219_v2 }
 0xe0f   : > { %v6363_v45 = vsel %vm1571_vm9, %v6347_v60, %v6235_v9 }
 0xe10   : > { %v14461_v47 = vpop.permute.xlu0 %6254  ;;  %v6379_v8 = vsel %vm1588_vm10, %v6363_v45, %v6251_v31 }
 0xe11   : > { %15984 = vst [vmem:[#allocation34_spill] sm:$0xff] %v14461_v47  ;;  %v6297_v47 = vsel %vm1503_vm5, %v6281_v56, %v14401_v5  ;;  %v6295_v5 = vsel %vm1503_vm5, %v6279_v7, %v14374_v14  ;;  %v6277_v14 = vsel %vm1486_vm4, %v14169_v30, %v14335_v12  ;;  %v6275_v12 = vsel %vm1486_vm4, %v14121_v21, %v14358_v63 }
 0xe12   : > { %v6313_v20 = vsel %vm1520_vm6, %v6297_v47, %v6185_v34  ;;  %v6311_v34 = vsel %vm1520_vm6, %v6295_v5, %v6183_v44  ;;  %v6263_v44 = vpop.permute.xlu2 %6262  ;;  %v6293_v22 = vsel %vm1503_vm5, %v6277_v14, %v14396_v26  ;;  %v6291_v26 = vsel %vm1503_vm5, %v6275_v12, %v14389_v46  ;;  %v9752_v5 = vld [vmem:[%s10664_s13 + $0x2e4] sm:$0x1]  ;;  %v9761_v12 = vld [vmem:[%s10664_s13 + $0x308] sm:$0x1] }
 0xe13   : > { %v6329_v41 = vsel %vm1537_vm7, %v6313_v20, %v6201_v61  ;;  %v6327_v2 = vsel %vm1537_vm7, %v6311_v34, %v6199_v38  ;;  %v6309_v38 = vsel %vm1520_vm6, %v6293_v22, %v14419_v49 }
 0xe14   : > { %v6345_v52 = vsel %vm1554_vm8, %v6329_v41, %v6217_v55  ;;  %v6343_v29 = vsel %vm1554_vm8, %v6327_v2, %v6215_v23  ;;  %v6639_v2 = vunpack.c.l.b16 %v9752_v5 }
 0xe15   : > { %v6259_v50 = vpop.permute.xlu1 %6258  ;;  %v6361_v31 = vsel %vm1571_vm9, %v6345_v52, %v6233_v11  ;;  %v6359_v47 = vsel %vm1571_vm9, %v6343_v29, %v6231_v36  ;;  %v6325_v11 = vsel %vm1537_vm7, %v6309_v38, %v14431_v43  ;;  %v6307_v43 = vsel %vm1520_vm6, %v6291_v26, %v14406_v3  ;;  %v15990_v52 = vld [vmem:[#allocation26_spill] sm:$0xff]  ;;  %v15995_v14 = vld [vmem:[#allocation33_spill] sm:$0xff]  ;;  %v10259_v38 = vld [vmem:[%s10664_s13 + $0x2e8] sm:$0xff] }
 0xe16   : > { %v6377_v61 = vsel %vm1588_vm10, %v6361_v31, %v6249_v19  ;;  %v6375_v9 = vsel %vm1588_vm10, %v6359_v47, %v6247_v39  ;;  %v6341_v36 = vsel %vm1554_vm8, %v6325_v11, %v6213_v15  ;;  %v6323_v15 = vsel %vm1537_vm7, %v6307_v43, %v14433_v1  ;;  %v9749_v19 = vld [vmem:[%s10664_s13 + $0x2d8] sm:$0x1]  ;;  %v15992_v31 = vld [vmem:[#allocation15_spill] sm:$0xff]  ;;  %v10433_v11 = vld [vmem:[%s15772_s3] sm:$0xf] }
 0xe17   : > { %v6391_v23 = vsel %vm1605_vm11, %v6375_v9, %v6263_v44  ;;  %v6357_v30 = vsel %vm1571_vm9, %v6341_v36, %v6229_v58  ;;  %v6339_v58 = vsel %vm1554_vm8, %v6323_v15, %v14441_v53  ;;  %v6667_v44 = vpack.c.b16 %v6639_v2, %v6639_v2  ;;  %v9770_v43 = vld [vmem:[%s10664_s13 + $0x32c] sm:$0x1] }
 0xe18   : > { %v6261_v33 = vpop.permute.xlu0 %6260  ;;  %v6406_v48 = vsel %vm1622_vm12, %v6391_v23, 0  ;;  %v6373_v49 = vsel %vm1588_vm10, %v6357_v30, %v6245_v54  ;;  %v6273_v54 = vsel %vm1486_vm4, %v14125_v35, %v14350_v25  ;;  %v15989_v7 = vld [vmem:[#allocation34_spill] sm:$0xff]  ;;  %v9758_v23 = vld [vmem:[%s10664_s13 + $0x2fc] sm:$0x1]  ;;  %v6648_v26 = vunpack.c.l.b16 %v9761_v12 }
 0xe19   : > { %v6389_v39 = vsel %vm1605_vm11, %v6373_v49, %v6261_v33  ;;  %v6289_v63 = vsel %vm1503_vm5, %v6273_v54, %v14361_v42  ;;  %v6355_v33 = vsel %vm1571_vm9, %v6339_v58, %v14449_v16  ;;  %v10257_v42 = vld [vmem:[%s10664_s13 + $0x2d0] sm:$0xff]  ;;  %v6645_v36 = vunpack.c.l.b16 %v9758_v23  ;;  %v10261_v30 = vld [vmem:[%s10664_s13 + $0x300] sm:$0xff] }
 0xe1a   : > { %v6404_v21 = vsel %vm1622_vm12, %v6389_v39, 0  ;;  %v6305_v46 = vsel %vm1520_vm6, %v6289_v63, %v14416_v17  ;;  %v6371_v3 = vsel %vm1588_vm10, %v6355_v33, %v14455_v40  ;;  %v6271_v17 = vsel %vm1486_vm4, %v14112_v28, %v14327_v0  ;;  %6684 = vrot.lane.b32.xlu0 %v10257_v42, %s15837_s12  ;;  %v10263_v39 = vld [vmem:[%s10664_s13 + $0x318] sm:$0xff]  ;;  %v9779_v54 = vld [vmem:[%s10664_s13 + $0x350] sm:$0x1] }
 0xe1b   : > { %v6321_v1 = vsel %vm1537_vm7, %v6305_v46, %v14429_v27  ;;  %v6387_v53 = vsel %vm1605_vm11, %v6371_v3, %v6259_v50  ;;  %v6636_v50 = vunpack.c.l.b16 %v9749_v19  ;;  %v6673_v49 = vpack.c.b16 %v6648_v26, %v6648_v26  ;;  %v10269_v46 = vld [vmem:[%s10664_s13 + $0x360] sm:$0xff]  ;;  %v9788_v3 = vld [vmem:[%s10664_s13 + $0x374] sm:$0x1] }
 0xe1c   : > { %v6337_v35 = vsel %vm1554_vm8, %v6321_v1, %v14439_v37  ;;  %v6402_v25 = vsel %vm1622_vm12, %v6387_v53, 0  ;;  %v6287_v37 = vsel %vm1503_vm5, %v6271_v17, %v14384_v59  ;;  %v15985_v59 = vld [vmem:[#allocation16_spill] sm:$0xff]  ;;  %v6657_v15 = vunpack.c.l.b16 %v9770_v43 }
 0xe1d   : > { %v6265_v60 = vpop.permute.xlu1 %6264  ;;  %v6353_v16 = vsel %vm1571_vm9, %v6337_v35, %v14447_v51  ;;  %v6303_v40 = vsel %vm1520_vm6, %v6287_v37, %v14410_v4  ;;  %v6665_v45 = vpack.c.b16 %v6636_v50, %v6636_v50  ;;  %v6756_v63 = vunpack.c.l.b16 %v9779_v54  ;;  %v10272_v35 = vld [vmem:[%s10664_s13 + $0x384] sm:$0xff]  ;;  %v9755_v37 = vld [vmem:[%s10664_s13 + $0x2f0] sm:$0x1] }
 0xe1e   : > { %v6393_v24 = vsel %vm1605_vm11, %v6377_v61, %v6265_v60  ;;  %v6369_v27 = vsel %vm1588_vm10, %v6353_v16, %v14453_v13  ;;  %v6319_v28 = vsel %vm1537_vm7, %v6303_v40, %v14425_v10  ;;  %v6679_v58 = vpack.c.b16 %v6657_v15, %v6657_v15  ;;  %v10274_v15 = vld [vmem:[%s10664_s13 + $0x39c] sm:$0xff] }
 0xe1f   : > { %v6408_v55 = vsel %vm1622_vm12, %v6393_v24, 0  ;;  %v6385_v51 = vsel %vm1605_vm11, %v6369_v27, %v6257_v57  ;;  %v6335_v0 = vsel %vm1554_vm8, %v6319_v28, %v14437_v6  ;;  %v15993_v24 = vld [vmem:[#allocation14_spill] sm:$0xff]  ;;  %v6785_v33 = vpack.c.b16 %v6756_v63, %v6756_v63  ;;  %v10275_v27 = vld [vmem:[%s10664_s13 + $0x3a8] sm:$0xff] }
 0xe20   : > { %v6267_v62 = vpop.permute.xlu0 %6266  ;;  %v6400_v13 = vsel %vm1622_vm12, %v6385_v51, 0  ;;  %v6351_v20 = vsel %vm1571_vm9, %v6335_v0, %v14443_v18  ;;  %v10258_v18 = vld [vmem:[%s10664_s13 + $0x2dc] sm:$0xff]  ;;  %v6765_v1 = vunpack.c.l.b16 %v9788_v3  ;;  %v6642_v40 = vunpack.c.l.b16 %v9755_v37  ;;  %v10276_v3 = vld [vmem:[%s10664_s13 + $0x3b4] sm:$0xff] }
 0xe21   : > { %v6395_v32 = vsel %vm1605_vm11, %v6379_v8, %v6267_v62  ;;  %v15986_v8 = vld [vmem:[#allocation18_spill] sm:$0xff]  ;;  %v15987_v62 = vld [vmem:[#allocation21_spill] sm:$0xff] }
 0xe22   : > { %v6410_v56 = vsel %vm1622_vm12, %v6395_v32, 0  ;;  %v6269_v4 = vsel %vm1486_vm4, %v15986_v8, %v15985_v59  ;;  %6686 = vrot.lane.b32.xlu0 %v6665_v45, %s15837_s12  ;;  %v15988_v32 = vld [vmem:[#allocation32_spill] sm:$0xff]  ;;  %v6791_v53 = vpack.c.b16 %v6765_v1, %v6765_v1  ;;  %v9806_v51 = vld [vmem:[%s10664_s13 + $0x3bc] sm:$0x1]  ;;  %v6669_v28 = vpack.c.b16 %v6642_v40, %v6642_v40 }
 0xe23   : > { %6412 = vmatpush.bf16.xpose.msrb.mxu1 %v6410_v56  ;;  %v6285_v41 = vsel %vm1503_vm5, %v6269_v4, %v15987_v62  ;;  %v6367_v10 = vsel %vm1588_vm10, %v6351_v20, %v15988_v32  ;;  %v15991_v56 = vld [vmem:[#allocation19_spill] sm:$0xff]  ;;  %v6783_v45 = vunpack.c.l.b16 %v9806_v51  ;;  %v9764_v20 = vld [vmem:[%s10664_s13 + $0x314] sm:$0x1]  ;;  %v9767_v4 = vld [vmem:[%s10664_s13 + $0x320] sm:$0x1] }
 0xe24   : > { %v6383_v6 = vsel %vm1605_vm11, %v6367_v10, %v15989_v7  ;;  %v6301_v57 = vsel %vm1520_vm6, %v6285_v41, %v15990_v52  ;;  %v6651_v59 = vunpack.c.l.b16 %v9764_v20  ;;  %v10262_v8 = vld [vmem:[%s10664_s13 + $0x30c] sm:$0xff]  ;;  %v6654_v41 = vunpack.c.l.b16 %v9767_v4  ;;  %v10264_v10 = vld [vmem:[%s10664_s13 + $0x324] sm:$0xff]  ;;  %v9773_v7 = vld [vmem:[%s10664_s13 + $0x338] sm:$0x1] }
 0xe25   : > { %v6317_v60 = vsel %vm1537_vm7, %v6301_v57, %v15991_v56  ;;  %v6398_v61 = vsel %vm1622_vm12, %v6383_v6, 0  ;;  %v6803_v0 = vpack.c.b16 %v6783_v45, %v6783_v45  ;;  %v6660_v52 = vunpack.c.l.b16 %v9773_v7  ;;  %v10265_v57 = vld [vmem:[%s10664_s13 + $0x330] sm:$0xff]  ;;  %v9725_v20 = vld [vmem:[%s10664_s13 + $0x278] sm:$0x1] }
 0xe26   : > { %v6333_v34 = vsel %vm1554_vm8, %v6317_v60, %v15992_v31  ;;  %v6675_v62 = vpack.c.b16 %v6651_v59, %v6651_v59  ;;  %v6677_v32 = vpack.c.b16 %v6654_v41, %v6654_v41 }
 0xe27   : > { %v6349_v29 = vsel %vm1571_vm9, %v6333_v34, %v15993_v24  ;;  %v6681_v56 = vpack.c.b16 %v6660_v52, %v6660_v52  ;;  %v10267_v34 = vld [vmem:[%s10664_s13 + $0x348] sm:$0xff]  ;;  %v10268_v24 = vld [vmem:[%s10664_s13 + $0x354] sm:$0xff] }
 0xe2a   : > { %6688 = vrot.lane.b32.xlu0 %v10258_v18, %s15837_s12  ;;  %v9776_v18 = vld [vmem:[%s10664_s13 + $0x344] sm:$0x1] }
 0xe2b   : > { %6413 = vmatpush.bf16.xpose.msrb.mxu1 %v6408_v55  ;;  %v15994_v55 = vld [vmem:[#allocation17_spill] sm:$0xff]  ;;  %v6663_v60 = vunpack.c.l.b16 %v9776_v18 }
 0xe2c   : > { %v6365_v47 = vsel %vm1588_vm10, %v6349_v29, %v15994_v55  ;;  %v9785_v29 = vld [vmem:[%s10664_s13 + $0x368] sm:$0x1]  ;;  %v10247_v18 = vld [vmem:[%s10664_s13 + $0x258] sm:$0xff] }
 0xe2d   : > { %v6381_v9 = vsel %vm1605_vm11, %v6365_v47, %v15995_v14  ;;  %v6683_v5 = vpack.c.b16 %v6663_v60, %v6663_v60  ;;  %v6762_v14 = vunpack.c.l.b16 %v9785_v29  ;;  %v10248_v60 = vld [vmem:[%s10664_s13 + $0x264] sm:$0xff] }
 0xe2e   : > { %v6396_v22 = vsel %vm1622_vm12, %v6381_v9, 0 }
 0xe2f   : > { %v6789_v9 = vpack.c.b16 %v6762_v14, %v6762_v14 }
 0xe32   : > { %6690 = vrot.lane.b32.xlu0 %v6667_v44, %s15837_s12  ;;  %v10270_v44 = vld [vmem:[%s10664_s13 + $0x36c] sm:$0xff] }
 0xe33   : > { %6414 = vmatpush.bf16.xpose.msrb.mxu1 %v6406_v48  ;;  %v6671_v48 = vpack.c.b16 %v6645_v36, %v6645_v36  ;;  %v9794_v36 = vld [vmem:[%s10664_s13 + $0x38c] sm:$0x1] }
 0xe3a   : > { %6692 = vrot.lane.b32.xlu0 %v10259_v38, %s15837_s12 }
 0xe3b   : > { %6415 = vmatpush.bf16.xpose.msrb.mxu1 %v6404_v21  ;;  %v10266_v21 = vld [vmem:[%s10664_s13 + $0x33c] sm:$0xff] }
 0xe42   : > { %6698 = vrot.lane.b32.xlu0 %v6671_v48, %s15837_s12 }
 0xe43   : > { %6416 = vmatpush.bf16.xpose.msrb.mxu1 %v6402_v25  ;;  %v9797_v25 = vld [vmem:[%s10664_s13 + $0x398] sm:$0x1] }
 0xe44   : > { %v6774_v42 = vunpack.c.l.b16 %v9797_v25 }
 0xe46   : > { %v6797_v19 = vpack.c.b16 %v6774_v42, %v6774_v42 }
 0xe4a   : > { %6700 = vrot.lane.b32.xlu0 %v10261_v30, %s15837_s12  ;;  %v6771_v30 = vunpack.c.l.b16 %v9794_v36 }
 0xe4b   : > { %6417 = vmatpush.bf16.xpose.msrb.mxu1 %v6400_v13  ;;  %v10260_v13 = vld [vmem:[%s10664_s13 + $0x2f4] sm:$0xff] }
 0xe4c   : > { %v6795_v26 = vpack.c.b16 %v6771_v30, %v6771_v30 }
 0xe52   : > { %6702 = vrot.lane.b32.xlu0 %v6673_v49, %s15837_s12  ;;  %v10273_v49 = vld [vmem:[%s10664_s13 + $0x390] sm:$0xff] }
 0xe53   : > { %6418 = vmatpush.bf16.xpose.msrb.mxu1 %v6398_v61  ;;  %v9782_v61 = vld [vmem:[%s10664_s13 + $0x35c] sm:$0x1] }
 0xe54   : > { %v6759_v2 = vunpack.c.l.b16 %v9782_v61 }
 0xe56   : > { %v6787_v47 = vpack.c.b16 %v6759_v2, %v6759_v2 }
 0xe5a   : > { %6708 = vrot.lane.b32.xlu0 %v10263_v39, %s15837_s12  ;;  %v9800_v39 = vld [vmem:[%s10664_s13 + $0x3a4] sm:$0x1] }
 0xe5b   : > { %6419 = vmatpush.bf16.xpose.msrb.mxu1 %v6396_v22  ;;  %v9791_v22 = vld [vmem:[%s10664_s13 + $0x380] sm:$0x1]  ;;  %v6777_v43 = vunpack.c.l.b16 %v9800_v39 }
 0xe5c   : > { %v6768_v23 = vunpack.c.l.b16 %v9791_v22 }
 0xe5d   : > { %v6799_v54 = vpack.c.b16 %v6777_v43, %v6777_v43 }
 0xe5e   : > { %v6793_v48 = vpack.c.b16 %v6768_v23, %v6768_v23  ;;  %v9728_v23 = vld [vmem:[%s10664_s13 + $0x284] sm:$0x1] }
 0xe5f   : > { %v6565_v43 = vunpack.c.l.b16 %v9728_v23 }
 0xe62   : > { %9716 = vmatmul.msk.bf16.vlgmr.msrb.gmra.mxu1 %vm1622_vm12, %v10433_v11  ;;  %6714 = vrot.lane.b32.xlu0 %v6679_v58, %s15837_s12  ;;  %v10271_v11 = vld [vmem:[%s10664_s13 + $0x378] sm:$0xff] }
 0xe6a   : > { %6720 = vrot.lane.b32.xlu0 %v10266_v21, %s15837_s12  ;;  %v9803_v21 = vld [vmem:[%s10664_s13 + $0x3b0] sm:$0x1] }
 0xe6b   : > { %v6780_v63 = vunpack.c.l.b16 %v9803_v21 }
 0xe72   : > { %6806 = vrot.lane.b32.xlu0 %v6785_v33, %s15840_s18  ;;  %v6801_v33 = vpack.c.b16 %v6780_v63, %v6780_v63 }
 0xe7a   : > { %6812 = vrot.lane.b32.xlu0 %v10269_v46, %s15840_s18 }
 0xe82   : > { %6818 = vrot.lane.b32.xlu0 %v6791_v53, %s15840_s18 }
 0xe8a   : > { %6824 = vrot.lane.b32.xlu0 %v10272_v35, %s15840_s18 }
 0xe8c   : > { %v14635_v6 = vpop.permute.xlu0 %6684 }
 0xe92   : > { %6830 = vrot.lane.b32.xlu0 %v6797_v19, %s15840_s18 }
 0xe94   : > { %v14642_v31 = vpop.permute.xlu0 %6686 }
 0xe9a   : > { %6836 = vrot.lane.b32.xlu0 %v10275_v27, %s15840_s18 }
 0xe9c   : > { %v14650_v55 = vpop.permute.xlu0 %6688 }
 0xe9d   : > { %v6852_v22 = vsel %vm1104_vm0, %v10248_v60, %v14650_v55  ;;  %v9731_v60 = vld [vmem:[%s10664_s13 + $0x290] sm:$0x1] }
 0xea2   : > { %6842 = vrot.lane.b32.xlu0 %v6803_v0, %s15840_s18 }
 0xea4   : > { %v14657_v38 = vpop.permute.xlu0 %6690 }
 0xeac   : > { %v6693_v12 = vpop.permute.xlu0 %6692 }
 0xeb4   : > { %v14669_v58 = vpop.permute.xlu0 %6698 }
 0xebc   : > { %v14674_v46 = vpop.permute.xlu0 %6700 }
 0xec4   : > { %v14679_v1 = vpop.permute.xlu0 %6702 }
 0xecc   : > { %v14683_v35 = vpop.permute.xlu0 %6708 }
 0xed4   : > { %v14685_v19 = vpop.permute.xlu0 %6714 }
 0xedf   : > { %v6421_v16 = vpop.f32.mrf.mxu1 }
 0xee0   : > { %6425 = vst [vmem:[%s11747_s7 + $0x28] sm:$0xff] %v6421_v16  ;;  %v6429_v17 = vmul.f32 %v6421_v16, %v6421_v16  ;;  %6426 = vadd.xlane.f32.xlu2 %v6421_v16 }
 0xee2   : > { %6430 = vadd.xlane.f32.xlu1 %v6429_v17 }
 0xee7   : > { %v6423_v50 = vpop.f32.mrf.mxu1 }
 0xee8   : > { %v14693_v50 = vpop.permute.xlu0 %6720 }
 0xef0   : > { %v6807_v51 = vpop.permute.xlu0 %6806 }
 0xef8   : > { %6694 = vrot.lane.b32.xlu2 %v6669_v28, %s15837_s12  ;;  %v10249_v28 = vld [vmem:[%s10664_s13 + $0x270] sm:$0xff]  ;;  %v6813_v4 = vpop.permute.xlu0 %6812 }
 0xefb   : > { %6696 = vrot.lane.b32.xlu1 %v10260_v13, %s15837_s12  ;;  %v9719_v13 = vld [vmem:[%s10664_s13 + $0x260] sm:$0x1] }
 0xefc   : > { %v6556_v59 = vunpack.c.l.b16 %v9719_v13 }
 0xf00   : > { %6704 = vrot.lane.b32.xlu2 %v10262_v8, %s15837_s12  ;;  %v6858_v8 = vsel %vm1104_vm0, %v10249_v28, %v6693_v12 }
 0xf03   : > { %6706 = vrot.lane.b32.xlu1 %v6675_v62, %s15837_s12  ;;  %v6562_v62 = vunpack.c.l.b16 %v9725_v20 }
 0xf05   : > { %v6589_v52 = vpack.c.b16 %v6562_v62, %v6562_v62 }
 0xf08   : > { %6710 = vrot.lane.b32.xlu2 %v6677_v32, %s15837_s12  ;;  %v14708_v32 = vsel %vm1165_vm1, %v6858_v8, %v6813_v4 }
 0xf0b   : > { %6712 = vrot.lane.b32.xlu1 %v10264_v10, %s15837_s12  ;;  %v6585_v10 = vpack.c.b16 %v6556_v59, %v6556_v59  ;;  %v6591_v59 = vpack.c.b16 %v6565_v43, %v6565_v43 }
 0xf10   : > { %6716 = vrot.lane.b32.xlu2 %v10265_v57, %s15837_s12  ;;  %v6966_v57 = vshll.u32 %v14708_v32, 16 }
 0xf12   : > { %v6968_v29 = vrot.slane %v6966_v57, 1 }
 0xf13   : > { %6718 = vrot.lane.b32.xlu1 %v6681_v56, %s15837_s12  ;;  %v6849_v56 = vsel %vm1104_vm0, %v6585_v10, %v14642_v31  ;;  %v6846_v31 = vsel %vm1104_vm0, %v10247_v18, %v14635_v6 }
 0xf14   : > { %v14721_v14 = vsel %vm1165_vm1, %v6849_v56, %v6807_v51  ;;  %v10251_v56 = vld [vmem:[%s10664_s13 + $0x288] sm:$0xff] }
 0xf15   : > { %v6950_v12 = vshll.u32 %v14721_v14, 16 }
 0xf18   : > { %6722 = vrot.lane.b32.xlu2 %v6683_v5, %s15837_s12  ;;  %v9722_v5 = vld [vmem:[%s10664_s13 + $0x26c] sm:$0x1] }
 0xf1b   : > { %6804 = vrot.lane.b32.xlu1 %v10267_v34, %s15840_s18  ;;  %v6819_v34 = vpop.permute.xlu0 %6818 }
 0xf20   : > { %6808 = vrot.lane.b32.xlu2 %v10268_v24, %s15840_s18  ;;  %v6964_v24 = vshrl.u32 %v14708_v32, 16 }
 0xf22   : > { %v6969_v39 = vor.u32 %v6968_v29, %v6964_v24 }
 0xf23   : > { %6810 = vrot.lane.b32.xlu1 %v6787_v47, %s15840_s18  ;;  %v6559_v47 = vunpack.c.l.b16 %v9722_v5  ;;  %v6825_v21 = vpop.permute.xlu0 %6824  ;;  %v10250_v5 = vld [vmem:[%s10664_s13 + $0x27c] sm:$0xff] }
 0xf25   : > { %v6587_v6 = vpack.c.b16 %v6559_v47, %v6559_v47 }
 0xf27   : > { %v6855_v20 = vsel %vm1104_vm0, %v6587_v6, %v14657_v38  ;;  %v6867_v38 = vsel %vm1104_vm0, %v6591_v59, %v14669_v58 }
 0xf28   : > { %6814 = vrot.lane.b32.xlu2 %v6789_v9, %s15840_s18  ;;  %v10252_v9 = vld [vmem:[%s10664_s13 + $0x294] sm:$0xff]  ;;  %v6919_v23 = vsel %vm1165_vm1, %v6867_v38, %v6819_v34  ;;  %v10254_v38 = vld [vmem:[%s10664_s13 + $0x2ac] sm:$0xff] }
 0xf2b   : > { %6816 = vrot.lane.b32.xlu1 %v10270_v44, %s15840_s18 }
 0xf30   : > { %6820 = vrot.lane.b32.xlu2 %v10271_v11, %s15840_s18 }
 0xf33   : > { %6822 = vrot.lane.b32.xlu1 %v6793_v48, %s15840_s18 }
 0xf38   : > { %6826 = vrot.lane.b32.xlu2 %v6795_v26, %s15840_s18 }
 0xf3b   : > { %6828 = vrot.lane.b32.xlu1 %v10273_v49, %s15840_s18 }
 0xf40   : > { %6832 = vrot.lane.b32.xlu2 %v10274_v15, %s15840_s18  ;;  %v9734_v15 = vld [vmem:[%s10664_s13 + $0x29c] sm:$0x1] }
 0xf41   : > { %v6571_v51 = vunpack.c.l.b16 %v9734_v15 }
 0xf43   : > { %6834 = vrot.lane.b32.xlu1 %v6799_v54, %s15840_s18  ;;  %v6595_v10 = vpack.c.b16 %v6571_v51, %v6571_v51 }
 0xf48   : > { %6838 = vrot.lane.b32.xlu2 %v6801_v33, %s15840_s18 }
 0xf4b   : > { %6840 = vrot.lane.b32.xlu1 %v10276_v3, %s15840_s18 }
 0xf53   : > { %v14681_v53 = vpop.xlane.xlu2 %6426 }
 0xf55   : > { %v14687_v16 = vpop.xlane.xlu1 %6430 }
 0xf5b   : > { %v6695_v25 = vpop.permute.xlu2 %6694 }
 0xf5c   : > { %v6861_v61 = vsel %vm1104_vm0, %v6589_v52, %v6695_v25  ;;  %v6952_v25 = vrot.slane %v6950_v12, 1 }
 0xf63   : > { %v6705_v42 = vpop.permute.xlu2 %6704 }
 0xf64   : > { %v6876_v55 = vsel %vm1104_vm0, %v10252_v9, %v6705_v42 }
 0xf65   : > { %v14751_v42 = vsel %vm1165_vm1, %v6876_v55, %v6825_v21 }
 0xf66   : > { %v6996_v18 = vshll.u32 %v14751_v42, 16  ;;  %v6994_v9 = vshrl.u32 %v14751_v42, 16 }
 0xf6b   : > { %v14689_v17 = vpop.permute.xlu2 %6710 }
 0xf6d   : > { %v14691_v27 = vpop.permute.xlu1 %6696 }
 0xf73   : > { %v14695_v37 = vpop.permute.xlu2 %6716 }
 0xf75   : > { %v14697_v40 = vpop.permute.xlu1 %6706 }
 0xf76   : > { %v6879_v24 = vsel %vm1104_vm0, %v6595_v10, %v14697_v40  ;;  %v9737_v40 = vld [vmem:[%s10664_s13 + $0x2a8] sm:$0x1] }
 0xf7b   : > { %v14699_v45 = vpop.permute.xlu2 %6722 }
 0xf7d   : > { %v14702_v0 = vpop.permute.xlu1 %6712 }
 0xf83   : > { %v6809_v41 = vpop.permute.xlu2 %6808 }
 0xf84   : > { %v14734_v48 = vsel %vm1165_vm1, %v6852_v22, %v6809_v41  ;;  %v6568_v22 = vunpack.c.l.b16 %v9731_v60 }
 0xf85   : > { %v14710_v7 = vpop.permute.xlu1 %6718  ;;  %v6956_v54 = vshll.u32 %v14734_v48, 16  ;;  %v6954_v52 = vshrl.u32 %v14734_v48, 16 }
 0xf86   : > { %v6593_v15 = vpack.c.b16 %v6568_v22, %v6568_v22 }
 0xf87   : > { %v6958_v8 = vrot.slane %v6956_v54, 1 }
 0xf88   : > { %v6873_v51 = vsel %vm1104_vm0, %v6593_v15, %v14679_v1 }
 0xf8b   : > { %v6815_v2 = vpop.permute.xlu2 %6814 }
 0xf8c   : > { %v14725_v44 = vsel %vm1165_vm1, %v6861_v61, %v6815_v2  ;;  %v6959_v2 = vor.u32 %v6958_v8, %v6954_v52  ;;  %v10253_v52 = vld [vmem:[%s10664_s13 + $0x2a0] sm:$0xff] }
 0xf8d   : > { %v6970_v11 = vshll.u32 %v14725_v44, 16  ;;  %v6805_v36 = vpop.permute.xlu1 %6804 }
 0xf8e   : > { %v14737_v30 = vsel %vm1165_vm1, %v6846_v31, %v6805_v36  ;;  %v6998_v31 = vrot.slane %v6996_v18, 1  ;;  %v6864_v36 = vsel %vm1104_vm0, %v10250_v5, %v14691_v27 }
 0xf8f   : > { %v6972_v26 = vrot.slane %v6970_v11, 1  ;;  %v6946_v49 = vshll.u32 %v14737_v30, 16  ;;  %v6944_v63 = vshrl.u32 %v14737_v30, 16  ;;  %v6870_v11 = vsel %vm1104_vm0, %v10251_v56, %v14674_v46 }
 0xf90   : > { %v6999_v43 = vor.u32 %v6998_v31, %v6994_v9  ;;  %v6574_v46 = vunpack.c.l.b16 %v9737_v40  ;;  %v6888_v9 = vsel %vm1104_vm0, %v10254_v38, %v14702_v0 }
 0xf91   : > { %v6948_v33 = vrot.slane %v6946_v49, 1  ;;  %v14746_v3 = vsel %vm1206_vm3, %v6969_v39, %v6972_v26  ;;  %v6980_v39 = vshll.u32 %v6919_v23, 16 }
 0xf92   : > { %7098 = vrot.lane.b32.xlu0 %v14746_v3, %s15894_s30 }
 0xf93   : > { %v6949_v28 = vor.u32 %v6948_v33, %v6944_v63  ;;  %v6821_v13 = vpop.permute.xlu2 %6820  ;;  %v6982_v33 = vrot.slane %v6980_v39, 1 }
 0xf94   : > { %v14787_v49 = vsel %vm1165_vm1, %v6870_v11, %v6821_v13  ;;  %v7040_v13 = vrot.slane %v14737_v30, 1 }
 0xf95   : > { %v6811_v4 = vpop.permute.xlu1 %6810  ;;  %v6953_v62 = vsel %vm1206_vm3, %v6949_v28, %v6952_v25  ;;  %v6986_v63 = vshll.u32 %v14787_v49, 16  ;;  %v6597_v28 = vpack.c.b16 %v6574_v46, %v6574_v46  ;;  %v6984_v1 = vshrl.u32 %v14787_v49, 16 }
 0xf96   : > { %v14757_v41 = vsel %vm1165_vm1, %v6855_v20, %v6811_v4  ;;  %7094 = vrot.lane.b32.xlu2 %v6953_v62, %s15894_s30  ;;  %v7041_v62 = vrot.slane %v14721_v14, 1  ;;  %v7052_v38 = vrot.slane %v14787_v49, 1 }
 0xf97   : > { %v6960_v57 = vshll.u32 %v14757_v41, 16  ;;  %v6988_v8 = vrot.slane %v6986_v63, 1  ;;  %v6885_v18 = vsel %vm1104_vm0, %v6597_v28, %v14689_v17  ;;  %v6882_v17 = vsel %vm1104_vm0, %v10253_v52, %v14683_v35 }
 0xf98   : > { %v7042_v60 = vsel %vm1303_vm2, %v7040_v13, %v7041_v62  ;;  %v7044_v13 = vrot.slane %v14757_v41, 1  ;;  %v7047_v41 = vrot.slane %v14725_v44, 1 }
 0xf99   : > { %v6962_v61 = vrot.slane %v6960_v57, 1  ;;  %v9740_v57 = vld [vmem:[%s10664_s13 + $0x2b4] sm:$0x1]  ;;  %v6989_v5 = vor.u32 %v6988_v8, %v6984_v1 }
 0xf9b   : > { %v6827_v29 = vpop.permute.xlu2 %6826  ;;  %v14771_v47 = vsel %vm1206_vm3, %v6959_v2, %v6962_v61  ;;  %v6831_v61 = vpop.permute.xlu0 %6830 }
 0xf9c   : > { %v14776_v58 = vsel %vm1165_vm1, %v6879_v24, %v6827_v29  ;;  %7096 = vrot.lane.b32.xlu1 %v14771_v47, %s15894_s30  ;;  %v6577_v24 = vunpack.c.l.b16 %v9740_v57  ;;  %v6931_v29 = vsel %vm1165_vm1, %v6885_v18, %v6831_v61  ;;  %v7046_v57 = vrot.slane %v14708_v32, 1 }
 0xf9d   : > { %v7000_v12 = vshll.u32 %v14776_v58, 16  ;;  %v6817_v26 = vpop.permute.xlu1 %6816  ;;  %v7056_v44 = vrot.slane %v14776_v58, 1 }
 0xf9e   : > { %v14790_v34 = vsel %vm1165_vm1, %v6864_v36, %v6817_v26  ;;  %v7050_v36 = vrot.slane %v6919_v23, 1  ;;  %v6599_v39 = vpack.c.b16 %v6577_v24, %v6577_v24  ;;  %v14876_v18 = vsel %vm1303_vm2, %v7046_v57, %v7047_v41 }
 0xf9f   : > { %v7002_v6 = vrot.slane %v7000_v12, 1  ;;  %v6976_v55 = vshll.u32 %v14790_v34, 16  ;;  %v6974_v27 = vshrl.u32 %v14790_v34, 16  ;;  %v7049_v22 = vrot.slane %v14790_v34, 1 }
 0xfa0   : > { %v7010_v12 = vshll.u32 %v6931_v29, 16  ;;  %v6891_v23 = vsel %vm1104_vm0, %v6599_v39, %v14685_v19 }
 0xfa1   : > { %v14794_v21 = vsel %vm1206_vm3, %v6999_v43, %v7002_v6  ;;  %v6978_v54 = vrot.slane %v6976_v55, 1  ;;  %v14840_v6 = vsel %vm1303_vm2, %v7049_v22, %v7050_v36 }
 0xfa2   : > { %7104 = vrot.lane.b32.xlu0 %v14794_v21, %s15894_s30  ;;  %v7012_v55 = vrot.slane %v7010_v12, 1 }
 0xfa3   : > { %v6979_v25 = vor.u32 %v6978_v54, %v6974_v27  ;;  %v6833_v2 = vpop.permute.xlu2 %6832 }
 0xfa4   : > { %v14833_v11 = vsel %vm1165_vm1, %v6888_v9, %v6833_v2 }
 0xfa5   : > { %v6823_v20 = vpop.permute.xlu1 %6822  ;;  %v14804_v59 = vsel %vm1206_vm3, %v6979_v25, %v6982_v33  ;;  %v7016_v43 = vshll.u32 %v14833_v11, 16  ;;  %v7059_v25 = vrot.slane %v6931_v29, 1  ;;  %v7014_v28 = vshrl.u32 %v14833_v11, 16  ;;  %v6837_v29 = vpop.permute.xlu0 %6836 }
 0xfa6   : > { %v14807_v4 = vsel %vm1165_vm1, %v6873_v51, %v6823_v20  ;;  %7100 = vrot.lane.b32.xlu2 %v14804_v59, %s15894_s30  ;;  %v7061_v2 = vrot.slane %v14833_v11, 1 }
 0xfa7   : > { %v6990_v10 = vshll.u32 %v14807_v4, 16  ;;  %v7018_v63 = vrot.slane %v7016_v43, 1  ;;  %v7053_v52 = vrot.slane %v14807_v4, 1 }
 0xfa9   : > { %v6992_v56 = vrot.slane %v6990_v10, 1  ;;  %v7019_v8 = vor.u32 %v7018_v63, %v7014_v28  ;;  %v7043_v10 = vrot.slane %v14734_v48, 1  ;;  %v10256_v63 = vld [vmem:[%s10664_s13 + $0x2c4] sm:$0xff] }
 0xfaa   : > { %7110 = vrot.lane.b32.xlu0 %v7042_v60, %s15973_s1  ;;  %v7055_v60 = vrot.slane %v14751_v42, 1  ;;  %v6900_v28 = vsel %vm1104_vm0, %v10256_v63, %v14693_v50 }
 0xfab   : > { %v14822_v14 = vsel %vm1206_vm3, %v6989_v5, %v6992_v56  ;;  %v7045_v1 = vsel %vm1303_vm2, %v7043_v10, %v7044_v13  ;;  %v14882_v56 = vsel %vm1303_vm2, %v7052_v38, %v7053_v52  ;;  %v10255_v5 = vld [vmem:[%s10664_s13 + $0x2b8] sm:$0xff]  ;;  %v6839_v22 = vpop.permute.xlu2 %6838  ;;  %v9746_v52 = vld [vmem:[%s10664_s13 + $0x2cc] sm:$0x1] }
 0xfac   : > { %7102 = vrot.lane.b32.xlu1 %v14822_v14, %s15894_s30  ;;  %v14892_v61 = vsel %vm1303_vm2, %v7055_v60, %v7056_v44  ;;  %v6894_v58 = vsel %vm1104_vm0, %v10255_v5, %v14695_v37  ;;  %v9743_v37 = vld [vmem:[%s10664_s13 + $0x2c0] sm:$0x1]  ;;  %v6583_v38 = vunpack.c.l.b16 %v9746_v52 }
 0xfad   : > { %v6829_v31 = vpop.permute.xlu1 %6828  ;;  %v6580_v9 = vunpack.c.l.b16 %v9743_v37 }
 0xfae   : > { %v14836_v40 = vsel %vm1165_vm1, %v6882_v17, %v6829_v31  ;;  %v14905_v17 = vsel %vm1165_vm1, %v6894_v58, %v6837_v29 }
 0xfaf   : > { %v7006_v26 = vshll.u32 %v14836_v40, 16  ;;  %v7004_v35 = vshrl.u32 %v14836_v40, 16  ;;  %v7058_v54 = vrot.slane %v14836_v40, 1  ;;  %v6601_v31 = vpack.c.b16 %v6580_v9, %v6580_v9 }
 0xfb0   : > { %v7064_v39 = vshrl.u32 %v14905_v17, 16 }
 0xfb1   : > { %v7008_v0 = vrot.slane %v7006_v26, 1  ;;  %v14858_v19 = vsel %vm1303_vm2, %v7058_v54, %v7059_v25  ;;  %v6897_v36 = vsel %vm1104_vm0, %v6601_v31, %v14710_v7  ;;  %v7066_v26 = vshll.u32 %v14905_v17, 16 }
 0xfb2   : > { %7116 = vrot.lane.b32.xlu0 %v14840_v6, %s15973_s1  ;;  %v6939_v12 = vsel %vm1165_vm1, %v6897_v36, %v6839_v22  ;;  %v7076_v54 = vrot.slane %v14905_v17, 1 }
 0xfb3   : > { %v7009_v15 = vor.u32 %v7008_v0, %v7004_v35  ;;  %v7068_v35 = vrot.slane %v7066_v26, 1 }
 0xfb5   : > { %v6835_v46 = vpop.permute.xlu1 %6834  ;;  %v14849_v27 = vsel %vm1206_vm3, %v7009_v15, %v7012_v55  ;;  %v7069_v7 = vor.u32 %v7068_v35, %v7064_v39  ;;  %v6843_v15 = vpop.permute.xlu0 %6842 }
 0xfb6   : > { %v6935_v33 = vsel %vm1165_vm1, %v6891_v23, %v6835_v46  ;;  %7106 = vrot.lane.b32.xlu2 %v14849_v27, %s15894_s30  ;;  %v7077_v46 = vrot.slane %v6939_v12, 1 }
 0xfb7   : > { %v7020_v51 = vshll.u32 %v6935_v33, 16  ;;  %v7062_v4 = vrot.slane %v6935_v33, 1 }
 0xfb8   : > { %v7078_v25 = vsel %vm1303_vm2, %v7076_v54, %v7077_v46 }
 0xfb9   : > { %v7022_v20 = vrot.slane %v7020_v51, 1  ;;  %v14898_v24 = vsel %vm1303_vm2, %v7061_v2, %v7062_v4  ;;  %v6603_v4 = vpack.c.b16 %v6583_v38, %v6583_v38 }
 0xfba   : > { %7122 = vrot.lane.b32.xlu0 %v14858_v19, %s15973_s1 }
 0xfbb   : > { %v14863_v62 = vsel %vm1206_vm3, %v7019_v8, %v7022_v20 }
 0xfbc   : > { %7108 = vrot.lane.b32.xlu1 %v14863_v62, %s15894_s30 }
 0xfbd   : > { %v6841_v51 = vpop.permute.xlu1 %6840 }
 0xfbe   : > { %7112 = vrot.lane.b32.xlu2 %v7045_v1, %s15973_s1  ;;  %v6941_v20 = vsel %vm1165_vm1, %v6900_v28, %v6841_v51 }
 0xfbf   : > { %v7081_v5 = vshll.u32 %v6941_v20, 16 }
 0xfc2   : > { %7128 = vrot.lane.b32.xlu0 %v14708_v32, %s15974_s8 }
 0xfc4   : > { %7114 = vrot.lane.b32.xlu1 %v14876_v18, %s15973_s1 }
 0xfc6   : > { %7118 = vrot.lane.b32.xlu2 %v14882_v56, %s15973_s1 }
 0xfca   : > { %7134 = vrot.lane.b32.xlu0 %v14751_v42, %s15974_s8 }
 0xfcc   : > { %7120 = vrot.lane.b32.xlu1 %v14892_v61, %s15973_s1 }
 0xfce   : > { %7124 = vrot.lane.b32.xlu2 %v14898_v24, %s15973_s1 }
 0xfd2   : > { %7140 = vrot.lane.b32.xlu0 %v14905_v17, %s15974_s8 }
 0xfd4   : > { %7126 = vrot.lane.b32.xlu1 %v14734_v48, %s15974_s8 }
 0xfd6   : > { %7130 = vrot.lane.b32.xlu2 %v14790_v34, %s15974_s8 }
 0xfda   : > { %7146 = vrot.lane.b32.xlu0 %v14804_v59, %s15949_s14 }
 0xfdc   : > { %7132 = vrot.lane.b32.xlu1 %v14787_v49, %s15974_s8 }
 0xfde   : > { %7136 = vrot.lane.b32.xlu2 %v14836_v40, %s15974_s8 }
 0xfe2   : > { %7152 = vrot.lane.b32.xlu0 %v14849_v27, %s15949_s14 }
 0xfe4   : > { %7138 = vrot.lane.b32.xlu1 %v14833_v11, %s15974_s8 }
 0xfe6   : > { %7142 = vrot.lane.b32.xlu2 %v14771_v47, %s15949_s14  ;;  %v7070_v47 = vshll.u32 %v6939_v12, 16 }
 0xfe8   : > { %v7072_v0 = vrot.slane %v7070_v47, 1  ;;  %v7091_v47 = vrot.slane %v6941_v20, 1 }
 0xfea   : > { %7158 = vrot.lane.b32.xlu0 %v7045_v1, %s15950_s9  ;;  %v7073_v43 = vsel %vm1206_vm3, %v7069_v7, %v7072_v0 }
 0xfec   : > { %7144 = vrot.lane.b32.xlu1 %v14746_v3, %s15949_s14 }
 0xfee   : > { %7148 = vrot.lane.b32.xlu2 %v14822_v14, %s15949_s14 }
 0xff0   : > { %v14948_v55 = vpop.permute.xlu2 %7094 }
 0xff2   : > { %7164 = vrot.lane.b32.xlu0 %v14882_v56, %s15950_s9 }
 0xff4   : > { %7150 = vrot.lane.b32.xlu1 %v14794_v21, %s15949_s14 }
 0xff6   : > { %7154 = vrot.lane.b32.xlu2 %v14863_v62, %s15949_s14 }
 0xffa   : > { %7170 = vrot.lane.b32.xlu0 %v14898_v24, %s15950_s9 }
 0xffc   : > { %7156 = vrot.lane.b32.xlu1 %v7073_v43, %s15949_s14 }
 0xffe   : > { %7160 = vrot.lane.b32.xlu2 %v14876_v18, %s15950_s9 }
0x1000   : > { %v14956_v23 = vpop.permute.xlu2 %7100 }
0x1001   : > { %v7229_v54 = vsel %vm1486_vm4, %v14790_v34, %v14956_v23 }
0x1002   : > { %7176 = vrot.lane.b32.xlu0 %v14790_v34, %s15922_s29 }
0x1004   : > { %7162 = vrot.lane.b32.xlu1 %v14840_v6, %s15950_s9  ;;  %v14962_v33 = vpop.permute.xlu0 %7098 }
0x1006   : > { %7166 = vrot.lane.b32.xlu2 %v14892_v61, %s15950_s9 }
0x100a   : > { %7182 = vrot.lane.b32.xlu0 %v14836_v40, %s15922_s29 }
0x100c   : > { %7168 = vrot.lane.b32.xlu1 %v14858_v19, %s15950_s9 }
0x100e   : > { %7172 = vrot.lane.b32.xlu2 %v7078_v25, %s15950_s9  ;;  %v14988_v1 = vpop.permute.xlu1 %7096 }
0x1010   : > { %v14970_v13 = vpop.permute.xlu2 %7106 }
0x1012   : > { %7188 = vrot.lane.b32.xlu0 %v6941_v20, %s15922_s29 }
0x1014   : > { %v14974_v8 = vpop.permute.xlu0 %7104  ;;  %7174 = vrot.lane.b32.xlu1 %v14708_v32, %s15922_s29 }
0x1016   : > { %7178 = vrot.lane.b32.xlu2 %v14787_v49, %s15922_s29 }
0x1018   : > { %v14980_v10 = vpop.permute.xlu2 %7112 }
0x101a   : > { %7194 = vrot.lane.b32.xlu0 %v14822_v14, %s15923_s27 }
0x101c   : > { %v14984_v50 = vpop.permute.xlu0 %7110  ;;  %7180 = vrot.lane.b32.xlu1 %v14751_v42, %s15922_s29 }
0x101e   : > { %7184 = vrot.lane.b32.xlu2 %v14833_v11, %s15922_s29  ;;  %v7103_v14 = vpop.permute.xlu1 %7102 }
0x101f   : > { %v7231_v51 = vsel %vm1486_vm4, %v14787_v49, %v7103_v14  ;;  %v7225_v49 = vsel %vm1486_vm4, %v14734_v48, %v14988_v1 }
0x1020   : > { %v14992_v41 = vpop.permute.xlu2 %7118 }
0x1021   : > { %v7247_v52 = vsel %vm1503_vm5, %v7231_v51, %v14992_v41 }
0x1022   : > { %7200 = vrot.lane.b32.xlu0 %v14863_v62, %s15923_s27 }
0x1024   : > { %v7117_v57 = vpop.permute.xlu0 %7116  ;;  %7186 = vrot.lane.b32.xlu1 %v14905_v17, %s15922_s29 }
0x1026   : > { %7190 = vrot.lane.b32.xlu2 %v14746_v3, %s15923_s27  ;;  %v6903_v3 = vsel %vm1104_vm0, %v6603_v4, %v14699_v45 }
0x1027   : > { %v6943_v58 = vsel %vm1165_vm1, %v6903_v3, %v6843_v15 }
0x1028   : > { %v15001_v44 = vpop.permute.xlu2 %7124  ;;  %v7092_v39 = vrot.slane %v6943_v58, 1 }
0x102a   : > { %7206 = vrot.lane.b32.xlu0 %v14876_v18, %s15866_s20  ;;  %v7083_v18 = vrot.slane %v7081_v5, 1  ;;  %v7241_v5 = vsel %vm1503_vm5, %v7225_v49, %v14980_v10 }
0x102c   : > { %v15005_v60 = vpop.permute.xlu0 %7122  ;;  %7192 = vrot.lane.b32.xlu1 %v14804_v59, %s15923_s27  ;;  %v7085_v59 = vshll.u32 %v6943_v58, 16 }
0x102e   : > { %7196 = vrot.lane.b32.xlu2 %v14794_v21, %s15923_s27  ;;  %v15011_v62 = vpop.permute.xlu1 %7108  ;;  %v7079_v21 = vshrl.u32 %v6941_v20, 16  ;;  %v7087_v9 = vrot.slane %v7085_v59, 1 }
0x1030   : > { %v15015_v2 = vpop.permute.xlu2 %7130  ;;  %v7084_v37 = vor.u32 %v7083_v18, %v7079_v21  ;;  %v7227_v18 = vsel %vm1486_vm4, %v14708_v32, %v14962_v33 }
0x1032   : > { %7212 = vrot.lane.b32.xlu0 %v14892_v61, %s15866_s20  ;;  %v7088_v31 = vsel %vm1206_vm3, %v7084_v37, %v7087_v9 }
0x1034   : > { %v7129_v29 = vpop.permute.xlu0 %7128  ;;  %7198 = vrot.lane.b32.xlu1 %v14849_v27, %s15923_s27 }
0x1035   : > { %v7257_v41 = vsel %vm1520_vm6, %v7241_v5, %v7129_v29 }
0x1036   : > { %7202 = vrot.lane.b32.xlu2 %v7073_v43, %s15923_s27  ;;  %v7115_v17 = vpop.permute.xlu1 %7114 }
0x1037   : > { %v7243_v21 = vsel %vm1503_vm5, %v7227_v18, %v7115_v17 }
0x1038   : > { %v15023_v45 = vpop.permute.xlu2 %7136  ;;  %v7259_v48 = vsel %vm1520_vm6, %v7243_v21, %v15015_v2 }
0x103a   : > { %7218 = vrot.lane.b32.xlu0 %v7078_v25, %s15866_s20 }
0x103c   : > { %v7135_v22 = vpop.permute.xlu0 %7134  ;;  %7204 = vrot.lane.b32.xlu1 %v7088_v31, %s15923_s27 }
0x103d   : > { %v7263_v34 = vsel %vm1520_vm6, %v7247_v52, %v7135_v22 }
0x103e   : > { %7208 = vrot.lane.b32.xlu2 %v14840_v6, %s15866_s20  ;;  %v15030_v27 = vpop.permute.xlu1 %7120  ;;  %v7093_v6 = vsel %vm1303_vm2, %v7091_v47, %v7092_v39 }
0x1040   : > { %v7143_v61 = vpop.permute.xlu2 %7142 }
0x1044   : > { %v15032_v36 = vpop.permute.xlu0 %7140  ;;  %7210 = vrot.lane.b32.xlu1 %v14882_v56, %s15866_s20 }
0x1046   : > { %7214 = vrot.lane.b32.xlu2 %v14858_v19, %s15866_s20  ;;  %v7127_v12 = vpop.permute.xlu1 %7126 }
0x1048   : > { %v7149_v26 = vpop.permute.xlu2 %7148 }
0x104c   : > { %v7147_v35 = vpop.permute.xlu0 %7146  ;;  %7216 = vrot.lane.b32.xlu1 %v14898_v24, %s15866_s20  ;;  %v7245_v24 = vsel %vm1503_vm5, %v7229_v54, %v7117_v57 }
0x104d   : > { %v7275_v10 = vsel %vm1537_vm7, %v7259_v48, %v7147_v35  ;;  %v7233_v48 = vsel %vm1486_vm4, %v14751_v42, %v14974_v8 }
0x104e   : > { %7220 = vrot.lane.b32.xlu2 %v7093_v6, %s15866_s20  ;;  %v7133_v0 = vpop.permute.xlu1 %7132 }
0x104f   : > { %v7261_v25 = vsel %vm1520_vm6, %v7245_v24, %v7133_v0 }
0x1050   : > { %v15042_v7 = vpop.permute.xlu2 %7154  ;;  %v7277_v20 = vsel %vm1537_vm7, %v7261_v25, %v7149_v26  ;;  %v7223_v26 = vsel %vm1486_vm4, %v14737_v30, %v14948_v55 }
0x1051   : > { %v7239_v47 = vsel %vm1503_vm5, %v7223_v26, %v14984_v50 }
0x1052   : > { %v7255_v39 = vsel %vm1520_vm6, %v7239_v47, %v7127_v12 }
0x1053   : > { %v7271_v6 = vsel %vm1537_vm7, %v7255_v39, %v7143_v61 }
0x1054   : > { %v15044_v43 = vpop.permute.xlu0 %7152 }
0x1056   : > { %v15046_v56 = vpop.permute.xlu1 %7138 }
0x1058   : > { %v7161_v19 = vpop.permute.xlu2 %7160 }
0x105c   : > { %v7159_v15 = vpop.permute.xlu0 %7158 }
0x105d   : > { %v7287_v0 = vsel %vm1554_vm8, %v7271_v6, %v7159_v15 }
0x105e   : > { %v7145_v46 = vpop.permute.xlu1 %7144 }
0x105f   : > { %v7273_v59 = vsel %vm1537_vm7, %v7257_v41, %v7145_v46 }
0x1060   : > { %v15052_v63 = vpop.permute.xlu2 %7166  ;;  %v7289_v9 = vsel %vm1554_vm8, %v7273_v59, %v7161_v19  ;;  %v7235_v59 = vsel %vm1486_vm4, %v14836_v40, %v14970_v13 }
0x1061   : > { %v7251_v21 = vsel %vm1503_vm5, %v7235_v59, %v15005_v60  ;;  %v10295_v59 = vld [vmem:[%s10664_s13 + $0x3a8] sm:$0xff] }
0x1064   : > { %v7165_v28 = vpop.permute.xlu0 %7164 }
0x1065   : > { %v15061_v38 = vsel %vm1554_vm8, %v7277_v20, %v7165_v28 }
0x1066   : > { %v7151_v23 = vpop.permute.xlu1 %7150 }
0x1067   : > { %v15065_v57 = vsel %vm1537_vm7, %v7263_v34, %v7151_v23  ;;  %v7237_v34 = vsel %vm1486_vm4, %v14833_v11, %v15011_v62  ;;  %v7267_v11 = vsel %vm1520_vm6, %v7251_v21, %v15046_v56 }
0x1068   : > { %v7173_v4 = vpop.permute.xlu2 %7172  ;;  %v7253_v5 = vsel %vm1503_vm5, %v7237_v34, %v15001_v44 }
0x1069   : > { %v7269_v41 = vsel %vm1520_vm6, %v7253_v5, %v15032_v36 }
0x106c   : > { %v7171_v3 = vpop.permute.xlu0 %7170 }
0x106e   : > { %v7157_v14 = vpop.permute.xlu1 %7156 }
0x106f   : > { %v7285_v18 = vsel %vm1537_vm7, %v7269_v41, %v7157_v14  ;;  %v621_v41 = vld [vmem:[%s15192_s5 + $0x5c] sm:$0x1] }
0x1070   : > { %v7179_v58 = vpop.permute.xlu2 %7178  ;;  %v7301_v44 = vsel %vm1554_vm8, %v7285_v18, %v7173_v4  ;;  %v655_v18 = vunpack.c.l.bf16 %v621_v41  ;;  %v10290_v41 = vld [vmem:[%s10664_s13 + $0x36c] sm:$0xff] }
0x1074   : > { %v7177_v37 = vpop.permute.xlu0 %7176 }
0x1075   : > { %v7305_v1 = vsel %vm1571_vm9, %v7289_v9, %v7177_v37  ;;  %v7283_v9 = vsel %vm1537_vm7, %v7267_v11, %v15042_v7  ;;  %v7249_v7 = vsel %vm1503_vm5, %v7233_v48, %v15030_v27 }
0x1076   : > { %v7163_v29 = vpop.permute.xlu1 %7162  ;;  %v7299_v13 = vsel %vm1554_vm8, %v7283_v9, %v7171_v3  ;;  %v7265_v42 = vsel %vm1520_vm6, %v7249_v7, %v15023_v45  ;;  %v625_v9 = vld [vmem:[%s15192_s5 + $0x6c] sm:$0xff]  }
0x1077   : > { %v7291_v31 = vsel %vm1554_vm8, %v7275_v10, %v7163_v29  ;;  %v7281_v8 = vsel %vm1537_vm7, %v7265_v42, %v15044_v43  ;;  %v10343_v7 = vld [vmem:[%s15192_s5 + $0x48] sm:$0xff]  }
0x1078   : > { %v15084_v22 = vpop.permute.xlu2 %7184  ;;  %v15087_v32 = vsel %vm1571_vm9, %v7291_v31, %v7179_v58  ;;  %v10331_v42 = vunpack.c.l.bf16 %v10343_v7 }
0x107c   : > { %v15089_v33 = vpop.permute.xlu0 %7182 }
0x107e   : > { %v7169_v17 = vpop.permute.xlu1 %7168 }
0x107f   : > { %v7297_v29 = vsel %vm1554_vm8, %v7281_v8, %v7169_v17  ;;  %v7295_v17 = vsel %vm1554_vm8, %v15065_v57, %v15052_v63  ;;  %v10332_v8 = vunpack.c.h.bf16 %v10343_v7 }
0x1080   : > { %v7191_v2 = vpop.permute.xlu2 %7190  ;;  %v7313_v31 = vsel %vm1571_vm9, %v7297_v29, %v15084_v22  ;;  %v7311_v22 = vsel %vm1571_vm9, %v7295_v17, %v15089_v33 }
0x1084   : > { %v7189_v35 = vpop.permute.xlu0 %7188 }
0x1085   : > { %v7317_v62 = vsel %vm1571_vm9, %v7301_v44, %v7189_v35 }
0x1086   : > { %v7175_v19 = vpop.permute.xlu1 %7174 }
0x1087   : > { %v7303_v46 = vsel %vm1571_vm9, %v7287_v0, %v7175_v19  ;;  %v10294_v0 = vld [vmem:[%s10664_s13 + $0x39c] sm:$0xff]  ;;  %v619_v19 = vld [vmem:[%s15192_s5 + $0x54] sm:$0xff]  }
0x1088   : > { %v15100_v54 = vpop.permute.xlu2 %7196  ;;  %v7319_v24 = vsel %vm1588_vm10, %v7303_v46, %v7191_v2  ;;  %v653_v46 = vunpack.c.l.bf16 %v619_v19  ;;  %7635 = vrot.lane.b32.xlu2 %v10294_v0, %s15837_s12 }
0x108c   : > { %v15103_v25 = vpop.permute.xlu0 %7194 }
0x108e   : > { %v15105_v30 = vpop.permute.xlu1 %7180 }
0x108f   : > { %v7309_v63 = vsel %vm1571_vm9, %v15061_v38, %v15105_v30  ;;  %v630_v38 = vstv %s629_s19 }
0x1090   : > { %v7203_v55 = vpop.permute.xlu2 %7202  ;;  %v7325_v57 = vsel %vm1588_vm10, %v7309_v63, %v15100_v54  ;;  %v15197_v30 = vunpack.c.l.bf16 %v630_v38 }
0x1092   : > { %v684_v54 = vmul.f32 %v15197_v30, %v653_v46  ;;  %v9975_v46 = vld [vmem:[%s10664_s13 + $0x38c] sm:$0x1] }
0x1094   : > { %v7201_v50 = vpop.permute.xlu0 %7200 }
0x1095   : > { %v7329_v26 = vsel %vm1588_vm10, %v7313_v31, %v7201_v50  ;;  %v7323_v50 = vsel %vm1588_vm10, %v15087_v32, %v15103_v25  ;;  %v686_v25 = vmul.f32 %v15197_v30, %v655_v18  ;;  %v681_v31 = vmul.f32 %v10331_v42, %v15197_v30 }
0x1096   : > { %v7187_v51 = vpop.permute.xlu1 %7186 }
0x1097   : > { %v7315_v56 = vsel %vm1571_vm9, %v7299_v13, %v7187_v51  ;;  %v716_v21 = vpack.c.bf16 %v686_v25, %v686_v25  ;;  %v659_v13 = vunpack.c.l.bf16 %v625_v9 }
0x1098   : > { %v7209_v12 = vpop.permute.xlu2 %7208  ;;  %v7331_v3 = vsel %vm1588_vm10, %v7315_v56, %v7203_v55 }
0x1099   : > { %v7700_v44 = vunpack.c.l.b16 %v716_v21 }
0x109c   : > { %v7207_v28 = vpop.permute.xlu0 %7206 }
0x109d   : > { %v15108_v61 = vsel %vm1605_vm11, %v7319_v24, %v7207_v28  ;;  %v654_v24 = vunpack.c.h.bf16 %v619_v19 }
0x109e   : > { %v7193_v15 = vpop.permute.xlu1 %7192  ;;  %v7350_v11 = vsel %vm1622_vm12, %v15108_v61, 0 }
0x109f   : > { %v7321_v20 = vsel %vm1588_vm10, %v7305_v1, %v7193_v15  ;;  %v685_v55 = vmul.f32 %v15197_v30, %v654_v24  ;;  %v7574_v24 = vunpack.c.l.b16 %v9975_v46  ;;  %v10293_v46 = vld [vmem:[%s10664_s13 + $0x390] sm:$0xff] }
0x10a0   : > { %v15112_v52 = vsel %vm1605_vm11, %v7321_v20, %v7209_v12  ;;  %v7215_v23 = vpop.permute.xlu2 %7214  ;;  %v714_v12 = vpack.c.bf16 %v684_v54, %v684_v54 }
0x10a1   : > { %v715_v28 = vpack.c.bf16 %v685_v55, %v685_v55  ;;  %v7352_v32 = vsel %vm1622_vm12, %v15112_v52, 0  ;;  %v7722_v52 = vpack.c.b16 %v7700_v44, %v7700_v44 }
0x10a2   : > { %v7698_v15 = vunpack.c.l.b16 %v714_v12 }
0x10a3   : > { %v7699_v20 = vunpack.c.l.b16 %v715_v28 }
0x10a4   : > { %v7213_v58 = vpop.permute.xlu0 %7212 }
0x10a5   : > { %v7341_v33 = vsel %vm1605_vm11, %v7325_v57, %v7213_v58 }
0x10a6   : > { %v7199_v49 = vpop.permute.xlu1 %7198  ;;  %v7356_v6 = vsel %vm1622_vm12, %v7341_v33, 0 }
0x10a7   : > { %v7327_v47 = vsel %vm1588_vm10, %v7311_v22, %v7199_v49  ;;  %v7721_v49 = vpack.c.b16 %v7699_v20, %v7698_v15  ;;  %v609_v20 = vld [vmem:[%s15192_s5 + $0x2c] sm:$0x1] }
0x10a8   : > { %v7221_v37 = vpop.permute.xlu2 %7220  ;;  %v7343_v39 = vsel %vm1605_vm11, %v7327_v47, %v7215_v23  ;;  %v9981_v23 = vld [vmem:[%s10664_s13 + $0x3a4] sm:$0x1] }
0x10a9   : > { %v7358_v35 = vsel %vm1622_vm12, %v7343_v39, 0  ;;  %7755 = vrot.lane.b32.xlu2 %v7721_v49, %s15840_s18  ;;  %v7580_v5 = vunpack.c.l.b16 %v9981_v23  ;;  %v643_v23 = vunpack.c.l.bf16 %v609_v20 }
0x10ab   : > { %v7602_v58 = vpack.c.b16 %v7580_v5, %v7580_v5  ;;  %v674_v49 = vmul.f32 %v15197_v30, %v643_v23 }
0x10ac   : > { %v7219_v4 = vpop.permute.xlu0 %7218 }
0x10ad   : > { %v7347_v10 = vsel %vm1605_vm11, %v7331_v3, %v7219_v4  ;;  %v690_v4 = vmul.f32 %v15197_v30, %v659_v13 }
0x10ae   : > { %v7205_v36 = vpop.permute.xlu1 %7204  ;;  %v7362_v27 = vsel %vm1622_vm12, %v7347_v10, 0 }
0x10af   : > { %v7333_v14 = vsel %vm1588_vm10, %v7317_v62, %v7205_v36  ;;  %v624_v62 = vld [vmem:[%s15192_s5 + $0x68] sm:$0x1] }
0x10b0   : > { %v7349_v40 = vsel %vm1605_vm11, %v7333_v14, %v7221_v37  ;;  %v658_v36 = vunpack.c.l.bf16 %v624_v62  ;;  %v10434_v37 = vld [vmem:[%s15772_s3] sm:$0xf]  ;;  %v9951_v62 = vld [vmem:[%s10664_s13 + $0x32c] sm:$0x1] }
0x10b1   : > { %v7364_v60 = vsel %vm1622_vm12, %v7349_v40, 0  ;;  %7637 = vrot.lane.b32.xlu2 %v7602_v58, %s15837_s12  ;;  %v10296_v40 = vld [vmem:[%s10664_s13 + $0x3b4] sm:$0xff]  ;;  %v704_v58 = vpack.c.bf16 %v674_v49, %v674_v49 }
0x10b2   : > { %7366 = vmatpush.bf16.xpose.msrb.mxu2 %v7364_v60  ;;  %v689_v14 = vmul.f32 %v15197_v30, %v658_v36  ;;  %v660_v60 = vunpack.c.h.bf16 %v625_v9  ;;  %v7500_v36 = vunpack.c.l.b16 %v9951_v62 }
0x10b3   : > { %v7688_v18 = vunpack.c.l.b16 %v704_v58 }
0x10b4   : > { %v719_v61 = vpack.c.bf16 %v689_v14, %v689_v14  ;;  %v691_v48 = vmul.f32 %v15197_v30, %v660_v60  ;;  %v10284_v14 = vld [vmem:[%s10664_s13 + $0x324] sm:$0xff] }
0x10b5   : > { %v7714_v25 = vpack.c.b16 %v7688_v18, %v7688_v18 }
0x10b6   : > { %v7211_v1 = vpop.permute.xlu1 %7210  ;;  %v7703_v56 = vunpack.c.l.b16 %v719_v61  ;;  %v721_v10 = vpack.c.bf16 %v691_v48, %v691_v48 }
0x10b7   : > { %v7339_v51 = vsel %vm1605_vm11, %v7323_v50, %v7211_v1  ;;  %v720_v1 = vpack.c.bf16 %v690_v4, %v690_v4  ;;  %v7598_v50 = vpack.c.b16 %v7574_v24, %v7574_v24 }
0x10b8   : > { %v7354_v34 = vsel %vm1622_vm12, %v7339_v51, 0  ;;  %v7724_v3 = vpack.c.b16 %v7703_v56, %v7703_v56  ;;  %v7705_v29 = vunpack.c.l.b16 %v721_v10 }
0x10b9   : > { %7639 = vrot.lane.b32.xlu2 %v10295_v59, %s15837_s12  ;;  %v9966_v59 = vld [vmem:[%s10664_s13 + $0x368] sm:$0x1] }
0x10ba   : > { %7367 = vmatpush.bf16.xpose.msrb.mxu2 %v7362_v27  ;;  %v7704_v27 = vunpack.c.l.b16 %v720_v1  ;;  %v7565_v21 = vunpack.c.l.b16 %v9966_v59 }
0x10bc   : > { %v7592_v44 = vpack.c.b16 %v7565_v21, %v7565_v21  ;;  %v612_v21 = vld [vmem:[%s15192_s5 + $0x38] sm:$0x1] }
0x10bd   : > { %v646_v62 = vunpack.c.l.bf16 %v612_v21 }
0x10be   : > { %v7217_v2 = vpop.permute.xlu1 %7216 }
0x10bf   : > { %v7345_v45 = vsel %vm1605_vm11, %v7329_v26, %v7217_v2  ;;  %v682_v26 = vmul.f32 %v10332_v8, %v15197_v30  ;;  %v618_v2 = vld [vmem:[%s15192_s5 + $0x50] sm:$0x1] }
0x10c0   : > { %v7360_v43 = vsel %vm1622_vm12, %v7345_v45, 0  ;;  %v7725_v45 = vpack.c.b16 %v7705_v29, %v7704_v27  ;;  %v652_v22 = vunpack.c.l.bf16 %v618_v2  ;;  %v10344_v27 = vld [vmem:[%s15192_s5 + $0x60] sm:$0xff]  }
0x10c1   : > { %7757 = vrot.lane.b32.xlu2 %v7722_v52, %s15840_s18  ;;  %v712_v17 = vpack.c.bf16 %v682_v26, %v682_v26  ;;  %v10335_v29 = vunpack.c.l.bf16 %v10344_v27 }
0x10c2   : > { %7368 = vmatpush.bf16.xpose.msrb.mxu2 %v7360_v43  ;;  %v711_v43 = vpack.c.bf16 %v681_v31, %v681_v31  ;;  %v10336_v31 = vunpack.c.h.bf16 %v10344_v27 }
0x10c3   : > { %v7696_v39 = vunpack.c.l.b16 %v712_v17  ;;  %v687_v2 = vmul.f32 %v10335_v29, %v15197_v30 }
0x10c4   : > { %v7695_v47 = vunpack.c.l.b16 %v711_v43  ;;  %v9984_v43 = vld [vmem:[%s10664_s13 + $0x3b0] sm:$0x1] }
0x10c5   : > { %v717_v17 = vpack.c.bf16 %v687_v2, %v687_v2 }
0x10c6   : > { %v7719_v63 = vpack.c.b16 %v7696_v39, %v7695_v47  ;;  %v7583_v47 = vunpack.c.l.b16 %v9984_v43  ;;  %v627_v39 = vld [vmem:[%s15192_s5 + $0x74] sm:$0x1] }
0x10c9   : > { %7643 = vrot.lane.b32.xlu2 %v10296_v40, %s15837_s12 }
0x10ca   : > { %7369 = vmatpush.bf16.xpose.msrb.mxu2 %v7358_v35  ;;  %v683_v35 = vmul.f32 %v15197_v30, %v652_v22 }
0x10cc   : > { %v713_v57 = vpack.c.bf16 %v683_v35, %v683_v35  ;;  %v7701_v35 = vunpack.c.l.b16 %v717_v17 }
0x10ce   : > { %v7697_v33 = vunpack.c.l.b16 %v713_v57  ;;  %v7604_v57 = vpack.c.b16 %v7583_v47, %v7583_v47 }
0x10d0   : > { %v7720_v0 = vpack.c.b16 %v7697_v33, %v7697_v33  ;;  %v661_v33 = vunpack.c.l.bf16 %v627_v39 }
0x10d1   : > { %7761 = vrot.lane.b32.xlu2 %v7724_v3, %s15840_s18 }
0x10d2   : > { %7370 = vmatpush.bf16.xpose.msrb.mxu2 %v7356_v6  ;;  %v10342_v6 = vld [vmem:[%s15192_s5 + $0x30] sm:$0xff]  }
0x10d3   : > { %v10327_v19 = vunpack.c.l.bf16 %v10342_v6  ;;  %v10328_v38 = vunpack.c.h.bf16 %v10342_v6 }
0x10d5   : > { %v675_v54 = vmul.f32 %v10327_v19, %v15197_v30  ;;  %v676_v55 = vmul.f32 %v10328_v38, %v15197_v30  ;;  %v692_v19 = vmul.f32 %v15197_v30, %v661_v33 }
0x10d7   : > { %v705_v51 = vpack.c.bf16 %v675_v54, %v675_v54  ;;  %v706_v12 = vpack.c.bf16 %v676_v55, %v676_v55  ;;  %v722_v24 = vpack.c.bf16 %v692_v19, %v692_v19  ;;  %v613_v54 = vld [vmem:[%s15192_s5 + $0x3c] sm:$0xff]  }
0x10d9   : > { %7763 = vrot.lane.b32.xlu2 %v7725_v45, %s15840_s18  ;;  %v7689_v28 = vunpack.c.l.b16 %v705_v51  ;;  %v7690_v15 = vunpack.c.l.b16 %v706_v12  ;;  %v688_v45 = vmul.f32 %v10336_v31, %v15197_v30  ;;  %v648_v51 = vunpack.c.h.bf16 %v613_v54 }
0x10da   : > { %7371 = vmatpush.bf16.xpose.msrb.mxu2 %v7354_v34  ;;  %v7706_v12 = vunpack.c.l.b16 %v722_v24  ;;  %v606_v24 = vld [vmem:[%s15192_s5 + $0x20] sm:$0x1] }
0x10db   : > { %v7715_v34 = vpack.c.b16 %v7690_v15, %v7689_v28  ;;  %v718_v22 = vpack.c.bf16 %v688_v45, %v688_v45  ;;  %v9978_v28 = vld [vmem:[%s10664_s13 + $0x398] sm:$0x1]  ;;  %v615_v15 = vld [vmem:[%s15192_s5 + $0x44] sm:$0x1]  ;;  %v679_v23 = vmul.f32 %v15197_v30, %v648_v51 }
0x10dc   : > { %v7577_v20 = vunpack.c.l.b16 %v9978_v28  ;;  %v7726_v49 = vpack.c.b16 %v7706_v12, %v7706_v12  ;;  %v10288_v28 = vld [vmem:[%s10664_s13 + $0x354] sm:$0xff] }
0x10dd   : > { %v709_v18 = vpack.c.bf16 %v679_v23, %v679_v23 }
0x10df   : > { %v7693_v59 = vunpack.c.l.b16 %v709_v18 }
0x10e1   : > { %7751 = vrot.lane.b32.xlu2 %v7719_v63, %s15840_s18  ;;  %v7702_v63 = vunpack.c.l.b16 %v718_v22 }
0x10e2   : > { %7372 = vmatpush.bf16.xpose.msrb.mxu2 %v7352_v32  ;;  %v7636_v5 = vpop.permute.xlu2 %7635 }
0x10e3   : > { %v7811_v40 = vsel %vm1104_vm0, %v10284_v14, %v7636_v5  ;;  %v7723_v6 = vpack.c.b16 %v7702_v63, %v7701_v35  ;;  %v649_v5 = vunpack.c.l.bf16 %v615_v15  ;;  %v677_v14 = vmul.f32 %v15197_v30, %v646_v62 }
0x10e9   : > { %7753 = vrot.lane.b32.xlu2 %v7720_v0, %s15840_s18  ;;  %v9987_v0 = vld [vmem:[%s10664_s13 + $0x3bc] sm:$0x1] }
0x10ea   : > { %7373 = vmatpush.bf16.xpose.msrb.mxu2 %v7350_v11  ;;  %v7586_v38 = vunpack.c.l.b16 %v9987_v0 }
0x10ec   : > { %v7606_v55 = vpack.c.b16 %v7586_v38, %v7586_v38 }
0x10f1   : > { %9927 = vmatmul.msk.bf16.vlgmr.msrb.gmra.mxu2 %vm1622_vm12, %v10434_v37  ;;  %7629 = vrot.lane.b32.xlu2 %v7598_v50, %s15837_s12  ;;  %v7522_v37 = vpack.c.b16 %v7500_v36, %v7500_v36  ;;  %v647_v50 = vunpack.c.l.bf16 %v613_v54 }
0x10f9   : > { %7743 = vrot.lane.b32.xlu2 %v7715_v34, %s15840_s18  ;;  %v678_v34 = vmul.f32 %v15197_v30, %v647_v50 }
0x10fb   : > { %v708_v58 = vpack.c.bf16 %v678_v34, %v678_v34  ;;  %v601_v34 = vld [vmem:[%s15192_s5 + $0xc] sm:$0xff]  }
0x1101   : > { %7619 = vrot.lane.b32.xlu2 %v10290_v41, %s15837_s12  ;;  %v7600_v41 = vpack.c.b16 %v7577_v20, %v7577_v20  ;;  %v603_v20 = vld [vmem:[%s15192_s5 + $0x14] sm:$0x1] }
0x1102   : > { %v637_v23 = vunpack.c.l.bf16 %v603_v20  ;;  %v600_v20 = vld [vmem:[%s15192_s5 + $0x8] sm:$0x1] }
0x1103   : > { %v7756_v32 = vpop.permute.xlu2 %7755 }
0x1104   : > { %v15262_v60 = vsel %vm1165_vm1, %v7811_v40, %v7756_v32  ;;  %v680_v32 = vmul.f32 %v15197_v30, %v649_v5  ;;  %v707_v40 = vpack.c.bf16 %v677_v14, %v677_v14  ;;  %v636_v5 = vunpack.c.h.bf16 %v601_v34 }
0x1105   : > { %v7939_v4 = vshll.u32 %v15262_v60, 16  ;;  %v7937_v7 = vshrl.u32 %v15262_v60, 16 }
0x1106   : > { %v667_v18 = vmul.f32 %v15197_v30, %v636_v5 }
0x1107   : > { %v7941_v3 = vrot.slane %v7939_v4, 1 }
0x1109   : > { %7741 = vrot.lane.b32.xlu2 %v7714_v25, %s15840_s18  ;;  %v7942_v1 = vor.u32 %v7941_v3, %v7937_v7  ;;  %v7692_v25 = vunpack.c.l.b16 %v708_v58  ;;  %v10341_v7 = vld [vmem:[%s15192_s5 + $0x18] sm:$0xff]  }
0x110a   : > { %v10323_v27 = vunpack.c.l.bf16 %v10341_v7  ;;  %v10324_v29 = vunpack.c.h.bf16 %v10341_v7 }
0x110b   : > { %v7638_v11 = vpop.permute.xlu2 %7637  ;;  %v7717_v36 = vpack.c.b16 %v7693_v59, %v7692_v25  ;;  %v7984_v25 = vrot.slane %v15262_v60, 1 }
0x110c   : > { %v7814_v9 = vsel %vm1104_vm0, %v7522_v37, %v7638_v11  ;;  %v10292_v11 = vld [vmem:[%s10664_s13 + $0x384] sm:$0xff]  ;;  %v669_v17 = vmul.f32 %v10323_v27, %v15197_v30  ;;  %v670_v22 = vmul.f32 %v10324_v29, %v15197_v30 }
0x110e   : > { %v699_v33 = vpack.c.bf16 %v669_v17, %v669_v17 }
0x1110   : > { %v7683_v19 = vunpack.c.l.b16 %v699_v33  ;;  %v10318_v33 = vld [vmem:[%s15192_s5] sm:$0xff]  }
0x1111   : > { %7617 = vrot.lane.b32.xlu2 %v7592_v44, %s15837_s12  ;;  %v710_v44 = vpack.c.bf16 %v680_v32, %v680_v32 }
0x1113   : > { %v15253_v52 = vpop.permute.xlu2 %7639  ;;  %v7694_v37 = vunpack.c.l.b16 %v710_v44 }
0x111b   : > { %v7758_v61 = vpop.permute.xlu2 %7757 }
0x111c   : > { %v15259_v13 = vsel %vm1165_vm1, %v7814_v9, %v7758_v61  ;;  %v7718_v9 = vpack.c.b16 %v7694_v37, %v7694_v37  ;;  %v9972_v61 = vld [vmem:[%s10664_s13 + $0x380] sm:$0x1] }
0x111d   : > { %v7943_v56 = vshll.u32 %v15259_v13, 16  ;;  %v7571_v4 = vunpack.c.l.b16 %v9972_v61  ;;  %v7985_v32 = vrot.slane %v15259_v13, 1 }
0x111f   : > { %v7945_v48 = vrot.slane %v7943_v56, 1  ;;  %v10291_v56 = vld [vmem:[%s10664_s13 + $0x378] sm:$0xff]  ;;  %v7596_v3 = vpack.c.b16 %v7571_v4, %v7571_v4  ;;  %v15329_v37 = vsel %vm1303_vm2, %v7984_v25, %v7985_v32  ;;  %v634_v32 = vunpack.c.l.bf16 %v600_v20 }
0x1121   : > { %v15268_v10 = vsel %vm1206_vm3, %v7942_v1, %v7945_v48  ;;  %v7691_v48 = vunpack.c.l.b16 %v707_v40  ;;  %v9963_v40 = vld [vmem:[%s10664_s13 + $0x35c] sm:$0x1] }
0x1122   : > { %8031 = vrot.lane.b32.xlu2 %v15268_v10, %s15894_s30  ;;  %v7562_v4 = vunpack.c.l.b16 %v9963_v40 }
0x1123   : > { %v7716_v1 = vpack.c.b16 %v7691_v48, %v7691_v48  ;;  %v7644_v59 = vpop.permute.xlu2 %7643 }
0x1124   : > { %v7590_v48 = vpack.c.b16 %v7562_v4, %v7562_v4 }
0x112a   : > { %7613 = vrot.lane.b32.xlu2 %v7590_v48, %s15837_s12 }
0x112b   : > { %v7762_v13 = vpop.permute.xlu2 %7761 }
0x1174   : > { %v7375_v42 = vpop.f32.mrf.mxu2 }
0x1175   : > { %7379 = vst [vmem:[%s11747_s7 + $0x30] sm:$0xff] %v7375_v42  ;;  %v7383_v8 = vmul.f32 %v7375_v42, %v7375_v42  ;;  %7380 = vadd.xlane.f32.xlu1 %v7375_v42  ;;  %v607_v42 = vld [vmem:[%s15192_s5 + $0x24] sm:$0xff]  }
0x1176   : > { %v641_v31 = vunpack.c.l.bf16 %v607_v42 }
0x1177   : > { %7384 = vadd.xlane.f32.xlu0 %v7383_v8  ;;  %v9969_v8 = vld [vmem:[%s10664_s13 + $0x374] sm:$0x1] }
0x1178   : > { %v672_v2 = vmul.f32 %v15197_v30, %v641_v31  ;;  %v7568_v43 = vunpack.c.l.b16 %v9969_v8  ;;  %v9954_v8 = vld [vmem:[%s10664_s13 + $0x338] sm:$0x1] }
0x1179   : > { %v7503_v29 = vunpack.c.l.b16 %v9954_v8 }
0x117a   : > { %v702_v47 = vpack.c.bf16 %v672_v2, %v672_v2  ;;  %v10285_v2 = vld [vmem:[%s10664_s13 + $0x330] sm:$0xff] }
0x117c   : > { %v7377_v26 = vpop.f32.mrf.mxu2  ;;  %v7686_v35 = vunpack.c.l.b16 %v702_v47 }
0x117d   : > { %v642_v26 = vunpack.c.h.bf16 %v607_v42  ;;  %v10287_v42 = vld [vmem:[%s10664_s13 + $0x348] sm:$0xff] }
0x117f   : > { %v673_v45 = vmul.f32 %v15197_v30, %v642_v26  ;;  %v7524_v26 = vpack.c.b16 %v7503_v29, %v7503_v29 }
0x1181   : > { %v703_v39 = vpack.c.bf16 %v673_v45, %v673_v45 }
0x1183   : > { %v7687_v63 = vunpack.c.l.b16 %v703_v39  ;;  %v9957_v39 = vld [vmem:[%s10664_s13 + $0x344] sm:$0x1] }
0x1185   : > { %v7713_v0 = vpack.c.b16 %v7687_v63, %v7686_v35 }
0x118b   : > { %7641 = vrot.lane.b32.xlu0 %v7604_v57, %s15837_s12  ;;  %v7594_v57 = vpack.c.b16 %v7568_v43, %v7568_v43 }
0x118e   : > { %7759 = vrot.lane.b32.xlu1 %v7723_v6, %s15840_s18  ;;  %v700_v6 = vpack.c.bf16 %v670_v22, %v670_v22  ;;  %v7817_v22 = vsel %vm1104_vm0, %v10285_v2, %v15253_v52  ;;  %v9945_v2 = vld [vmem:[%s10664_s13 + $0x314] sm:$0x1] }
0x1190   : > { %v7684_v38 = vunpack.c.l.b16 %v700_v6  ;;  %v7506_v6 = vunpack.c.l.b16 %v9957_v39 }
0x1192   : > { %v7711_v54 = vpack.c.b16 %v7684_v38, %v7683_v19 }
0x1193   : > { %7631 = vrot.lane.b32.xlu0 %v10293_v46, %s15837_s12  ;;  %v10289_v46 = vld [vmem:[%s10664_s13 + $0x360] sm:$0xff] }
0x1196   : > { %7645 = vrot.lane.b32.xlu1 %v7606_v55, %s15837_s12  ;;  %v640_v55 = vunpack.c.l.bf16 %v606_v24 }
0x1198   : > { %v671_v50 = vmul.f32 %v15197_v30, %v640_v55  ;;  %v9948_v55 = vld [vmem:[%s10664_s13 + $0x320] sm:$0x1] }
0x119a   : > { %v701_v51 = vpack.c.bf16 %v671_v50, %v671_v50  ;;  %v10320_v50 = vunpack.c.h.bf16 %v10318_v33 }
0x119b   : > { %7765 = vrot.lane.b32.xlu0 %v7726_v49, %s15840_s18  ;;  %v635_v49 = vunpack.c.l.bf16 %v601_v34 }
0x119c   : > { %v7685_v12 = vunpack.c.l.b16 %v701_v51 }
0x119d   : > { %v666_v58 = vmul.f32 %v15197_v30, %v635_v49 }
0x119e   : > { %7633 = vrot.lane.b32.xlu1 %v7600_v41, %s15837_s12  ;;  %v7712_v15 = vpack.c.b16 %v7685_v12, %v7685_v12  ;;  %v668_v41 = vmul.f32 %v15197_v30, %v637_v23 }
0x119f   : > { %v696_v21 = vpack.c.bf16 %v666_v58, %v666_v58 }
0x11a0   : > { %v698_v44 = vpack.c.bf16 %v668_v41, %v668_v41  ;;  %v7497_v41 = vunpack.c.l.b16 %v9948_v55 }
0x11a1   : > { %v7680_v62 = vunpack.c.l.b16 %v696_v21 }
0x11a3   : > { %7627 = vrot.lane.b32.xlu0 %v10292_v11, %s15837_s12  ;;  %v697_v11 = vpack.c.bf16 %v667_v18, %v667_v18  ;;  %v664_v18 = vmul.f32 %v10320_v50, %v15197_v30  ;;  %v9960_v50 = vld [vmem:[%s10664_s13 + $0x350] sm:$0x1] }
0x11a6   : > { %7747 = vrot.lane.b32.xlu1 %v7717_v36, %s15840_s18  ;;  %v7681_v36 = vunpack.c.l.b16 %v697_v11 }
0x11a8   : > { %v7709_v14 = vpack.c.b16 %v7681_v36, %v7680_v62  ;;  %v7520_v62 = vpack.c.b16 %v7497_v41, %v7497_v41 }
0x11ab   : > { %7749 = vrot.lane.b32.xlu0 %v7718_v9, %s15840_s18  ;;  %v7682_v9 = vunpack.c.l.b16 %v698_v44 }
0x11ad   : > { %v7710_v61 = vpack.c.b16 %v7682_v9, %v7682_v9 }
0x11ae   : > { %7623 = vrot.lane.b32.xlu1 %v10291_v56, %s15837_s12  ;;  %v10286_v56 = vld [vmem:[%s10664_s13 + $0x33c] sm:$0xff] }
0x11af   : > { %v7823_v7 = vsel %vm1104_vm0, %v10286_v56, %v7644_v59 }
0x11b3   : > { %7625 = vrot.lane.b32.xlu0 %v7596_v3, %s15837_s12  ;;  %v7764_v3 = vpop.permute.xlu2 %7763 }
0x11b6   : > { %7745 = vrot.lane.b32.xlu1 %v7716_v1, %s15840_s18  ;;  %v15340_v1 = vsel %vm1165_vm1, %v7823_v7, %v7764_v3 }
0x11b7   : > { %v8004_v34 = vshll.u32 %v15340_v1, 16  ;;  %v8002_v21 = vshrl.u32 %v15340_v1, 16  ;;  %v8014_v40 = vrot.slane %v15340_v1, 1 }
0x11b9   : > { %v8006_v11 = vrot.slane %v8004_v34, 1  ;;  %v7559_v34 = vunpack.c.l.b16 %v9960_v50 }
0x11bb   : > { %7739 = vrot.lane.b32.xlu0 %v7713_v0, %s15840_s18  ;;  %v7752_v51 = vpop.permute.xlu2 %7751  ;;  %v8007_v48 = vor.u32 %v8006_v11, %v8002_v21 }
0x11be   : > { %7621 = vrot.lane.b32.xlu1 %v7594_v57, %s15837_s12 }
0x11c3   : > { %7615 = vrot.lane.b32.xlu0 %v10289_v46, %s15837_s12  ;;  %v10319_v46 = vunpack.c.l.bf16 %v10318_v33  ;;  %v7754_v3 = vpop.permute.xlu2 %7753 }
0x11c5   : > { %v663_v58 = vmul.f32 %v10319_v46, %v15197_v30 }
0x11c6   : > { %7735 = vrot.lane.b32.xlu1 %v7711_v54, %s15840_s18 }
0x11c7   : > { %v693_v36 = vpack.c.bf16 %v663_v58, %v663_v58 }
0x11cb   : > { %7737 = vrot.lane.b32.xlu0 %v7712_v15, %s15840_s18  ;;  %v7526_v15 = vpack.c.b16 %v7506_v6, %v7506_v6  ;;  %v10282_v6 = vld [vmem:[%s10664_s13 + $0x30c] sm:$0xff] }
0x11ce   : > { %7611 = vrot.lane.b32.xlu1 %v10288_v28, %s15837_s12  ;;  %v10283_v28 = vld [vmem:[%s10664_s13 + $0x318] sm:$0xff] }
0x11d3   : > { %7731 = vrot.lane.b32.xlu0 %v7709_v14, %s15840_s18 }
0x11d6   : > { %8047 = vrot.lane.b32.xlu1 %v15329_v37, %s15973_s1 }
0x11de   : > { %7733 = vrot.lane.b32.xlu1 %v7710_v61, %s15840_s18  ;;  %v665_v61 = vmul.f32 %v15197_v30, %v634_v32  ;;  %v7677_v30 = vunpack.c.l.b16 %v693_v36 }
0x11e6   : > { %8111 = vrot.lane.b32.xlu1 %v15340_v1, %s15922_s29 }
0x11e8   : > { %v15349_v31 = vpop.xlane.xlu1 %7380 }
0x11ea   : > { %v15347_v27 = vpop.xlane.xlu0 %7384 }
0x11ee   : > { %7607 = vrot.lane.b32.xlu1 %v10287_v42, %s15837_s12 }
0x11fd   : > { %v7642_v45 = vpop.permute.xlu0 %7641 }
0x11fe   : > { %v7820_v43 = vsel %vm1104_vm0, %v7524_v26, %v7642_v45 }
0x11ff   : > { %v7862_v17 = vsel %vm1165_vm1, %v7820_v43, %v7762_v13  ;;  %v694_v13 = vpack.c.bf16 %v664_v18, %v664_v18  ;;  %v695_v43 = vpack.c.bf16 %v665_v61, %v665_v61  ;;  %v7588_v18 = vpack.c.b16 %v7559_v34, %v7559_v34 }
0x1200   : > { %v7760_v47 = vpop.permute.xlu1 %7759  ;;  %v7993_v63 = vshll.u32 %v7862_v17, 16  ;;  %v8000_v12 = vrot.slane %v7862_v17, 1 }
0x1201   : > { %v15358_v35 = vsel %vm1165_vm1, %v7817_v22, %v7760_v47  ;;  %v7678_v1 = vunpack.c.l.b16 %v694_v13 }
0x1202   : > { %v7989_v57 = vshll.u32 %v15358_v35, 16  ;;  %8063 = vrot.lane.b32.xlu0 %v15358_v35, %s15974_s8  ;;  %v7987_v0 = vshrl.u32 %v15358_v35, 16  ;;  %v7999_v38 = vrot.slane %v15358_v35, 1  ;;  %v7995_v24 = vrot.slane %v7993_v63, 1 }
0x1203   : > { %v7494_v63 = vunpack.c.l.b16 %v9945_v2 }
0x1204   : > { %v7991_v19 = vrot.slane %v7989_v57, 1  ;;  %v15376_v5 = vsel %vm1303_vm2, %v7999_v38, %v8000_v12 }
0x1205   : > { %v7632_v52 = vpop.permute.xlu0 %7631 }
0x1206   : > { %v7992_v54 = vor.u32 %v7991_v19, %v7987_v0  ;;  %v7805_v25 = vsel %vm1104_vm0, %v10283_v28, %v7632_v52  ;;  %v7707_v19 = vpack.c.b16 %v7678_v1, %v7677_v30  ;;  %v7679_v52 = vunpack.c.l.b16 %v695_v43 }
0x1207   : > { %v15386_v14 = vsel %vm1165_vm1, %v7805_v25, %v7752_v51 }
0x1208   : > { %v7646_v23 = vpop.permute.xlu1 %7645  ;;  %v15371_v49 = vsel %vm1206_vm3, %v7992_v54, %v7995_v24  ;;  %v7929_v26 = vshll.u32 %v15386_v14, 16  ;;  %v7981_v39 = vrot.slane %v15386_v14, 1  ;;  %v7927_v46 = vshrl.u32 %v15386_v14, 16 }
0x1209   : > { %8079 = vrot.lane.b32.xlu2 %v15371_v49, %s15949_s14  ;;  %v7826_v59 = vsel %vm1104_vm0, %v7526_v15, %v7646_v23  ;;  %v7518_v24 = vpack.c.b16 %v7494_v63, %v7494_v63  ;;  %v7708_v51 = vpack.c.b16 %v7679_v52, %v7679_v52  ;;  %v7630_v15 = vpop.permute.xlu2 %7629 }
0x120a   : > { %8095 = vrot.lane.b32.xlu0 %v15376_v5, %s15950_s9  ;;  %v7931_v33 = vrot.slane %v7929_v26, 1 }
0x120b   : > { %v7802_v23 = vsel %vm1104_vm0, %v7518_v24, %v7630_v15  ;;  %v10279_v15 = vld [vmem:[%s10664_s13 + $0x2e8] sm:$0xff] }
0x120c   : > { %v7932_v54 = vor.u32 %v7931_v33, %v7927_v46 }
0x120d   : > { %v7766_v44 = vpop.permute.xlu0 %7765 }
0x120e   : > { %v7866_v9 = vsel %vm1165_vm1, %v7826_v59, %v7766_v44 }
0x120f   : > { %v8008_v56 = vshll.u32 %v7866_v9, 16  ;;  %v8015_v4 = vrot.slane %v7866_v9, 1  ;;  %v9942_v9 = vld [vmem:[%s10664_s13 + $0x308] sm:$0x1] }
0x1210   : > { %v7634_v7 = vpop.permute.xlu1 %7633  ;;  %v7491_v61 = vunpack.c.l.b16 %v9942_v9 }
0x1211   : > { %v8010_v42 = vrot.slane %v8008_v56, 1  ;;  %v7808_v8 = vsel %vm1104_vm0, %v7520_v62, %v7634_v7  ;;  %v8016_v29 = vsel %vm1303_vm2, %v8014_v40, %v8015_v4  ;;  %v7744_v36 = vpop.permute.xlu2 %7743 }
0x1212   : > { %v7854_v45 = vsel %vm1165_vm1, %v7808_v8, %v7754_v3  ;;  %8143 = vrot.lane.b32.xlu0 %v8016_v29, %s15866_s20 }
0x1213   : > { %v7933_v17 = vshll.u32 %v7854_v45, 16  ;;  %v7982_v22 = vrot.slane %v7854_v45, 1  ;;  %v8011_v47 = vsel %vm1206_vm3, %v8007_v48, %v8010_v42  ;;  %v7516_v48 = vpack.c.b16 %v7491_v61, %v7491_v61 }
0x1214   : > { %8127 = vrot.lane.b32.xlu2 %v8011_v47, %s15923_s27 }
0x1215   : > { %v15401_v57 = vsel %vm1303_vm2, %v7981_v39, %v7982_v22  ;;  %v7628_v0 = vpop.permute.xlu0 %7627  ;;  %v7935_v38 = vrot.slane %v7933_v17, 1 }
0x1216   : > { %8045 = vrot.lane.b32.xlu1 %v15401_v57, %s15973_s1  ;;  %v7799_v55 = vsel %vm1104_vm0, %v10282_v6, %v7628_v0  ;;  %v9939_v6 = vld [vmem:[%s10664_s13 + $0x2fc] sm:$0x1] }
0x1217   : > { %v15411_v28 = vsel %vm1206_vm3, %v7932_v54, %v7935_v38  ;;  %v7488_v52 = vunpack.c.l.b16 %v9939_v6  ;;  %v9936_v54 = vld [vmem:[%s10664_s13 + $0x2f0] sm:$0x1] }
0x1218   : > { %v7748_v12 = vpop.permute.xlu1 %7747 }
0x1219   : > { %v15416_v20 = vsel %vm1165_vm1, %v7799_v55, %v7748_v12  ;;  %v7620_v40 = vpop.permute.xlu2 %7619  ;;  %v7514_v24 = vpack.c.b16 %v7488_v52, %v7488_v52  ;;  %v7485_v12 = vunpack.c.l.b16 %v9936_v54 }
0x121a   : > { %7727 = vrot.lane.b32.xlu0 %v7707_v19, %s15840_s18  ;;  %v7919_v58 = vshll.u32 %v15416_v20, 16  ;;  %v7917_v59 = vshrl.u32 %v15416_v20, 16  ;;  %v7978_v7 = vrot.slane %v15416_v20, 1  ;;  %v10280_v19 = vld [vmem:[%s10664_s13 + $0x2f4] sm:$0xff] }
0x121b   : > { %v7787_v46 = vsel %vm1104_vm0, %v10280_v19, %v7620_v40 }
0x121c   : > { %8029 = vrot.lane.b32.xlu2 %v15411_v28, %s15894_s30  ;;  %v7921_v21 = vrot.slane %v7919_v58, 1 }
0x121d   : > { %v7750_v41 = vpop.permute.xlu0 %7749 }
0x121e   : > { %7729 = vrot.lane.b32.xlu1 %v7708_v51, %s15840_s18  ;;  %v7850_v32 = vsel %vm1165_vm1, %v7802_v23, %v7750_v41  ;;  %v7922_v44 = vor.u32 %v7921_v21, %v7917_v59  ;;  %v7512_v41 = vpack.c.b16 %v7485_v12, %v7485_v12 }
0x121f   : > { %v7923_v25 = vshll.u32 %v7850_v32, 16  ;;  %v7979_v4 = vrot.slane %v7850_v32, 1 }
0x1220   : > { %v7624_v13 = vpop.permute.xlu1 %7623 }
0x1221   : > { %v7925_v11 = vrot.slane %v7923_v25, 1  ;;  %v7742_v2 = vpop.permute.xlu2 %7741 }
0x1222   : > { %8061 = vrot.lane.b32.xlu0 %v15262_v60, %s15974_s8 }
0x1223   : > { %v15431_v62 = vsel %vm1206_vm3, %v7922_v44, %v7925_v11 }
0x1224   : > { %7609 = vrot.lane.b32.xlu2 %v7588_v18, %s15837_s12  ;;  %s10071_s12 = sshll.u32 %s10518_s25, 4 }
0x1225   : > { %v7626_v3 = vpop.permute.xlu0 %7625  ;;  %s8341_s18 = sadd.s32 %s10071_s12, %s10649_s16 }
0x1226   : > { %8109 = vrot.lane.b32.xlu1 %v15358_v35, %s15922_s29  ;;  %v10281_v35 = vld [vmem:[%s10664_s13 + $0x300] sm:$0xff] }
0x1227   : > { %v7793_v56 = vsel %vm1104_vm0, %v10281_v35, %v7624_v13 }
0x1228   : > { %v15448_v42 = vsel %vm1165_vm1, %v7793_v56, %v7744_v36  ;;  %v7746_v8 = vpop.permute.xlu1 %7745 }
0x1229   : > { %v7909_v29 = vshll.u32 %v15448_v42, 16  ;;  %v7975_v45 = vrot.slane %v15448_v42, 1  ;;  %v7907_v43 = vshrl.u32 %v15448_v42, 16  ;;  %v7618_v33 = vpop.permute.xlu2 %7617 }
0x122a   : > { %8093 = vrot.lane.b32.xlu0 %v15329_v37, %s15950_s9 }
0x122b   : > { %v7911_v17 = vrot.slane %v7909_v29, 1 }
0x122c   : > { %8077 = vrot.lane.b32.xlu2 %v15268_v10, %s15949_s14 }
0x122d   : > { %v7740_v0 = vpop.permute.xlu0 %7739 }
0x122e   : > { %8027 = vrot.lane.b32.xlu1 %v15431_v62, %s15894_s30  ;;  %v15489_v50 = vsel %vm1165_vm1, %v7787_v46, %v7740_v0 }
0x122f   : > { %v7899_v34 = vshll.u32 %v15489_v50, 16  ;;  %v7897_v25 = vshrl.u32 %v15489_v50, 16  ;;  %v7972_v11 = vrot.slane %v15489_v50, 1 }
0x1230   : > { %v7622_v39 = vpop.permute.xlu1 %7621 }
0x1231   : > { %v8032_v55 = vpop.permute.xlu2 %8031  ;;  %v7901_v59 = vrot.slane %v7899_v34, 1 }
0x1232   : > { %8141 = vrot.lane.b32.xlu0 %v15376_v5, %s15866_s20  ;;  %v7796_v5 = vsel %vm1104_vm0, %v7516_v48, %v7626_v3  ;;  %v8160_v52 = vsel %vm1486_vm4, %v15262_v60, %v8032_v55 }
0x1233   : > { %v7846_v26 = vsel %vm1165_vm1, %v7796_v5, %v7746_v8  ;;  %v7902_v13 = vor.u32 %v7901_v59, %v7897_v25 }
0x1234   : > { %8125 = vrot.lane.b32.xlu2 %v15371_v49, %s15923_s27  ;;  %v15454_v49 = vsel %vm1303_vm2, %v7978_v7, %v7979_v4  ;;  %v7913_v30 = vshll.u32 %v7846_v26, 16  ;;  %v7976_v1 = vrot.slane %v7846_v26, 1 }
0x1235   : > { %v7616_v51 = vpop.permute.xlu0 %7615 }
0x1236   : > { %8075 = vrot.lane.b32.xlu1 %v15411_v28, %s15949_s14  ;;  %v7915_v22 = vrot.slane %v7913_v30, 1  ;;  %v15469_v47 = vsel %vm1303_vm2, %v7975_v45, %v7976_v1  ;;  %v7781_v32 = vsel %vm1104_vm0, %v10279_v15, %v7616_v51  ;;  %v9933_v1 = vld [vmem:[%s10664_s13 + $0x2e4] sm:$0x1] }
0x1238   : > { %v7736_v38 = vpop.permute.xlu1 %7735 }
0x1239   : > { %v7614_v21 = vpop.permute.xlu2 %7613  ;;  %v15507_v44 = vsel %vm1165_vm1, %v7781_v32, %v7736_v38 }
0x123a   : > { %8059 = vrot.lane.b32.xlu0 %v15386_v14, %s15974_s8  ;;  %v7889_v61 = vshll.u32 %v15507_v44, 16  ;;  %v7887_v7 = vshrl.u32 %v15507_v44, 16  ;;  %v7969_v19 = vrot.slane %v15507_v44, 1 }
0x123c   : > { %8043 = vrot.lane.b32.xlu2 %v15454_v49, %s15973_s1  ;;  %v7891_v3 = vrot.slane %v7889_v61, 1  ;;  %v9930_v61 = vld [vmem:[%s10664_s13 + $0x2d8] sm:$0x1] }
0x123d   : > { %v7738_v9 = vpop.permute.xlu0 %7737 }
0x123e   : > { %8123 = vrot.lane.b32.xlu1 %v15268_v10, %s15923_s27  ;;  %v7912_v10 = vor.u32 %v7911_v17, %v7907_v43  ;;  %v7892_v29 = vor.u32 %v7891_v3, %v7887_v7  ;;  %v10278_v43 = vld [vmem:[%s10664_s13 + $0x2dc] sm:$0xff]  ;;  %v7482_v17 = vunpack.c.l.b16 %v9933_v1  ;;  %v10277_v7 = vld [vmem:[%s10664_s13 + $0x2d0] sm:$0xff] }
0x1240   : > { %v15474_v63 = vsel %vm1206_vm3, %v7912_v10, %v7915_v22  ;;  %v7612_v58 = vpop.permute.xlu1 %7611  ;;  %v7510_v6 = vpack.c.b16 %v7482_v17, %v7482_v17 }
0x1241   : > { %v7775_v10 = vsel %vm1104_vm0, %v10278_v43, %v7612_v58 }
0x1242   : > { %8107 = vrot.lane.b32.xlu0 %v15262_v60, %s15922_s29  ;;  %v7778_v46 = vsel %vm1104_vm0, %v7510_v6, %v7614_v21 }
0x1244   : > { %8091 = vrot.lane.b32.xlu2 %v15401_v57, %s15950_s9 }
0x1246   : > { %8041 = vrot.lane.b32.xlu1 %v15469_v47, %s15973_s1 }
0x1248   : > { %v8048_v4 = vpop.permute.xlu1 %8047 }
0x124a   : > { %8025 = vrot.lane.b32.xlu0 %v15474_v63, %s15894_s30 }
0x124c   : > { %8139 = vrot.lane.b32.xlu2 %v15329_v37, %s15866_s20  ;;  %v7790_v37 = vsel %vm1104_vm0, %v7514_v24, %v7622_v39 }
0x124d   : > { %v7842_v23 = vsel %vm1165_vm1, %v7790_v37, %v7742_v2  ;;  %v7732_v2 = vpop.permute.xlu0 %7731 }
0x124e   : > { %8089 = vrot.lane.b32.xlu1 %v15454_v49, %s15950_s9  ;;  %v7903_v18 = vshll.u32 %v7842_v23, 16  ;;  %v15550_v38 = vsel %vm1165_vm1, %v7775_v10, %v7732_v2 }
0x124f   : > { %v7879_v54 = vshll.u32 %v15550_v38, 16  ;;  %v7877_v34 = vshrl.u32 %v15550_v38, 16  ;;  %v7966_v32 = vrot.slane %v15550_v38, 1 }
0x1250   : > { %v7905_v36 = vrot.slane %v7903_v18, 1  ;;  %v7734_v26 = vpop.permute.xlu1 %7733 }
0x1251   : > { %v7834_v37 = vsel %vm1165_vm1, %v7778_v46, %v7734_v26 }
0x1252   : > { %8073 = vrot.lane.b32.xlu0 %v15431_v62, %s15949_s14  ;;  %v15520_v56 = vsel %vm1206_vm3, %v7902_v13, %v7905_v36  ;;  %v7967_v58 = vrot.slane %v7834_v37, 1 }
0x1254   : > { %8057 = vrot.lane.b32.xlu2 %v15416_v20, %s15974_s8  ;;  %v15576_v21 = vsel %vm1303_vm2, %v7966_v32, %v7967_v58 }
0x1256   : > { %8137 = vrot.lane.b32.xlu1 %v15401_v57, %s15866_s20  ;;  %v7973_v57 = vrot.slane %v7842_v23, 1  ;;  %v7881_v23 = vrot.slane %v7879_v54, 1 }
0x1258   : > { %v15513_v35 = vsel %vm1303_vm2, %v7972_v11, %v7973_v57  ;;  %v8112_v39 = vpop.permute.xlu1 %8111  ;;  %v7882_v11 = vor.u32 %v7881_v23, %v7877_v34 }
0x125a   : > { %8121 = vrot.lane.b32.xlu0 %v15411_v28, %s15923_s27  ;;  %v7784_v28 = vsel %vm1104_vm0, %v7512_v41, %v7618_v33  ;;  %v7883_v41 = vshll.u32 %v7834_v37, 16 }
0x125b   : > { %v7838_v40 = vsel %vm1165_vm1, %v7784_v28, %v7738_v9 }
0x125c   : > { %8105 = vrot.lane.b32.xlu2 %v15386_v14, %s15922_s29  ;;  %v7893_v48 = vshll.u32 %v7838_v40, 16  ;;  %v7970_v0 = vrot.slane %v7838_v40, 1  ;;  %v7885_v59 = vrot.slane %v7883_v41, 1 }
0x125e   : > { %8055 = vrot.lane.b32.xlu1 %v15448_v42, %s15974_s8  ;;  %v7895_v8 = vrot.slane %v7893_v48, 1  ;;  %v15557_v24 = vsel %vm1303_vm2, %v7969_v19, %v7970_v0  ;;  %v7886_v13 = vsel %vm1206_vm3, %v7882_v11, %v7885_v59 }
0x1260   : > { %v15532_v45 = vsel %vm1206_vm3, %v7892_v29, %v7895_v8  ;;  %v7608_v15 = vpop.permute.xlu1 %7607 }
0x1261   : > { %v7769_v8 = vsel %vm1104_vm0, %v10277_v7, %v7608_v15 }
0x1262   : > { %8039 = vrot.lane.b32.xlu0 %v15513_v35, %s15973_s1 }
0x1263   : > { %v8080_v5 = vpop.permute.xlu2 %8079 }
0x1264   : > { %8023 = vrot.lane.b32.xlu2 %v15520_v56, %s15894_s30 }
0x1266   : > { %8103 = vrot.lane.b32.xlu1 %v15416_v20, %s15922_s29 }
0x126a   : > { %8087 = vrot.lane.b32.xlu0 %v15469_v47, %s15950_s9 }
0x126c   : > { %8071 = vrot.lane.b32.xlu2 %v15474_v63, %s15949_s14 }
0x126e   : > { %v8128_v30 = vpop.permute.xlu2 %8127  ;;  %8021 = vrot.lane.b32.xlu1 %v15532_v45, %s15894_s30 }
0x1272   : > { %8135 = vrot.lane.b32.xlu0 %v15454_v49, %s15866_s20  ;;  %v8176_v49 = vsel %vm1503_vm5, %v8160_v52, %v8048_v4  ;;  %v7479_v4 = vunpack.c.l.b16 %v9930_v61 }
0x1274   : > { %8119 = vrot.lane.b32.xlu2 %v15431_v62, %s15923_s27  ;;  %v8064_v22 = vpop.permute.xlu0 %8063 }
0x1275   : > { %v8192_v62 = vsel %vm1520_vm6, %v8176_v49, %v8064_v22 }
0x1276   : > { %v8030_v33 = vpop.permute.xlu2 %8029  ;;  %8069 = vrot.lane.b32.xlu1 %v15520_v56, %s15949_s14  ;;  %v8208_v55 = vsel %vm1537_vm7, %v8192_v62, %v8080_v5  ;;  %v7508_v5 = vpack.c.b16 %v7479_v4, %v7479_v4 }
0x127a   : > { %8053 = vrot.lane.b32.xlu0 %v15489_v50, %s15974_s8 }
0x127c   : > { %8037 = vrot.lane.b32.xlu2 %v15557_v24, %s15973_s1  ;;  %v8096_v60 = vpop.permute.xlu0 %8095 }
0x127d   : > { %v8224_v51 = vsel %vm1554_vm8, %v8208_v55, %v8096_v60 }
0x127e   : > { %v7610_v12 = vpop.permute.xlu2 %7609  ;;  %8117 = vrot.lane.b32.xlu1 %v15474_v63, %s15923_s27  ;;  %v8240_v18 = vsel %vm1571_vm9, %v8224_v51, %v8112_v39 }
0x127f   : > { %v8256_v63 = vsel %vm1588_vm10, %v8240_v18, %v8128_v30  ;;  %v8158_v30 = vsel %vm1486_vm4, %v15386_v14, %v8030_v33 }
0x1282   : > { %8101 = vrot.lane.b32.xlu0 %v15448_v42, %s15922_s29 }
0x1284   : > { %8085 = vrot.lane.b32.xlu2 %v15513_v35, %s15950_s9  ;;  %v8144_v25 = vpop.permute.xlu0 %8143 }
0x1285   : > { %v8272_v57 = vsel %vm1605_vm11, %v8256_v63, %v8144_v25 }
0x1286   : > { %v8078_v28 = vpop.permute.xlu2 %8077  ;;  %8035 = vrot.lane.b32.xlu1 %v15576_v21, %s15973_s1  ;;  %v8287_v36 = vsel %vm1622_vm12, %v8272_v57, 0 }
0x1287   : > { %8289 = vmatpush.bf16.xpose.msrb.mxu3 %v8287_v36 }
0x1288   : > { %v8046_v9 = vpop.permute.xlu1 %8045 }
0x1289   : > { %v8174_v17 = vsel %vm1503_vm5, %v8158_v30, %v8046_v9 }
0x128a   : > { %8019 = vrot.lane.b32.xlu0 %v7886_v13, %s15894_s30 }
0x128c   : > { %8133 = vrot.lane.b32.xlu2 %v15469_v47, %s15866_s20  ;;  %v7728_v40 = vpop.permute.xlu0 %7727  ;;  %v7772_v47 = vsel %vm1104_vm0, %v7508_v5, %v7610_v12 }
0x128d   : > { %v15597_v26 = vsel %vm1165_vm1, %v7769_v8, %v7728_v40 }
0x128e   : > { %v8126_v48 = vpop.permute.xlu2 %8125  ;;  %8083 = vrot.lane.b32.xlu1 %v15557_v24, %s15950_s9  ;;  %v7869_v22 = vshll.u32 %v15597_v26, 16  ;;  %v7867_v52 = vshrl.u32 %v15597_v26, 16  ;;  %v7963_v49 = vrot.slane %v15597_v26, 1 }
0x1290   : > { %v7730_v3 = vpop.permute.xlu1 %7729  ;;  %v7871_v6 = vrot.slane %v7869_v22, 1 }
0x1291   : > { %v7830_v1 = vsel %vm1165_vm1, %v7772_v47, %v7730_v3 }
0x1292   : > { %8067 = vrot.lane.b32.xlu0 %v15532_v45, %s15949_s14  ;;  %v7873_v39 = vshll.u32 %v7830_v1, 16  ;;  %v7964_v0 = vrot.slane %v7830_v1, 1  ;;  %v7872_v46 = vor.u32 %v7871_v6, %v7867_v52 }
0x1294   : > { %8051 = vrot.lane.b32.xlu2 %v15507_v44, %s15974_s8  ;;  %v8062_v29 = vpop.permute.xlu0 %8061  ;;  %v7965_v60 = vsel %vm1303_vm2, %v7963_v49, %v7964_v0 }
0x1295   : > { %v8190_v10 = vsel %vm1520_vm6, %v8174_v17, %v8062_v29 }
0x1296   : > { %v8044_v2 = vpop.permute.xlu2 %8043  ;;  %8131 = vrot.lane.b32.xlu1 %v15513_v35, %s15866_s20  ;;  %v8206_v14 = vsel %vm1537_vm7, %v8190_v10, %v8078_v28 }
0x1298   : > { %v8110_v43 = vpop.permute.xlu1 %8109 }
0x129a   : > { %8115 = vrot.lane.b32.xlu0 %v15520_v56, %s15923_s27  ;;  %v7875_v56 = vrot.slane %v7873_v39, 1 }
0x129c   : > { %8099 = vrot.lane.b32.xlu2 %v15489_v50, %s15922_s29  ;;  %v8094_v35 = vpop.permute.xlu0 %8093  ;;  %v7876_v55 = vsel %vm1206_vm3, %v7872_v46, %v7875_v56 }
0x129d   : > { %v8222_v33 = vsel %vm1554_vm8, %v8206_v14, %v8094_v35 }
0x129e   : > { %v8092_v19 = vpop.permute.xlu2 %8091  ;;  %8049 = vrot.lane.b32.xlu1 %v15550_v38, %s15974_s8  ;;  %v8238_v54 = vsel %vm1571_vm9, %v8222_v33, %v8110_v43 }
0x129f   : > { %v8254_v51 = vsel %vm1588_vm10, %v8238_v54, %v8126_v48 }
0x12a0   : > { %v8028_v62 = vpop.permute.xlu1 %8027 }
0x12a1   : > { %v8156_v41 = vsel %vm1486_vm4, %v15416_v20, %v8028_v62 }
0x12a2   : > { %8033 = vrot.lane.b32.xlu0 %v7965_v60, %s15973_s1  ;;  %v8172_v18 = vsel %vm1503_vm5, %v8156_v41, %v8044_v2  ;;  %s15997_s1 = sand.u32 1, %s10506_s22  }
0x12a3   : > { %s8314_s8 = scalar_lea.sflag [#allocation3], %s15997_s1 }
0x12a4   : > { %8017 = vrot.lane.b32.xlu2 %v7876_v55, %s15894_s30  ;;  %v8142_v37 = vpop.permute.xlu0 %8141  ;;  %s10072_s30 = sshll.u32 %s8341_s18, 3 }
0x12a5   : > { %v8270_v12 = vsel %vm1605_vm11, %v8254_v51, %v8142_v37 }
0x12a6   : > { %v8140_v15 = vpop.permute.xlu2 %8139  ;;  %8097 = vrot.lane.b32.xlu1 %v15507_v44, %s15922_s29  ;;  %v8285_v34 = vsel %vm1622_vm12, %v8270_v12, 0 }
0x12a7   : > { %8290 = vmatpush.bf16.xpose.msrb.mxu3 %v8285_v34 }
0x12a8   : > { %v8076_v23 = vpop.permute.xlu1 %8075 }
0x12aa   : > { %8081 = vrot.lane.b32.xlu0 %v15576_v21, %s15950_s9 }
0x12ac   : > { %8065 = vrot.lane.b32.xlu2 %v7886_v13, %s15949_s14  ;;  %v8060_v58 = vpop.permute.xlu0 %8059  ;;  %s8345_s14 = sshll.u32 %s11747_s7, 4  ;;  %s8346_s14 = int_to_ptr.vmem [resolvable:$true] %s8345_s14 }
0x12ad   : > { %v8188_v32 = vsel %vm1520_vm6, %v8172_v18, %v8060_v58 }
0x12ae   : > { %v8058_v25 = vpop.permute.xlu2 %8057  ;;  %v8204_v59 = vsel %vm1537_vm7, %v8188_v32, %v8076_v23 }
0x12af   : > { %v8220_v20 = vsel %vm1554_vm8, %v8204_v59, %v8092_v19 }
0x12b0   : > { %v8124_v63 = vpop.permute.xlu1 %8123 }
0x12b2   : > { %8129 = vrot.lane.b32.xlu0 %v15557_v24, %s15866_s20 }
0x12b4   : > { %8113 = vrot.lane.b32.xlu2 %v15532_v45, %s15923_s27  ;;  %v8108_v21 = vpop.permute.xlu0 %8107  ;;  %s8343_s27 = scalar_lea.hbm %s15773_s4, %s10072_s30 }
0x12b5   : > { %v8236_v57 = vsel %vm1571_vm9, %v8220_v20, %v8108_v21  ;;  %s8347_s9 = sshll.u32 %s8343_s27, 4  ;;  %s8348_s9 = int_to_ptr.hbm [resolvable:$true] %s8347_s9 }
0x12b6   : > { %v8106_v11 = vpop.permute.xlu2 %8105  ;;  %v8252_v28 = vsel %vm1588_vm10, %v8236_v57, %v8124_v63  ;;  %s10450_s21 = sshra.s32 %s8348_s9, 4  ;;  %s10451_s21 = int_to_ptr.hbm [resolvable:$true] %s10450_s21 }
0x12b7   : > { %v8268_v36 = vsel %vm1605_vm11, %v8252_v28, %v8140_v15  ;;  %s10452_s25 = scalar_lea.hbm %s10451_s21, 64  ;;  %p10457_p12 = scmp.lt.s32.totalorder %s10451_s21, %s15773_s4 }
0x12b8   : > { %v8042_v9 = vpop.permute.xlu1 %8041  ;;  %v8283_v13 = vsel %vm1622_vm12, %v8268_v36, 0  ;;  %p10453_p9 = scmp.ne.s32.totalorder %s10451_s21, %s10452_s25  ;;  %p10458_p13 = scmp.lt.s32.totalorder %s10456_s15, %s10452_s25 }
0x12b9   : > { %8291 = vmatpush.bf16.xpose.msrb.mxu3 %v8283_v13 }
0x12ba   : > { %p10454_p10 = pnand %p10453_p9, %p10628_p3  ;;  %p10459_p0 = por %p10458_p13, %p10457_p12 }
0x12bc   : > { %v8026_v61 = vpop.permute.xlu0 %8025  ;;  %p10455_p11 = pneg %p10454_p10 }
0x12bd   : > { %v8154_v24 = vsel %vm1486_vm4, %v15448_v42, %v8026_v61 }
0x12be   : > { %v8024_v40 = vpop.permute.xlu2 %8023  ;;  %v8170_v4 = vsel %vm1503_vm5, %v8154_v24, %v8042_v9  ;;  %p10460_p1 = pnand %p10459_p0, %p10455_p11 }
0x12bf   : > { %v8186_v7 = vsel %vm1520_vm6, %v8170_v4, %v8058_v25  ;;  %v8152_v10 = vsel %vm1486_vm4, %v15489_v50, %v8024_v40 }
0x12c0   : > { %v8090_v45 = vpop.permute.xlu1 %8089 }
0x12c4   : > { %v8074_v48 = vpop.permute.xlu0 %8073 }
0x12c5   : > { %v8202_v3 = vsel %vm1537_vm7, %v8186_v7, %v8074_v48 }
0x12c6   : > { %v8218_v8 = vsel %vm1554_vm8, %v8202_v3, %v8090_v45  ;;  %v8072_v29 = vpop.permute.xlu2 %8071 }
0x12c7   : > { %v8234_v47 = vsel %vm1571_vm9, %v8218_v8, %v8106_v11 }
0x12c8   : > { %v8138_v5 = vpop.permute.xlu1 %8137 }
0x12cc   : > { %v8122_v2 = vpop.permute.xlu0 %8121 }
0x12cd   : > { %v8250_v30 = vsel %vm1588_vm10, %v8234_v47, %v8122_v2 }
0x12ce   : > { %v8266_v42 = vsel %vm1605_vm11, %v8250_v30, %v8138_v5  ;;  %v8120_v17 = vpop.permute.xlu2 %8119 }
0x12cf   : > { %v8281_v1 = vsel %vm1622_vm12, %v8266_v42, 0 }
0x12d0   : > { %v8056_v43 = vpop.permute.xlu1 %8055  ;;  %8292 = vmatpush.bf16.xpose.msrb.mxu3 %v8281_v1 }
0x12d4   : > { %v8040_v22 = vpop.permute.xlu0 %8039 }
0x12d5   : > { %v8168_v39 = vsel %vm1503_vm5, %v8152_v10, %v8040_v22 }
0x12d6   : > { %v8184_v6 = vsel %vm1520_vm6, %v8168_v39, %v8056_v43  ;;  %v8038_v14 = vpop.permute.xlu2 %8037 }
0x12d7   : > { %v8200_v33 = vsel %vm1537_vm7, %v8184_v6, %v8072_v29  ;;  %v10435_v6 = vld [vmem:[%s15772_s3] sm:$0xf] }
0x12d8   : > { %v8104_v35 = vpop.permute.xlu1 %8103 }
0x12dc   : > { %v8088_v0 = vpop.permute.xlu0 %8087 }
0x12dd   : > { %v8216_v19 = vsel %vm1554_vm8, %v8200_v33, %v8088_v0 }
0x12de   : > { %v8232_v49 = vsel %vm1571_vm9, %v8216_v19, %v8104_v35  ;;  %v8086_v54 = vpop.permute.xlu2 %8085 }
0x12df   : > { %v8248_v62 = vsel %vm1588_vm10, %v8232_v49, %v8120_v17 }
0x12e0   : > { %v8022_v52 = vpop.permute.xlu1 %8021 }
0x12e1   : > { %v8150_v55 = vsel %vm1486_vm4, %v15507_v44, %v8022_v52 }
0x12e2   : > { %v8166_v51 = vsel %vm1503_vm5, %v8150_v55, %v8038_v14 }
0x12e4   : > { %v8136_v56 = vpop.permute.xlu0 %8135 }
0x12e5   : > { %v8264_v46 = vsel %vm1605_vm11, %v8248_v62, %v8136_v56 }
0x12e6   : > { %v8279_v50 = vsel %vm1622_vm12, %v8264_v46, 0  ;;  %v8134_v34 = vpop.permute.xlu2 %8133 }
0x12e7   : > { %8293 = vmatpush.bf16.xpose.msrb.mxu3 %v8279_v50 }
0x12e8   : > { %v8070_v60 = vpop.permute.xlu1 %8069 }
0x12ec   : > { %v8054_v37 = vpop.permute.xlu0 %8053 }
0x12ed   : > { %v8182_v12 = vsel %vm1520_vm6, %v8166_v51, %v8054_v37 }
0x12ee   : > { %v8198_v23 = vsel %vm1537_vm7, %v8182_v12, %v8070_v60  ;;  %v8052_v59 = vpop.permute.xlu2 %8051 }
0x12ef   : > { %v8214_v41 = vsel %vm1554_vm8, %v8198_v23, %v8086_v54 }
0x12f0   : > { %v8118_v15 = vpop.permute.xlu1 %8117 }
0x12f4   : > { %v8102_v58 = vpop.permute.xlu0 %8101 }
0x12f5   : > { %v8230_v18 = vsel %vm1571_vm9, %v8214_v41, %v8102_v58 }
0x12f6   : > { %v8246_v32 = vsel %vm1588_vm10, %v8230_v18, %v8118_v15  ;;  %v8100_v36 = vpop.permute.xlu2 %8099 }
0x12f7   : > { %v8262_v25 = vsel %vm1605_vm11, %v8246_v32, %v8134_v34 }
0x12f8   : > { %v8036_v63 = vpop.permute.xlu1 %8035  ;;  %v8277_v44 = vsel %vm1622_vm12, %v8262_v25, 0 }
0x12f9   : > { %8294 = vmatpush.bf16.xpose.msrb.mxu3 %v8277_v44 }
0x12fc   : > { %v8020_v20 = vpop.permute.xlu0 %8019 }
0x12fd   : > { %v8148_v21 = vsel %vm1486_vm4, %v15550_v38, %v8020_v20 }
0x12fe   : > { %v8164_v57 = vsel %vm1503_vm5, %v8148_v21, %v8036_v63  ;;  %v8018_v38 = vpop.permute.xlu2 %8017 }
0x12ff   : > { %v8180_v9 = vsel %vm1520_vm6, %v8164_v57, %v8052_v59  ;;  %v8146_v5 = vsel %vm1486_vm4, %v15597_v26, %v8018_v38 }
0x1300   : > { %v8084_v11 = vpop.permute.xlu1 %8083 }
0x1304   : > { %v8068_v28 = vpop.permute.xlu0 %8067 }
0x1305   : > { %v8196_v13 = vsel %vm1537_vm7, %v8180_v9, %v8068_v28 }
0x1306   : > { %v8212_v61 = vsel %vm1554_vm8, %v8196_v13, %v8084_v11  ;;  %v8066_v47 = vpop.permute.xlu2 %8065 }
0x1307   : > { %v8228_v40 = vsel %vm1571_vm9, %v8212_v61, %v8100_v36 }
0x1308   : > { %v8132_v24 = vpop.permute.xlu1 %8131 }
0x130c   : > { %v8116_v45 = vpop.permute.xlu0 %8115 }
0x130d   : > { %v8244_v4 = vsel %vm1588_vm10, %v8228_v40, %v8116_v45 }
0x130e   : > { %v8260_v48 = vsel %vm1605_vm11, %v8244_v4, %v8132_v24  ;;  %v8114_v22 = vpop.permute.xlu2 %8113 }
0x130f   : > { %v8275_v7 = vsel %vm1622_vm12, %v8260_v48, 0 }
0x1310   : > { %8295 = vmatpush.bf16.xpose.msrb.mxu3 %v8275_v7  ;;  %v8050_v8 = vpop.permute.xlu1 %8049 }
0x1314   : > { %v8034_v3 = vpop.permute.xlu0 %8033 }
0x1315   : > { %v8162_v29 = vsel %vm1503_vm5, %v8146_v5, %v8034_v3 }
0x1316   : > { %v8178_v2 = vsel %vm1520_vm6, %v8162_v29, %v8050_v8 }
0x1317   : > { %v8194_v42 = vsel %vm1537_vm7, %v8178_v2, %v8066_v47 }
0x1318   : > { %v8098_v43 = vpop.permute.xlu1 %8097 }
0x131c   : > { %v8082_v30 = vpop.permute.xlu0 %8081 }
0x131d   : > { %v8210_v1 = vsel %vm1554_vm8, %v8194_v42, %v8082_v30 }
0x131e   : > { %v8226_v17 = vsel %vm1571_vm9, %v8210_v1, %v8098_v43 }
0x131f   : > { %v8242_v26 = vsel %vm1588_vm10, %v8226_v17, %v8114_v22 }
0x1324   : > { %v8130_v10 = vpop.permute.xlu0 %8129 }
0x1325   : > { %v8258_v39 = vsel %vm1605_vm11, %v8242_v26, %v8130_v10 }
0x1326   : > { %v8273_v35 = vsel %vm1622_vm12, %v8258_v39, 0 }
0x1327   : > { %8296 = vmatpush.bf16.xpose.msrb.mxu3 %v8273_v35 }
0x132e   : > { %10068 = vmatmul.msk.bf16.vlgmr.msrb.gmra.mxu3 %vm1622_vm12, %v10435_v6 }
0x13b1   : > { %v8298_v0 = vpop.f32.mrf.mxu3 }
0x13b2   : > { %8302 = vst [vmem:[%s11747_s7 + $0x38] sm:$0xff] %v8298_v0  ;;  %v8306_v14 = vmul.f32 %v8298_v0, %v8298_v0  ;;  %8303 = vadd.xlane.f32.xlu1 %v8298_v0 }
0x13b3   : > { %10463 = shalt.err (!%p10460_p1)
}
0x13b4   : > { %10349 = dma.vmem_to_hbm [thread:$0]  (%p10628_p3), %s8346_s14, 1024, %s8348_s9, %s8314_s8   ;;  %8307 = vadd.xlane.f32.xlu2 %v8306_v14  ;;  %v15998_v19 = vld [vmem:[#allocation24_spill] sm:$0xff]  ;;  %v16000_v56 = vld [vmem:[#allocation25_spill] sm:$0xff]  ;;  %v16002_v50 = vld [vmem:[#allocation23_spill] sm:$0xff]  ;;  %vm8310_vm13 = vcmask 7168  }
0x13b5   : > { %v15999_v52 = vld [vmem:[#allocation28_spill] sm:$0xff]  ;;  %s16040_s24 = smov (!%p434_p5, %s10514_s24), 1  ;;  %v16001_v62 = vld [vmem:[#allocation29_spill] sm:$0xff]  ;;  %s8577_s7 = sshll.u32 %s10654_s17, 1  ;;  %v16004_v37 = vld [vmem:[#allocation22_spill] sm:$0xff] }
0x13b6   : > { %v2612_v49 = vadd.f32 %v15999_v52, %v15998_v19  ;;  %v2616_v46 = vadd.f32 %v16001_v62, %v16000_v56  ;;  %v16003_v60 = vld [vmem:[#allocation20_spill] sm:$0xff]  ;;  %s437_s10 = sadd.s32 %s8577_s7, %s16040_s24  ;;  %v16005_v12 = vld [vmem:[#allocation27_spill] sm:$0xff]  ;;  %v16006_v34 = vld [vmem:[#allocation30_spill] sm:$0xff]  ;;  %s16008_s6 = sld [smem:[#allocation37_spill]] }
0x13b7   : > { %v16007_v41 = vld [vmem:[#allocation31_spill] sm:$0xff]  ;;  %s8578_s26 = sshll.u32 %s437_s10, 3  ;;  %s16009_s13 = sld [smem:[#allocation38_spill]] }
0x13b8   : > { %v3566_v54 = vadd.f32 %v16002_v50, %v2612_v49  ;;  %v3570_v55 = vadd.f32 %v16003_v60, %v2616_v46 }
0x13b9   : > { %v8300_v33 = vpop.f32.mrf.mxu3 }
0x13ba   : > { %v4520_v51 = vadd.f32 %v16004_v37, %v3566_v54  ;;  %v4524_v15 = vadd.f32 %v16005_v12, %v3570_v55 }
0x13bc   : > { %v5474_v23 = vadd.f32 %v16006_v34, %v4520_v51  ;;  %v5478_v58 = vadd.f32 %v16007_v41, %v4524_v15  ;;  %s439_s11 = scalar_lea.vmem %s16008_s6, %s8578_s26 }
0x13bd   : > { %s447_s12 = scalar_lea.vmem %s16009_s13, %s8578_s26 }
0x13be   : > { %v6428_v18 = vadd.f32 %v14681_v53, %v5474_v23  ;;  %v6432_v32 = vadd.f32 %v14687_v16, %v5478_v58 }
0x13c0   : > { %v7382_v25 = vadd.f32 %v15349_v31, %v6428_v18  ;;  %v7386_v44 = vadd.f32 %v15347_v27, %v6432_v32 }
0x1425   : > { %v8304_v63 = vpop.xlane.xlu1 %8303 }
0x1426   : > { %v8305_v59 = vadd.f32 %v8304_v63, %v7382_v25 }
0x1427   : > { %v8308_v20 = vpop.xlane.xlu2 %8307 }
0x1428   : > { %8311 = vst.msk [vmem:[%s439_s11] sm:$0xff] %vm8310_vm13, %v8305_v59  ;;  %v8309_v53 = vadd.f32 %v8308_v20, %v7386_v44 }
0x142a   : > { %8312 = vst.msk [vmem:[%s447_s12] sm:$0xff] %vm8310_vm13, %v8309_v53 }
0x142b PF: > { %s16010_s18 = sld [smem:[#allocation9_spill]] }
0x142c   : > { %s16011_s30 = sld [smem:[#allocation5_spill]] }
0x1431   : > { %p10355_p3 = scmp.ge.s32.totalorder %s16010_s18, 2 }
0x1432   : > { %s8365_s29 = sand.u32 1, %s16011_s30  }
0x1433   : > { %p10352_p2 = pnand %p10355_p3, %p10637_p8  ;;  %s8366_s27 = scalar_lea.sflag [#allocation3], %s8365_s29 }
0x1435   : > { %p10353_p4 = pneg %p10352_p2 }
0x1437   : > { %10497 = dma.done.wait (%p10353_p4), %s8366_s27, 1024  }
0x1438   : > { %10499 = vsyncadd (%p10353_p4), %s8366_s27, 4294966272  ;;  %s20_s28 = sadd.s32 1, %s16010_s18   ;;  %s16013_s14 = sld [smem:[#allocation6_spill]] }
0x1439   : > { %p17_p5 = scmp.ge.s32.totalorder %s20_s28, 6   ;;  %s16014_s23 = sld [smem:[#allocation13_spill]] }
0x143a   : > { %s16015_s24 = sld [smem:[#allocation7_spill]]  ;;  %s16019_s21 = smov %s10506_s22 }
0x143b   : > { %s16016_s25 = sld [smem:[#allocation8_spill]]  ;;  %19 = sbr.rel (!%p17_p5) target bundleno = 10 (0xa), region = 108 }
0x143c   : > { %s16017_s26 = sld [smem:[#allocation10_spill]] }
0x143d   : > { %s16018_s27 = sld [smem:[#allocation11_spill]] }
0x143e   : > { %s16020_s22 = smov %s16013_s14 }
0x1440   :  { %8394 = vsyncpa [#allocation3], 1 }
0x1441   :  { %8396 = vsyncpa [#allocation3 + $0x1], 1 }

</bundles_post_ra>
